<compile_context>
chip_gen: v6e
topology: v6e:2x2x1
jax: 0.10.0
libtpu: 0.0.40
codegen_flags: <defaults>
</compile_context>

<pallas_src>
import jax
import jax.numpy as jnp
from jax.experimental import pallas as pl
from jax.experimental.pallas import tpu as pltpu


# --------------------------------------------------------------------------
# In-kernel helpers (traced inside the Pallas kernel body)
# --------------------------------------------------------------------------
def _tap_dot(x_tap, w_tap):
    """Batched per-row matmul: (R, S, C) x (C, OC) -> (R, S, OC) in f32."""
    r = x_tap.shape[0]
    w_b = jnp.broadcast_to(w_tap, (r,) + w_tap.shape)
    return jax.lax.dot_general(
        x_tap, w_b,
        dimension_numbers=(((2,), (1,)), ((0,), (0,))),
        preferred_element_type=jnp.float32)


def _deint_w(a, pw):
    """(H, W, C) -> (H, W//2, C), columns pw::2, via static slices + concat."""
    return jnp.concatenate(
        [a[:, 2 * j + pw:2 * j + pw + 1, :] for j in range(a.shape[1] // 2)],
        axis=1)


def _deint_h(a, ph):
    """(H, Wd, C) -> (H//2, Wd, C), rows ph::2, via leading-dim slices + concat."""
    return jnp.concatenate(
        [a[2 * i + ph:2 * i + ph + 1] for i in range(a.shape[0] // 2)],
        axis=0)


# --------------------------------------------------------------------------
# Fused Policy_Net kernel: one image per grid step, everything in VMEM.
# --------------------------------------------------------------------------
def _policy_net_kernel(x_ref, w1_ref, b1_ref, w2_ref, b2_ref, w3_ref, b3_ref,
                       fc1w_ref, fc1b_ref, fc2w_ref, fc2b_ref, o_ref):
    cdt = w1_ref.dtype  # bf16 compute dtype for matmul operands

    # ---- conv1: 2x2 stride-1 over the space-to-depth input (Cin=64 -> 32) ----
    acc1 = None
    for bh in range(2):
        for bw in range(2):
            xt = x_ref[0, bh:bh + 20, bw:bw + 20, :]          # (20, 20, 64) bf16
            p = _tap_dot(xt, w1_ref[bh * 2 + bw])             # (20, 20, 32) f32
            acc1 = p if acc1 is None else acc1 + p
    x1 = jnp.maximum(acc1 + b1_ref[...], 0.0)                 # (20, 20, 32) f32

    # ---- parity deinterleave of conv1 output (for the stride-2 conv2) --------
    # x1q[ph][pw][a, b, c] == relu(conv1)[2a+ph, 2b+pw, c]
    x1w = [_deint_w(x1, pw) for pw in range(2)]               # 2 x (20, 10, 32)
    x1q = [[_deint_h(x1w[pw], ph).astype(cdt) for pw in range(2)]
           for ph in range(2)]                                # 4 x (10, 10, 32)

    # ---- conv2: 4x4 stride-2 (as 2x2 stride-1 over parity quadrants) ---------
    acc2 = None
    for ph in range(2):
        for pw in range(2):
            for bh in range(2):
                for bw in range(2):
                    xt = x1q[ph][pw][bh:bh + 9, bw:bw + 9, :]          # (9, 9, 32)
                    wt = w2_ref[(2 * bh + ph) * 4 + (2 * bw + pw)]     # (32, 64)
                    p = _tap_dot(xt, wt)                               # (9, 9, 64)
                    acc2 = p if acc2 is None else acc2 + p
    x2 = jnp.maximum(acc2 + b2_ref[...], 0.0).astype(cdt)     # (9, 9, 64) bf16

    # ---- conv3: 3x3 stride-1 (64 -> 64) --------------------------------------
    acc3 = None
    for kh in range(3):
        for kw in range(3):
            xt = x2[kh:kh + 7, kw:kw + 7, :]                  # (7, 7, 64)
            p = _tap_dot(xt, w3_ref[kh * 3 + kw])             # (7, 7, 64) f32
            acc3 = p if acc3 is None else acc3 + p
    x3 = jnp.maximum(acc3 + b3_ref[...], 0.0).astype(cdt)     # (7, 7, 64) bf16

    # ---- flatten (h, w, c) -> (1, 3136) in lanes (matches fc1 row permutation)
    flat = jnp.concatenate(
        [x3[h, w:w + 1, :] for h in range(7) for w in range(7)], axis=-1)

    # ---- fc1 + ReLU + fc2 + softmax ------------------------------------------
    h1 = jnp.dot(flat, fc1w_ref[...], preferred_element_type=jnp.float32)
    h1 = jnp.maximum(h1 + fc1b_ref[...], 0.0).astype(cdt)     # (1, fc_width)
    logits = jnp.dot(h1, fc2w_ref[...],
                     preferred_element_type=jnp.float32) + fc2b_ref[...]
    m = jnp.max(logits, axis=-1, keepdims=True)
    e = jnp.exp(logits - m)
    probs = e / jnp.sum(e, axis=-1, keepdims=True)            # exact divide
    o_ref[0] = probs.astype(o_ref.dtype)


# --------------------------------------------------------------------------
# Wrapper: one-time input relayout + the single fused pallas_call
# --------------------------------------------------------------------------
def policy_net_forward(params, s):
    """s: (B, 4, 84, 84) raw pixels in [0, 255]; /255 is folded into w1."""
    B = s.shape[0]
    cdt = params["w1"].dtype
    fcw = params["fc1_w"].shape[1]
    A = params["fc2_w"].shape[1]

    # NCHW -> NHWC, then space-to-depth factor 4: (B, 84, 84, 4) -> (B, 21, 21, 64)
    x = jnp.transpose(s, (0, 2, 3, 1))
    x = x.reshape(B, 21, 4, 21, 4, 4).transpose(0, 1, 3, 2, 4, 5)
    x = x.reshape(B, 21, 21, 64).astype(cdt)

    out = pl.pallas_call(
        _policy_net_kernel,
        out_shape=jax.ShapeDtypeStruct((B, 1, A), jnp.float32),
        grid=(B,),
        in_specs=[
            pl.BlockSpec((1, 21, 21, 64), lambda i: (i, 0, 0, 0)),  # per-image input
            pl.BlockSpec((4, 64, 32), lambda i: (0, 0, 0)),         # w1 (resident)
            pl.BlockSpec((1, 1, 32), lambda i: (0, 0, 0)),          # b1
            pl.BlockSpec((16, 32, 64), lambda i: (0, 0, 0)),        # w2
            pl.BlockSpec((1, 1, 64), lambda i: (0, 0, 0)),          # b2
            pl.BlockSpec((9, 64, 64), lambda i: (0, 0, 0)),         # w3
            pl.BlockSpec((1, 1, 64), lambda i: (0, 0, 0)),          # b3
            pl.BlockSpec((64 * 7 * 7, fcw), lambda i: (0, 0)),      # fc1_w
            pl.BlockSpec((1, fcw), lambda i: (0, 0)),               # fc1_b
            pl.BlockSpec((fcw, A), lambda i: (0, 0)),               # fc2_w
            pl.BlockSpec((1, A), lambda i: (0, 0)),                 # fc2_b
        ],
        out_specs=pl.BlockSpec((1, 1, A), lambda i: (i, 0, 0)),
        compiler_params=pltpu.CompilerParams(
            dimension_semantics=("parallel",),       # batch grid -> v7x megacore
            vmem_limit_bytes=32 * 1024 * 1024,       # explicit, safe on v5e/v6e/v7x
        ),
    )(x, params["w1"], params["b1"], params["w2"], params["b2"],
      params["w3"], params["b3"], params["fc1_w"], params["fc1_b"],
      params["fc2_w"], params["fc2_b"])
    return out.reshape(B, A)


# --------------------------------------------------------------------------
# Parameters: torch-layout init + one-time host-side prep
# --------------------------------------------------------------------------
def init_params(key, fc_width=32, action_dim=6):
    """Deterministic params in torch layout (shapes from Q_Net.__init__)."""
    ks = jax.random.split(key, 5)

    def _w(k, shape, fan_in):
        return jax.random.normal(k, shape, jnp.float32) * (1.0 / jnp.sqrt(fan_in))

    return {
        "w1": _w(ks[0], (32, 4, 8, 8), 4 * 8 * 8),
        "b1": jnp.zeros((32,), jnp.float32),
        "w2": _w(ks[1], (64, 32, 4, 4), 32 * 4 * 4),
        "b2": jnp.zeros((64,), jnp.float32),
        "w3": _w(ks[2], (64, 64, 3, 3), 64 * 3 * 3),
        "b3": jnp.zeros((64,), jnp.float32),
        # fc1 rows in torch's NCHW-flatten order (c*49 + h*7 + w), (in, out)
        "fc1_w": _w(ks[3], (64 * 7 * 7, fc_width), 64 * 7 * 7),
        "fc1_b": jnp.zeros((fc_width,), jnp.float32),
        "fc2_w": _w(ks[4], (fc_width, action_dim), fc_width),
        "fc2_b": jnp.zeros((action_dim,), jnp.float32),
    }


def prepare_params(p, compute_dtype=jnp.bfloat16):
    """One-time host prep: fold /255 into w1, rewrite conv weights as per-tap
    (C, OC) matrices matching the in-kernel tap order, permute fc1 rows to the
    NHWC flatten order, cast matmul operands to bf16 (biases stay f32)."""
    # conv1: (OC=32, IC=4, 8, 8) -> space-to-depth taps (2*2, 4*4*IC, OC), /255 folded
    w1 = p["w1"].reshape(32, 4, 2, 4, 2, 4)          # (oc, ic, bh, sh, bw, sw)
    w1 = w1.transpose(2, 4, 3, 5, 1, 0)              # (bh, bw, sh, sw, ic, oc)
    w1 = w1.reshape(4, 64, 32) * (1.0 / 255.0)

    def conv_taps(w):  # torch (OC, IC, K, K) -> (K*K, IC, OC), tap = kh*K + kw
        OC, IC, K, _ = w.shape
        return jnp.transpose(w, (2, 3, 1, 0)).reshape(K * K, IC, OC)

    fc1 = p["fc1_w"]
    F = fc1.shape[1]
    # torch row index c*49 + h*7 + w  ->  kernel row index (h*7 + w)*64 + c
    fc1 = fc1.reshape(64, 7, 7, F).transpose(1, 2, 0, 3).reshape(64 * 7 * 7, F)

    return {
        "w1": w1.astype(compute_dtype),
        "b1": p["b1"].reshape(1, 1, 32).astype(jnp.float32),
        "w2": conv_taps(p["w2"]).astype(compute_dtype),   # (16, 32, 64)
        "b2": p["b2"].reshape(1, 1, 64).astype(jnp.float32),
        "w3": conv_taps(p["w3"]).astype(compute_dtype),   # (9, 64, 64)
        "b3": p["b3"].reshape(1, 1, 64).astype(jnp.float32),
        "fc1_w": fc1.astype(compute_dtype),
        "fc1_b": p["fc1_b"].reshape(1, -1).astype(jnp.float32),
        "fc2_w": p["fc2_w"].astype(compute_dtype),
        "fc2_b": p["fc2_b"].reshape(1, -1).astype(jnp.float32),
    }


if __name__ == "__main__":
    key = jax.random.PRNGKey(0)
    pkey, xkey = jax.random.split(key)

    fc_width, action_dim, batch = 32, 6, 2
    raw_params = init_params(pkey, fc_width=fc_width, action_dim=action_dim)
    params = prepare_params(raw_params, compute_dtype=jnp.bfloat16)

    # 84x84 spatial is required by the architecture (conv stack -> 7x7 for fc1).
    s = jax.random.randint(xkey, (batch, 4, 84, 84), 0, 256).astype(jnp.float32)

    fwd = jax.jit(policy_net_forward)
    probs = jax.block_until_ready(fwd(params, s))

    assert probs.shape == (batch, action_dim)
    assert bool(jnp.all(probs >= 0.0))
    assert bool(jnp.all(jnp.abs(jnp.sum(probs, axis=1) - 1.0) < 1e-3))
    print("KERNEL_OK")
</pallas_src>

<mosaic_0001>
module attributes {stable_mosaic.version = 11 : i64} {
  func.func @_policy_net_kernel(%arg0: i32, %arg1: memref<1x21x21x64xbf16, #tpu.memory_space<vmem>>, %arg2: memref<4x64x32xbf16, #tpu.memory_space<vmem>>, %arg3: memref<1x1x32xf32, #tpu.memory_space<vmem>>, %arg4: memref<16x32x64xbf16, #tpu.memory_space<vmem>>, %arg5: memref<1x1x64xf32, #tpu.memory_space<vmem>>, %arg6: memref<9x64x64xbf16, #tpu.memory_space<vmem>>, %arg7: memref<1x1x64xf32, #tpu.memory_space<vmem>>, %arg8: memref<3136x32xbf16, #tpu.memory_space<vmem>>, %arg9: memref<1x32xf32, #tpu.memory_space<vmem>>, %arg10: memref<32x6xbf16, #tpu.memory_space<vmem>>, %arg11: memref<1x6xf32, #tpu.memory_space<vmem>>, %arg12: memref<1x1x6xf32, #tpu.memory_space<vmem>>) attributes {dimension_semantics = [#tpu.dimension_semantics<parallel>], iteration_bounds = array<i64: 2>, scalar_prefetch = 0 : i64, scratch_operands = 0 : i64, tpu.core_type = #tpu.core_type<tc>, window_params = [{transform_indices = @transform_0, window_bounds = array<i64: 1, 21, 21, 64>}, {pipeline_mode = #tpu.pipeline_mode<synchronous>, transform_indices = @transform_1, window_bounds = array<i64: 4, 64, 32>}, {pipeline_mode = #tpu.pipeline_mode<synchronous>, transform_indices = @transform_2, window_bounds = array<i64: 1, 1, 32>}, {pipeline_mode = #tpu.pipeline_mode<synchronous>, transform_indices = @transform_3, window_bounds = array<i64: 16, 32, 64>}, {pipeline_mode = #tpu.pipeline_mode<synchronous>, transform_indices = @transform_4, window_bounds = array<i64: 1, 1, 64>}, {pipeline_mode = #tpu.pipeline_mode<synchronous>, transform_indices = @transform_5, window_bounds = array<i64: 9, 64, 64>}, {pipeline_mode = #tpu.pipeline_mode<synchronous>, transform_indices = @transform_6, window_bounds = array<i64: 1, 1, 64>}, {pipeline_mode = #tpu.pipeline_mode<synchronous>, transform_indices = @transform_7, window_bounds = array<i64: 3136, 32>}, {pipeline_mode = #tpu.pipeline_mode<synchronous>, transform_indices = @transform_8, window_bounds = array<i64: 1, 32>}, {pipeline_mode = #tpu.pipeline_mode<synchronous>, transform_indices = @transform_9, window_bounds = array<i64: 32, 6>}, {pipeline_mode = #tpu.pipeline_mode<synchronous>, transform_indices = @transform_10, window_bounds = array<i64: 1, 6>}, {transform_indices = @transform_11, window_bounds = array<i64: 1, 1, 6>}]} {
    %c0 = arith.constant 0 : index
    %c0_0 = arith.constant 0 : index
    %c0_1 = arith.constant 0 : index
    %c0_2 = arith.constant 0 : index
    %0 = vector.load %arg1[%c0, %c0_0, %c0_1, %c0_2] : memref<1x21x21x64xbf16, #tpu.memory_space<vmem>>, vector<1x20x20x64xbf16>
    %1 = vector.shape_cast %0 : vector<1x20x20x64xbf16> to vector<20x20x64xbf16>
    %c0_3 = arith.constant 0 : index
    %c0_4 = arith.constant 0 : index
    %c0_5 = arith.constant 0 : index
    %2 = vector.load %arg2[%c0_3, %c0_4, %c0_5] : memref<4x64x32xbf16, #tpu.memory_space<vmem>>, vector<1x64x32xbf16>
    %3 = vector.shape_cast %2 : vector<1x64x32xbf16> to vector<64x32xbf16>
    %4 = vector.shape_cast %3 : vector<64x32xbf16> to vector<1x64x32xbf16>
    %5 = vector.broadcast %4 : vector<1x64x32xbf16> to vector<20x64x32xbf16>
    %cst = arith.constant dense<0.000000e+00> : vector<20x20x32xf32>
    %6 = tpu.matmul %1, %5, %cst {dimension_numbers = #tpu.dot_dimension_numbers<[2], [1], [1], [2], [0, 0, 0, 1, 1, 2], [0], [0]>} : vector<20x20x64xbf16>, vector<20x64x32xbf16>, vector<20x20x32xf32> -> vector<20x20x32xf32>
    %c0_6 = arith.constant 0 : index
    %c0_7 = arith.constant 0 : index
    %c1 = arith.constant 1 : index
    %c0_8 = arith.constant 0 : index
    %7 = vector.load %arg1[%c0_6, %c0_7, %c1, %c0_8] : memref<1x21x21x64xbf16, #tpu.memory_space<vmem>>, vector<1x20x20x64xbf16>
    %8 = vector.shape_cast %7 : vector<1x20x20x64xbf16> to vector<20x20x64xbf16>
    %c1_9 = arith.constant 1 : index
    %c0_10 = arith.constant 0 : index
    %c0_11 = arith.constant 0 : index
    %9 = vector.load %arg2[%c1_9, %c0_10, %c0_11] : memref<4x64x32xbf16, #tpu.memory_space<vmem>>, vector<1x64x32xbf16>
    %10 = vector.shape_cast %9 : vector<1x64x32xbf16> to vector<64x32xbf16>
    %11 = vector.shape_cast %10 : vector<64x32xbf16> to vector<1x64x32xbf16>
    %12 = vector.broadcast %11 : vector<1x64x32xbf16> to vector<20x64x32xbf16>
    %cst_12 = arith.constant dense<0.000000e+00> : vector<20x20x32xf32>
    %13 = tpu.matmul %8, %12, %cst_12 {dimension_numbers = #tpu.dot_dimension_numbers<[2], [1], [1], [2], [0, 0, 0, 1, 1, 2], [0], [0]>} : vector<20x20x64xbf16>, vector<20x64x32xbf16>, vector<20x20x32xf32> -> vector<20x20x32xf32>
    %14 = arith.addf %6, %13 : vector<20x20x32xf32>
    %c0_13 = arith.constant 0 : index
    %c1_14 = arith.constant 1 : index
    %c0_15 = arith.constant 0 : index
    %c0_16 = arith.constant 0 : index
    %15 = vector.load %arg1[%c0_13, %c1_14, %c0_15, %c0_16] : memref<1x21x21x64xbf16, #tpu.memory_space<vmem>>, vector<1x20x20x64xbf16>
    %16 = vector.shape_cast %15 : vector<1x20x20x64xbf16> to vector<20x20x64xbf16>
    %c2 = arith.constant 2 : index
    %c0_17 = arith.constant 0 : index
    %c0_18 = arith.constant 0 : index
    %17 = vector.load %arg2[%c2, %c0_17, %c0_18] : memref<4x64x32xbf16, #tpu.memory_space<vmem>>, vector<1x64x32xbf16>
    %18 = vector.shape_cast %17 : vector<1x64x32xbf16> to vector<64x32xbf16>
    %19 = vector.shape_cast %18 : vector<64x32xbf16> to vector<1x64x32xbf16>
    %20 = vector.broadcast %19 : vector<1x64x32xbf16> to vector<20x64x32xbf16>
    %cst_19 = arith.constant dense<0.000000e+00> : vector<20x20x32xf32>
    %21 = tpu.matmul %16, %20, %cst_19 {dimension_numbers = #tpu.dot_dimension_numbers<[2], [1], [1], [2], [0, 0, 0, 1, 1, 2], [0], [0]>} : vector<20x20x64xbf16>, vector<20x64x32xbf16>, vector<20x20x32xf32> -> vector<20x20x32xf32>
    %22 = arith.addf %14, %21 : vector<20x20x32xf32>
    %c0_20 = arith.constant 0 : index
    %c1_21 = arith.constant 1 : index
    %c1_22 = arith.constant 1 : index
    %c0_23 = arith.constant 0 : index
    %23 = vector.load %arg1[%c0_20, %c1_21, %c1_22, %c0_23] : memref<1x21x21x64xbf16, #tpu.memory_space<vmem>>, vector<1x20x20x64xbf16>
    %24 = vector.shape_cast %23 : vector<1x20x20x64xbf16> to vector<20x20x64xbf16>
    %c3 = arith.constant 3 : index
    %c0_24 = arith.constant 0 : index
    %c0_25 = arith.constant 0 : index
    %25 = vector.load %arg2[%c3, %c0_24, %c0_25] : memref<4x64x32xbf16, #tpu.memory_space<vmem>>, vector<1x64x32xbf16>
    %26 = vector.shape_cast %25 : vector<1x64x32xbf16> to vector<64x32xbf16>
    %27 = vector.shape_cast %26 : vector<64x32xbf16> to vector<1x64x32xbf16>
    %28 = vector.broadcast %27 : vector<1x64x32xbf16> to vector<20x64x32xbf16>
    %cst_26 = arith.constant dense<0.000000e+00> : vector<20x20x32xf32>
    %29 = tpu.matmul %24, %28, %cst_26 {dimension_numbers = #tpu.dot_dimension_numbers<[2], [1], [1], [2], [0, 0, 0, 1, 1, 2], [0], [0]>} : vector<20x20x64xbf16>, vector<20x64x32xbf16>, vector<20x20x32xf32> -> vector<20x20x32xf32>
    %30 = arith.addf %22, %29 : vector<20x20x32xf32>
    %c0_27 = arith.constant 0 : index
    %c0_28 = arith.constant 0 : index
    %c0_29 = arith.constant 0 : index
    %31 = vector.load %arg3[%c0_27, %c0_28, %c0_29] : memref<1x1x32xf32, #tpu.memory_space<vmem>>, vector<1x1x32xf32>
    %32 = vector.broadcast %31 : vector<1x1x32xf32> to vector<20x20x32xf32>
    %33 = arith.addf %30, %32 : vector<20x20x32xf32>
    %cst_30 = arith.constant 0.000000e+00 : f32
    %34 = vector.broadcast %cst_30 : f32 to vector<20x20x32xf32>
    %35 = arith.maximumf %33, %34 : vector<20x20x32xf32>
    %36 = vector.extract_strided_slice %35 {offsets = [0, 0, 0], sizes = [20, 1, 32], strides = [1, 1, 1]} : vector<20x20x32xf32> to vector<20x1x32xf32>
    %37 = vector.extract_strided_slice %35 {offsets = [0, 2, 0], sizes = [20, 1, 32], strides = [1, 1, 1]} : vector<20x20x32xf32> to vector<20x1x32xf32>
    %38 = vector.extract_strided_slice %35 {offsets = [0, 4, 0], sizes = [20, 1, 32], strides = [1, 1, 1]} : vector<20x20x32xf32> to vector<20x1x32xf32>
    %39 = vector.extract_strided_slice %35 {offsets = [0, 6, 0], sizes = [20, 1, 32], strides = [1, 1, 1]} : vector<20x20x32xf32> to vector<20x1x32xf32>
    %40 = vector.extract_strided_slice %35 {offsets = [0, 8, 0], sizes = [20, 1, 32], strides = [1, 1, 1]} : vector<20x20x32xf32> to vector<20x1x32xf32>
    %41 = vector.extract_strided_slice %35 {offsets = [0, 10, 0], sizes = [20, 1, 32], strides = [1, 1, 1]} : vector<20x20x32xf32> to vector<20x1x32xf32>
    %42 = vector.extract_strided_slice %35 {offsets = [0, 12, 0], sizes = [20, 1, 32], strides = [1, 1, 1]} : vector<20x20x32xf32> to vector<20x1x32xf32>
    %43 = vector.extract_strided_slice %35 {offsets = [0, 14, 0], sizes = [20, 1, 32], strides = [1, 1, 1]} : vector<20x20x32xf32> to vector<20x1x32xf32>
    %44 = vector.extract_strided_slice %35 {offsets = [0, 16, 0], sizes = [20, 1, 32], strides = [1, 1, 1]} : vector<20x20x32xf32> to vector<20x1x32xf32>
    %45 = vector.extract_strided_slice %35 {offsets = [0, 18, 0], sizes = [20, 1, 32], strides = [1, 1, 1]} : vector<20x20x32xf32> to vector<20x1x32xf32>
    %46 = tpu.concatenate %36, %37, %38, %39, %40, %41, %42, %43, %44, %45 in 1 : vector<20x1x32xf32>, vector<20x1x32xf32>, vector<20x1x32xf32>, vector<20x1x32xf32>, vector<20x1x32xf32>, vector<20x1x32xf32>, vector<20x1x32xf32>, vector<20x1x32xf32>, vector<20x1x32xf32>, vector<20x1x32xf32> -> vector<20x10x32xf32>
    %47 = vector.extract_strided_slice %35 {offsets = [0, 1, 0], sizes = [20, 1, 32], strides = [1, 1, 1]} : vector<20x20x32xf32> to vector<20x1x32xf32>
    %48 = vector.extract_strided_slice %35 {offsets = [0, 3, 0], sizes = [20, 1, 32], strides = [1, 1, 1]} : vector<20x20x32xf32> to vector<20x1x32xf32>
    %49 = vector.extract_strided_slice %35 {offsets = [0, 5, 0], sizes = [20, 1, 32], strides = [1, 1, 1]} : vector<20x20x32xf32> to vector<20x1x32xf32>
    %50 = vector.extract_strided_slice %35 {offsets = [0, 7, 0], sizes = [20, 1, 32], strides = [1, 1, 1]} : vector<20x20x32xf32> to vector<20x1x32xf32>
    %51 = vector.extract_strided_slice %35 {offsets = [0, 9, 0], sizes = [20, 1, 32], strides = [1, 1, 1]} : vector<20x20x32xf32> to vector<20x1x32xf32>
    %52 = vector.extract_strided_slice %35 {offsets = [0, 11, 0], sizes = [20, 1, 32], strides = [1, 1, 1]} : vector<20x20x32xf32> to vector<20x1x32xf32>
    %53 = vector.extract_strided_slice %35 {offsets = [0, 13, 0], sizes = [20, 1, 32], strides = [1, 1, 1]} : vector<20x20x32xf32> to vector<20x1x32xf32>
    %54 = vector.extract_strided_slice %35 {offsets = [0, 15, 0], sizes = [20, 1, 32], strides = [1, 1, 1]} : vector<20x20x32xf32> to vector<20x1x32xf32>
    %55 = vector.extract_strided_slice %35 {offsets = [0, 17, 0], sizes = [20, 1, 32], strides = [1, 1, 1]} : vector<20x20x32xf32> to vector<20x1x32xf32>
    %56 = vector.extract_strided_slice %35 {offsets = [0, 19, 0], sizes = [20, 1, 32], strides = [1, 1, 1]} : vector<20x20x32xf32> to vector<20x1x32xf32>
    %57 = tpu.concatenate %47, %48, %49, %50, %51, %52, %53, %54, %55, %56 in 1 : vector<20x1x32xf32>, vector<20x1x32xf32>, vector<20x1x32xf32>, vector<20x1x32xf32>, vector<20x1x32xf32>, vector<20x1x32xf32>, vector<20x1x32xf32>, vector<20x1x32xf32>, vector<20x1x32xf32>, vector<20x1x32xf32> -> vector<20x10x32xf32>
    %58 = vector.extract_strided_slice %46 {offsets = [0, 0, 0], sizes = [1, 10, 32], strides = [1, 1, 1]} : vector<20x10x32xf32> to vector<1x10x32xf32>
    %59 = vector.extract_strided_slice %46 {offsets = [2, 0, 0], sizes = [1, 10, 32], strides = [1, 1, 1]} : vector<20x10x32xf32> to vector<1x10x32xf32>
    %60 = vector.extract_strided_slice %46 {offsets = [4, 0, 0], sizes = [1, 10, 32], strides = [1, 1, 1]} : vector<20x10x32xf32> to vector<1x10x32xf32>
    %61 = vector.extract_strided_slice %46 {offsets = [6, 0, 0], sizes = [1, 10, 32], strides = [1, 1, 1]} : vector<20x10x32xf32> to vector<1x10x32xf32>
    %62 = vector.extract_strided_slice %46 {offsets = [8, 0, 0], sizes = [1, 10, 32], strides = [1, 1, 1]} : vector<20x10x32xf32> to vector<1x10x32xf32>
    %63 = vector.extract_strided_slice %46 {offsets = [10, 0, 0], sizes = [1, 10, 32], strides = [1, 1, 1]} : vector<20x10x32xf32> to vector<1x10x32xf32>
    %64 = vector.extract_strided_slice %46 {offsets = [12, 0, 0], sizes = [1, 10, 32], strides = [1, 1, 1]} : vector<20x10x32xf32> to vector<1x10x32xf32>
    %65 = vector.extract_strided_slice %46 {offsets = [14, 0, 0], sizes = [1, 10, 32], strides = [1, 1, 1]} : vector<20x10x32xf32> to vector<1x10x32xf32>
    %66 = vector.extract_strided_slice %46 {offsets = [16, 0, 0], sizes = [1, 10, 32], strides = [1, 1, 1]} : vector<20x10x32xf32> to vector<1x10x32xf32>
    %67 = vector.extract_strided_slice %46 {offsets = [18, 0, 0], sizes = [1, 10, 32], strides = [1, 1, 1]} : vector<20x10x32xf32> to vector<1x10x32xf32>
    %68 = tpu.concatenate %58, %59, %60, %61, %62, %63, %64, %65, %66, %67 in 0 : vector<1x10x32xf32>, vector<1x10x32xf32>, vector<1x10x32xf32>, vector<1x10x32xf32>, vector<1x10x32xf32>, vector<1x10x32xf32>, vector<1x10x32xf32>, vector<1x10x32xf32>, vector<1x10x32xf32>, vector<1x10x32xf32> -> vector<10x10x32xf32>
    %69 = arith.truncf %68 : vector<10x10x32xf32> to vector<10x10x32xbf16>
    %70 = vector.extract_strided_slice %57 {offsets = [0, 0, 0], sizes = [1, 10, 32], strides = [1, 1, 1]} : vector<20x10x32xf32> to vector<1x10x32xf32>
    %71 = vector.extract_strided_slice %57 {offsets = [2, 0, 0], sizes = [1, 10, 32], strides = [1, 1, 1]} : vector<20x10x32xf32> to vector<1x10x32xf32>
    %72 = vector.extract_strided_slice %57 {offsets = [4, 0, 0], sizes = [1, 10, 32], strides = [1, 1, 1]} : vector<20x10x32xf32> to vector<1x10x32xf32>
    %73 = vector.extract_strided_slice %57 {offsets = [6, 0, 0], sizes = [1, 10, 32], strides = [1, 1, 1]} : vector<20x10x32xf32> to vector<1x10x32xf32>
    %74 = vector.extract_strided_slice %57 {offsets = [8, 0, 0], sizes = [1, 10, 32], strides = [1, 1, 1]} : vector<20x10x32xf32> to vector<1x10x32xf32>
    %75 = vector.extract_strided_slice %57 {offsets = [10, 0, 0], sizes = [1, 10, 32], strides = [1, 1, 1]} : vector<20x10x32xf32> to vector<1x10x32xf32>
    %76 = vector.extract_strided_slice %57 {offsets = [12, 0, 0], sizes = [1, 10, 32], strides = [1, 1, 1]} : vector<20x10x32xf32> to vector<1x10x32xf32>
    %77 = vector.extract_strided_slice %57 {offsets = [14, 0, 0], sizes = [1, 10, 32], strides = [1, 1, 1]} : vector<20x10x32xf32> to vector<1x10x32xf32>
    %78 = vector.extract_strided_slice %57 {offsets = [16, 0, 0], sizes = [1, 10, 32], strides = [1, 1, 1]} : vector<20x10x32xf32> to vector<1x10x32xf32>
    %79 = vector.extract_strided_slice %57 {offsets = [18, 0, 0], sizes = [1, 10, 32], strides = [1, 1, 1]} : vector<20x10x32xf32> to vector<1x10x32xf32>
    %80 = tpu.concatenate %70, %71, %72, %73, %74, %75, %76, %77, %78, %79 in 0 : vector<1x10x32xf32>, vector<1x10x32xf32>, vector<1x10x32xf32>, vector<1x10x32xf32>, vector<1x10x32xf32>, vector<1x10x32xf32>, vector<1x10x32xf32>, vector<1x10x32xf32>, vector<1x10x32xf32>, vector<1x10x32xf32> -> vector<10x10x32xf32>
    %81 = arith.truncf %80 : vector<10x10x32xf32> to vector<10x10x32xbf16>
    %82 = vector.extract_strided_slice %46 {offsets = [1, 0, 0], sizes = [1, 10, 32], strides = [1, 1, 1]} : vector<20x10x32xf32> to vector<1x10x32xf32>
    %83 = vector.extract_strided_slice %46 {offsets = [3, 0, 0], sizes = [1, 10, 32], strides = [1, 1, 1]} : vector<20x10x32xf32> to vector<1x10x32xf32>
    %84 = vector.extract_strided_slice %46 {offsets = [5, 0, 0], sizes = [1, 10, 32], strides = [1, 1, 1]} : vector<20x10x32xf32> to vector<1x10x32xf32>
    %85 = vector.extract_strided_slice %46 {offsets = [7, 0, 0], sizes = [1, 10, 32], strides = [1, 1, 1]} : vector<20x10x32xf32> to vector<1x10x32xf32>
    %86 = vector.extract_strided_slice %46 {offsets = [9, 0, 0], sizes = [1, 10, 32], strides = [1, 1, 1]} : vector<20x10x32xf32> to vector<1x10x32xf32>
    %87 = vector.extract_strided_slice %46 {offsets = [11, 0, 0], sizes = [1, 10, 32], strides = [1, 1, 1]} : vector<20x10x32xf32> to vector<1x10x32xf32>
    %88 = vector.extract_strided_slice %46 {offsets = [13, 0, 0], sizes = [1, 10, 32], strides = [1, 1, 1]} : vector<20x10x32xf32> to vector<1x10x32xf32>
    %89 = vector.extract_strided_slice %46 {offsets = [15, 0, 0], sizes = [1, 10, 32], strides = [1, 1, 1]} : vector<20x10x32xf32> to vector<1x10x32xf32>
    %90 = vector.extract_strided_slice %46 {offsets = [17, 0, 0], sizes = [1, 10, 32], strides = [1, 1, 1]} : vector<20x10x32xf32> to vector<1x10x32xf32>
    %91 = vector.extract_strided_slice %46 {offsets = [19, 0, 0], sizes = [1, 10, 32], strides = [1, 1, 1]} : vector<20x10x32xf32> to vector<1x10x32xf32>
    %92 = tpu.concatenate %82, %83, %84, %85, %86, %87, %88, %89, %90, %91 in 0 : vector<1x10x32xf32>, vector<1x10x32xf32>, vector<1x10x32xf32>, vector<1x10x32xf32>, vector<1x10x32xf32>, vector<1x10x32xf32>, vector<1x10x32xf32>, vector<1x10x32xf32>, vector<1x10x32xf32>, vector<1x10x32xf32> -> vector<10x10x32xf32>
    %93 = arith.truncf %92 : vector<10x10x32xf32> to vector<10x10x32xbf16>
    %94 = vector.extract_strided_slice %57 {offsets = [1, 0, 0], sizes = [1, 10, 32], strides = [1, 1, 1]} : vector<20x10x32xf32> to vector<1x10x32xf32>
    %95 = vector.extract_strided_slice %57 {offsets = [3, 0, 0], sizes = [1, 10, 32], strides = [1, 1, 1]} : vector<20x10x32xf32> to vector<1x10x32xf32>
    %96 = vector.extract_strided_slice %57 {offsets = [5, 0, 0], sizes = [1, 10, 32], strides = [1, 1, 1]} : vector<20x10x32xf32> to vector<1x10x32xf32>
    %97 = vector.extract_strided_slice %57 {offsets = [7, 0, 0], sizes = [1, 10, 32], strides = [1, 1, 1]} : vector<20x10x32xf32> to vector<1x10x32xf32>
    %98 = vector.extract_strided_slice %57 {offsets = [9, 0, 0], sizes = [1, 10, 32], strides = [1, 1, 1]} : vector<20x10x32xf32> to vector<1x10x32xf32>
    %99 = vector.extract_strided_slice %57 {offsets = [11, 0, 0], sizes = [1, 10, 32], strides = [1, 1, 1]} : vector<20x10x32xf32> to vector<1x10x32xf32>
    %100 = vector.extract_strided_slice %57 {offsets = [13, 0, 0], sizes = [1, 10, 32], strides = [1, 1, 1]} : vector<20x10x32xf32> to vector<1x10x32xf32>
    %101 = vector.extract_strided_slice %57 {offsets = [15, 0, 0], sizes = [1, 10, 32], strides = [1, 1, 1]} : vector<20x10x32xf32> to vector<1x10x32xf32>
    %102 = vector.extract_strided_slice %57 {offsets = [17, 0, 0], sizes = [1, 10, 32], strides = [1, 1, 1]} : vector<20x10x32xf32> to vector<1x10x32xf32>
    %103 = vector.extract_strided_slice %57 {offsets = [19, 0, 0], sizes = [1, 10, 32], strides = [1, 1, 1]} : vector<20x10x32xf32> to vector<1x10x32xf32>
    %104 = tpu.concatenate %94, %95, %96, %97, %98, %99, %100, %101, %102, %103 in 0 : vector<1x10x32xf32>, vector<1x10x32xf32>, vector<1x10x32xf32>, vector<1x10x32xf32>, vector<1x10x32xf32>, vector<1x10x32xf32>, vector<1x10x32xf32>, vector<1x10x32xf32>, vector<1x10x32xf32>, vector<1x10x32xf32> -> vector<10x10x32xf32>
    %105 = arith.truncf %104 : vector<10x10x32xf32> to vector<10x10x32xbf16>
    %106 = vector.extract_strided_slice %69 {offsets = [0, 0, 0], sizes = [9, 9, 32], strides = [1, 1, 1]} : vector<10x10x32xbf16> to vector<9x9x32xbf16>
    %c0_31 = arith.constant 0 : index
    %c0_32 = arith.constant 0 : index
    %c0_33 = arith.constant 0 : index
    %107 = vector.load %arg4[%c0_31, %c0_32, %c0_33] : memref<16x32x64xbf16, #tpu.memory_space<vmem>>, vector<1x32x64xbf16>
    %108 = vector.shape_cast %107 : vector<1x32x64xbf16> to vector<32x64xbf16>
    %109 = vector.shape_cast %108 : vector<32x64xbf16> to vector<1x32x64xbf16>
    %110 = vector.broadcast %109 : vector<1x32x64xbf16> to vector<9x32x64xbf16>
    %cst_34 = arith.constant dense<0.000000e+00> : vector<9x9x64xf32>
    %111 = tpu.matmul %106, %110, %cst_34 {dimension_numbers = #tpu.dot_dimension_numbers<[2], [1], [1], [2], [0, 0, 0, 1, 1, 2], [0], [0]>} : vector<9x9x32xbf16>, vector<9x32x64xbf16>, vector<9x9x64xf32> -> vector<9x9x64xf32>
    %112 = vector.extract_strided_slice %69 {offsets = [0, 1, 0], sizes = [9, 9, 32], strides = [1, 1, 1]} : vector<10x10x32xbf16> to vector<9x9x32xbf16>
    %c2_35 = arith.constant 2 : index
    %c0_36 = arith.constant 0 : index
    %c0_37 = arith.constant 0 : index
    %113 = vector.load %arg4[%c2_35, %c0_36, %c0_37] : memref<16x32x64xbf16, #tpu.memory_space<vmem>>, vector<1x32x64xbf16>
    %114 = vector.shape_cast %113 : vector<1x32x64xbf16> to vector<32x64xbf16>
    %115 = vector.shape_cast %114 : vector<32x64xbf16> to vector<1x32x64xbf16>
    %116 = vector.broadcast %115 : vector<1x32x64xbf16> to vector<9x32x64xbf16>
    %cst_38 = arith.constant dense<0.000000e+00> : vector<9x9x64xf32>
    %117 = tpu.matmul %112, %116, %cst_38 {dimension_numbers = #tpu.dot_dimension_numbers<[2], [1], [1], [2], [0, 0, 0, 1, 1, 2], [0], [0]>} : vector<9x9x32xbf16>, vector<9x32x64xbf16>, vector<9x9x64xf32> -> vector<9x9x64xf32>
    %118 = arith.addf %111, %117 : vector<9x9x64xf32>
    %119 = vector.extract_strided_slice %69 {offsets = [1, 0, 0], sizes = [9, 9, 32], strides = [1, 1, 1]} : vector<10x10x32xbf16> to vector<9x9x32xbf16>
    %c8 = arith.constant 8 : index
    %c0_39 = arith.constant 0 : index
    %c0_40 = arith.constant 0 : index
    %120 = vector.load %arg4[%c8, %c0_39, %c0_40] : memref<16x32x64xbf16, #tpu.memory_space<vmem>>, vector<1x32x64xbf16>
    %121 = vector.shape_cast %120 : vector<1x32x64xbf16> to vector<32x64xbf16>
    %122 = vector.shape_cast %121 : vector<32x64xbf16> to vector<1x32x64xbf16>
    %123 = vector.broadcast %122 : vector<1x32x64xbf16> to vector<9x32x64xbf16>
    %cst_41 = arith.constant dense<0.000000e+00> : vector<9x9x64xf32>
    %124 = tpu.matmul %119, %123, %cst_41 {dimension_numbers = #tpu.dot_dimension_numbers<[2], [1], [1], [2], [0, 0, 0, 1, 1, 2], [0], [0]>} : vector<9x9x32xbf16>, vector<9x32x64xbf16>, vector<9x9x64xf32> -> vector<9x9x64xf32>
    %125 = arith.addf %118, %124 : vector<9x9x64xf32>
    %126 = vector.extract_strided_slice %69 {offsets = [1, 1, 0], sizes = [9, 9, 32], strides = [1, 1, 1]} : vector<10x10x32xbf16> to vector<9x9x32xbf16>
    %c10 = arith.constant 10 : index
    %c0_42 = arith.constant 0 : index
    %c0_43 = arith.constant 0 : index
    %127 = vector.load %arg4[%c10, %c0_42, %c0_43] : memref<16x32x64xbf16, #tpu.memory_space<vmem>>, vector<1x32x64xbf16>
    %128 = vector.shape_cast %127 : vector<1x32x64xbf16> to vector<32x64xbf16>
    %129 = vector.shape_cast %128 : vector<32x64xbf16> to vector<1x32x64xbf16>
    %130 = vector.broadcast %129 : vector<1x32x64xbf16> to vector<9x32x64xbf16>
    %cst_44 = arith.constant dense<0.000000e+00> : vector<9x9x64xf32>
    %131 = tpu.matmul %126, %130, %cst_44 {dimension_numbers = #tpu.dot_dimension_numbers<[2], [1], [1], [2], [0, 0, 0, 1, 1, 2], [0], [0]>} : vector<9x9x32xbf16>, vector<9x32x64xbf16>, vector<9x9x64xf32> -> vector<9x9x64xf32>
    %132 = arith.addf %125, %131 : vector<9x9x64xf32>
    %133 = vector.extract_strided_slice %81 {offsets = [0, 0, 0], sizes = [9, 9, 32], strides = [1, 1, 1]} : vector<10x10x32xbf16> to vector<9x9x32xbf16>
    %c1_45 = arith.constant 1 : index
    %c0_46 = arith.constant 0 : index
    %c0_47 = arith.constant 0 : index
    %134 = vector.load %arg4[%c1_45, %c0_46, %c0_47] : memref<16x32x64xbf16, #tpu.memory_space<vmem>>, vector<1x32x64xbf16>
    %135 = vector.shape_cast %134 : vector<1x32x64xbf16> to vector<32x64xbf16>
    %136 = vector.shape_cast %135 : vector<32x64xbf16> to vector<1x32x64xbf16>
    %137 = vector.broadcast %136 : vector<1x32x64xbf16> to vector<9x32x64xbf16>
    %cst_48 = arith.constant dense<0.000000e+00> : vector<9x9x64xf32>
    %138 = tpu.matmul %133, %137, %cst_48 {dimension_numbers = #tpu.dot_dimension_numbers<[2], [1], [1], [2], [0, 0, 0, 1, 1, 2], [0], [0]>} : vector<9x9x32xbf16>, vector<9x32x64xbf16>, vector<9x9x64xf32> -> vector<9x9x64xf32>
    %139 = arith.addf %132, %138 : vector<9x9x64xf32>
    %140 = vector.extract_strided_slice %81 {offsets = [0, 1, 0], sizes = [9, 9, 32], strides = [1, 1, 1]} : vector<10x10x32xbf16> to vector<9x9x32xbf16>
    %c3_49 = arith.constant 3 : index
    %c0_50 = arith.constant 0 : index
    %c0_51 = arith.constant 0 : index
    %141 = vector.load %arg4[%c3_49, %c0_50, %c0_51] : memref<16x32x64xbf16, #tpu.memory_space<vmem>>, vector<1x32x64xbf16>
    %142 = vector.shape_cast %141 : vector<1x32x64xbf16> to vector<32x64xbf16>
    %143 = vector.shape_cast %142 : vector<32x64xbf16> to vector<1x32x64xbf16>
    %144 = vector.broadcast %143 : vector<1x32x64xbf16> to vector<9x32x64xbf16>
    %cst_52 = arith.constant dense<0.000000e+00> : vector<9x9x64xf32>
    %145 = tpu.matmul %140, %144, %cst_52 {dimension_numbers = #tpu.dot_dimension_numbers<[2], [1], [1], [2], [0, 0, 0, 1, 1, 2], [0], [0]>} : vector<9x9x32xbf16>, vector<9x32x64xbf16>, vector<9x9x64xf32> -> vector<9x9x64xf32>
    %146 = arith.addf %139, %145 : vector<9x9x64xf32>
    %147 = vector.extract_strided_slice %81 {offsets = [1, 0, 0], sizes = [9, 9, 32], strides = [1, 1, 1]} : vector<10x10x32xbf16> to vector<9x9x32xbf16>
    %c9 = arith.constant 9 : index
    %c0_53 = arith.constant 0 : index
    %c0_54 = arith.constant 0 : index
    %148 = vector.load %arg4[%c9, %c0_53, %c0_54] : memref<16x32x64xbf16, #tpu.memory_space<vmem>>, vector<1x32x64xbf16>
    %149 = vector.shape_cast %148 : vector<1x32x64xbf16> to vector<32x64xbf16>
    %150 = vector.shape_cast %149 : vector<32x64xbf16> to vector<1x32x64xbf16>
    %151 = vector.broadcast %150 : vector<1x32x64xbf16> to vector<9x32x64xbf16>
    %cst_55 = arith.constant dense<0.000000e+00> : vector<9x9x64xf32>
    %152 = tpu.matmul %147, %151, %cst_55 {dimension_numbers = #tpu.dot_dimension_numbers<[2], [1], [1], [2], [0, 0, 0, 1, 1, 2], [0], [0]>} : vector<9x9x32xbf16>, vector<9x32x64xbf16>, vector<9x9x64xf32> -> vector<9x9x64xf32>
    %153 = arith.addf %146, %152 : vector<9x9x64xf32>
    %154 = vector.extract_strided_slice %81 {offsets = [1, 1, 0], sizes = [9, 9, 32], strides = [1, 1, 1]} : vector<10x10x32xbf16> to vector<9x9x32xbf16>
    %c11 = arith.constant 11 : index
    %c0_56 = arith.constant 0 : index
    %c0_57 = arith.constant 0 : index
    %155 = vector.load %arg4[%c11, %c0_56, %c0_57] : memref<16x32x64xbf16, #tpu.memory_space<vmem>>, vector<1x32x64xbf16>
    %156 = vector.shape_cast %155 : vector<1x32x64xbf16> to vector<32x64xbf16>
    %157 = vector.shape_cast %156 : vector<32x64xbf16> to vector<1x32x64xbf16>
    %158 = vector.broadcast %157 : vector<1x32x64xbf16> to vector<9x32x64xbf16>
    %cst_58 = arith.constant dense<0.000000e+00> : vector<9x9x64xf32>
    %159 = tpu.matmul %154, %158, %cst_58 {dimension_numbers = #tpu.dot_dimension_numbers<[2], [1], [1], [2], [0, 0, 0, 1, 1, 2], [0], [0]>} : vector<9x9x32xbf16>, vector<9x32x64xbf16>, vector<9x9x64xf32> -> vector<9x9x64xf32>
    %160 = arith.addf %153, %159 : vector<9x9x64xf32>
    %161 = vector.extract_strided_slice %93 {offsets = [0, 0, 0], sizes = [9, 9, 32], strides = [1, 1, 1]} : vector<10x10x32xbf16> to vector<9x9x32xbf16>
    %c4 = arith.constant 4 : index
    %c0_59 = arith.constant 0 : index
    %c0_60 = arith.constant 0 : index
    %162 = vector.load %arg4[%c4, %c0_59, %c0_60] : memref<16x32x64xbf16, #tpu.memory_space<vmem>>, vector<1x32x64xbf16>
    %163 = vector.shape_cast %162 : vector<1x32x64xbf16> to vector<32x64xbf16>
    %164 = vector.shape_cast %163 : vector<32x64xbf16> to vector<1x32x64xbf16>
    %165 = vector.broadcast %164 : vector<1x32x64xbf16> to vector<9x32x64xbf16>
    %cst_61 = arith.constant dense<0.000000e+00> : vector<9x9x64xf32>
    %166 = tpu.matmul %161, %165, %cst_61 {dimension_numbers = #tpu.dot_dimension_numbers<[2], [1], [1], [2], [0, 0, 0, 1, 1, 2], [0], [0]>} : vector<9x9x32xbf16>, vector<9x32x64xbf16>, vector<9x9x64xf32> -> vector<9x9x64xf32>
    %167 = arith.addf %160, %166 : vector<9x9x64xf32>
    %168 = vector.extract_strided_slice %93 {offsets = [0, 1, 0], sizes = [9, 9, 32], strides = [1, 1, 1]} : vector<10x10x32xbf16> to vector<9x9x32xbf16>
    %c6 = arith.constant 6 : index
    %c0_62 = arith.constant 0 : index
    %c0_63 = arith.constant 0 : index
    %169 = vector.load %arg4[%c6, %c0_62, %c0_63] : memref<16x32x64xbf16, #tpu.memory_space<vmem>>, vector<1x32x64xbf16>
    %170 = vector.shape_cast %169 : vector<1x32x64xbf16> to vector<32x64xbf16>
    %171 = vector.shape_cast %170 : vector<32x64xbf16> to vector<1x32x64xbf16>
    %172 = vector.broadcast %171 : vector<1x32x64xbf16> to vector<9x32x64xbf16>
    %cst_64 = arith.constant dense<0.000000e+00> : vector<9x9x64xf32>
    %173 = tpu.matmul %168, %172, %cst_64 {dimension_numbers = #tpu.dot_dimension_numbers<[2], [1], [1], [2], [0, 0, 0, 1, 1, 2], [0], [0]>} : vector<9x9x32xbf16>, vector<9x32x64xbf16>, vector<9x9x64xf32> -> vector<9x9x64xf32>
    %174 = arith.addf %167, %173 : vector<9x9x64xf32>
    %175 = vector.extract_strided_slice %93 {offsets = [1, 0, 0], sizes = [9, 9, 32], strides = [1, 1, 1]} : vector<10x10x32xbf16> to vector<9x9x32xbf16>
    %c12 = arith.constant 12 : index
    %c0_65 = arith.constant 0 : index
    %c0_66 = arith.constant 0 : index
    %176 = vector.load %arg4[%c12, %c0_65, %c0_66] : memref<16x32x64xbf16, #tpu.memory_space<vmem>>, vector<1x32x64xbf16>
    %177 = vector.shape_cast %176 : vector<1x32x64xbf16> to vector<32x64xbf16>
    %178 = vector.shape_cast %177 : vector<32x64xbf16> to vector<1x32x64xbf16>
    %179 = vector.broadcast %178 : vector<1x32x64xbf16> to vector<9x32x64xbf16>
    %cst_67 = arith.constant dense<0.000000e+00> : vector<9x9x64xf32>
    %180 = tpu.matmul %175, %179, %cst_67 {dimension_numbers = #tpu.dot_dimension_numbers<[2], [1], [1], [2], [0, 0, 0, 1, 1, 2], [0], [0]>} : vector<9x9x32xbf16>, vector<9x32x64xbf16>, vector<9x9x64xf32> -> vector<9x9x64xf32>
    %181 = arith.addf %174, %180 : vector<9x9x64xf32>
    %182 = vector.extract_strided_slice %93 {offsets = [1, 1, 0], sizes = [9, 9, 32], strides = [1, 1, 1]} : vector<10x10x32xbf16> to vector<9x9x32xbf16>
    %c14 = arith.constant 14 : index
    %c0_68 = arith.constant 0 : index
    %c0_69 = arith.constant 0 : index
    %183 = vector.load %arg4[%c14, %c0_68, %c0_69] : memref<16x32x64xbf16, #tpu.memory_space<vmem>>, vector<1x32x64xbf16>
    %184 = vector.shape_cast %183 : vector<1x32x64xbf16> to vector<32x64xbf16>
    %185 = vector.shape_cast %184 : vector<32x64xbf16> to vector<1x32x64xbf16>
    %186 = vector.broadcast %185 : vector<1x32x64xbf16> to vector<9x32x64xbf16>
    %cst_70 = arith.constant dense<0.000000e+00> : vector<9x9x64xf32>
    %187 = tpu.matmul %182, %186, %cst_70 {dimension_numbers = #tpu.dot_dimension_numbers<[2], [1], [1], [2], [0, 0, 0, 1, 1, 2], [0], [0]>} : vector<9x9x32xbf16>, vector<9x32x64xbf16>, vector<9x9x64xf32> -> vector<9x9x64xf32>
    %188 = arith.addf %181, %187 : vector<9x9x64xf32>
    %189 = vector.extract_strided_slice %105 {offsets = [0, 0, 0], sizes = [9, 9, 32], strides = [1, 1, 1]} : vector<10x10x32xbf16> to vector<9x9x32xbf16>
    %c5 = arith.constant 5 : index
    %c0_71 = arith.constant 0 : index
    %c0_72 = arith.constant 0 : index
    %190 = vector.load %arg4[%c5, %c0_71, %c0_72] : memref<16x32x64xbf16, #tpu.memory_space<vmem>>, vector<1x32x64xbf16>
    %191 = vector.shape_cast %190 : vector<1x32x64xbf16> to vector<32x64xbf16>
    %192 = vector.shape_cast %191 : vector<32x64xbf16> to vector<1x32x64xbf16>
    %193 = vector.broadcast %192 : vector<1x32x64xbf16> to vector<9x32x64xbf16>
    %cst_73 = arith.constant dense<0.000000e+00> : vector<9x9x64xf32>
    %194 = tpu.matmul %189, %193, %cst_73 {dimension_numbers = #tpu.dot_dimension_numbers<[2], [1], [1], [2], [0, 0, 0, 1, 1, 2], [0], [0]>} : vector<9x9x32xbf16>, vector<9x32x64xbf16>, vector<9x9x64xf32> -> vector<9x9x64xf32>
    %195 = arith.addf %188, %194 : vector<9x9x64xf32>
    %196 = vector.extract_strided_slice %105 {offsets = [0, 1, 0], sizes = [9, 9, 32], strides = [1, 1, 1]} : vector<10x10x32xbf16> to vector<9x9x32xbf16>
    %c7 = arith.constant 7 : index
    %c0_74 = arith.constant 0 : index
    %c0_75 = arith.constant 0 : index
    %197 = vector.load %arg4[%c7, %c0_74, %c0_75] : memref<16x32x64xbf16, #tpu.memory_space<vmem>>, vector<1x32x64xbf16>
    %198 = vector.shape_cast %197 : vector<1x32x64xbf16> to vector<32x64xbf16>
    %199 = vector.shape_cast %198 : vector<32x64xbf16> to vector<1x32x64xbf16>
    %200 = vector.broadcast %199 : vector<1x32x64xbf16> to vector<9x32x64xbf16>
    %cst_76 = arith.constant dense<0.000000e+00> : vector<9x9x64xf32>
    %201 = tpu.matmul %196, %200, %cst_76 {dimension_numbers = #tpu.dot_dimension_numbers<[2], [1], [1], [2], [0, 0, 0, 1, 1, 2], [0], [0]>} : vector<9x9x32xbf16>, vector<9x32x64xbf16>, vector<9x9x64xf32> -> vector<9x9x64xf32>
    %202 = arith.addf %195, %201 : vector<9x9x64xf32>
    %203 = vector.extract_strided_slice %105 {offsets = [1, 0, 0], sizes = [9, 9, 32], strides = [1, 1, 1]} : vector<10x10x32xbf16> to vector<9x9x32xbf16>
    %c13 = arith.constant 13 : index
    %c0_77 = arith.constant 0 : index
    %c0_78 = arith.constant 0 : index
    %204 = vector.load %arg4[%c13, %c0_77, %c0_78] : memref<16x32x64xbf16, #tpu.memory_space<vmem>>, vector<1x32x64xbf16>
    %205 = vector.shape_cast %204 : vector<1x32x64xbf16> to vector<32x64xbf16>
    %206 = vector.shape_cast %205 : vector<32x64xbf16> to vector<1x32x64xbf16>
    %207 = vector.broadcast %206 : vector<1x32x64xbf16> to vector<9x32x64xbf16>
    %cst_79 = arith.constant dense<0.000000e+00> : vector<9x9x64xf32>
    %208 = tpu.matmul %203, %207, %cst_79 {dimension_numbers = #tpu.dot_dimension_numbers<[2], [1], [1], [2], [0, 0, 0, 1, 1, 2], [0], [0]>} : vector<9x9x32xbf16>, vector<9x32x64xbf16>, vector<9x9x64xf32> -> vector<9x9x64xf32>
    %209 = arith.addf %202, %208 : vector<9x9x64xf32>
    %210 = vector.extract_strided_slice %105 {offsets = [1, 1, 0], sizes = [9, 9, 32], strides = [1, 1, 1]} : vector<10x10x32xbf16> to vector<9x9x32xbf16>
    %c15 = arith.constant 15 : index
    %c0_80 = arith.constant 0 : index
    %c0_81 = arith.constant 0 : index
    %211 = vector.load %arg4[%c15, %c0_80, %c0_81] : memref<16x32x64xbf16, #tpu.memory_space<vmem>>, vector<1x32x64xbf16>
    %212 = vector.shape_cast %211 : vector<1x32x64xbf16> to vector<32x64xbf16>
    %213 = vector.shape_cast %212 : vector<32x64xbf16> to vector<1x32x64xbf16>
    %214 = vector.broadcast %213 : vector<1x32x64xbf16> to vector<9x32x64xbf16>
    %cst_82 = arith.constant dense<0.000000e+00> : vector<9x9x64xf32>
    %215 = tpu.matmul %210, %214, %cst_82 {dimension_numbers = #tpu.dot_dimension_numbers<[2], [1], [1], [2], [0, 0, 0, 1, 1, 2], [0], [0]>} : vector<9x9x32xbf16>, vector<9x32x64xbf16>, vector<9x9x64xf32> -> vector<9x9x64xf32>
    %216 = arith.addf %209, %215 : vector<9x9x64xf32>
    %c0_83 = arith.constant 0 : index
    %c0_84 = arith.constant 0 : index
    %c0_85 = arith.constant 0 : index
    %217 = vector.load %arg5[%c0_83, %c0_84, %c0_85] : memref<1x1x64xf32, #tpu.memory_space<vmem>>, vector<1x1x64xf32>
    %218 = vector.broadcast %217 : vector<1x1x64xf32> to vector<9x9x64xf32>
    %219 = arith.addf %216, %218 : vector<9x9x64xf32>
    %cst_86 = arith.constant 0.000000e+00 : f32
    %220 = vector.broadcast %cst_86 : f32 to vector<9x9x64xf32>
    %221 = arith.maximumf %219, %220 : vector<9x9x64xf32>
    %222 = arith.truncf %221 : vector<9x9x64xf32> to vector<9x9x64xbf16>
    %223 = vector.extract_strided_slice %222 {offsets = [0, 0, 0], sizes = [7, 7, 64], strides = [1, 1, 1]} : vector<9x9x64xbf16> to vector<7x7x64xbf16>
    %c0_87 = arith.constant 0 : index
    %c0_88 = arith.constant 0 : index
    %c0_89 = arith.constant 0 : index
    %224 = vector.load %arg6[%c0_87, %c0_88, %c0_89] : memref<9x64x64xbf16, #tpu.memory_space<vmem>>, vector<1x64x64xbf16>
    %225 = vector.shape_cast %224 : vector<1x64x64xbf16> to vector<64x64xbf16>
    %226 = vector.shape_cast %225 : vector<64x64xbf16> to vector<1x64x64xbf16>
    %227 = vector.broadcast %226 : vector<1x64x64xbf16> to vector<7x64x64xbf16>
    %cst_90 = arith.constant dense<0.000000e+00> : vector<7x7x64xf32>
    %228 = tpu.matmul %223, %227, %cst_90 {dimension_numbers = #tpu.dot_dimension_numbers<[2], [1], [1], [2], [0, 0, 0, 1, 1, 2], [0], [0]>} : vector<7x7x64xbf16>, vector<7x64x64xbf16>, vector<7x7x64xf32> -> vector<7x7x64xf32>
    %229 = vector.extract_strided_slice %222 {offsets = [0, 1, 0], sizes = [7, 7, 64], strides = [1, 1, 1]} : vector<9x9x64xbf16> to vector<7x7x64xbf16>
    %c1_91 = arith.constant 1 : index
    %c0_92 = arith.constant 0 : index
    %c0_93 = arith.constant 0 : index
    %230 = vector.load %arg6[%c1_91, %c0_92, %c0_93] : memref<9x64x64xbf16, #tpu.memory_space<vmem>>, vector<1x64x64xbf16>
    %231 = vector.shape_cast %230 : vector<1x64x64xbf16> to vector<64x64xbf16>
    %232 = vector.shape_cast %231 : vector<64x64xbf16> to vector<1x64x64xbf16>
    %233 = vector.broadcast %232 : vector<1x64x64xbf16> to vector<7x64x64xbf16>
    %cst_94 = arith.constant dense<0.000000e+00> : vector<7x7x64xf32>
    %234 = tpu.matmul %229, %233, %cst_94 {dimension_numbers = #tpu.dot_dimension_numbers<[2], [1], [1], [2], [0, 0, 0, 1, 1, 2], [0], [0]>} : vector<7x7x64xbf16>, vector<7x64x64xbf16>, vector<7x7x64xf32> -> vector<7x7x64xf32>
    %235 = arith.addf %228, %234 : vector<7x7x64xf32>
    %236 = vector.extract_strided_slice %222 {offsets = [0, 2, 0], sizes = [7, 7, 64], strides = [1, 1, 1]} : vector<9x9x64xbf16> to vector<7x7x64xbf16>
    %c2_95 = arith.constant 2 : index
    %c0_96 = arith.constant 0 : index
    %c0_97 = arith.constant 0 : index
    %237 = vector.load %arg6[%c2_95, %c0_96, %c0_97] : memref<9x64x64xbf16, #tpu.memory_space<vmem>>, vector<1x64x64xbf16>
    %238 = vector.shape_cast %237 : vector<1x64x64xbf16> to vector<64x64xbf16>
    %239 = vector.shape_cast %238 : vector<64x64xbf16> to vector<1x64x64xbf16>
    %240 = vector.broadcast %239 : vector<1x64x64xbf16> to vector<7x64x64xbf16>
    %cst_98 = arith.constant dense<0.000000e+00> : vector<7x7x64xf32>
    %241 = tpu.matmul %236, %240, %cst_98 {dimension_numbers = #tpu.dot_dimension_numbers<[2], [1], [1], [2], [0, 0, 0, 1, 1, 2], [0], [0]>} : vector<7x7x64xbf16>, vector<7x64x64xbf16>, vector<7x7x64xf32> -> vector<7x7x64xf32>
    %242 = arith.addf %235, %241 : vector<7x7x64xf32>
    %243 = vector.extract_strided_slice %222 {offsets = [1, 0, 0], sizes = [7, 7, 64], strides = [1, 1, 1]} : vector<9x9x64xbf16> to vector<7x7x64xbf16>
    %c3_99 = arith.constant 3 : index
    %c0_100 = arith.constant 0 : index
    %c0_101 = arith.constant 0 : index
    %244 = vector.load %arg6[%c3_99, %c0_100, %c0_101] : memref<9x64x64xbf16, #tpu.memory_space<vmem>>, vector<1x64x64xbf16>
    %245 = vector.shape_cast %244 : vector<1x64x64xbf16> to vector<64x64xbf16>
    %246 = vector.shape_cast %245 : vector<64x64xbf16> to vector<1x64x64xbf16>
    %247 = vector.broadcast %246 : vector<1x64x64xbf16> to vector<7x64x64xbf16>
    %cst_102 = arith.constant dense<0.000000e+00> : vector<7x7x64xf32>
    %248 = tpu.matmul %243, %247, %cst_102 {dimension_numbers = #tpu.dot_dimension_numbers<[2], [1], [1], [2], [0, 0, 0, 1, 1, 2], [0], [0]>} : vector<7x7x64xbf16>, vector<7x64x64xbf16>, vector<7x7x64xf32> -> vector<7x7x64xf32>
    %249 = arith.addf %242, %248 : vector<7x7x64xf32>
    %250 = vector.extract_strided_slice %222 {offsets = [1, 1, 0], sizes = [7, 7, 64], strides = [1, 1, 1]} : vector<9x9x64xbf16> to vector<7x7x64xbf16>
    %c4_103 = arith.constant 4 : index
    %c0_104 = arith.constant 0 : index
    %c0_105 = arith.constant 0 : index
    %251 = vector.load %arg6[%c4_103, %c0_104, %c0_105] : memref<9x64x64xbf16, #tpu.memory_space<vmem>>, vector<1x64x64xbf16>
    %252 = vector.shape_cast %251 : vector<1x64x64xbf16> to vector<64x64xbf16>
    %253 = vector.shape_cast %252 : vector<64x64xbf16> to vector<1x64x64xbf16>
    %254 = vector.broadcast %253 : vector<1x64x64xbf16> to vector<7x64x64xbf16>
    %cst_106 = arith.constant dense<0.000000e+00> : vector<7x7x64xf32>
    %255 = tpu.matmul %250, %254, %cst_106 {dimension_numbers = #tpu.dot_dimension_numbers<[2], [1], [1], [2], [0, 0, 0, 1, 1, 2], [0], [0]>} : vector<7x7x64xbf16>, vector<7x64x64xbf16>, vector<7x7x64xf32> -> vector<7x7x64xf32>
    %256 = arith.addf %249, %255 : vector<7x7x64xf32>
    %257 = vector.extract_strided_slice %222 {offsets = [1, 2, 0], sizes = [7, 7, 64], strides = [1, 1, 1]} : vector<9x9x64xbf16> to vector<7x7x64xbf16>
    %c5_107 = arith.constant 5 : index
    %c0_108 = arith.constant 0 : index
    %c0_109 = arith.constant 0 : index
    %258 = vector.load %arg6[%c5_107, %c0_108, %c0_109] : memref<9x64x64xbf16, #tpu.memory_space<vmem>>, vector<1x64x64xbf16>
    %259 = vector.shape_cast %258 : vector<1x64x64xbf16> to vector<64x64xbf16>
    %260 = vector.shape_cast %259 : vector<64x64xbf16> to vector<1x64x64xbf16>
    %261 = vector.broadcast %260 : vector<1x64x64xbf16> to vector<7x64x64xbf16>
    %cst_110 = arith.constant dense<0.000000e+00> : vector<7x7x64xf32>
    %262 = tpu.matmul %257, %261, %cst_110 {dimension_numbers = #tpu.dot_dimension_numbers<[2], [1], [1], [2], [0, 0, 0, 1, 1, 2], [0], [0]>} : vector<7x7x64xbf16>, vector<7x64x64xbf16>, vector<7x7x64xf32> -> vector<7x7x64xf32>
    %263 = arith.addf %256, %262 : vector<7x7x64xf32>
    %264 = vector.extract_strided_slice %222 {offsets = [2, 0, 0], sizes = [7, 7, 64], strides = [1, 1, 1]} : vector<9x9x64xbf16> to vector<7x7x64xbf16>
    %c6_111 = arith.constant 6 : index
    %c0_112 = arith.constant 0 : index
    %c0_113 = arith.constant 0 : index
    %265 = vector.load %arg6[%c6_111, %c0_112, %c0_113] : memref<9x64x64xbf16, #tpu.memory_space<vmem>>, vector<1x64x64xbf16>
    %266 = vector.shape_cast %265 : vector<1x64x64xbf16> to vector<64x64xbf16>
    %267 = vector.shape_cast %266 : vector<64x64xbf16> to vector<1x64x64xbf16>
    %268 = vector.broadcast %267 : vector<1x64x64xbf16> to vector<7x64x64xbf16>
    %cst_114 = arith.constant dense<0.000000e+00> : vector<7x7x64xf32>
    %269 = tpu.matmul %264, %268, %cst_114 {dimension_numbers = #tpu.dot_dimension_numbers<[2], [1], [1], [2], [0, 0, 0, 1, 1, 2], [0], [0]>} : vector<7x7x64xbf16>, vector<7x64x64xbf16>, vector<7x7x64xf32> -> vector<7x7x64xf32>
    %270 = arith.addf %263, %269 : vector<7x7x64xf32>
    %271 = vector.extract_strided_slice %222 {offsets = [2, 1, 0], sizes = [7, 7, 64], strides = [1, 1, 1]} : vector<9x9x64xbf16> to vector<7x7x64xbf16>
    %c7_115 = arith.constant 7 : index
    %c0_116 = arith.constant 0 : index
    %c0_117 = arith.constant 0 : index
    %272 = vector.load %arg6[%c7_115, %c0_116, %c0_117] : memref<9x64x64xbf16, #tpu.memory_space<vmem>>, vector<1x64x64xbf16>
    %273 = vector.shape_cast %272 : vector<1x64x64xbf16> to vector<64x64xbf16>
    %274 = vector.shape_cast %273 : vector<64x64xbf16> to vector<1x64x64xbf16>
    %275 = vector.broadcast %274 : vector<1x64x64xbf16> to vector<7x64x64xbf16>
    %cst_118 = arith.constant dense<0.000000e+00> : vector<7x7x64xf32>
    %276 = tpu.matmul %271, %275, %cst_118 {dimension_numbers = #tpu.dot_dimension_numbers<[2], [1], [1], [2], [0, 0, 0, 1, 1, 2], [0], [0]>} : vector<7x7x64xbf16>, vector<7x64x64xbf16>, vector<7x7x64xf32> -> vector<7x7x64xf32>
    %277 = arith.addf %270, %276 : vector<7x7x64xf32>
    %278 = vector.extract_strided_slice %222 {offsets = [2, 2, 0], sizes = [7, 7, 64], strides = [1, 1, 1]} : vector<9x9x64xbf16> to vector<7x7x64xbf16>
    %c8_119 = arith.constant 8 : index
    %c0_120 = arith.constant 0 : index
    %c0_121 = arith.constant 0 : index
    %279 = vector.load %arg6[%c8_119, %c0_120, %c0_121] : memref<9x64x64xbf16, #tpu.memory_space<vmem>>, vector<1x64x64xbf16>
    %280 = vector.shape_cast %279 : vector<1x64x64xbf16> to vector<64x64xbf16>
    %281 = vector.shape_cast %280 : vector<64x64xbf16> to vector<1x64x64xbf16>
    %282 = vector.broadcast %281 : vector<1x64x64xbf16> to vector<7x64x64xbf16>
    %cst_122 = arith.constant dense<0.000000e+00> : vector<7x7x64xf32>
    %283 = tpu.matmul %278, %282, %cst_122 {dimension_numbers = #tpu.dot_dimension_numbers<[2], [1], [1], [2], [0, 0, 0, 1, 1, 2], [0], [0]>} : vector<7x7x64xbf16>, vector<7x64x64xbf16>, vector<7x7x64xf32> -> vector<7x7x64xf32>
    %284 = arith.addf %277, %283 : vector<7x7x64xf32>
    %c0_123 = arith.constant 0 : index
    %c0_124 = arith.constant 0 : index
    %c0_125 = arith.constant 0 : index
    %285 = vector.load %arg7[%c0_123, %c0_124, %c0_125] : memref<1x1x64xf32, #tpu.memory_space<vmem>>, vector<1x1x64xf32>
    %286 = vector.broadcast %285 : vector<1x1x64xf32> to vector<7x7x64xf32>
    %287 = arith.addf %284, %286 : vector<7x7x64xf32>
    %cst_126 = arith.constant 0.000000e+00 : f32
    %288 = vector.broadcast %cst_126 : f32 to vector<7x7x64xf32>
    %289 = arith.maximumf %287, %288 : vector<7x7x64xf32>
    %290 = arith.truncf %289 : vector<7x7x64xf32> to vector<7x7x64xbf16>
    %291 = vector.extract_strided_slice %290 {offsets = [0, 0, 0], sizes = [1, 1, 64], strides = [1, 1, 1]} : vector<7x7x64xbf16> to vector<1x1x64xbf16>
    %292 = vector.shape_cast %291 : vector<1x1x64xbf16> to vector<1x64xbf16>
    %293 = vector.extract_strided_slice %290 {offsets = [0, 1, 0], sizes = [1, 1, 64], strides = [1, 1, 1]} : vector<7x7x64xbf16> to vector<1x1x64xbf16>
    %294 = vector.shape_cast %293 : vector<1x1x64xbf16> to vector<1x64xbf16>
    %295 = vector.extract_strided_slice %290 {offsets = [0, 2, 0], sizes = [1, 1, 64], strides = [1, 1, 1]} : vector<7x7x64xbf16> to vector<1x1x64xbf16>
    %296 = vector.shape_cast %295 : vector<1x1x64xbf16> to vector<1x64xbf16>
    %297 = vector.extract_strided_slice %290 {offsets = [0, 3, 0], sizes = [1, 1, 64], strides = [1, 1, 1]} : vector<7x7x64xbf16> to vector<1x1x64xbf16>
    %298 = vector.shape_cast %297 : vector<1x1x64xbf16> to vector<1x64xbf16>
    %299 = vector.extract_strided_slice %290 {offsets = [0, 4, 0], sizes = [1, 1, 64], strides = [1, 1, 1]} : vector<7x7x64xbf16> to vector<1x1x64xbf16>
    %300 = vector.shape_cast %299 : vector<1x1x64xbf16> to vector<1x64xbf16>
    %301 = vector.extract_strided_slice %290 {offsets = [0, 5, 0], sizes = [1, 1, 64], strides = [1, 1, 1]} : vector<7x7x64xbf16> to vector<1x1x64xbf16>
    %302 = vector.shape_cast %301 : vector<1x1x64xbf16> to vector<1x64xbf16>
    %303 = vector.extract_strided_slice %290 {offsets = [0, 6, 0], sizes = [1, 1, 64], strides = [1, 1, 1]} : vector<7x7x64xbf16> to vector<1x1x64xbf16>
    %304 = vector.shape_cast %303 : vector<1x1x64xbf16> to vector<1x64xbf16>
    %305 = vector.extract_strided_slice %290 {offsets = [1, 0, 0], sizes = [1, 1, 64], strides = [1, 1, 1]} : vector<7x7x64xbf16> to vector<1x1x64xbf16>
    %306 = vector.shape_cast %305 : vector<1x1x64xbf16> to vector<1x64xbf16>
    %307 = vector.extract_strided_slice %290 {offsets = [1, 1, 0], sizes = [1, 1, 64], strides = [1, 1, 1]} : vector<7x7x64xbf16> to vector<1x1x64xbf16>
    %308 = vector.shape_cast %307 : vector<1x1x64xbf16> to vector<1x64xbf16>
    %309 = vector.extract_strided_slice %290 {offsets = [1, 2, 0], sizes = [1, 1, 64], strides = [1, 1, 1]} : vector<7x7x64xbf16> to vector<1x1x64xbf16>
    %310 = vector.shape_cast %309 : vector<1x1x64xbf16> to vector<1x64xbf16>
    %311 = vector.extract_strided_slice %290 {offsets = [1, 3, 0], sizes = [1, 1, 64], strides = [1, 1, 1]} : vector<7x7x64xbf16> to vector<1x1x64xbf16>
    %312 = vector.shape_cast %311 : vector<1x1x64xbf16> to vector<1x64xbf16>
    %313 = vector.extract_strided_slice %290 {offsets = [1, 4, 0], sizes = [1, 1, 64], strides = [1, 1, 1]} : vector<7x7x64xbf16> to vector<1x1x64xbf16>
    %314 = vector.shape_cast %313 : vector<1x1x64xbf16> to vector<1x64xbf16>
    %315 = vector.extract_strided_slice %290 {offsets = [1, 5, 0], sizes = [1, 1, 64], strides = [1, 1, 1]} : vector<7x7x64xbf16> to vector<1x1x64xbf16>
    %316 = vector.shape_cast %315 : vector<1x1x64xbf16> to vector<1x64xbf16>
    %317 = vector.extract_strided_slice %290 {offsets = [1, 6, 0], sizes = [1, 1, 64], strides = [1, 1, 1]} : vector<7x7x64xbf16> to vector<1x1x64xbf16>
    %318 = vector.shape_cast %317 : vector<1x1x64xbf16> to vector<1x64xbf16>
    %319 = vector.extract_strided_slice %290 {offsets = [2, 0, 0], sizes = [1, 1, 64], strides = [1, 1, 1]} : vector<7x7x64xbf16> to vector<1x1x64xbf16>
    %320 = vector.shape_cast %319 : vector<1x1x64xbf16> to vector<1x64xbf16>
    %321 = vector.extract_strided_slice %290 {offsets = [2, 1, 0], sizes = [1, 1, 64], strides = [1, 1, 1]} : vector<7x7x64xbf16> to vector<1x1x64xbf16>
    %322 = vector.shape_cast %321 : vector<1x1x64xbf16> to vector<1x64xbf16>
    %323 = vector.extract_strided_slice %290 {offsets = [2, 2, 0], sizes = [1, 1, 64], strides = [1, 1, 1]} : vector<7x7x64xbf16> to vector<1x1x64xbf16>
    %324 = vector.shape_cast %323 : vector<1x1x64xbf16> to vector<1x64xbf16>
    %325 = vector.extract_strided_slice %290 {offsets = [2, 3, 0], sizes = [1, 1, 64], strides = [1, 1, 1]} : vector<7x7x64xbf16> to vector<1x1x64xbf16>
    %326 = vector.shape_cast %325 : vector<1x1x64xbf16> to vector<1x64xbf16>
    %327 = vector.extract_strided_slice %290 {offsets = [2, 4, 0], sizes = [1, 1, 64], strides = [1, 1, 1]} : vector<7x7x64xbf16> to vector<1x1x64xbf16>
    %328 = vector.shape_cast %327 : vector<1x1x64xbf16> to vector<1x64xbf16>
    %329 = vector.extract_strided_slice %290 {offsets = [2, 5, 0], sizes = [1, 1, 64], strides = [1, 1, 1]} : vector<7x7x64xbf16> to vector<1x1x64xbf16>
    %330 = vector.shape_cast %329 : vector<1x1x64xbf16> to vector<1x64xbf16>
    %331 = vector.extract_strided_slice %290 {offsets = [2, 6, 0], sizes = [1, 1, 64], strides = [1, 1, 1]} : vector<7x7x64xbf16> to vector<1x1x64xbf16>
    %332 = vector.shape_cast %331 : vector<1x1x64xbf16> to vector<1x64xbf16>
    %333 = vector.extract_strided_slice %290 {offsets = [3, 0, 0], sizes = [1, 1, 64], strides = [1, 1, 1]} : vector<7x7x64xbf16> to vector<1x1x64xbf16>
    %334 = vector.shape_cast %333 : vector<1x1x64xbf16> to vector<1x64xbf16>
    %335 = vector.extract_strided_slice %290 {offsets = [3, 1, 0], sizes = [1, 1, 64], strides = [1, 1, 1]} : vector<7x7x64xbf16> to vector<1x1x64xbf16>
    %336 = vector.shape_cast %335 : vector<1x1x64xbf16> to vector<1x64xbf16>
    %337 = vector.extract_strided_slice %290 {offsets = [3, 2, 0], sizes = [1, 1, 64], strides = [1, 1, 1]} : vector<7x7x64xbf16> to vector<1x1x64xbf16>
    %338 = vector.shape_cast %337 : vector<1x1x64xbf16> to vector<1x64xbf16>
    %339 = vector.extract_strided_slice %290 {offsets = [3, 3, 0], sizes = [1, 1, 64], strides = [1, 1, 1]} : vector<7x7x64xbf16> to vector<1x1x64xbf16>
    %340 = vector.shape_cast %339 : vector<1x1x64xbf16> to vector<1x64xbf16>
    %341 = vector.extract_strided_slice %290 {offsets = [3, 4, 0], sizes = [1, 1, 64], strides = [1, 1, 1]} : vector<7x7x64xbf16> to vector<1x1x64xbf16>
    %342 = vector.shape_cast %341 : vector<1x1x64xbf16> to vector<1x64xbf16>
    %343 = vector.extract_strided_slice %290 {offsets = [3, 5, 0], sizes = [1, 1, 64], strides = [1, 1, 1]} : vector<7x7x64xbf16> to vector<1x1x64xbf16>
    %344 = vector.shape_cast %343 : vector<1x1x64xbf16> to vector<1x64xbf16>
    %345 = vector.extract_strided_slice %290 {offsets = [3, 6, 0], sizes = [1, 1, 64], strides = [1, 1, 1]} : vector<7x7x64xbf16> to vector<1x1x64xbf16>
    %346 = vector.shape_cast %345 : vector<1x1x64xbf16> to vector<1x64xbf16>
    %347 = vector.extract_strided_slice %290 {offsets = [4, 0, 0], sizes = [1, 1, 64], strides = [1, 1, 1]} : vector<7x7x64xbf16> to vector<1x1x64xbf16>
    %348 = vector.shape_cast %347 : vector<1x1x64xbf16> to vector<1x64xbf16>
    %349 = vector.extract_strided_slice %290 {offsets = [4, 1, 0], sizes = [1, 1, 64], strides = [1, 1, 1]} : vector<7x7x64xbf16> to vector<1x1x64xbf16>
    %350 = vector.shape_cast %349 : vector<1x1x64xbf16> to vector<1x64xbf16>
    %351 = vector.extract_strided_slice %290 {offsets = [4, 2, 0], sizes = [1, 1, 64], strides = [1, 1, 1]} : vector<7x7x64xbf16> to vector<1x1x64xbf16>
    %352 = vector.shape_cast %351 : vector<1x1x64xbf16> to vector<1x64xbf16>
    %353 = vector.extract_strided_slice %290 {offsets = [4, 3, 0], sizes = [1, 1, 64], strides = [1, 1, 1]} : vector<7x7x64xbf16> to vector<1x1x64xbf16>
    %354 = vector.shape_cast %353 : vector<1x1x64xbf16> to vector<1x64xbf16>
    %355 = vector.extract_strided_slice %290 {offsets = [4, 4, 0], sizes = [1, 1, 64], strides = [1, 1, 1]} : vector<7x7x64xbf16> to vector<1x1x64xbf16>
    %356 = vector.shape_cast %355 : vector<1x1x64xbf16> to vector<1x64xbf16>
    %357 = vector.extract_strided_slice %290 {offsets = [4, 5, 0], sizes = [1, 1, 64], strides = [1, 1, 1]} : vector<7x7x64xbf16> to vector<1x1x64xbf16>
    %358 = vector.shape_cast %357 : vector<1x1x64xbf16> to vector<1x64xbf16>
    %359 = vector.extract_strided_slice %290 {offsets = [4, 6, 0], sizes = [1, 1, 64], strides = [1, 1, 1]} : vector<7x7x64xbf16> to vector<1x1x64xbf16>
    %360 = vector.shape_cast %359 : vector<1x1x64xbf16> to vector<1x64xbf16>
    %361 = vector.extract_strided_slice %290 {offsets = [5, 0, 0], sizes = [1, 1, 64], strides = [1, 1, 1]} : vector<7x7x64xbf16> to vector<1x1x64xbf16>
    %362 = vector.shape_cast %361 : vector<1x1x64xbf16> to vector<1x64xbf16>
    %363 = vector.extract_strided_slice %290 {offsets = [5, 1, 0], sizes = [1, 1, 64], strides = [1, 1, 1]} : vector<7x7x64xbf16> to vector<1x1x64xbf16>
    %364 = vector.shape_cast %363 : vector<1x1x64xbf16> to vector<1x64xbf16>
    %365 = vector.extract_strided_slice %290 {offsets = [5, 2, 0], sizes = [1, 1, 64], strides = [1, 1, 1]} : vector<7x7x64xbf16> to vector<1x1x64xbf16>
    %366 = vector.shape_cast %365 : vector<1x1x64xbf16> to vector<1x64xbf16>
    %367 = vector.extract_strided_slice %290 {offsets = [5, 3, 0], sizes = [1, 1, 64], strides = [1, 1, 1]} : vector<7x7x64xbf16> to vector<1x1x64xbf16>
    %368 = vector.shape_cast %367 : vector<1x1x64xbf16> to vector<1x64xbf16>
    %369 = vector.extract_strided_slice %290 {offsets = [5, 4, 0], sizes = [1, 1, 64], strides = [1, 1, 1]} : vector<7x7x64xbf16> to vector<1x1x64xbf16>
    %370 = vector.shape_cast %369 : vector<1x1x64xbf16> to vector<1x64xbf16>
    %371 = vector.extract_strided_slice %290 {offsets = [5, 5, 0], sizes = [1, 1, 64], strides = [1, 1, 1]} : vector<7x7x64xbf16> to vector<1x1x64xbf16>
    %372 = vector.shape_cast %371 : vector<1x1x64xbf16> to vector<1x64xbf16>
    %373 = vector.extract_strided_slice %290 {offsets = [5, 6, 0], sizes = [1, 1, 64], strides = [1, 1, 1]} : vector<7x7x64xbf16> to vector<1x1x64xbf16>
    %374 = vector.shape_cast %373 : vector<1x1x64xbf16> to vector<1x64xbf16>
    %375 = vector.extract_strided_slice %290 {offsets = [6, 0, 0], sizes = [1, 1, 64], strides = [1, 1, 1]} : vector<7x7x64xbf16> to vector<1x1x64xbf16>
    %376 = vector.shape_cast %375 : vector<1x1x64xbf16> to vector<1x64xbf16>
    %377 = vector.extract_strided_slice %290 {offsets = [6, 1, 0], sizes = [1, 1, 64], strides = [1, 1, 1]} : vector<7x7x64xbf16> to vector<1x1x64xbf16>
    %378 = vector.shape_cast %377 : vector<1x1x64xbf16> to vector<1x64xbf16>
    %379 = vector.extract_strided_slice %290 {offsets = [6, 2, 0], sizes = [1, 1, 64], strides = [1, 1, 1]} : vector<7x7x64xbf16> to vector<1x1x64xbf16>
    %380 = vector.shape_cast %379 : vector<1x1x64xbf16> to vector<1x64xbf16>
    %381 = vector.extract_strided_slice %290 {offsets = [6, 3, 0], sizes = [1, 1, 64], strides = [1, 1, 1]} : vector<7x7x64xbf16> to vector<1x1x64xbf16>
    %382 = vector.shape_cast %381 : vector<1x1x64xbf16> to vector<1x64xbf16>
    %383 = vector.extract_strided_slice %290 {offsets = [6, 4, 0], sizes = [1, 1, 64], strides = [1, 1, 1]} : vector<7x7x64xbf16> to vector<1x1x64xbf16>
    %384 = vector.shape_cast %383 : vector<1x1x64xbf16> to vector<1x64xbf16>
    %385 = vector.extract_strided_slice %290 {offsets = [6, 5, 0], sizes = [1, 1, 64], strides = [1, 1, 1]} : vector<7x7x64xbf16> to vector<1x1x64xbf16>
    %386 = vector.shape_cast %385 : vector<1x1x64xbf16> to vector<1x64xbf16>
    %387 = vector.extract_strided_slice %290 {offsets = [6, 6, 0], sizes = [1, 1, 64], strides = [1, 1, 1]} : vector<7x7x64xbf16> to vector<1x1x64xbf16>
    %388 = vector.shape_cast %387 : vector<1x1x64xbf16> to vector<1x64xbf16>
    %389 = tpu.concatenate %292, %294, %296, %298, %300, %302, %304, %306, %308, %310, %312, %314, %316, %318, %320, %322 in 1 : vector<1x64xbf16>, vector<1x64xbf16>, vector<1x64xbf16>, vector<1x64xbf16>, vector<1x64xbf16>, vector<1x64xbf16>, vector<1x64xbf16>, vector<1x64xbf16>, vector<1x64xbf16>, vector<1x64xbf16>, vector<1x64xbf16>, vector<1x64xbf16>, vector<1x64xbf16>, vector<1x64xbf16>, vector<1x64xbf16>, vector<1x64xbf16> -> vector<1x1024xbf16>
    %390 = tpu.concatenate %324, %326, %328, %330, %332, %334, %336, %338, %340, %342, %344, %346, %348, %350, %352, %354 in 1 : vector<1x64xbf16>, vector<1x64xbf16>, vector<1x64xbf16>, vector<1x64xbf16>, vector<1x64xbf16>, vector<1x64xbf16>, vector<1x64xbf16>, vector<1x64xbf16>, vector<1x64xbf16>, vector<1x64xbf16>, vector<1x64xbf16>, vector<1x64xbf16>, vector<1x64xbf16>, vector<1x64xbf16>, vector<1x64xbf16>, vector<1x64xbf16> -> vector<1x1024xbf16>
    %391 = tpu.concatenate %356, %358, %360, %362, %364, %366, %368, %370, %372, %374, %376, %378, %380, %382, %384, %386 in 1 : vector<1x64xbf16>, vector<1x64xbf16>, vector<1x64xbf16>, vector<1x64xbf16>, vector<1x64xbf16>, vector<1x64xbf16>, vector<1x64xbf16>, vector<1x64xbf16>, vector<1x64xbf16>, vector<1x64xbf16>, vector<1x64xbf16>, vector<1x64xbf16>, vector<1x64xbf16>, vector<1x64xbf16>, vector<1x64xbf16>, vector<1x64xbf16> -> vector<1x1024xbf16>
    %392 = tpu.concatenate %389, %390, %391, %388 in 1 : vector<1x1024xbf16>, vector<1x1024xbf16>, vector<1x1024xbf16>, vector<1x64xbf16> -> vector<1x3136xbf16>
    %c0_127 = arith.constant 0 : index
    %c0_128 = arith.constant 0 : index
    %393 = vector.load %arg8[%c0_127, %c0_128] : memref<3136x32xbf16, #tpu.memory_space<vmem>>, vector<3136x32xbf16>
    %cst_129 = arith.constant dense<0.000000e+00> : vector<1x32xf32>
    %394 = tpu.matmul %392, %393, %cst_129 {dimension_numbers = #tpu.dot_dimension_numbers<[1], [0], [0], [1], [0, 0, 1, 1], [], []>} : vector<1x3136xbf16>, vector<3136x32xbf16>, vector<1x32xf32> -> vector<1x32xf32>
    %c0_130 = arith.constant 0 : index
    %c0_131 = arith.constant 0 : index
    %395 = vector.load %arg9[%c0_130, %c0_131] : memref<1x32xf32, #tpu.memory_space<vmem>>, vector<1x32xf32>
    %396 = arith.addf %394, %395 : vector<1x32xf32>
    %cst_132 = arith.constant 0.000000e+00 : f32
    %397 = vector.broadcast %cst_132 : f32 to vector<1x32xf32>
    %398 = arith.maximumf %396, %397 : vector<1x32xf32>
    %399 = arith.truncf %398 : vector<1x32xf32> to vector<1x32xbf16>
    %c0_133 = arith.constant 0 : index
    %c0_134 = arith.constant 0 : index
    %400 = vector.load %arg10[%c0_133, %c0_134] : memref<32x6xbf16, #tpu.memory_space<vmem>>, vector<32x6xbf16>
    %cst_135 = arith.constant dense<0.000000e+00> : vector<1x6xf32>
    %401 = tpu.matmul %399, %400, %cst_135 {dimension_numbers = #tpu.dot_dimension_numbers<[1], [0], [0], [1], [0, 0, 1, 1], [], []>} : vector<1x32xbf16>, vector<32x6xbf16>, vector<1x6xf32> -> vector<1x6xf32>
    %c0_136 = arith.constant 0 : index
    %c0_137 = arith.constant 0 : index
    %402 = vector.load %arg11[%c0_136, %c0_137] : memref<1x6xf32, #tpu.memory_space<vmem>>, vector<1x6xf32>
    %403 = arith.addf %401, %402 : vector<1x6xf32>
    %cst_138 = arith.constant dense<0xFF800000> : vector<1xf32>
    %404 = vector.multi_reduction <maximumf>, %403, %cst_138 [1] : vector<1x6xf32> to vector<1xf32>
    %405 = vector.shape_cast %404 : vector<1xf32> to vector<1x1xf32>
    %406 = vector.broadcast %405 : vector<1x1xf32> to vector<1x6xf32>
    %407 = arith.subf %403, %406 : vector<1x6xf32>
    %408 = math.exp %407 : vector<1x6xf32>
    %cst_139 = arith.constant dense<0.000000e+00> : vector<1xf32>
    %409 = vector.multi_reduction <add>, %408, %cst_139 [1] : vector<1x6xf32> to vector<1xf32>
    %410 = vector.shape_cast %409 : vector<1xf32> to vector<1x1xf32>
    %411 = vector.broadcast %410 : vector<1x1xf32> to vector<1x6xf32>
    %412 = arith.divf %408, %411 : vector<1x6xf32>
    %c0_140 = arith.constant 0 : index
    %c0_141 = arith.constant 0 : index
    %c0_142 = arith.constant 0 : index
    %413 = vector.load %arg12[%c0_140, %c0_141, %c0_142] : memref<1x1x6xf32, #tpu.memory_space<vmem>>, vector<1x1x6xf32>
    %414 = vector.shape_cast %413 : vector<1x1x6xf32> to vector<1x6xf32>
    %415 = vector.shape_cast %412 : vector<1x6xf32> to vector<1x1x6xf32>
    tpu.vector_store %arg12[%c0_140, %c0_141, %c0_142], %415 {strides = array<i32>} : memref<1x1x6xf32, #tpu.memory_space<vmem>>, vector<1x1x6xf32>,
    return
  }
  func.func @transform_0(%arg0: i32) -> (i32, i32, i32, i32) {
    %c0_i32 = arith.constant 0 : i32
    %c0_i32_0 = arith.constant 0 : i32
    %c0_i32_1 = arith.constant 0 : i32
    %c0_i32_2 = arith.constant 0 : i32
    return %arg0, %c0_i32, %c0_i32_0, %c0_i32_1 : i32, i32, i32, i32
  }
  func.func @transform_1(%arg0: i32) -> (i32, i32, i32) {
    %c0_i32 = arith.constant 0 : i32
    %c0_i32_0 = arith.constant 0 : i32
    %c0_i32_1 = arith.constant 0 : i32
    %c0_i32_2 = arith.constant 0 : i32
    return %c0_i32, %c0_i32_0, %c0_i32_1 : i32, i32, i32
  }
  func.func @transform_2(%arg0: i32) -> (i32, i32, i32) {
    %c0_i32 = arith.constant 0 : i32
    %c0_i32_0 = arith.constant 0 : i32
    %c0_i32_1 = arith.constant 0 : i32
    %c0_i32_2 = arith.constant 0 : i32
    return %c0_i32, %c0_i32_0, %c0_i32_1 : i32, i32, i32
  }
  func.func @transform_3(%arg0: i32) -> (i32, i32, i32) {
    %c0_i32 = arith.constant 0 : i32
    %c0_i32_0 = arith.constant 0 : i32
    %c0_i32_1 = arith.constant 0 : i32
    %c0_i32_2 = arith.constant 0 : i32
    return %c0_i32, %c0_i32_0, %c0_i32_1 : i32, i32, i32
  }
  func.func @transform_4(%arg0: i32) -> (i32, i32, i32) {
    %c0_i32 = arith.constant 0 : i32
    %c0_i32_0 = arith.constant 0 : i32
    %c0_i32_1 = arith.constant 0 : i32
    %c0_i32_2 = arith.constant 0 : i32
    return %c0_i32, %c0_i32_0, %c0_i32_1 : i32, i32, i32
  }
  func.func @transform_5(%arg0: i32) -> (i32, i32, i32) {
    %c0_i32 = arith.constant 0 : i32
    %c0_i32_0 = arith.constant 0 : i32
    %c0_i32_1 = arith.constant 0 : i32
    %c0_i32_2 = arith.constant 0 : i32
    return %c0_i32, %c0_i32_0, %c0_i32_1 : i32, i32, i32
  }
  func.func @transform_6(%arg0: i32) -> (i32, i32, i32) {
    %c0_i32 = arith.constant 0 : i32
    %c0_i32_0 = arith.constant 0 : i32
    %c0_i32_1 = arith.constant 0 : i32
    %c0_i32_2 = arith.constant 0 : i32
    return %c0_i32, %c0_i32_0, %c0_i32_1 : i32, i32, i32
  }
  func.func @transform_7(%arg0: i32) -> (i32, i32) {
    %c0_i32 = arith.constant 0 : i32
    %c0_i32_0 = arith.constant 0 : i32
    %c0_i32_1 = arith.constant 0 : i32
    return %c0_i32, %c0_i32_0 : i32, i32
  }
  func.func @transform_8(%arg0: i32) -> (i32, i32) {
    %c0_i32 = arith.constant 0 : i32
    %c0_i32_0 = arith.constant 0 : i32
    %c0_i32_1 = arith.constant 0 : i32
    return %c0_i32, %c0_i32_0 : i32, i32
  }
  func.func @transform_9(%arg0: i32) -> (i32, i32) {
    %c0_i32 = arith.constant 0 : i32
    %c0_i32_0 = arith.constant 0 : i32
    %c0_i32_1 = arith.constant 0 : i32
    return %c0_i32, %c0_i32_0 : i32, i32
  }
  func.func @transform_10(%arg0: i32) -> (i32, i32) {
    %c0_i32 = arith.constant 0 : i32
    %c0_i32_0 = arith.constant 0 : i32
    %c0_i32_1 = arith.constant 0 : i32
    return %c0_i32, %c0_i32_0 : i32, i32
  }
  func.func @transform_11(%arg0: i32) -> (i32, i32, i32) {
    %c0_i32 = arith.constant 0 : i32
    %c0_i32_0 = arith.constant 0 : i32
    %c0_i32_1 = arith.constant 0 : i32
    return %arg0, %c0_i32, %c0_i32_0 : i32, i32, i32
  }
}

</mosaic_0001>

<bundles_post_ra>
// kernel: policy_net_forward.1
= control target key start
LH: loop header
LB: loop body
LE: loop exit
PB: predicated region body
PF: predicated region fallthrough
CT: control target
= control target key end

     0   :  { %s33020_s0 = inlined_call_operand.vmem [shape: bf16[2,21,21,64], index: 0, kind: input, shape index: {}]   ;;  %s33021_s1 = inlined_call_operand.vmem [shape: bf16[4,64,32], index: 1, kind: input, shape index: {}]   ;;  %s33022_s2 = inlined_call_operand.vmem [shape: f32[1,1,32], index: 2, kind: input, shape index: {}]   ;;  %s33023_s3 = inlined_call_operand.vmem [shape: bf16[16,32,64], index: 3, kind: input, shape index: {}]   ;;  %s33024_s4 = inlined_call_operand.vmem [shape: f32[1,1,64], index: 4, kind: input, shape index: {}]   ;;  %s33025_s5 = inlined_call_operand.vmem [shape: bf16[9,64,64], index: 5, kind: input, shape index: {}]   ;;  %s33026_s6 = inlined_call_operand.vmem [shape: f32[1,1,64], index: 6, kind: input, shape index: {}]   ;;  %s33027_s7 = inlined_call_operand.vmem [shape: bf16[3136,32], index: 7, kind: input, shape index: {}]   ;;  %s33028_s8 = inlined_call_operand.vmem [shape: f32[1,32], index: 8, kind: input, shape index: {}]   ;;  %s33029_s9 = inlined_call_operand.vmem [shape: bf16[32,6], index: 9, kind: input, shape index: {}]   ;;  %s33030_s10 = inlined_call_operand.vmem [shape: f32[1,6], index: 10, kind: input, shape index: {}]   ;;  %s33031_s11 = inlined_call_operand.hbm [shape: f32[2,1,6], index: 11, kind: output, shape index: {}]  }
   0x1   :  { %33156 = sst [smem:[#allocation96_spill]] %s33020_s0 }
   0x2   :  { %33157 = sst [smem:[#allocation97_spill]] %s33021_s1 }
   0x3   :  { %16 = vsyncpa [#allocation3], 0 }
   0x4   :  { %18 = vsyncpa [#allocation3 + $0x1], 0  ;;  %s25537_s17 = smov 0   ;;  %s25539_s18 = smov 0  }
   0x5   :  { %s25541_s19 = smov 0   ;;  %s25543_s20 = smov 0  }
   0x6 LB: > { %s25558_s21 = sadd.s32 4294967295, %s25471_s20   ;;  %s19534_s22 = sadd.s32 4294967294, %s25471_s20   ;;  %s25471_s20 = sphi %s25543_s20, %s33583_s20   ;;  %s25467_s19 = sphi %s25541_s19, %s33582_s19   ;;  %s25463_s18 = sphi %s25539_s18, %s33581_s18   ;;  %s25459_s17 = sphi %s25537_s17, %s33580_s17  }
   0x7   : > { %s25562_s23 = sadd.s32 1, %s25471_s20   ;;  %s267_s24 = sadd.s32 1, %s25467_s19 }
   0x8   : > { %s264_s25 = ssub.s32 %s25471_s20, %s25562_s23  ;;  %p277_p0 = scmp.ne.s32.totalorder %s25467_s19, %s25463_s18 }
   0x9   : > { %p265_p1 = scmp.eq.s32.totalorder %s264_s25, 0  ;;  %p278_p2 = scmp.eq.s32.totalorder %s25558_s21, 1 }
   0xa   : > { %p283_p3 = scmp.ne.s32.totalorder %s25463_s18, %s25459_s17  ;;  %p284_p4 = scmp.eq.s32.totalorder %s19534_s22, 1 }
   0xb   : > { %s25573_s26 = scalar_select %p265_p1, %s25467_s19, %s267_s24  }
   0xc   : > { %p25575_p5 = por %p278_p2, %p277_p0  ;;  %p25579_p6 = por %p284_p4, %p283_p3 }
   0xd   : > { %p19537_p7 = scmp.ge.s32.totalorder %s25471_s20, 1  ;;  %p340_p8 = scmp.lt.s32.totalorder %s25471_s20, 3 }
   0xf   : > { %p341_p9 = pnand %p19537_p7, %p340_p8 }
  0x11   : > { %344 = sbr.rel (%p341_p9) target bundleno = 3292 (0xcdc), region = 64 }
  0x16   : > { %s33160_s1 = sld [smem:[#allocation97_spill]]  ;;  %p379_p10 = scmp.lt.s32.totalorder %s25558_s21, 1  ;;  %vm490_vm0 = vsmask.f32 7424  ;;  %vm530_vm1 = vcmask 523264   ;;  %vm25474_vm2 = vmmov 0  }
  0x17   : > { %s33161_s0 = sld [smem:[#allocation96_spill]]  ;;  %vm6626_vm3 = vcmask 1040384   ;;  %vm6647_vm4 = vcmask 1041408   ;;  %vm6668_vm5 = vcmask 1042432   ;;  %vm6689_vm6 = vcmask 1043456   ;;  %s25475_s29 = smov 64  }
  0x18   : > { %s380_s14 = scalar_select %p379_p10, %s25558_s21, 1  ;;  %vm6710_vm7 = vcmask 1044480   ;;  %vm6731_vm8 = vcmask 1045504   ;;  %vm6752_vm9 = vcmask 1046528   ;;  %vm7101_vm10 = vcmask 261120  }
  0x19   : > { %vm19453_vm11 = vcmask 40960   ;;  %s377_s16 = sand.u32 1, %s25463_s18   ;;  %s25476_s15 = smov [#allocation2]  }
  0x1a   : > { %s24931_s22 = smul.u32 252, %s380_s14  ;;  %s19467_s13 = scalar_lea.sflag [#allocation3], %s377_s16 }
  0x1c   : > { %v25588_v0 = vld [vmem:[%s33160_s1 + $0x38] sm:$0xff]   ;;  %v25594_v1 = vld [vmem:[%s33160_s1 + $0x30] sm:$0xff]   ;;  %v25606_v2 = vld [vmem:[%s33160_s1 + $0x28] sm:$0xff]  }
  0x1d   : > { %22043 = vmatprep.subr.bf16.mxu0 %v25588_v0  ;;  %22055 = vmatprep.subr.bf16.mxu1 %v25588_v0  ;;  %v25611_v3 = vld [vmem:[%s33160_s1 + $0x20] sm:$0xff]   ;;  %s25616_s12 = scalar_lea.vmem %s33161_s0, %s24931_s22  ;;  %s378_s22 = scalar_lea.vmem [#allocation2], %s377_s16 }
  0x1e   : > { %22044 = vmatpush3.bf16.msra.mxu0 %v25588_v0  ;;  %22056 = vmatpush3.bf16.msra.mxu1 %v25588_v0  ;;  %v24978_v4 = vld [vmem:[%s25616_s12] sm:$0xff]   ;;  %v24979_v5 = vld [vmem:[%s25616_s12 + $0x8] ss:$0 sps:$4 sm:$0x77]   ;;  %v24980_v6 = vld [vmem:[%s25616_s12 + $0xc] sm:$0xff]   ;;  %s19479_s24 = sshll.u32 %s378_s22, 4  ;;  %s19480_s24 = int_to_ptr.vmem [resolvable:$true] %s19479_s24 }
  0x1f   : > { %22045 = vmatprep.subr.bf16.mxu0 %v25594_v1  ;;  %22057 = vmatprep.subr.bf16.mxu1 %v25594_v1  ;;  %v492_v7 = vshrl.u32 %v24978_v4, 16  ;;  %v494_v8 = vshll.u32 %v24978_v4, 16  ;;  %v499_v9 = vshll.u32 %v24979_v5, 16  ;;  %v503_v10 = vshrl.u32 %v24979_v5, 16  ;;  %v24982_v14 = vld [vmem:[%s25616_s12 + $0x18] sm:$0xff]   ;;  %v24984_v28 = vld [vmem:[%s25616_s12 + $0x24] sm:$0xff]  }
  0x20   : > { %v24981_v11 = vld [vmem:[%s25616_s12 + $0x14] ss:$0 sps:$4 sm:$0x77]   ;;  %v594_v12 = vshrl.u32 %v24980_v6, 16  ;;  %v596_v13 = vshll.u32 %v24980_v6, 16  ;;  %v671_v23 = vshrl.u32 %v24982_v14, 16 }
  0x21   : > { %v496_v15 = vrot.slane %v494_v8, 1  ;;  %v501_v16 = vrot.slane %v499_v9, 1  ;;  %v601_v18 = vshll.u32 %v24981_v11, 16  ;;  %v605_v19 = vshrl.u32 %v24981_v11, 16  ;;  %v24986_v39 = vld [vmem:[%s25616_s12 + $0x30] sm:$0xff]   ;;  %v24988_v40 = vld [vmem:[%s25616_s12 + $0x3c] sm:$0xff]  }
  0x22   : > { %22046 = vmatpush3.bf16.msra.mxu0 %v25594_v1  ;;  %22058 = vmatpush3.bf16.msra.mxu1 %v25594_v1  ;;  %v598_v17 = vrot.slane %v596_v13, 1  ;;  %v24983_v20 = vld [vmem:[%s25616_s12 + $0x20] ss:$0 sps:$4 sm:$0x77]   ;;  %v673_v24 = vshll.u32 %v24982_v14, 16  ;;  %v748_v36 = vshrl.u32 %v24984_v28, 16 }
  0x23   : > { %22047 = vmatprep.subr.bf16.mxu0 %v25606_v2  ;;  %22059 = vmatprep.subr.bf16.mxu1 %v25606_v2  ;;  %v497_v21 = vor.u32 %v496_v15, %v492_v7  ;;  %v505_v22 = vor.u32 %v503_v10, %v501_v16  ;;  %v603_v26 = vrot.slane %v601_v18, 1  ;;  %v678_v27 = vshll.u32 %v24983_v20, 16  ;;  %v24985_v31 = vld [vmem:[%s25616_s12 + $0x2c] ss:$0 sps:$4 sm:$0x77]   ;;  %v24992_v8 = vld [vmem:[%s25616_s12 + $0x54] sm:$0xff]  }
  0x24   : > { %v599_v25 = vor.u32 %v598_v17, %v594_v12  ;;  %v675_v30 = vrot.slane %v673_v24, 1  ;;  %v750_v37 = vshll.u32 %v24984_v28, 16  ;;  %v755_v38 = vshll.u32 %v24985_v31, 16  ;;  %v25653_v44 = vld [vmem:[%s25616_s12 + $0x38] ss:$0 sps:$4 sm:$0x77]  }
  0x25   : > { %v502_v29 = vsel %vm490_vm0, %v497_v21, %v501_v16  ;;  %v607_v33 = vor.u32 %v605_v19, %v603_v26  ;;  %v680_v34 = vrot.slane %v678_v27, 1  ;;  %v827_v46 = vshll.u32 %v24986_v39, 16  ;;  %v25657_v47 = vld [vmem:[%s25616_s12 + $0x44] ss:$0 sps:$4 sm:$0x77]   ;;  %v24990_v4 = vld [vmem:[%s25616_s12 + $0x48] sm:$0xff]  }
  0x26   : > { %22048 = vmatpush3.bf16.msra.mxu0 %v25606_v2  ;;  %22060 = vmatpush3.bf16.msra.mxu1 %v25606_v2  ;;  %v604_v32 = vsel %vm490_vm0, %v599_v25, %v603_v26  ;;  %v676_v35 = vor.u32 %v675_v30, %v671_v23  ;;  %v752_v42 = vrot.slane %v750_v37, 1  ;;  %v757_v43 = vrot.slane %v755_v38, 1  ;;  %v25678_v6 = vld [vmem:[%s25616_s12 + $0x50] ss:$0 sps:$4 sm:$0x77]   ;;  %v25700_v18 = vld [vmem:[%s25616_s12 + $0x60] sm:$0xff]  }
  0x27   : > { %22049 = vmatprep.subr.bf16.mxu0 %v25611_v3  ;;  %22061 = vmatprep.subr.bf16.mxu1 %v25611_v3  ;;  %v904_v48 = vshll.u32 %v24988_v40, 16  ;;  %v682_v50 = vshrl.u32 %v24983_v20, 16  ;;  %v825_v51 = vshrl.u32 %v24986_v39, 16  ;;  %v829_v52 = vrot.slane %v827_v46, 1  ;;  %v25704_v20 = vld [vmem:[%s25616_s12 + $0x6c] sm:$0xff]   ;;  %v25721_v28 = vld [vmem:[%s25616_s12 + $0x78] sm:$0xff]  }
  0x28   : > { %22051 = vmatprep.mubr.msk.bf16.mxu0 %vm530_vm1, %v502_v29  ;;  %22063 = vmatprep.mubr.msk.bf16.mxu1 %vm530_vm1, %v604_v32  ;;  %v681_v41 = vsel %vm490_vm0, %v676_v35, %v680_v34  ;;  %v753_v45 = vor.u32 %v752_v42, %v748_v36  ;;  %v832_v53 = vshll.u32 %v25653_v44, 16  ;;  %v759_v54 = vshrl.u32 %v24985_v31, 16  ;;  %v25691_v11 = vld [vmem:[%s25616_s12 + $0x5c] ss:$0 sps:$4 sm:$0x77]   ;;  %v25728_v32 = vld [vmem:[%s25616_s12 + $0x84] sm:$0xff]  }
  0x29   : > { %v902_v55 = vshrl.u32 %v24988_v40, 16  ;;  %v906_v56 = vrot.slane %v904_v48, 1  ;;  %v909_v57 = vshll.u32 %v25657_v47, 16  ;;  %v684_v58 = vor.u32 %v682_v50, %v680_v34  ;;  %v25715_v26 = vld [vmem:[%s25616_s12 + $0x74] ss:$0 sps:$4 sm:$0x77]  }
  0x2a   : > { %22050 = vmatpush3.bf16.msra.mxu0 %v25611_v3  ;;  %22062 = vmatpush3.bf16.msra.mxu1 %v25611_v3  ;;  %v758_v49 = vsel %vm490_vm0, %v753_v45, %v757_v43  ;;  %v830_v59 = vor.u32 %v829_v52, %v825_v51  ;;  %v834_v60 = vrot.slane %v832_v53, 1  ;;  %v761_v61 = vor.u32 %v759_v54, %v757_v43  ;;  %v25725_v31 = vld [vmem:[%s25616_s12 + $0x80] ss:$0 sps:$4 sm:$0x77]   ;;  %v25757_v51 = vld [vmem:[%s25616_s12 + $0x90] sm:$0xff]   ;;  %s25411_s14 = scalar_lea.vmem %s19480_s24, 16 }
  0x2b   : > { %22067 = vmatprep.subr.bf16.mxu0 %v25588_v0  ;;  %22079 = vmatprep.subr.bf16.mxu1 %v25588_v0  ;;  %v907_v62 = vor.u32 %v906_v56, %v902_v55  ;;  %v911_v63 = vrot.slane %v909_v57, 1  ;;  %v981_v9 = vshll.u32 %v24990_v4, 16  ;;  %v986_v10 = vshll.u32 %v25678_v6, 16  ;;  %v25768_v56 = vld [vmem:[%s25616_s12 + $0x98] ss:$0 sps:$4 sm:$0x77]   ;;  %p25412_p11 = scmp.ne.s32.totalorder %s19480_s24, %s25411_s14 }
  0x2c   : > { %v835_v5 = vsel %vm490_vm0, %v830_v59, %v834_v60  ;;  %v836_v12 = vshrl.u32 %v25653_v44, 16  ;;  %v1058_v13 = vshll.u32 %v24992_v8, 16  ;;  %v913_v14 = vshrl.u32 %v25657_v47, 16  ;;  %v25745_v44 = vld [vmem:[%s25616_s12 + $0x8c] ss:$0 sps:$4 sm:$0x77]  }
  0x2d   : > { %22052 = vmatmul.mubr.msk.bf16.vlgmr.msra.gmra.mxu0 %vm530_vm1, %v505_v22  ;;  %22064 = vmatmul.mubr.msk.bf16.vlgmr.msra.gmra.mxu1 %vm530_vm1, %v607_v33  ;;  %v912_v7 = vsel %vm490_vm0, %v907_v62, %v911_v63  ;;  %v979_v15 = vshrl.u32 %v24990_v4, 16  ;;  %v983_v16 = vrot.slane %v981_v9, 1  ;;  %v990_v17 = vshrl.u32 %v25678_v6, 16  ;;  %v25709_v22 = vld [vmem:[%s25616_s12 + $0x68] ss:$0 sps:$4 sm:$0x77]   ;;  %p25413_p12 = pnand %p25412_p11, %p25575_p5 }
  0x2e   : > { %22068 = vmatpush3.bf16.msra.mxu0 %v25588_v0  ;;  %22080 = vmatpush3.bf16.msra.mxu1 %v25588_v0  ;;  %v1056_v19 = vshrl.u32 %v24992_v8, 16  ;;  %v25706_v21 = vrot.slane %v986_v10, 1  ;;  %v1060_v23 = vrot.slane %v1058_v13, 1  ;;  %v1063_v24 = vshll.u32 %v25691_v11, 16  ;;  %v25776_v59 = vld [vmem:[%s25616_s12 + $0x9c] sm:$0xff]   ;;  %v25787_v4 = vld [vmem:[%s25616_s12 + $0xa8] sm:$0xff]  }
  0x2f   : > { %22069 = vmatprep.subr.bf16.mxu0 %v25594_v1  ;;  %22081 = vmatprep.subr.bf16.mxu1 %v25594_v1  ;;  %v1133_v25 = vshrl.u32 %v25700_v18, 16  ;;  %v1135_v27 = vshll.u32 %v25700_v18, 16  ;;  %v838_v29 = vor.u32 %v836_v12, %v834_v60  ;;  %v984_v30 = vor.u32 %v983_v16, %v979_v15  ;;  %v25797_v9 = vld [vmem:[%s25616_s12 + $0xb4] sm:$0xff]   ;;  %v25802_v10 = vld [vmem:[%s25616_s12 + $0xb0] ss:$0 sps:$4 sm:$0x77]   ;;  %p25414_p13 = pneg %p25413_p12 }
  0x30   : > { %22075 = vmatprep.mubr.msk.bf16.mxu0 %vm530_vm1, %v681_v41  ;;  %22087 = vmatprep.mubr.msk.bf16.mxu1 %vm530_vm1, %v758_v49  ;;  %v1067_v33 = vshrl.u32 %v25691_v11, 16  ;;  %v1140_v34 = vshll.u32 %v25709_v22, 16  ;;  %v1210_v35 = vshrl.u32 %v25704_v20, 16  ;;  %v1212_v36 = vshll.u32 %v25704_v20, 16  ;;  %s25415_s0 = sshll.u32 %s25476_s15, 4  ;;  %s25416_s0 = int_to_ptr.vmem [resolvable:$false] %s25415_s0 }
  0x31   : > { %v915_v37 = vor.u32 %v913_v14, %v911_v63  ;;  %v1061_v38 = vor.u32 %v1060_v23, %v1056_v19  ;;  %v25735_v39 = vrot.slane %v1063_v24, 1  ;;  %v1217_v40 = vshll.u32 %v25715_v26, 16  ;;  %v25805_v12 = vld [vmem:[%s25616_s12 + $0xbc] ss:$0 sps:$4 sm:$0x77]   ;;  %v25810_v14 = vld [vmem:[%s25616_s12 + $0xc0] sm:$0xff]   ;;  %p25418_p0 = scmp.lt.s32.totalorder %s19480_s24, %s25416_s0 }
  0x32   : > { %22070 = vmatpush3.bf16.msra.mxu0 %v25594_v1  ;;  %22082 = vmatpush3.bf16.msra.mxu1 %v25594_v1  ;;  %v25740_v41 = vrot.slane %v1135_v27, 1  ;;  %v1144_v42 = vshrl.u32 %v25709_v22, 16  ;;  %v1289_v43 = vshll.u32 %v25721_v28, 16  ;;  %v1294_v45 = vshll.u32 %v25725_v31, 16 }
  0x33   : > { %22071 = vmatprep.subr.bf16.mxu0 %v25606_v2  ;;  %22083 = vmatprep.subr.bf16.mxu1 %v25606_v2  ;;  %v1366_v46 = vshll.u32 %v25728_v32, 16  ;;  %v989_v47 = vsel %vm490_vm0, %v984_v30, %v25706_v21  ;;  %v25753_v48 = vrot.slane %v1140_v34, 1  ;;  %v1214_v49 = vrot.slane %v1212_v36, 1 }
  0x34   : > { %v1221_v50 = vshrl.u32 %v25715_v26, 16  ;;  %v1066_v52 = vsel %vm490_vm0, %v1061_v38, %v25735_v39  ;;  %v25763_v53 = vrot.slane %v1217_v40, 1  ;;  %v1287_v54 = vshrl.u32 %v25721_v28, 16  ;;  %v25833_v40 = vld [vmem:[%s25616_s12 + $0xcc] sm:$0xff]  }
  0x35   : > { %v1298_v55 = vshrl.u32 %v25725_v31, 16  ;;  %v25772_v57 = vrot.slane %v1289_v43, 1  ;;  %v25780_v60 = vrot.slane %v1294_v45, 1  ;;  %v1371_v62 = vshll.u32 %v25745_v44, 16 }
  0x36   : > { %22072 = vmatpush3.bf16.msra.mxu0 %v25606_v2  ;;  %22084 = vmatpush3.bf16.msra.mxu1 %v25606_v2  ;;  %v1375_v63 = vshrl.u32 %v25745_v44, 16  ;;  %v1448_v8 = vshll.u32 %v25768_v56, 16  ;;  %v1441_v13 = vshrl.u32 %v25757_v51, 16  ;;  %v1452_v16 = vshrl.u32 %v25768_v56, 16  ;;  %v26019_v56 = vld [vmem:[%s33160_s1 + $0x38] sm:$0xff]  }
  0x37   : > { %22073 = vmatprep.subr.bf16.mxu0 %v25611_v3  ;;  %22085 = vmatprep.subr.bf16.mxu1 %v25611_v3  ;;  %v25812_v15 = vrot.slane %v1371_v62, 1  ;;  %v1520_v19 = vshll.u32 %v25776_v59, 16  ;;  %v1597_v30 = vshll.u32 %v25787_v4, 16  ;;  %v992_v34 = vor.u32 %v990_v17, %v25706_v21  ;;  %v25845_v17 = vld [vmem:[%s25616_s12 + $0xc8] ss:$0 sps:$4 sm:$0x77]  }
  0x38   : > { %v25820_v27 = vrot.slane %v1448_v8, 1  ;;  %v1602_v36 = vshll.u32 %v25802_v10, 16  ;;  %v1679_v38 = vshll.u32 %v25805_v12, 16  ;;  %v1069_v43 = vor.u32 %v1067_v33, %v25735_v39 }
  0x39   : > { %v1138_v45 = vor.u32 %v25740_v41, %v1133_v25  ;;  %v1215_v6 = vor.u32 %v1214_v49, %v1210_v35  ;;  %v1751_v21 = vshll.u32 %v25810_v14, 16  ;;  %v1595_v11 = vshrl.u32 %v25787_v4, 16 }
  0x3a   : > { %22074 = vmatpush3.bf16.msra.mxu0 %v25611_v3  ;;  %22086 = vmatpush3.bf16.msra.mxu1 %v25611_v3  ;;  %v25855_v18 = vrot.slane %v1597_v30, 1  ;;  %v1606_v25 = vshrl.u32 %v25802_v10, 16  ;;  %v1672_v20 = vshrl.u32 %v25797_v9, 16  ;;  %v1749_v33 = vshrl.u32 %v25810_v14, 16 }
  0x3b   : > { %22091 = vmatprep.subr.bf16.mxu0 %v25588_v0  ;;  %22103 = vmatprep.subr.bf16.mxu1 %v25588_v0  ;;  %v25862_v35 = vrot.slane %v1602_v36, 1  ;;  %v25866_v41 = vrot.slane %v1679_v38, 1  ;;  %v1683_v49 = vshrl.u32 %v25805_v12, 16  ;;  %v25870_v62 = vrot.slane %v1751_v21, 1 }
  0x3c   : > { %v1826_v8 = vshrl.u32 %v25833_v40, 16  ;;  %v1220_v30 = vsel %vm490_vm0, %v1215_v6, %v25763_v53  ;;  %v1146_v36 = vor.u32 %v1144_v42, %v25753_v48  ;;  %v1223_v38 = vor.u32 %v1221_v50, %v25763_v53  ;;  %v25938_v50 = vld [vmem:[%s25616_s12 + $0xd4] ss:$0 sps:$4 sm:$0x77]   ;;  %v25944_v53 = vld [vmem:[%s25616_s12 + $0xe4] sm:$0xff]  }
  0x3d   : > { %22076 = vmatmul.mubr.msk.bf16.vlgmr.msra.gmra.mxu0 %vm530_vm1, %v684_v58  ;;  %22088 = vmatmul.mubr.msk.bf16.vlgmr.msra.gmra.mxu1 %vm530_vm1, %v761_v61  ;;  %v1364_v58 = vshrl.u32 %v25728_v32, 16  ;;  %v25782_v61 = vrot.slane %v1366_v46, 1  ;;  %v25848_v46 = vrot.slane %v1520_v19, 1  ;;  %v1828_v19 = vshll.u32 %v25833_v40, 16 }
  0x3e   : > { %22092 = vmatpush3.bf16.msra.mxu0 %v25588_v0  ;;  %22104 = vmatpush3.bf16.msra.mxu1 %v25588_v0  ;;  %v1760_v28 = vshrl.u32 %v25845_v17, 16  ;;  %v1833_v31 = vshll.u32 %v25938_v50, 16  ;;  %v1608_v6 = vor.u32 %v1606_v25, %v25862_v35  ;;  %v1754_v21 = vor.u32 %v25870_v62, %v1749_v33 }
  0x3f   : > { %22093 = vmatprep.subr.bf16.mxu0 %v25594_v1  ;;  %22105 = vmatprep.subr.bf16.mxu1 %v25594_v1  ;;  %v25917_v42 = vrot.slane %v1828_v19, 1  ;;  %v26139_v19 = vld [vmem:[%s33160_s1 + $0x8] sm:$0xff]  }
  0x40   : > { %22099 = vmatprep.mubr.msk.bf16.mxu0 %vm530_vm1, %v835_v5  ;;  %22111 = vmatprep.mubr.msk.bf16.mxu1 %vm530_vm1, %v912_v7  ;;  %v1443_v5 = vshll.u32 %v25757_v51, 16  ;;  %v25792_v7 = vld [vmem:[%s25616_s12 + $0xa4] ss:$0 sps:$4 sm:$0x77]   ;;  %v1837_v51 = vshrl.u32 %v25938_v50, 16  ;;  %v1835_v4 = vrot.slane %v1833_v31, 1 }
  0x41   : > { %v1525_v23 = vshll.u32 %v25792_v7, 16  ;;  %v25391_v31 = vld [vmem:[%s25616_s12 + $0x54] sm:$0xff]  }
  0x42   : > { %22094 = vmatpush3.bf16.msra.mxu0 %v25594_v1  ;;  %22106 = vmatpush3.bf16.msra.mxu1 %v25594_v1  ;;  %v25818_v24 = vrot.slane %v1443_v5, 1  ;;  %v1756_v5 = vshll.u32 %v25845_v17, 16 }
  0x43   : > { %22095 = vmatprep.subr.bf16.mxu0 %v25606_v2  ;;  %22107 = vmatprep.subr.bf16.mxu1 %v25606_v2 }
  0x44   : > { %v25914_v22 = vrot.slane %v1756_v5, 1  ;;  %v26129_v5 = vld [vmem:[%s33160_s1 + $0x10] sm:$0xff]  }
  0x46   : > { %22096 = vmatpush3.bf16.msra.mxu0 %v25606_v2  ;;  %22108 = vmatpush3.bf16.msra.mxu1 %v25606_v2  ;;  %v1759_v12 = vsel %vm490_vm0, %v1754_v21, %v25914_v22 }
  0x47   : > { %22097 = vmatprep.subr.bf16.mxu0 %v25611_v3  ;;  %22109 = vmatprep.subr.bf16.mxu1 %v25611_v3 }
  0x4a   : > { %22098 = vmatpush3.bf16.msra.mxu0 %v25611_v3  ;;  %22110 = vmatpush3.bf16.msra.mxu1 %v25611_v3 }
  0x4b   : > { %22115 = vmatprep.subr.bf16.mxu0 %v25588_v0  ;;  %22127 = vmatprep.subr.bf16.mxu1 %v25588_v0 }
  0x4d   : > { %22100 = vmatmul.mubr.msk.bf16.vlgmr.msra.gmra.mxu0 %vm530_vm1, %v838_v29  ;;  %22112 = vmatmul.mubr.msk.bf16.vlgmr.msra.gmra.mxu1 %vm530_vm1, %v915_v37  ;;  %v1518_v29 = vshrl.u32 %v25776_v59, 16  ;;  %v1674_v37 = vshll.u32 %v25797_v9, 16 }
  0x4e   : > { %22116 = vmatpush3.bf16.msra.mxu0 %v25588_v0  ;;  %22128 = vmatpush3.bf16.msra.mxu1 %v25588_v0 }
  0x4f   : > { %22117 = vmatprep.subr.bf16.mxu0 %v25594_v1  ;;  %22129 = vmatprep.subr.bf16.mxu1 %v25594_v1  ;;  %v25864_v39 = vrot.slane %v1674_v37, 1  ;;  %v1292_v37 = vor.u32 %v25772_v57, %v1287_v54  ;;  %v1300_v54 = vor.u32 %v1298_v55, %v25780_v60  ;;  %v1446_v57 = vor.u32 %v25818_v24, %v1441_v13  ;;  %v25992_v13 = vld [vmem:[%s33160_s1 + $0x28] sm:$0xff]  }
  0x50   : > { %22123 = vmatprep.mubr.msk.bf16.mxu0 %vm530_vm1, %v989_v47  ;;  %22135 = vmatprep.mubr.msk.bf16.mxu1 %vm530_vm1, %v1066_v52  ;;  %v25850_v47 = vrot.slane %v1525_v23, 1  ;;  %v1529_v52 = vshrl.u32 %v25792_v7, 16  ;;  %v1143_v23 = vsel %vm490_vm0, %v1138_v45, %v25753_v48  ;;  %v1982_v7 = vshll.u32 %v25944_v53, 16  ;;  %v26037_v45 = vld [vmem:[%s33160_s1 + $0x30] sm:$0xff]  }
  0x51   : > { %v1297_v26 = vsel %vm490_vm0, %v1292_v37, %v25780_v60  ;;  %v1980_v60 = vshrl.u32 %v25944_v53, 16  ;;  %v1451_v44 = vsel %vm490_vm0, %v1446_v57, %v25820_v27  ;;  %v1677_v24 = vor.u32 %v25864_v39, %v1672_v20  ;;  %v25023_v37 = vld [vmem:[%s25616_s12 + $0x14] ss:$0 sps:$4 sm:$0x33]   ;;  %v25390_v57 = vld [vmem:[%s25616_s12 + $0x48] sm:$0xff]  }
  0x52   : > { %22118 = vmatpush3.bf16.msra.mxu0 %v25594_v1  ;;  %22130 = vmatpush3.bf16.msra.mxu1 %v25594_v1  ;;  %v1839_v20 = vor.u32 %v1837_v51, %v1835_v4 }
  0x53   : > { %22119 = vmatprep.subr.bf16.mxu0 %v25606_v2  ;;  %22131 = vmatprep.subr.bf16.mxu1 %v25606_v2 }
  0x56   : > { %22120 = vmatpush3.bf16.msra.mxu0 %v25606_v2  ;;  %22132 = vmatpush3.bf16.msra.mxu1 %v25606_v2 }
  0x57   : > { %22121 = vmatprep.subr.bf16.mxu0 %v25611_v3  ;;  %22133 = vmatprep.subr.bf16.mxu1 %v25611_v3 }
  0x5a   : > { %22122 = vmatpush3.bf16.msra.mxu0 %v25611_v3  ;;  %22134 = vmatpush3.bf16.msra.mxu1 %v25611_v3 }
  0x5b   : > { %22139 = vmatprep.subr.bf16.mxu0 %v25588_v0  ;;  %22151 = vmatprep.subr.bf16.mxu1 %v25588_v0 }
  0x5d   : > { %22124 = vmatmul.mubr.msk.bf16.vlgmr.msra.gmra.mxu0 %vm530_vm1, %v992_v34  ;;  %22136 = vmatmul.mubr.msk.bf16.vlgmr.msra.gmra.mxu1 %vm530_vm1, %v1069_v43  ;;  %v25896_v34 = vld [vmem:[%s25616_s12 + $0xd8] sm:$0xff]   ;;  %v1369_v43 = vor.u32 %v25782_v61, %v1364_v58  ;;  %v1377_v58 = vor.u32 %v1375_v63, %v25812_v15  ;;  %v1523_v61 = vor.u32 %v25848_v46, %v1518_v29  ;;  %v25984_v63 = vld [vmem:[%s25616_s12 + $0xe0] ss:$0 sps:$4 sm:$0x77]  }
  0x5e   : > { %22140 = vmatpush3.bf16.msra.mxu0 %v25588_v0  ;;  %22152 = vmatpush3.bf16.msra.mxu1 %v25588_v0  ;;  %v1903_v48 = vshrl.u32 %v25896_v34, 16  ;;  %v1905_v55 = vshll.u32 %v25896_v34, 16  ;;  %v1682_v29 = vsel %vm490_vm0, %v1677_v24, %v25866_v41  ;;  %v1685_v46 = vor.u32 %v1683_v49, %v25866_v41  ;;  %v26120_v49 = vld [vmem:[%s33160_s1 + $0x18] sm:$0xff]   ;;  %v25385_v34 = vld [vmem:[%s25616_s12 + $0xc] sm:$0xff]  }
  0x5f   : > { %22141 = vmatprep.subr.bf16.mxu0 %v25594_v1  ;;  %22153 = vmatprep.subr.bf16.mxu1 %v25594_v1  ;;  %v1374_v32 = vsel %vm490_vm0, %v1369_v43, %v25812_v15  ;;  %v1528_v59 = vsel %vm490_vm0, %v1523_v61, %v25850_v47  ;;  %v1600_v15 = vor.u32 %v25855_v18, %v1595_v11  ;;  %v1914_v17 = vshrl.u32 %v25984_v63, 16  ;;  %v25387_v43 = vld [vmem:[%s25616_s12 + $0x24] sm:$0xff]  }
  0x60   : > { %22147 = vmatprep.mubr.msk.bf16.mxu0 %vm530_vm1, %v1143_v23  ;;  %22159 = vmatprep.mubr.msk.bf16.mxu1 %vm530_vm1, %v1220_v30  ;;  %v1907_v10 = vrot.slane %v1905_v55, 1  ;;  %v1762_v18 = vor.u32 %v1760_v28, %v25914_v22  ;;  %v25384_v23 = vld [vmem:[%s25616_s12] sm:$0xff]   ;;  %v25025_v28 = vld [vmem:[%s25616_s12 + $0x2c] ss:$0 sps:$4 sm:$0x33]  }
  0x61   : > { %v26151_v30 = vld [vmem:[%s33160_s1] sm:$0xff]   ;;  %v25028_v55 = vld [vmem:[%s25616_s12 + $0x50] ss:$0 sps:$4 sm:$0x33]  }
  0x62   : > { %22142 = vmatpush3.bf16.msra.mxu0 %v25594_v1  ;;  %22154 = vmatpush3.bf16.msra.mxu1 %v25594_v1  ;;  %v1908_v25 = vor.u32 %v1907_v10, %v1903_v48  ;;  %v25024_v22 = vld [vmem:[%s25616_s12 + $0x20] ss:$0 sps:$4 sm:$0x33]  }
  0x63   : > { %22143 = vmatprep.subr.bf16.mxu0 %v25606_v2  ;;  %22155 = vmatprep.subr.bf16.mxu1 %v25606_v2  ;;  %v25389_v48 = vld [vmem:[%s25616_s12 + $0x3c] sm:$0xff]  }
  0x64   : > { %v25032_v10 = vld [vmem:[%s25616_s12 + $0x80] ss:$0 sps:$4 sm:$0x33]  }
  0x66   : > { %22144 = vmatpush3.bf16.msra.mxu0 %v25606_v2  ;;  %22156 = vmatpush3.bf16.msra.mxu1 %v25606_v2 }
  0x67   : > { %22145 = vmatprep.subr.bf16.mxu0 %v25611_v3  ;;  %22157 = vmatprep.subr.bf16.mxu1 %v25611_v3 }
  0x6a   : > { %22146 = vmatpush3.bf16.msra.mxu0 %v25611_v3  ;;  %22158 = vmatpush3.bf16.msra.mxu1 %v25611_v3 }
  0x6b   : > { %22163 = vmatprep.subr.bf16.mxu0 %v25588_v0  ;;  %22175 = vmatprep.subr.bf16.mxu1 %v25588_v0 }
  0x6d   : > { %22148 = vmatmul.mubr.msk.bf16.vlgmr.msra.gmra.mxu0 %vm530_vm1, %v1146_v36  ;;  %22160 = vmatmul.mubr.msk.bf16.vlgmr.msra.gmra.mxu1 %vm530_vm1, %v1223_v38  ;;  %v25022_v36 = vld [vmem:[%s25616_s12 + $0x8] ss:$0 sps:$4 sm:$0x33]   ;;  %v25386_v38 = vld [vmem:[%s25616_s12 + $0x18] sm:$0xff]  }
  0x6e   : > { %22164 = vmatpush3.bf16.msra.mxu0 %v25588_v0  ;;  %22176 = vmatpush3.bf16.msra.mxu1 %v25588_v0 }
  0x6f   : > { %22165 = vmatprep.subr.bf16.mxu0 %v25594_v1  ;;  %22177 = vmatprep.subr.bf16.mxu1 %v25594_v1 }
  0x70   : > { %22171 = vmatprep.mubr.msk.bf16.mxu0 %vm530_vm1, %v1297_v26  ;;  %22183 = vmatprep.mubr.msk.bf16.mxu1 %vm530_vm1, %v1374_v32  ;;  %v25026_v26 = vld [vmem:[%s25616_s12 + $0x38] ss:$0 sps:$4 sm:$0x33]   ;;  %v25027_v32 = vld [vmem:[%s25616_s12 + $0x44] ss:$0 sps:$4 sm:$0x33]  }
  0x72   : > { %22166 = vmatpush3.bf16.msra.mxu0 %v25594_v1  ;;  %22178 = vmatpush3.bf16.msra.mxu1 %v25594_v1 }
  0x73   : > { %22167 = vmatprep.subr.bf16.mxu0 %v25606_v2  ;;  %22179 = vmatprep.subr.bf16.mxu1 %v25606_v2 }
  0x76   : > { %22168 = vmatpush3.bf16.msra.mxu0 %v25606_v2  ;;  %22180 = vmatpush3.bf16.msra.mxu1 %v25606_v2 }
  0x77   : > { %22169 = vmatprep.subr.bf16.mxu0 %v25611_v3  ;;  %22181 = vmatprep.subr.bf16.mxu1 %v25611_v3 }
  0x7a   : > { %22170 = vmatpush3.bf16.msra.mxu0 %v25611_v3  ;;  %22182 = vmatpush3.bf16.msra.mxu1 %v25611_v3 }
  0x7b   : > { %22187 = vmatprep.subr.bf16.mxu0 %v25588_v0  ;;  %22199 = vmatprep.subr.bf16.mxu1 %v25588_v0 }
  0x7d   : > { %22172 = vmatmul.mubr.msk.bf16.vlgmr.msra.gmra.mxu0 %vm530_vm1, %v1300_v54  ;;  %22184 = vmatmul.mubr.msk.bf16.vlgmr.msra.gmra.mxu1 %vm530_vm1, %v1377_v58 }
  0x7e   : > { %22188 = vmatpush3.bf16.msra.mxu0 %v25588_v0  ;;  %22200 = vmatpush3.bf16.msra.mxu1 %v25588_v0  ;;  %v25987_v0 = vld [vmem:[%s25616_s12 + $0xec] ss:$0 sps:$4 sm:$0x77]  }
  0x7f   : > { %22189 = vmatprep.subr.bf16.mxu0 %v25594_v1  ;;  %22201 = vmatprep.subr.bf16.mxu1 %v25594_v1  ;;  %v1987_v9 = vshll.u32 %v25987_v0, 16 }
  0x80   : > { %22195 = vmatprep.mubr.msk.bf16.mxu0 %vm530_vm1, %v1451_v44  ;;  %22207 = vmatprep.mubr.msk.bf16.mxu1 %vm530_vm1, %v1528_v59 }
  0x81   : > { %v1989_v11 = vrot.slane %v1987_v9, 1 }
  0x82   : > { %22190 = vmatpush3.bf16.msra.mxu0 %v25594_v1  ;;  %22202 = vmatpush3.bf16.msra.mxu1 %v25594_v1  ;;  %v25999_v1 = vld [vmem:[%s33160_s1 + $0x20] sm:$0xff]  }
  0x83   : > { %22191 = vmatprep.subr.bf16.mxu0 %v25606_v2  ;;  %22203 = vmatprep.subr.bf16.mxu1 %v25606_v2 }
  0x86   : > { %22192 = vmatpush3.bf16.msra.mxu0 %v25606_v2  ;;  %22204 = vmatpush3.bf16.msra.mxu1 %v25992_v13  ;;  %v1454_v2 = vor.u32 %v1452_v16, %v25820_v27  ;;  %v1910_v16 = vshll.u32 %v25984_v63, 16  ;;  %v1605_v27 = vsel %vm490_vm0, %v1600_v15, %v25862_v35  ;;  %v1991_v35 = vshrl.u32 %v25987_v0, 16 }
  0x87   : > { %22193 = vmatprep.subr.bf16.mxu0 %v25611_v3  ;;  %22205 = vmatprep.subr.bf16.mxu1 %v25999_v1  ;;  %v1531_v3 = vor.u32 %v1529_v52, %v25850_v47  ;;  %v1831_v47 = vor.u32 %v25917_v42, %v1826_v8  ;;  %v1984_v52 = vrot.slane %v1982_v7, 1  ;;  %v25388_v42 = vld [vmem:[%s25616_s12 + $0x30] sm:$0xff]  }
  0x88   : > { %v1912_v14 = vrot.slane %v1910_v16, 1  ;;  %v1993_v8 = vor.u32 %v1991_v35, %v1989_v11 }
  0x89   : > { %v1836_v40 = vsel %vm490_vm0, %v1831_v47, %v1835_v4  ;;  %v1985_v33 = vor.u32 %v1984_v52, %v1980_v60  ;;  %v25029_v60 = vld [vmem:[%s25616_s12 + $0x5c] ss:$0 sps:$4 sm:$0x33]   ;;  %v25031_v4 = vld [vmem:[%s25616_s12 + $0x74] ss:$0 sps:$4 sm:$0x33]  }
  0x8a   : > { %22194 = vmatpush3.bf16.msra.mxu0 %v25999_v1  ;;  %22206 = vmatpush3.bf16.msra.mxu1 %v25999_v1  ;;  %v1913_v39 = vsel %vm490_vm0, %v1908_v25, %v1912_v14  ;;  %v1916_v62 = vor.u32 %v1914_v17, %v1912_v14  ;;  %v25033_v14 = vld [vmem:[%s25616_s12 + $0x8c] ss:$0 sps:$4 sm:$0x33]   ;;  %v25396_v25 = vld [vmem:[%s25616_s12 + $0x90] sm:$0xff]   ;;  %v25397_v17 = vld [vmem:[%s25616_s12 + $0x9c] sm:$0xff]  }
  0x8b   : > { %22211 = vmatprep.subr.bf16.mxu0 %v26019_v56  ;;  %22223 = vmatprep.subr.bf16.mxu1 %v26019_v56  ;;  %v1990_v41 = vsel %vm490_vm0, %v1985_v33, %v1989_v11 }
  0x8d   : > { %22196 = vmatmul.mubr.msk.bf16.vlgmr.msra.gmra.mxu0 %vm530_vm1, %v1454_v2  ;;  %22208 = vmatmul.mubr.msk.bf16.vlgmr.msra.gmra.mxu1 %vm530_vm1, %v1531_v3  ;;  %v25393_v3 = vld [vmem:[%s25616_s12 + $0x6c] sm:$0xff]  }
  0x8e   : > { %22212 = vmatpush3.bf16.msra.mxu0 %v26019_v56  ;;  %22224 = vmatpush3.bf16.msra.mxu1 %v26019_v56 }
  0x8f   : > { %22213 = vmatprep.subr.bf16.mxu0 %v26037_v45  ;;  %22225 = vmatprep.subr.bf16.mxu1 %v26037_v45 }
  0x90   : > { %22219 = vmatprep.mubr.msk.bf16.mxu0 %vm530_vm1, %v1605_v27  ;;  %22231 = vmatprep.mubr.msk.bf16.mxu1 %vm530_vm1, %v1682_v29 }
  0x92   : > { %22214 = vmatpush3.bf16.msra.mxu0 %v26037_v45  ;;  %22226 = vmatpush3.bf16.msra.mxu1 %v26037_v45 }
  0x93   : > { %22215 = vmatprep.subr.bf16.mxu0 %v25992_v13  ;;  %22227 = vmatprep.subr.bf16.mxu1 %v25992_v13 }
  0x96   : > { %22216 = vmatpush3.bf16.msra.mxu0 %v25992_v13  ;;  %22228 = vmatpush3.bf16.msra.mxu1 %v25992_v13 }
  0x97   : > { %22217 = vmatprep.subr.bf16.mxu0 %v25999_v1  ;;  %22229 = vmatprep.subr.bf16.mxu1 %v25999_v1 }
  0x9a   : > { %22218 = vmatpush3.bf16.msra.mxu0 %v25999_v1  ;;  %22230 = vmatpush3.bf16.msra.mxu1 %v25999_v1 }
  0x9b   : > { %22235 = vmatprep.subr.bf16.mxu0 %v26019_v56  ;;  %22247 = vmatprep.subr.bf16.mxu1 %v26019_v56 }
  0x9d   : > { %22220 = vmatmul.mubr.msk.bf16.vlgmr.msra.gmra.mxu0 %vm530_vm1, %v1608_v6  ;;  %22232 = vmatmul.mubr.msk.bf16.vlgmr.msra.gmra.mxu1 %vm530_vm1, %v1685_v46  ;;  %v25395_v46 = vld [vmem:[%s25616_s12 + $0x84] sm:$0xff]  }
  0x9e   : > { %22236 = vmatpush3.bf16.msra.mxu0 %v26019_v56  ;;  %22248 = vmatpush3.bf16.msra.mxu1 %v26019_v56 }
  0x9f   : > { %22237 = vmatprep.subr.bf16.mxu0 %v26037_v45  ;;  %22249 = vmatprep.subr.bf16.mxu1 %v26037_v45 }
  0xa0   : > { %22243 = vmatprep.mubr.msk.bf16.mxu0 %vm530_vm1, %v1759_v12  ;;  %22255 = vmatprep.mubr.msk.bf16.mxu1 %vm530_vm1, %v1836_v40 }
  0xa2   : > { %22238 = vmatpush3.bf16.msra.mxu0 %v26037_v45  ;;  %22250 = vmatpush3.bf16.msra.mxu1 %v26037_v45 }
  0xa3   : > { %22239 = vmatprep.subr.bf16.mxu0 %v25992_v13  ;;  %22251 = vmatprep.subr.bf16.mxu1 %v25992_v13 }
  0xa6   : > { %22240 = vmatpush3.bf16.msra.mxu0 %v25992_v13  ;;  %22252 = vmatpush3.bf16.msra.mxu1 %v25992_v13 }
  0xa7   : > { %22241 = vmatprep.subr.bf16.mxu0 %v25999_v1  ;;  %22253 = vmatprep.subr.bf16.mxu1 %v25999_v1 }
  0xaa   : > { %22242 = vmatpush3.bf16.msra.mxu0 %v25999_v1  ;;  %22254 = vmatpush3.bf16.msra.mxu1 %v25999_v1 }
  0xab   : > { %22259 = vmatprep.subr.bf16.mxu0 %v26019_v56  ;;  %22271 = vmatprep.subr.bf16.mxu1 %v26019_v56 }
  0xad   : > { %22244 = vmatmul.mubr.msk.bf16.vlgmr.msra.gmra.mxu0 %vm530_vm1, %v1762_v18  ;;  %22256 = vmatmul.mubr.msk.bf16.vlgmr.msra.gmra.mxu1 %vm530_vm1, %v1839_v20 }
  0xae   : > { %22260 = vmatpush3.bf16.msra.mxu0 %v26019_v56  ;;  %22272 = vmatpush3.bf16.msra.mxu1 %v26019_v56  ;;  %v25030_v56 = vld [vmem:[%s25616_s12 + $0x68] ss:$0 sps:$4 sm:$0x33]  }
  0xaf   : > { %22261 = vmatprep.subr.bf16.mxu0 %v26037_v45  ;;  %22273 = vmatprep.subr.bf16.mxu1 %v26037_v45 }
  0xb0   : > { %22267 = vmatprep.mubr.msk.bf16.mxu0 %vm530_vm1, %v1913_v39  ;;  %22279 = vmatprep.mubr.msk.bf16.mxu1 %vm530_vm1, %v1990_v41  ;;  %v25034_v39 = vld [vmem:[%s25616_s12 + $0x98] ss:$0 sps:$4 sm:$0x33]   ;;  %v25035_v41 = vld [vmem:[%s25616_s12 + $0xa4] ss:$0 sps:$4 sm:$0x33]  }
  0xb2   : > { %22262 = vmatpush3.bf16.msra.mxu0 %v26037_v45  ;;  %22274 = vmatpush3.bf16.msra.mxu1 %v26037_v45  ;;  %v25394_v45 = vld [vmem:[%s25616_s12 + $0x78] sm:$0xff]  }
  0xb3   : > { %22263 = vmatprep.subr.bf16.mxu0 %v25992_v13  ;;  %22275 = vmatprep.subr.bf16.mxu1 %v25992_v13 }
  0xb6   : > { %22264 = vmatpush3.bf16.msra.mxu0 %v25992_v13  ;;  %22276 = vmatpush3.bf16.msra.mxu1 %v25992_v13 }
  0xb7   : > { %22265 = vmatprep.subr.bf16.mxu0 %v25999_v1  ;;  %22277 = vmatprep.subr.bf16.mxu1 %v25999_v1 }
  0xba   : > { %22266 = vmatpush3.bf16.msra.mxu0 %v25999_v1  ;;  %22278 = vmatpush3.bf16.msra.mxu1 %v25999_v1  ;;  %v25392_v1 = vld [vmem:[%s25616_s12 + $0x60] sm:$0xff]  }
  0xbb   : > { %22283 = vmatprep.subr.bf16.mxu0 %v26120_v49  ;;  %22295 = vmatprep.subr.bf16.mxu1 %v26120_v49 }
  0xbd   : > { %22268 = vmatmul.mubr.msk.bf16.vlgmr.msra.gmra.mxu0 %vm530_vm1, %v1916_v62  ;;  %22280 = vmatmul.mubr.msk.bf16.vlgmr.msra.gmra.mxu1 %vm530_vm1, %v1993_v8 }
  0xbe   : > { %22284 = vmatpush3.bf16.msra.mxu0 %v26120_v49  ;;  %22296 = vmatpush3.bf16.msra.mxu1 %v26120_v49 }
  0xbf   : > { %22285 = vmatprep.subr.bf16.mxu0 %v26129_v5  ;;  %22297 = vmatprep.subr.bf16.mxu1 %v26129_v5 }
  0xc0   : > { %22291 = vmatprep.mubr.msk.bf16.mxu0 %vm530_vm1, %v25384_v23  ;;  %22303 = vmatprep.mubr.msk.bf16.mxu1 %vm530_vm1, %v25385_v34  ;;  %v25400_v34 = vld [vmem:[%s25616_s12 + $0xa8] sm:$0xff]  }
  0xc2   : > { %22286 = vmatpush3.bf16.msra.mxu0 %v26129_v5  ;;  %22298 = vmatpush3.bf16.msra.mxu1 %v26129_v5 }
  0xc3   : > { %22287 = vmatprep.subr.bf16.mxu0 %v26139_v19  ;;  %22299 = vmatprep.subr.bf16.mxu1 %v26139_v19 }
  0xc6   : > { %22288 = vmatpush3.bf16.msra.mxu0 %v26139_v19  ;;  %22300 = vmatpush3.bf16.msra.mxu1 %v26139_v19 }
  0xc7   : > { %22289 = vmatprep.subr.bf16.mxu0 %v26151_v30  ;;  %22301 = vmatprep.subr.bf16.mxu1 %v26151_v30 }
  0xca   : > { %22290 = vmatpush3.bf16.msra.mxu0 %v26151_v30  ;;  %22302 = vmatpush3.bf16.msra.mxu1 %v26151_v30 }
  0xcb   : > { %22307 = vmatprep.subr.bf16.mxu0 %v26120_v49  ;;  %22319 = vmatprep.subr.bf16.mxu1 %v26120_v49 }
  0xcd   : > { %22292 = vmatmul.mubr.msk.bf16.vlgmr.msra.gmra.mxu0 %vm530_vm1, %v25022_v36  ;;  %22304 = vmatmul.mubr.msk.bf16.vlgmr.msra.gmra.mxu1 %vm530_vm1, %v25023_v37 }
  0xce   : > { %22308 = vmatpush3.bf16.msra.mxu0 %v26120_v49  ;;  %22320 = vmatpush3.bf16.msra.mxu1 %v26120_v49 }
  0xcf   : > { %22309 = vmatprep.subr.bf16.mxu0 %v26129_v5  ;;  %22321 = vmatprep.subr.bf16.mxu1 %v26129_v5 }
  0xd0   : > { %22315 = vmatprep.mubr.msk.bf16.mxu0 %vm530_vm1, %v25386_v38  ;;  %22327 = vmatprep.mubr.msk.bf16.mxu1 %vm530_vm1, %v25387_v43  ;;  %v25401_v38 = vld [vmem:[%s25616_s12 + $0xb4] sm:$0xff]  }
  0xd2   : > { %22310 = vmatpush3.bf16.msra.mxu0 %v26129_v5  ;;  %22322 = vmatpush3.bf16.msra.mxu1 %v26129_v5 }
  0xd3   : > { %22311 = vmatprep.subr.bf16.mxu0 %v26139_v19  ;;  %22323 = vmatprep.subr.bf16.mxu1 %v26139_v19 }
  0xd6   : > { %22312 = vmatpush3.bf16.msra.mxu0 %v26139_v19  ;;  %22324 = vmatpush3.bf16.msra.mxu1 %v26139_v19 }
  0xd7   : > { %22313 = vmatprep.subr.bf16.mxu0 %v26151_v30  ;;  %22325 = vmatprep.subr.bf16.mxu1 %v26151_v30 }
  0xda   : > { %22314 = vmatpush3.bf16.msra.mxu0 %v26151_v30  ;;  %22326 = vmatpush3.bf16.msra.mxu1 %v26151_v30 }
  0xdb   : > { %22331 = vmatprep.subr.bf16.mxu0 %v26120_v49  ;;  %22343 = vmatprep.subr.bf16.mxu1 %v26120_v49 }
  0xdd   : > { %22316 = vmatmul.mubr.msk.bf16.vlgmr.msra.gmra.mxu0 %vm530_vm1, %v25024_v22  ;;  %22328 = vmatmul.mubr.msk.bf16.vlgmr.msra.gmra.mxu1 %vm530_vm1, %v25025_v28  ;;  %v26394_v22 = vld [vmem:[%s33160_s1 + $0x8] sm:$0xff]   ;;  %v26403_v28 = vld [vmem:[%s33160_s1] sm:$0xff]  }
  0xde   : > { %22332 = vmatpush3.bf16.msra.mxu0 %v26120_v49  ;;  %22344 = vmatpush3.bf16.msra.mxu1 %v26120_v49 }
  0xdf   : > { %22333 = vmatprep.subr.bf16.mxu0 %v26129_v5  ;;  %22345 = vmatprep.subr.bf16.mxu1 %v26129_v5 }
  0xe0   : > { %22339 = vmatprep.mubr.msk.bf16.mxu0 %vm530_vm1, %v25388_v42  ;;  %22351 = vmatprep.mubr.msk.bf16.mxu1 %vm530_vm1, %v25389_v48  ;;  %v25036_v42 = vld [vmem:[%s25616_s12 + $0xb0] ss:$0 sps:$4 sm:$0x33]   ;;  %v25037_v48 = vld [vmem:[%s25616_s12 + $0xbc] ss:$0 sps:$4 sm:$0x33]  }
  0xe2   : > { %22334 = vmatpush3.bf16.msra.mxu0 %v26129_v5  ;;  %22346 = vmatpush3.bf16.msra.mxu1 %v26129_v5 }
  0xe3   : > { %22335 = vmatprep.subr.bf16.mxu0 %v26139_v19  ;;  %22347 = vmatprep.subr.bf16.mxu1 %v26139_v19 }
  0xe6   : > { %22336 = vmatpush3.bf16.msra.mxu0 %v26139_v19  ;;  %22348 = vmatpush3.bf16.msra.mxu1 %v26139_v19 }
  0xe7   : > { %22337 = vmatprep.subr.bf16.mxu0 %v26151_v30  ;;  %22349 = vmatprep.subr.bf16.mxu1 %v26151_v30 }
  0xea   : > { %22338 = vmatpush3.bf16.msra.mxu0 %v26151_v30  ;;  %22350 = vmatpush3.bf16.msra.mxu1 %v26151_v30 }
  0xeb   : > { %22355 = vmatprep.subr.bf16.mxu0 %v26120_v49  ;;  %22367 = vmatprep.subr.bf16.mxu1 %v26120_v49 }
  0xed   : > { %v26217_v50 = vpop.f32.mrf.mxu0  ;;  %22340 = vmatmul.mubr.msk.bf16.vlgmr.msra.gmra.mxu0 %vm530_vm1, %v25026_v26  ;;  %22352 = vmatmul.mubr.msk.bf16.vlgmr.msra.gmra.mxu1 %vm530_vm1, %v25027_v32  ;;  %v26222_v53 = vpop.f32.mrf.mxu1 }
  0xee   : > { %22356 = vmatpush3.bf16.msra.mxu0 %v26120_v49  ;;  %22368 = vmatpush3.bf16.msra.mxu1 %v26120_v49 }
  0xef   : > { %v26225_v54 = vpop.f32.mrf.mxu0  ;;  %22357 = vmatprep.subr.bf16.mxu0 %v26129_v5  ;;  %22369 = vmatprep.subr.bf16.mxu1 %v26129_v5  ;;  %v26231_v58 = vpop.f32.mrf.mxu1 }
  0xf0   : > { %22363 = vmatprep.mubr.msk.bf16.mxu0 %vm530_vm1, %v25390_v57  ;;  %22375 = vmatprep.mubr.msk.bf16.mxu1 %vm530_vm1, %v25391_v31 }
  0xf1   : > { %v22054_v61 = vpop.f32.mrf.mxu0  ;;  %v22066_v51 = vpop.f32.mrf.mxu1 }
  0xf2   : > { %22358 = vmatpush3.bf16.msra.mxu0 %v26129_v5  ;;  %22370 = vmatpush3.bf16.msra.mxu1 %v26129_v5  ;;  %v25404_v51 = vld [vmem:[%s25616_s12 + $0xc0] sm:$0xff]  }
  0xf3   : > { %22359 = vmatprep.subr.bf16.mxu0 %v26139_v19  ;;  %22371 = vmatprep.subr.bf16.mxu1 %v26139_v19  ;;  %v26246_v44 = vpop.f32.mrf.mxu1  ;;  %v26248_v59 = vpop.f32.mrf.mxu0 }
  0xf4   : > { %33162 = vst [vmem:[#allocation5_spill] sm:$0xff] %v26246_v44  ;;  %33163 = vst [vmem:[#allocation6_spill] sm:$0xff] %v26248_v59  ;;  %v26684_v44 = vld [vmem:[%s25616_s12 + $0x78] sm:$0xff]  }
  0xf6   : > { %22360 = vmatpush3.bf16.msra.mxu0 %v26139_v19  ;;  %22372 = vmatpush3.bf16.msra.mxu1 %v26139_v19 }
  0xf7   : > { %22361 = vmatprep.subr.bf16.mxu0 %v26151_v30  ;;  %22373 = vmatprep.subr.bf16.mxu1 %v26151_v30 }
  0xfa   : > { %22362 = vmatpush3.bf16.msra.mxu0 %v26151_v30  ;;  %22374 = vmatpush3.bf16.msra.mxu1 %v26151_v30 }
  0xfb   : > { %22379 = vmatprep.subr.bf16.mxu0 %v26120_v49  ;;  %22391 = vmatprep.subr.bf16.mxu1 %v26120_v49 }
  0xfd   : > { %v26253_v63 = vpop.f32.mrf.mxu0  ;;  %22364 = vmatmul.mubr.msk.bf16.vlgmr.msra.gmra.mxu0 %vm530_vm1, %v25028_v55  ;;  %22376 = vmatmul.mubr.msk.bf16.vlgmr.msra.gmra.mxu1 %vm530_vm1, %v25029_v60  ;;  %v26258_v0 = vpop.f32.mrf.mxu1 }
  0xfe   : > { %22380 = vmatpush3.bf16.msra.mxu0 %v26120_v49  ;;  %22392 = vmatpush3.bf16.msra.mxu1 %v26120_v49 }
  0xff   : > { %v26261_v13 = vpop.f32.mrf.mxu0  ;;  %22381 = vmatprep.subr.bf16.mxu0 %v26129_v5  ;;  %22393 = vmatprep.subr.bf16.mxu1 %v26129_v5  ;;  %v26267_v2 = vpop.f32.mrf.mxu1 }
 0x100   : > { %22387 = vmatprep.mubr.msk.bf16.mxu0 %vm530_vm1, %v25392_v1  ;;  %22399 = vmatprep.mubr.msk.bf16.mxu1 %vm530_vm1, %v25393_v3  ;;  %v25405_v1 = vld [vmem:[%s25616_s12 + $0xcc] sm:$0xff]   ;;  %v25038_v3 = vld [vmem:[%s25616_s12 + $0xc8] ss:$0 sps:$4 sm:$0x33]  }
 0x101   : > { %v22078_v15 = vpop.f32.mrf.mxu0  ;;  %v22090_v24 = vpop.f32.mrf.mxu1 }
 0x102   : > { %22382 = vmatpush3.bf16.msra.mxu0 %v26129_v5  ;;  %22394 = vmatpush3.bf16.msra.mxu1 %v26129_v5  ;;  %v25039_v24 = vld [vmem:[%s25616_s12 + $0xd4] ss:$0 sps:$4 sm:$0x33]  }
 0x103   : > { %22383 = vmatprep.subr.bf16.mxu0 %v26139_v19  ;;  %22395 = vmatprep.subr.bf16.mxu1 %v26139_v19  ;;  %v26282_v16 = vpop.f32.mrf.mxu1  ;;  %v26284_v7 = vpop.f32.mrf.mxu0 }
 0x104   : > { %33164 = vst [vmem:[#allocation7_spill] sm:$0xff] %v26282_v16  ;;  %33165 = vst [vmem:[#allocation8_spill] sm:$0xff] %v26284_v7  ;;  %v26678_v16 = vld [vmem:[%s25616_s12 + $0x6c] sm:$0xff]  }
 0x106   : > { %22384 = vmatpush3.bf16.msra.mxu0 %v26139_v19  ;;  %22396 = vmatpush3.bf16.msra.mxu1 %v26139_v19 }
 0x107   : > { %22385 = vmatprep.subr.bf16.mxu0 %v26151_v30  ;;  %22397 = vmatprep.subr.bf16.mxu1 %v26151_v30 }
 0x10a   : > { %22386 = vmatpush3.bf16.msra.mxu0 %v26151_v30  ;;  %22398 = vmatpush3.bf16.msra.mxu1 %v26151_v30 }
 0x10b   : > { %22403 = vmatprep.subr.bf16.mxu0 %v26120_v49  ;;  %22415 = vmatprep.subr.bf16.mxu1 %v26120_v49 }
 0x10d   : > { %v26289_v9 = vpop.f32.mrf.mxu0  ;;  %22388 = vmatmul.mubr.msk.bf16.vlgmr.msra.gmra.mxu0 %vm530_vm1, %v25030_v56  ;;  %22400 = vmatmul.mubr.msk.bf16.vlgmr.msra.gmra.mxu1 %vm530_vm1, %v25031_v4  ;;  %v26294_v27 = vpop.f32.mrf.mxu1 }
 0x10e   : > { %22404 = vmatpush3.bf16.msra.mxu0 %v26120_v49  ;;  %22416 = vmatpush3.bf16.msra.mxu1 %v26120_v49 }
 0x10f   : > { %v26297_v29 = vpop.f32.mrf.mxu0  ;;  %22405 = vmatprep.subr.bf16.mxu0 %v26129_v5  ;;  %22417 = vmatprep.subr.bf16.mxu1 %v26129_v5  ;;  %v26303_v6 = vpop.f32.mrf.mxu1 }
 0x110   : > { %22411 = vmatprep.mubr.msk.bf16.mxu0 %vm530_vm1, %v25394_v45  ;;  %22423 = vmatprep.mubr.msk.bf16.mxu1 %vm530_vm1, %v25395_v46 }
 0x111   : > { %v22102_v21 = vpop.f32.mrf.mxu0  ;;  %v22114_v47 = vpop.f32.mrf.mxu1 }
 0x112   : > { %22406 = vmatpush3.bf16.msra.mxu0 %v26129_v5  ;;  %22418 = vmatpush3.bf16.msra.mxu1 %v26129_v5  ;;  %v25406_v47 = vld [vmem:[%s25616_s12 + $0xd8] sm:$0xff]  }
 0x113   : > { %22407 = vmatprep.subr.bf16.mxu0 %v26139_v19  ;;  %22419 = vmatprep.subr.bf16.mxu1 %v26139_v19  ;;  %v26318_v52 = vpop.f32.mrf.mxu1  ;;  %v26320_v11 = vpop.f32.mrf.mxu0 }
 0x114   : > { %33166 = vst [vmem:[#allocation9_spill] sm:$0xff] %v26318_v52  ;;  %33167 = vst [vmem:[#allocation10_spill] sm:$0xff] %v26320_v11 }
 0x116   : > { %22408 = vmatpush3.bf16.msra.mxu0 %v26139_v19  ;;  %22420 = vmatpush3.bf16.msra.mxu1 %v26139_v19 }
 0x117   : > { %22409 = vmatprep.subr.bf16.mxu0 %v26151_v30  ;;  %22421 = vmatprep.subr.bf16.mxu1 %v26151_v30 }
 0x11a   : > { %22410 = vmatpush3.bf16.msra.mxu0 %v26151_v30  ;;  %22422 = vmatpush3.bf16.msra.mxu1 %v26151_v30 }
 0x11b   : > { %22427 = vmatprep.subr.bf16.mxu0 %v26120_v49  ;;  %22439 = vmatprep.subr.bf16.mxu1 %v26120_v49 }
 0x11d   : > { %v26325_v12 = vpop.f32.mrf.mxu0  ;;  %22412 = vmatmul.mubr.msk.bf16.vlgmr.msra.gmra.mxu0 %vm530_vm1, %v25032_v10  ;;  %22424 = vmatmul.mubr.msk.bf16.vlgmr.msra.gmra.mxu1 %vm530_vm1, %v25033_v14  ;;  %v26330_v40 = vpop.f32.mrf.mxu1 }
 0x11e   : > { %22428 = vmatpush3.bf16.msra.mxu0 %v26120_v49  ;;  %22440 = vmatpush3.bf16.msra.mxu1 %v26120_v49 }
 0x11f   : > { %v26333_v18 = vpop.f32.mrf.mxu0  ;;  %22429 = vmatprep.subr.bf16.mxu0 %v26129_v5  ;;  %22441 = vmatprep.subr.bf16.mxu1 %v26129_v5  ;;  %v26339_v20 = vpop.f32.mrf.mxu1 }
 0x120   : > { %22435 = vmatprep.mubr.msk.bf16.mxu0 %vm530_vm1, %v25396_v25  ;;  %33168 = vst [vmem:[#allocation11_spill] sm:$0xff] %v26339_v20  ;;  %22447 = vmatprep.mubr.msk.bf16.mxu1 %vm530_vm1, %v25397_v17  ;;  %v25407_v25 = vld [vmem:[%s25616_s12 + $0xe4] sm:$0xff]   ;;  %v26481_v17 = vld [vmem:[%s33160_s1 + $0x58] sm:$0xff]  }
 0x121   : > { %v22126_v33 = vpop.f32.mrf.mxu0  ;;  %v22138_v35 = vpop.f32.mrf.mxu1 }
 0x122   : > { %22430 = vmatpush3.bf16.msra.mxu0 %v26129_v5  ;;  %22442 = vmatpush3.bf16.msra.mxu1 %v26129_v5  ;;  %v26362_v5 = vld [vmem:[%s33160_s1 + $0x18] sm:$0xff]   ;;  %v25040_v35 = vld [vmem:[%s25616_s12 + $0xe0] ss:$0 sps:$4 sm:$0x33]  }
 0x123   : > { %22431 = vmatprep.subr.bf16.mxu0 %v26139_v19  ;;  %22443 = vmatprep.subr.bf16.mxu1 %v26139_v19  ;;  %v26354_v49 = vpop.f32.mrf.mxu1  ;;  %v26356_v62 = vpop.f32.mrf.mxu0 }
 0x124   : > { %33169 = vst [vmem:[#allocation12_spill] sm:$0xff] %v26354_v49  ;;  %33170 = vst [vmem:[#allocation13_spill] sm:$0xff] %v26356_v62  ;;  %v26642_v49 = vld [vmem:[%s25616_s12 + $0x60] sm:$0xff]  }
 0x126   : > { %22432 = vmatpush3.bf16.msra.mxu0 %v26139_v19  ;;  %22444 = vmatpush3.bf16.msra.mxu1 %v26139_v19 }
 0x127   : > { %22433 = vmatprep.subr.bf16.mxu0 %v26151_v30  ;;  %22445 = vmatprep.subr.bf16.mxu1 %v26151_v30 }
 0x12a   : > { %22434 = vmatpush3.bf16.msra.mxu0 %v26151_v30  ;;  %22446 = vmatpush3.bf16.msra.mxu1 %v26151_v30  ;;  %v26379_v30 = vld [vmem:[%s33160_s1 + $0x10] sm:$0xff]  }
 0x12b   : > { %22451 = vmatprep.subr.bf16.mxu0 %v26362_v5  ;;  %22463 = vmatprep.subr.bf16.mxu1 %v26362_v5 }
 0x12d   : > { %v26366_v8 = vpop.f32.mrf.mxu0  ;;  %22436 = vmatmul.mubr.msk.bf16.vlgmr.msra.gmra.mxu0 %vm530_vm1, %v25034_v39  ;;  %22448 = vmatmul.mubr.msk.bf16.vlgmr.msra.gmra.mxu1 %vm530_vm1, %v25035_v41  ;;  %v26371_v19 = vpop.f32.mrf.mxu1  ;;  %v25041_v39 = vld [vmem:[%s25616_s12 + $0xec] ss:$0 sps:$4 sm:$0x33]  }
 0x12e   : > { %33171 = vst [vmem:[#allocation14_spill] sm:$0xff] %v26366_v8  ;;  %22452 = vmatpush3.bf16.msra.mxu0 %v26362_v5  ;;  %33172 = vst [vmem:[#allocation15_spill] sm:$0xff] %v26371_v19  ;;  %22464 = vmatpush3.bf16.msra.mxu1 %v26362_v5 }
 0x12f   : > { %v26374_v23 = vpop.f32.mrf.mxu0  ;;  %22453 = vmatprep.subr.bf16.mxu0 %v26379_v30  ;;  %22465 = vmatprep.subr.bf16.mxu1 %v26379_v30  ;;  %v26385_v36 = vpop.f32.mrf.mxu1 }
 0x130   : > { %33173 = vst [vmem:[#allocation16_spill] sm:$0xff] %v26374_v23  ;;  %22459 = vmatprep.mubr.msk.bf16.mxu0 %vm530_vm1, %v25400_v34  ;;  %33174 = vst [vmem:[#allocation17_spill] sm:$0xff] %v26385_v36  ;;  %22471 = vmatprep.mubr.msk.bf16.mxu1 %vm530_vm1, %v25401_v38  ;;  %v26500_v34 = vld [vmem:[%s25616_s12 + $0xc] sm:$0xff]   ;;  %v26506_v38 = vld [vmem:[%s25616_s12 + $0x18] sm:$0xff]  }
 0x131   : > { %v22150_v37 = vpop.f32.mrf.mxu0  ;;  %v22162_v43 = vpop.f32.mrf.mxu1 }
 0x132   : > { %22454 = vmatpush3.bf16.msra.mxu0 %v26379_v30  ;;  %22466 = vmatpush3.bf16.msra.mxu1 %v26379_v30 }
 0x133   : > { %22455 = vmatprep.subr.bf16.mxu0 %v26394_v22  ;;  %22467 = vmatprep.subr.bf16.mxu1 %v26394_v22  ;;  %v26410_v26 = vpop.f32.mrf.mxu1  ;;  %v26412_v32 = vpop.f32.mrf.mxu0 }
 0x134   : > { %33175 = vst [vmem:[#allocation18_spill] sm:$0xff] %v26410_v26  ;;  %33176 = vst [vmem:[#allocation19_spill] sm:$0xff] %v26412_v32  ;;  %v26636_v26 = vld [vmem:[%s25616_s12 + $0x54] sm:$0xff]  }
 0x136   : > { %22456 = vmatpush3.bf16.msra.mxu0 %v26394_v22  ;;  %22468 = vmatpush3.bf16.msra.mxu1 %v26394_v22 }
 0x137   : > { %22457 = vmatprep.subr.bf16.mxu0 %v26403_v28  ;;  %22469 = vmatprep.subr.bf16.mxu1 %v26403_v28 }
 0x13a   : > { %22458 = vmatpush3.bf16.msra.mxu0 %v26403_v28  ;;  %22470 = vmatpush3.bf16.msra.mxu1 %v26403_v28 }
 0x13b   : > { %22475 = vmatprep.subr.bf16.mxu0 %v26362_v5  ;;  %22487 = vmatprep.subr.bf16.mxu1 %v26362_v5 }
 0x13d   : > { %v26417_v57 = vpop.f32.mrf.mxu0  ;;  %22460 = vmatmul.mubr.msk.bf16.vlgmr.msra.gmra.mxu0 %vm530_vm1, %v25036_v42  ;;  %22472 = vmatmul.mubr.msk.bf16.vlgmr.msra.gmra.mxu1 %vm530_vm1, %v25037_v48  ;;  %v26422_v61 = vpop.f32.mrf.mxu1 }
 0x13e   : > { %33177 = vst [vmem:[#allocation20_spill] sm:$0xff] %v26417_v57  ;;  %22476 = vmatpush3.bf16.msra.mxu0 %v26362_v5  ;;  %33178 = vst [vmem:[#allocation21_spill] sm:$0xff] %v26422_v61  ;;  %22488 = vmatpush3.bf16.msra.mxu1 %v26362_v5 }
 0x13f   : > { %v26425_v31 = vpop.f32.mrf.mxu0  ;;  %22477 = vmatprep.subr.bf16.mxu0 %v26379_v30  ;;  %22489 = vmatprep.subr.bf16.mxu1 %v26379_v30  ;;  %v26431_v55 = vpop.f32.mrf.mxu1 }
 0x140   : > { %33179 = vst [vmem:[#allocation22_spill] sm:$0xff] %v26425_v31  ;;  %22483 = vmatprep.mubr.msk.bf16.mxu0 %vm530_vm1, %v25404_v51  ;;  %33180 = vst [vmem:[#allocation23_spill] sm:$0xff] %v26431_v55  ;;  %22495 = vmatprep.mubr.msk.bf16.mxu1 %vm530_vm1, %v25405_v1  ;;  %v25048_v1 = vld [vmem:[%s25616_s12 + $0x14] ss:$0 sps:$4 sm:$0x33]   ;;  %v26810_v55 = vld [vmem:[%s25616_s12 + $0xc0] sm:$0xff]  }
 0x141   : > { %v22174_v60 = vpop.f32.mrf.mxu0  ;;  %v22186_v15 = vpop.f32.mrf.mxu1  ;;  %33219 = vst [vmem:[#allocation62_spill] sm:$0xff] %v26810_v55 }
 0x142   : > { %22478 = vmatpush3.bf16.msra.mxu0 %v26379_v30  ;;  %22490 = vmatpush3.bf16.msra.mxu1 %v26379_v30  ;;  %v26534_v60 = vld [vmem:[%s33160_s1 + $0x40] sm:$0xff]  }
 0x143   : > { %22479 = vmatprep.subr.bf16.mxu0 %v26394_v22  ;;  %22491 = vmatprep.subr.bf16.mxu1 %v26394_v22  ;;  %v26446_v56 = vpop.f32.mrf.mxu1  ;;  %v26448_v4 = vpop.f32.mrf.mxu0  ;;  %v25049_v15 = vld [vmem:[%s25616_s12 + $0x20] ss:$0 sps:$4 sm:$0x33]  }
 0x144   : > { %33181 = vst [vmem:[#allocation24_spill] sm:$0xff] %v26446_v56  ;;  %33182 = vst [vmem:[#allocation25_spill] sm:$0xff] %v26448_v4  ;;  %v25057_v56 = vld [vmem:[%s25616_s12 + $0x50] ss:$0 sps:$4 sm:$0x33]  }
 0x146   : > { %22480 = vmatpush3.bf16.msra.mxu0 %v26394_v22  ;;  %22492 = vmatpush3.bf16.msra.mxu1 %v26394_v22 }
 0x147   : > { %22481 = vmatprep.subr.bf16.mxu0 %v26403_v28  ;;  %22493 = vmatprep.subr.bf16.mxu1 %v26403_v28 }
 0x14a   : > { %22482 = vmatpush3.bf16.msra.mxu0 %v26403_v28  ;;  %22494 = vmatpush3.bf16.msra.mxu1 %v26403_v28 }
 0x14b   : > { %22499 = vmatprep.subr.bf16.mxu0 %v26362_v5  ;;  %22511 = vmatprep.subr.bf16.mxu1 %v26362_v5 }
 0x14d   : > { %v26453_v45 = vpop.f32.mrf.mxu0  ;;  %22484 = vmatmul.mubr.msk.bf16.vlgmr.msra.gmra.mxu0 %vm530_vm1, %v25038_v3  ;;  %22496 = vmatmul.mubr.msk.bf16.vlgmr.msra.gmra.mxu1 %vm530_vm1, %v25039_v24  ;;  %v26458_v21 = vpop.f32.mrf.mxu1 }
 0x14e   : > { %33183 = vst [vmem:[#allocation26_spill] sm:$0xff] %v26453_v45  ;;  %22500 = vmatpush3.bf16.msra.mxu0 %v26362_v5  ;;  %33184 = vst [vmem:[#allocation27_spill] sm:$0xff] %v26458_v21  ;;  %22512 = vmatpush3.bf16.msra.mxu1 %v26362_v5  ;;  %v26804_v21 = vld [vmem:[%s25616_s12 + $0xb4] sm:$0xff]  }
 0x14f   : > { %v26461_v46 = vpop.f32.mrf.mxu0  ;;  %22501 = vmatprep.subr.bf16.mxu0 %v26379_v30  ;;  %22513 = vmatprep.subr.bf16.mxu1 %v26379_v30  ;;  %v26467_v10 = vpop.f32.mrf.mxu1  ;;  %33217 = vst [vmem:[#allocation60_spill] sm:$0xff] %v26804_v21 }
 0x150   : > { %33185 = vst [vmem:[#allocation28_spill] sm:$0xff] %v26461_v46  ;;  %22507 = vmatprep.mubr.msk.bf16.mxu0 %vm530_vm1, %v25406_v47  ;;  %33186 = vst [vmem:[#allocation29_spill] sm:$0xff] %v26467_v10  ;;  %22519 = vmatprep.mubr.msk.bf16.mxu1 %vm530_vm1, %v25407_v25  ;;  %v26552_v47 = vld [vmem:[%s25616_s12 + $0x24] sm:$0xff]   ;;  %v26558_v25 = vld [vmem:[%s25616_s12 + $0x30] sm:$0xff]  }
 0x151   : > { %v22198_v14 = vpop.f32.mrf.mxu0  ;;  %v22210_v33 = vpop.f32.mrf.mxu1 }
 0x152   : > { %22502 = vmatpush3.bf16.msra.mxu0 %v26379_v30  ;;  %22514 = vmatpush3.bf16.msra.mxu1 %v26379_v30  ;;  %v26496_v30 = vld [vmem:[%s33160_s1 + $0x50] sm:$0xff]  }
 0x153   : > { %22503 = vmatprep.subr.bf16.mxu0 %v26394_v22  ;;  %22515 = vmatprep.subr.bf16.mxu1 %v26394_v22  ;;  %v26487_v41 = vpop.f32.mrf.mxu1  ;;  %v26489_v5 = vpop.f32.mrf.mxu0 }
 0x154   : > { %33187 = vst [vmem:[#allocation30_spill] sm:$0xff] %v26487_v41  ;;  %33188 = vst [vmem:[#allocation31_spill] sm:$0xff] %v26489_v5  ;;  %v26600_v41 = vld [vmem:[%s25616_s12 + $0x48] sm:$0xff]  }
 0x156   : > { %22504 = vmatpush3.bf16.msra.mxu0 %v26394_v22  ;;  %22516 = vmatpush3.bf16.msra.mxu1 %v26394_v22 }
 0x157   : > { %22505 = vmatprep.subr.bf16.mxu0 %v26403_v28  ;;  %22517 = vmatprep.subr.bf16.mxu1 %v26403_v28 }
 0x15a   : > { %22506 = vmatpush3.bf16.msra.mxu0 %v26403_v28  ;;  %22518 = vmatpush3.bf16.msra.mxu1 %v26403_v28  ;;  %v26519_v28 = vld [vmem:[%s33160_s1 + $0x48] sm:$0xff]  }
 0x15b   : > { %22523 = vmatprep.subr.bf16.mxu0 %v26481_v17  ;;  %22535 = vmatprep.subr.bf16.mxu1 %v26481_v17 }
 0x15d   : > { %v26502_v37 = vpop.f32.mrf.mxu0  ;;  %22508 = vmatmul.mubr.msk.bf16.vlgmr.msra.gmra.mxu0 %vm530_vm1, %v25040_v35  ;;  %22520 = vmatmul.mubr.msk.bf16.vlgmr.msra.gmra.mxu1 %vm530_vm1, %v25041_v39  ;;  %v26510_v43 = vpop.f32.mrf.mxu1 }
 0x15e   : > { %33189 = vst [vmem:[#allocation32_spill] sm:$0xff] %v26502_v37  ;;  %22524 = vmatpush3.bf16.msra.mxu0 %v26481_v17  ;;  %33190 = vst [vmem:[#allocation33_spill] sm:$0xff] %v26510_v43  ;;  %22536 = vmatpush3.bf16.msra.mxu1 %v26481_v17  ;;  %v26768_v43 = vld [vmem:[%s25616_s12 + $0xa8] sm:$0xff]  }
 0x15f   : > { %v26513_v22 = vpop.f32.mrf.mxu0  ;;  %22525 = vmatprep.subr.bf16.mxu0 %v26496_v30  ;;  %22537 = vmatprep.subr.bf16.mxu1 %v26496_v30  ;;  %v26524_v42 = vpop.f32.mrf.mxu1 }
 0x160   : > { %33191 = vst [vmem:[#allocation34_spill] sm:$0xff] %v26513_v22  ;;  %22531 = vmatprep.mubr.msk.bf16.mxu0 %vm530_vm1, %v26500_v34  ;;  %33192 = vst [vmem:[#allocation35_spill] sm:$0xff] %v26524_v42  ;;  %22543 = vmatprep.mubr.msk.bf16.mxu1 %vm530_vm1, %v26506_v38  ;;  %v26762_v42 = vld [vmem:[%s25616_s12 + $0x9c] sm:$0xff]  }
 0x161   : > { %v22222_v48 = vpop.f32.mrf.mxu0  ;;  %v22234_v51 = vpop.f32.mrf.mxu1 }
 0x162   : > { %22526 = vmatpush3.bf16.msra.mxu0 %v26496_v30  ;;  %22538 = vmatpush3.bf16.msra.mxu1 %v26496_v30 }
 0x163   : > { %22527 = vmatprep.subr.bf16.mxu0 %v26519_v28  ;;  %22539 = vmatprep.subr.bf16.mxu1 %v26519_v28  ;;  %v26544_v3 = vpop.f32.mrf.mxu1  ;;  %v26546_v24 = vpop.f32.mrf.mxu0 }
 0x164   : > { %33193 = vst [vmem:[#allocation36_spill] sm:$0xff] %v26544_v3  ;;  %33194 = vst [vmem:[#allocation37_spill] sm:$0xff] %v26546_v24  ;;  %v26594_v3 = vld [vmem:[%s25616_s12 + $0x3c] sm:$0xff]  }
 0x166   : > { %22528 = vmatpush3.bf16.msra.mxu0 %v26519_v28  ;;  %22540 = vmatpush3.bf16.msra.mxu1 %v26519_v28 }
 0x167   : > { %22529 = vmatprep.subr.bf16.mxu0 %v26534_v60  ;;  %22541 = vmatprep.subr.bf16.mxu1 %v26534_v60 }
 0x16a   : > { %22530 = vmatpush3.bf16.msra.mxu0 %v26534_v60  ;;  %22542 = vmatpush3.bf16.msra.mxu1 %v26534_v60 }
 0x16b   : > { %22547 = vmatprep.subr.bf16.mxu0 %v26481_v17  ;;  %22559 = vmatprep.subr.bf16.mxu1 %v26481_v17 }
 0x16d   : > { %v26554_v14 = vpop.f32.mrf.mxu0  ;;  %22532 = vmatmul.mubr.msk.bf16.vlgmr.msra.gmra.mxu0 %vm530_vm1, %v25048_v1  ;;  %22544 = vmatmul.mubr.msk.bf16.vlgmr.msra.gmra.mxu1 %vm530_vm1, %v25049_v15  ;;  %v26562_v33 = vpop.f32.mrf.mxu1  ;;  %v25052_v1 = vld [vmem:[%s25616_s12 + $0x2c] ss:$0 sps:$4 sm:$0x33]   ;;  %v25053_v15 = vld [vmem:[%s25616_s12 + $0x38] ss:$0 sps:$4 sm:$0x33]  }
 0x16e   : > { %33195 = vst [vmem:[#allocation38_spill] sm:$0xff] %v26554_v14  ;;  %22548 = vmatpush3.bf16.msra.mxu0 %v26481_v17  ;;  %33196 = vst [vmem:[#allocation39_spill] sm:$0xff] %v26562_v33  ;;  %22560 = vmatpush3.bf16.msra.mxu1 %v26481_v17 }
 0x16f   : > { %v26565_v35 = vpop.f32.mrf.mxu0  ;;  %22549 = vmatprep.subr.bf16.mxu0 %v26496_v30  ;;  %22561 = vmatprep.subr.bf16.mxu1 %v26496_v30  ;;  %v26571_v39 = vpop.f32.mrf.mxu1 }
 0x170   : > { %33197 = vst [vmem:[#allocation40_spill] sm:$0xff] %v26565_v35  ;;  %22555 = vmatprep.mubr.msk.bf16.mxu0 %vm530_vm1, %v26552_v47  ;;  %33198 = vst [vmem:[#allocation41_spill] sm:$0xff] %v26571_v39  ;;  %22567 = vmatprep.mubr.msk.bf16.mxu1 %vm530_vm1, %v26558_v25  ;;  %v26726_v39 = vld [vmem:[%s25616_s12 + $0x90] sm:$0xff]  }
 0x171   : > { %v22246_v48 = vpop.f32.mrf.mxu0  ;;  %v22258_v51 = vpop.f32.mrf.mxu1 }
 0x172   : > { %22550 = vmatpush3.bf16.msra.mxu0 %v26496_v30  ;;  %22562 = vmatpush3.bf16.msra.mxu1 %v26496_v30 }
 0x173   : > { %22551 = vmatprep.subr.bf16.mxu0 %v26519_v28  ;;  %22563 = vmatprep.subr.bf16.mxu1 %v26519_v28  ;;  %v26586_v48 = vpop.f32.mrf.mxu1  ;;  %v26588_v51 = vpop.f32.mrf.mxu0 }
 0x174   : > { %33199 = vst [vmem:[#allocation42_spill] sm:$0xff] %v26586_v48  ;;  %33200 = vst [vmem:[#allocation43_spill] sm:$0xff] %v26588_v51 }
 0x176   : > { %22552 = vmatpush3.bf16.msra.mxu0 %v26519_v28  ;;  %22564 = vmatpush3.bf16.msra.mxu1 %v26519_v28 }
 0x177   : > { %22553 = vmatprep.subr.bf16.mxu0 %v26534_v60  ;;  %22565 = vmatprep.subr.bf16.mxu1 %v26534_v60 }
 0x17a   : > { %22554 = vmatpush3.bf16.msra.mxu0 %v26534_v60  ;;  %22566 = vmatpush3.bf16.msra.mxu1 %v26534_v60 }
 0x17b   : > { %22571 = vmatprep.subr.bf16.mxu0 %v26481_v17  ;;  %22583 = vmatprep.subr.bf16.mxu1 %v26481_v17 }
 0x17d   : > { %v26596_v24 = vpop.f32.mrf.mxu0  ;;  %22556 = vmatmul.mubr.msk.bf16.vlgmr.msra.gmra.mxu0 %vm530_vm1, %v25052_v1  ;;  %22568 = vmatmul.mubr.msk.bf16.vlgmr.msra.gmra.mxu1 %vm530_vm1, %v25053_v15  ;;  %v26604_v48 = vpop.f32.mrf.mxu1 }
 0x17e   : > { %33201 = vst [vmem:[#allocation44_spill] sm:$0xff] %v26596_v24  ;;  %22572 = vmatpush3.bf16.msra.mxu0 %v26481_v17  ;;  %33202 = vst [vmem:[#allocation45_spill] sm:$0xff] %v26604_v48  ;;  %22584 = vmatpush3.bf16.msra.mxu1 %v26481_v17  ;;  %v26720_v48 = vld [vmem:[%s25616_s12 + $0x84] sm:$0xff]  }
 0x17f   : > { %v26607_v51 = vpop.f32.mrf.mxu0  ;;  %22573 = vmatprep.subr.bf16.mxu0 %v26496_v30  ;;  %22585 = vmatprep.subr.bf16.mxu1 %v26496_v30  ;;  %v26611_v5 = vpop.f32.mrf.mxu1 }
 0x180   : > { %33203 = vst [vmem:[#allocation46_spill] sm:$0xff] %v26607_v51  ;;  %33204 = vst [vmem:[#allocation47_spill] sm:$0xff] %v26611_v5  ;;  %22579 = vmatprep.mubr.msk.bf16.mxu0 %vm530_vm1, %v26594_v3  ;;  %22591 = vmatprep.mubr.msk.bf16.mxu1 %vm530_vm1, %v26600_v41 }
 0x181   : > { %v22270_v1 = vpop.f32.mrf.mxu0  ;;  %v22282_v15 = vpop.f32.mrf.mxu1 }
 0x182   : > { %22574 = vmatpush3.bf16.msra.mxu0 %v26496_v30  ;;  %22586 = vmatpush3.bf16.msra.mxu1 %v26496_v30  ;;  %v25056_v1 = vld [vmem:[%s25616_s12 + $0x44] ss:$0 sps:$4 sm:$0x33]  }
 0x183   : > { %22575 = vmatprep.subr.bf16.mxu0 %v26519_v28  ;;  %22587 = vmatprep.subr.bf16.mxu1 %v26519_v28  ;;  %v26627_v15 = vpop.f32.mrf.mxu1  ;;  %v26630_v4 = vpop.f32.mrf.mxu0 }
 0x184   : > { %33205 = vst [vmem:[#allocation48_spill] sm:$0xff] %v26627_v15  ;;  %33206 = vst [vmem:[#allocation49_spill] sm:$0xff] %v26630_v4 }
 0x186   : > { %22576 = vmatpush3.bf16.msra.mxu0 %v26519_v28  ;;  %22588 = vmatpush3.bf16.msra.mxu1 %v26519_v28 }
 0x187   : > { %22577 = vmatprep.subr.bf16.mxu0 %v26534_v60  ;;  %22589 = vmatprep.subr.bf16.mxu1 %v26534_v60 }
 0x18a   : > { %22578 = vmatpush3.bf16.msra.mxu0 %v26534_v60  ;;  %22590 = vmatpush3.bf16.msra.mxu1 %v26534_v60 }
 0x18b   : > { %22595 = vmatprep.subr.bf16.mxu0 %v26481_v17  ;;  %22607 = vmatprep.subr.bf16.mxu1 %v26481_v17 }
 0x18d   : > { %v26638_v32 = vpop.f32.mrf.mxu0  ;;  %22580 = vmatmul.mubr.msk.bf16.vlgmr.msra.gmra.mxu0 %vm530_vm1, %v25056_v1  ;;  %v26644_v62 = vpop.f32.mrf.mxu1  ;;  %22592 = vmatmul.mubr.msk.bf16.vlgmr.msra.gmra.mxu1 %vm530_vm1, %v25057_v56 }
 0x18e   : > { %22596 = vmatpush3.bf16.msra.mxu0 %v26481_v17  ;;  %22608 = vmatpush3.bf16.msra.mxu1 %v26481_v17 }
 0x18f   : > { %v26649_v15 = vpop.f32.mrf.mxu0  ;;  %22597 = vmatprep.subr.bf16.mxu0 %v26496_v30  ;;  %v26652_v4 = vpop.f32.mrf.mxu1  ;;  %22609 = vmatprep.subr.bf16.mxu1 %v26496_v30 }
 0x190   : > { %22603 = vmatprep.mubr.msk.bf16.mxu0 %vm530_vm1, %v26636_v26  ;;  %22615 = vmatprep.mubr.msk.bf16.mxu1 %vm530_vm1, %v26642_v49 }
 0x191   : > { %v22294_v1 = vpop.f32.mrf.mxu0  ;;  %v22306_v56 = vpop.f32.mrf.mxu1 }
 0x192   : > { %22598 = vmatpush3.bf16.msra.mxu0 %v26496_v30  ;;  %22610 = vmatpush3.bf16.msra.mxu1 %v26496_v30  ;;  %v25060_v1 = vld [vmem:[%s25616_s12 + $0x5c] ss:$0 sps:$4 sm:$0x33]   ;;  %v25061_v56 = vld [vmem:[%s25616_s12 + $0x68] ss:$0 sps:$4 sm:$0x33]  }
 0x193   : > { %22599 = vmatprep.subr.bf16.mxu0 %v26519_v28  ;;  %22611 = vmatprep.subr.bf16.mxu1 %v26519_v28  ;;  %v26670_v52 = vpop.f32.mrf.mxu0  ;;  %v26674_v11 = vpop.f32.mrf.mxu1 }
 0x194   : > { %33207 = vst [vmem:[#allocation50_spill] sm:$0xff] %v26670_v52  ;;  %33208 = vst [vmem:[#allocation51_spill] sm:$0xff] %v26674_v11 }
 0x196   : > { %22600 = vmatpush3.bf16.msra.mxu0 %v26519_v28  ;;  %22612 = vmatpush3.bf16.msra.mxu1 %v26519_v28 }
 0x197   : > { %22601 = vmatprep.subr.bf16.mxu0 %v26534_v60  ;;  %22613 = vmatprep.subr.bf16.mxu1 %v26534_v60 }
 0x19a   : > { %22602 = vmatpush3.bf16.msra.mxu0 %v26534_v60  ;;  %22614 = vmatpush3.bf16.msra.mxu1 %v26534_v60 }
 0x19b   : > { %22619 = vmatprep.subr.bf16.mxu0 %v26481_v17  ;;  %22631 = vmatprep.subr.bf16.mxu1 %v26481_v17 }
 0x19d   : > { %v26680_v7 = vpop.f32.mrf.mxu0  ;;  %22604 = vmatmul.mubr.msk.bf16.vlgmr.msra.gmra.mxu0 %vm530_vm1, %v25060_v1  ;;  %v26686_v59 = vpop.f32.mrf.mxu1  ;;  %22616 = vmatmul.mubr.msk.bf16.vlgmr.msra.gmra.mxu1 %vm530_vm1, %v25061_v56 }
 0x19e   : > { %22620 = vmatpush3.bf16.msra.mxu0 %v26481_v17  ;;  %22632 = vmatpush3.bf16.msra.mxu1 %v26481_v17 }
 0x19f   : > { %v26691_v52 = vpop.f32.mrf.mxu0  ;;  %22621 = vmatprep.subr.bf16.mxu0 %v26496_v30  ;;  %v26694_v11 = vpop.f32.mrf.mxu1  ;;  %22633 = vmatprep.subr.bf16.mxu1 %v26496_v30 }
 0x1a0   : > { %22627 = vmatprep.mubr.msk.bf16.mxu0 %vm530_vm1, %v26678_v16  ;;  %22639 = vmatprep.mubr.msk.bf16.mxu1 %vm530_vm1, %v26684_v44 }
 0x1a1   : > { %v22318_v1 = vpop.f32.mrf.mxu0  ;;  %v22330_v56 = vpop.f32.mrf.mxu1 }
 0x1a2   : > { %22622 = vmatpush3.bf16.msra.mxu0 %v26496_v30  ;;  %22634 = vmatpush3.bf16.msra.mxu1 %v26496_v30  ;;  %v25064_v1 = vld [vmem:[%s25616_s12 + $0x74] ss:$0 sps:$4 sm:$0x33]   ;;  %v25065_v56 = vld [vmem:[%s25616_s12 + $0x80] ss:$0 sps:$4 sm:$0x33]  }
 0x1a3   : > { %22623 = vmatprep.subr.bf16.mxu0 %v26519_v28  ;;  %22635 = vmatprep.subr.bf16.mxu1 %v26519_v28  ;;  %v26712_v5 = vpop.f32.mrf.mxu0  ;;  %v26716_v51 = vpop.f32.mrf.mxu1 }
 0x1a4   : > { %33209 = vst [vmem:[#allocation52_spill] sm:$0xff] %v26712_v5  ;;  %33210 = vst [vmem:[#allocation53_spill] sm:$0xff] %v26716_v51 }
 0x1a6   : > { %22624 = vmatpush3.bf16.msra.mxu0 %v26519_v28  ;;  %22636 = vmatpush3.bf16.msra.mxu1 %v26519_v28 }
 0x1a7   : > { %22625 = vmatprep.subr.bf16.mxu0 %v26534_v60  ;;  %22637 = vmatprep.subr.bf16.mxu1 %v26534_v60 }
 0x1aa   : > { %22626 = vmatpush3.bf16.msra.mxu0 %v26534_v60  ;;  %22638 = vmatpush3.bf16.msra.mxu1 %v26534_v60 }
 0x1ab   : > { %22643 = vmatprep.subr.bf16.mxu0 %v26481_v17  ;;  %22655 = vmatprep.subr.bf16.mxu1 %v26481_v17 }
 0x1ad   : > { %v26722_v24 = vpop.f32.mrf.mxu0  ;;  %22628 = vmatmul.mubr.msk.bf16.vlgmr.msra.gmra.mxu0 %vm530_vm1, %v25064_v1  ;;  %v26728_v35 = vpop.f32.mrf.mxu1  ;;  %22640 = vmatmul.mubr.msk.bf16.vlgmr.msra.gmra.mxu1 %vm530_vm1, %v25065_v56 }
 0x1ae   : > { %22644 = vmatpush3.bf16.msra.mxu0 %v26481_v17  ;;  %22656 = vmatpush3.bf16.msra.mxu1 %v26481_v17 }
 0x1af   : > { %v26733_v5 = vpop.f32.mrf.mxu0  ;;  %22645 = vmatprep.subr.bf16.mxu0 %v26496_v30  ;;  %v26736_v51 = vpop.f32.mrf.mxu1  ;;  %22657 = vmatprep.subr.bf16.mxu1 %v26496_v30 }
 0x1b0   : > { %22651 = vmatprep.mubr.msk.bf16.mxu0 %vm530_vm1, %v26720_v48  ;;  %22663 = vmatprep.mubr.msk.bf16.mxu1 %vm530_vm1, %v26726_v39 }
 0x1b1   : > { %v22342_v1 = vpop.f32.mrf.mxu0  ;;  %v22354_v56 = vpop.f32.mrf.mxu1 }
 0x1b2   : > { %22646 = vmatpush3.bf16.msra.mxu0 %v26496_v30  ;;  %22658 = vmatpush3.bf16.msra.mxu1 %v26496_v30  ;;  %v25068_v1 = vld [vmem:[%s25616_s12 + $0x8c] ss:$0 sps:$4 sm:$0x33]   ;;  %v25069_v56 = vld [vmem:[%s25616_s12 + $0x98] ss:$0 sps:$4 sm:$0x33]  }
 0x1b3   : > { %22647 = vmatprep.subr.bf16.mxu0 %v26519_v28  ;;  %22659 = vmatprep.subr.bf16.mxu1 %v26519_v28  ;;  %v26754_v33 = vpop.f32.mrf.mxu0  ;;  %v26758_v14 = vpop.f32.mrf.mxu1 }
 0x1b4   : > { %33211 = vst [vmem:[#allocation54_spill] sm:$0xff] %v26754_v33  ;;  %33212 = vst [vmem:[#allocation55_spill] sm:$0xff] %v26758_v14 }
 0x1b6   : > { %22648 = vmatpush3.bf16.msra.mxu0 %v26519_v28  ;;  %22660 = vmatpush3.bf16.msra.mxu1 %v26519_v28 }
 0x1b7   : > { %22649 = vmatprep.subr.bf16.mxu0 %v26534_v60  ;;  %22661 = vmatprep.subr.bf16.mxu1 %v26534_v60 }
 0x1ba   : > { %22650 = vmatpush3.bf16.msra.mxu0 %v26534_v60  ;;  %22662 = vmatpush3.bf16.msra.mxu1 %v26534_v60 }
 0x1bb   : > { %22667 = vmatprep.subr.bf16.mxu0 %v26481_v17  ;;  %22679 = vmatprep.subr.bf16.mxu1 %v26481_v17 }
 0x1bd   : > { %v26764_v22 = vpop.f32.mrf.mxu0  ;;  %22652 = vmatmul.mubr.msk.bf16.vlgmr.msra.gmra.mxu0 %vm530_vm1, %v25068_v1  ;;  %v26770_v37 = vpop.f32.mrf.mxu1  ;;  %22664 = vmatmul.mubr.msk.bf16.vlgmr.msra.gmra.mxu1 %vm530_vm1, %v25069_v56 }
 0x1be   : > { %22668 = vmatpush3.bf16.msra.mxu0 %v26481_v17  ;;  %22680 = vmatpush3.bf16.msra.mxu1 %v26481_v17 }
 0x1bf   : > { %v26775_v33 = vpop.f32.mrf.mxu0  ;;  %22669 = vmatprep.subr.bf16.mxu0 %v26496_v30  ;;  %v26778_v14 = vpop.f32.mrf.mxu1  ;;  %22681 = vmatprep.subr.bf16.mxu1 %v26496_v30 }
 0x1c0   : > { %33213 = vst [vmem:[#allocation56_spill] sm:$0xff] %v26775_v33  ;;  %33214 = vst [vmem:[#allocation57_spill] sm:$0xff] %v26778_v14  ;;  %22675 = vmatprep.mubr.msk.bf16.mxu0 %vm530_vm1, %v26762_v42  ;;  %22687 = vmatprep.mubr.msk.bf16.mxu1 %vm530_vm1, %v26768_v43 }
 0x1c1   : > { %v22366_v1 = vpop.f32.mrf.mxu0  ;;  %v22378_v56 = vpop.f32.mrf.mxu1 }
 0x1c2   : > { %22670 = vmatpush3.bf16.msra.mxu0 %v26496_v30  ;;  %22682 = vmatpush3.bf16.msra.mxu1 %v26496_v30  ;;  %v25072_v1 = vld [vmem:[%s25616_s12 + $0xa4] ss:$0 sps:$4 sm:$0x33]   ;;  %v25073_v56 = vld [vmem:[%s25616_s12 + $0xb0] ss:$0 sps:$4 sm:$0x33]  }
 0x1c3   : > { %22671 = vmatprep.subr.bf16.mxu0 %v26519_v28  ;;  %22683 = vmatprep.subr.bf16.mxu1 %v26519_v28  ;;  %v26796_v10 = vpop.f32.mrf.mxu0  ;;  %v26800_v46 = vpop.f32.mrf.mxu1 }
 0x1c4   : > { %33215 = vst [vmem:[#allocation58_spill] sm:$0xff] %v26796_v10  ;;  %33216 = vst [vmem:[#allocation59_spill] sm:$0xff] %v26800_v46 }
 0x1c6   : > { %22672 = vmatpush3.bf16.msra.mxu0 %v26519_v28  ;;  %22684 = vmatpush3.bf16.msra.mxu1 %v26519_v28 }
 0x1c7   : > { %22673 = vmatprep.subr.bf16.mxu0 %v26534_v60  ;;  %22685 = vmatprep.subr.bf16.mxu1 %v26534_v60 }
 0x1ca   : > { %22674 = vmatpush3.bf16.msra.mxu0 %v26534_v60  ;;  %22686 = vmatpush3.bf16.msra.mxu1 %v26534_v60 }
 0x1cb   : > { %22691 = vmatprep.subr.bf16.mxu0 %v26481_v17  ;;  %22703 = vmatprep.subr.bf16.mxu1 %v26481_v17 }
 0x1cd   : > { %v26806_v45 = vpop.f32.mrf.mxu0  ;;  %22676 = vmatmul.mubr.msk.bf16.vlgmr.msra.gmra.mxu0 %vm530_vm1, %v25072_v1  ;;  %v26812_v31 = vpop.f32.mrf.mxu1  ;;  %22688 = vmatmul.mubr.msk.bf16.vlgmr.msra.gmra.mxu1 %vm530_vm1, %v25073_v56 }
 0x1ce   : > { %33218 = vst [vmem:[#allocation61_spill] sm:$0xff] %v26806_v45  ;;  %33220 = vst [vmem:[#allocation63_spill] sm:$0xff] %v26812_v31  ;;  %22692 = vmatpush3.bf16.msra.mxu0 %v26481_v17  ;;  %22704 = vmatpush3.bf16.msra.mxu1 %v26481_v17 }
 0x1cf   : > { %v26817_v10 = vpop.f32.mrf.mxu0  ;;  %22693 = vmatprep.subr.bf16.mxu0 %v26496_v30  ;;  %v26820_v46 = vpop.f32.mrf.mxu1  ;;  %22705 = vmatprep.subr.bf16.mxu1 %v26496_v30 }
 0x1d0   : > { %33221 = vst [vmem:[#allocation64_spill] sm:$0xff] %v26817_v10  ;;  %33222 = vst [vmem:[#allocation65_spill] sm:$0xff] %v26820_v46  ;;  %22699 = vmatprep.mubr.msk.bf16.mxu0 %vm530_vm1, %v26804_v21  ;;  %22711 = vmatprep.mubr.msk.bf16.mxu1 %vm530_vm1, %v26810_v55  ;;  %v26846_v46 = vld [vmem:[%s25616_s12 + $0xcc] sm:$0xff]   ;;  %v26852_v10 = vld [vmem:[%s25616_s12 + $0xd8] sm:$0xff]  }
 0x1d1   : > { %v22390_v1 = vpop.f32.mrf.mxu0  ;;  %v22402_v56 = vpop.f32.mrf.mxu1  ;;  %33225 = vst [vmem:[#allocation68_spill] sm:$0xff] %v26846_v46  ;;  %33227 = vst [vmem:[#allocation70_spill] sm:$0xff] %v26852_v10 }
 0x1d2   : > { %22694 = vmatpush3.bf16.msra.mxu0 %v26496_v30  ;;  %22706 = vmatpush3.bf16.msra.mxu1 %v26496_v30  ;;  %v25076_v1 = vld [vmem:[%s25616_s12 + $0xbc] ss:$0 sps:$4 sm:$0x33]   ;;  %v25077_v56 = vld [vmem:[%s25616_s12 + $0xc8] ss:$0 sps:$4 sm:$0x33]  }
 0x1d3   : > { %22695 = vmatprep.subr.bf16.mxu0 %v26519_v28  ;;  %22707 = vmatprep.subr.bf16.mxu1 %v26519_v28  ;;  %v26838_v61 = vpop.f32.mrf.mxu0  ;;  %v26842_v57 = vpop.f32.mrf.mxu1 }
 0x1d4   : > { %33223 = vst [vmem:[#allocation66_spill] sm:$0xff] %v26838_v61  ;;  %33224 = vst [vmem:[#allocation67_spill] sm:$0xff] %v26842_v57 }
 0x1d6   : > { %22696 = vmatpush3.bf16.msra.mxu0 %v26519_v28  ;;  %22708 = vmatpush3.bf16.msra.mxu1 %v26519_v28 }
 0x1d7   : > { %22697 = vmatprep.subr.bf16.mxu0 %v26534_v60  ;;  %22709 = vmatprep.subr.bf16.mxu1 %v26534_v60 }
 0x1da   : > { %22698 = vmatpush3.bf16.msra.mxu0 %v26534_v60  ;;  %22710 = vmatpush3.bf16.msra.mxu1 %v26534_v60 }
 0x1db   : > { %22715 = vmatprep.subr.bf16.mxu0 %v26481_v17  ;;  %22727 = vmatprep.subr.bf16.mxu1 %v26481_v17 }
 0x1dd   : > { %v26848_v36 = vpop.f32.mrf.mxu0  ;;  %22700 = vmatmul.mubr.msk.bf16.vlgmr.msra.gmra.mxu0 %vm530_vm1, %v25076_v1  ;;  %v26854_v23 = vpop.f32.mrf.mxu1  ;;  %22712 = vmatmul.mubr.msk.bf16.vlgmr.msra.gmra.mxu1 %vm530_vm1, %v25077_v56 }
 0x1de   : > { %33226 = vst [vmem:[#allocation69_spill] sm:$0xff] %v26848_v36  ;;  %33228 = vst [vmem:[#allocation71_spill] sm:$0xff] %v26854_v23  ;;  %22716 = vmatpush3.bf16.msra.mxu0 %v26481_v17  ;;  %22728 = vmatpush3.bf16.msra.mxu1 %v26481_v17  ;;  %v26888_v23 = vld [vmem:[%s25616_s12 + $0xe4] sm:$0xff]  }
 0x1df   : > { %v26859_v61 = vpop.f32.mrf.mxu0  ;;  %22717 = vmatprep.subr.bf16.mxu0 %v26496_v30  ;;  %v26862_v57 = vpop.f32.mrf.mxu1  ;;  %22729 = vmatprep.subr.bf16.mxu1 %v26496_v30  ;;  %33233 = vst [vmem:[#allocation76_spill] sm:$0xff] %v26888_v23 }
 0x1e0   : > { %33229 = vst [vmem:[#allocation72_spill] sm:$0xff] %v26859_v61  ;;  %33230 = vst [vmem:[#allocation73_spill] sm:$0xff] %v26862_v57  ;;  %22723 = vmatprep.mubr.msk.bf16.mxu0 %vm530_vm1, %v26846_v46  ;;  %22735 = vmatprep.mubr.msk.bf16.mxu1 %vm530_vm1, %v26852_v10  ;;  %v26894_v10 = vld [vmem:[%s25616_s12 + $0xf0] sm:$0xff]  }
 0x1e1   : > { %v22414_v1 = vpop.f32.mrf.mxu0  ;;  %v22426_v56 = vpop.f32.mrf.mxu1  ;;  %33235 = vst [vmem:[#allocation78_spill] sm:$0xff] %v26894_v10 }
 0x1e2   : > { %22718 = vmatpush3.bf16.msra.mxu0 %v26496_v30  ;;  %22730 = vmatpush3.bf16.msra.mxu1 %v26496_v30  ;;  %v25080_v1 = vld [vmem:[%s25616_s12 + $0xd4] ss:$0 sps:$4 sm:$0x33]   ;;  %v25081_v56 = vld [vmem:[%s25616_s12 + $0xe0] ss:$0 sps:$4 sm:$0x33]  }
 0x1e3   : > { %22719 = vmatprep.subr.bf16.mxu0 %v26519_v28  ;;  %22731 = vmatprep.subr.bf16.mxu1 %v26519_v28  ;;  %v26880_v57 = vpop.f32.mrf.mxu0  ;;  %v26884_v61 = vpop.f32.mrf.mxu1 }
 0x1e4   : > { %33231 = vst [vmem:[#allocation74_spill] sm:$0xff] %v26880_v57  ;;  %33232 = vst [vmem:[#allocation75_spill] sm:$0xff] %v26884_v61 }
 0x1e6   : > { %22720 = vmatpush3.bf16.msra.mxu0 %v26519_v28  ;;  %22732 = vmatpush3.bf16.msra.mxu1 %v26519_v28 }
 0x1e7   : > { %22721 = vmatprep.subr.bf16.mxu0 %v26534_v60  ;;  %22733 = vmatprep.subr.bf16.mxu1 %v26534_v60 }
 0x1ea   : > { %22722 = vmatpush3.bf16.msra.mxu0 %v26534_v60  ;;  %22734 = vmatpush3.bf16.msra.mxu1 %v26534_v60 }
 0x1eb   : > { %22739 = vmatprep.subr.bf16.mxu0 %v26481_v17  ;;  %22751 = vmatprep.subr.bf16.mxu1 %v26481_v17 }
 0x1ed   : > { %v26890_v36 = vpop.f32.mrf.mxu0  ;;  %22724 = vmatmul.mubr.msk.bf16.vlgmr.msra.gmra.mxu0 %vm530_vm1, %v25080_v1  ;;  %v26896_v46 = vpop.f32.mrf.mxu1  ;;  %22736 = vmatmul.mubr.msk.bf16.vlgmr.msra.gmra.mxu1 %vm530_vm1, %v25081_v56  ;;  %v26912_v56 = vld [vmem:[%s25616_s12 + $0x14] ss:$0 sps:$4 sm:$0x77]  }
 0x1ee   : > { %33234 = vst [vmem:[#allocation77_spill] sm:$0xff] %v26890_v36  ;;  %33236 = vst [vmem:[#allocation79_spill] sm:$0xff] %v26896_v46  ;;  %22740 = vmatpush3.bf16.msra.mxu0 %v26481_v17  ;;  %22752 = vmatpush3.bf16.msra.mxu1 %v26481_v17  ;;  %v4620_v46 = vshll.u32 %v26500_v34, 16 }
 0x1ef   : > { %v26901_v61 = vpop.f32.mrf.mxu0  ;;  %22741 = vmatprep.subr.bf16.mxu0 %v26496_v30  ;;  %v26904_v57 = vpop.f32.mrf.mxu1  ;;  %22753 = vmatprep.subr.bf16.mxu1 %v26496_v30 }
 0x1f0   : > { %33237 = vst [vmem:[#allocation80_spill] sm:$0xff] %v26901_v61  ;;  %33238 = vst [vmem:[#allocation81_spill] sm:$0xff] %v26904_v57  ;;  %22747 = vmatprep.mubr.msk.bf16.mxu0 %vm530_vm1, %v26888_v23  ;;  %22759 = vmatprep.mubr.msk.bf16.mxu1 %vm530_vm1, %v26894_v10  ;;  %v26917_v61 = vld [vmem:[%s25616_s12 + $0x20] ss:$0 sps:$4 sm:$0x77]   ;;  %v4715_v57 = vshll.u32 %v26506_v38, 16 }
 0x1f1   : > { %v22438_v1 = vpop.f32.mrf.mxu0  ;;  %v22450_v17 = vpop.f32.mrf.mxu1  ;;  %v4622_v36 = vrot.slane %v4620_v46, 1  ;;  %v4625_v10 = vshll.u32 %v26912_v56, 16  ;;  %v4720_v31 = vshll.u32 %v26917_v61, 16  ;;  %v25084_v46 = vld [vmem:[%s25616_s12 + $0xec] ss:$0 sps:$4 sm:$0x33]  }
 0x1f2   : > { %22742 = vmatpush3.bf16.msra.mxu0 %v26496_v30  ;;  %22754 = vmatpush3.bf16.msra.mxu1 %v26496_v30  ;;  %v4618_v1 = vshrl.u32 %v26500_v34, 16  ;;  %v4713_v17 = vshrl.u32 %v26506_v38, 16  ;;  %v4717_v23 = vrot.slane %v4715_v57, 1  ;;  %v26933_v30 = vld [vmem:[%s33160_s1 + $0x78] sm:$0xff]  }
 0x1f3   : > { %22743 = vmatprep.subr.bf16.mxu0 %v26519_v28  ;;  %22755 = vmatprep.subr.bf16.mxu1 %v26519_v28  ;;  %v4627_v19 = vrot.slane %v4625_v10, 1  ;;  %v25085_v38 = vld [vmem:[%s25616_s12 + $0xf8] ss:$0 sps:$4 sm:$0x33]   ;;  %v4722_v45 = vrot.slane %v4720_v31, 1  ;;  %v26939_v8 = vpop.f32.mrf.mxu0  ;;  %v26948_v55 = vpop.f32.mrf.mxu1 }
 0x1f4   : > { %v4623_v34 = vor.u32 %v4622_v36, %v4618_v1  ;;  %v4718_v57 = vor.u32 %v4717_v23, %v4713_v17  ;;  %33239 = vst [vmem:[#allocation82_spill] sm:$0xff] %v26939_v8  ;;  %33240 = vst [vmem:[#allocation83_spill] sm:$0xff] %v26948_v55  ;;  %v26967_v1 = vld [vmem:[%s33160_s1 + $0x68] sm:$0xff]   ;;  %v26980_v55 = vld [vmem:[%s25616_s12 + $0x38] ss:$0 sps:$4 sm:$0x77]  }
 0x1f5   : > { %v4857_v8 = vshll.u32 %v26558_v25, 16  ;;  %v4862_v21 = vshll.u32 %v26980_v55, 16 }
 0x1f6   : > { %22744 = vmatpush3.bf16.msra.mxu0 %v26519_v28  ;;  %22756 = vmatpush3.bf16.msra.mxu1 %v26519_v28  ;;  %v26946_v28 = vld [vmem:[%s33160_s1 + $0x70] sm:$0xff]   ;;  %v4628_v23 = vsel %vm490_vm0, %v4623_v34, %v4627_v19  ;;  %v4723_v10 = vsel %vm490_vm0, %v4718_v57, %v4722_v45  ;;  %v26975_v34 = vld [vmem:[%s25616_s12 + $0x2c] ss:$0 sps:$4 sm:$0x77]  }
 0x1f7   : > { %22745 = vmatprep.subr.bf16.mxu0 %v26534_v60  ;;  %22757 = vmatprep.subr.bf16.mxu1 %v26534_v60  ;;  %v4864_v33 = vrot.slane %v4862_v21, 1 }
 0x1fa   : > { %22746 = vmatpush3.bf16.msra.mxu0 %v26534_v60  ;;  %22758 = vmatpush3.bf16.msra.mxu1 %v26534_v60 }
 0x1fb   : > { %22763 = vmatprep.subr.bf16.mxu0 %v26933_v30  ;;  %22775 = vmatprep.subr.bf16.mxu1 %v26933_v30 }
 0x1fd   : > { %v26951_v36 = vpop.f32.mrf.mxu0  ;;  %22748 = vmatmul.mubr.msk.bf16.vlgmr.msra.gmra.mxu0 %vm530_vm1, %v25084_v46  ;;  %v26955_v31 = vpop.f32.mrf.mxu1  ;;  %22760 = vmatmul.mubr.msk.bf16.vlgmr.msra.gmra.mxu1 %vm530_vm1, %v25085_v38  ;;  %v4786_v38 = vshll.u32 %v26552_v47, 16 }
 0x1fe   : > { %33241 = vst [vmem:[#allocation84_spill] sm:$0xff] %v26951_v36  ;;  %33242 = vst [vmem:[#allocation85_spill] sm:$0xff] %v26955_v31  ;;  %22764 = vmatpush3.bf16.msra.mxu0 %v26933_v30  ;;  %22776 = vmatpush3.bf16.msra.mxu1 %v26933_v30  ;;  %v4855_v31 = vshrl.u32 %v26558_v25, 16  ;;  %v4859_v36 = vrot.slane %v4857_v8, 1 }
 0x1ff   : > { %v26961_v60 = vpop.f32.mrf.mxu0  ;;  %22765 = vmatprep.subr.bf16.mxu0 %v26946_v28  ;;  %v26969_v17 = vpop.f32.mrf.mxu1  ;;  %22777 = vmatprep.subr.bf16.mxu1 %v26946_v28 }
 0x200   : > { %33243 = vst [vmem:[#allocation86_spill] sm:$0xff] %v26961_v60  ;;  %33244 = vst [vmem:[#allocation87_spill] sm:$0xff] %v26969_v17  ;;  %22771 = vmatprep.mubr.msk.bf16.mxu0 %vm530_vm1, %v4628_v23  ;;  %22783 = vmatprep.mubr.msk.bf16.mxu1 %vm530_vm1, %v4723_v10  ;;  %v26988_v23 = vld [vmem:[%s33160_s1 + $0x60] sm:$0xff]   ;;  %v4629_v10 = vshrl.u32 %v26912_v56, 16  ;;  %v4791_v17 = vshll.u32 %v26975_v34, 16  ;;  %v4724_v60 = vshrl.u32 %v26917_v61, 16  ;;  %v4860_v20 = vor.u32 %v4859_v36, %v4855_v31 }
 0x201   : > { %v22462_v46 = vpop.f32.mrf.mxu0  ;;  %v22474_v57 = vpop.f32.mrf.mxu1 }
 0x202   : > { %22766 = vmatpush3.bf16.msra.mxu0 %v26946_v28  ;;  %22778 = vmatpush3.bf16.msra.mxu1 %v26946_v28  ;;  %v4784_v46 = vshrl.u32 %v26552_v47, 16  ;;  %v4788_v57 = vrot.slane %v4786_v38, 1  ;;  %v4631_v56 = vor.u32 %v4629_v10, %v4627_v19  ;;  %v4793_v38 = vrot.slane %v4791_v17, 1  ;;  %v27033_v10 = vld [vmem:[%s25616_s12 + $0x50] ss:$0 sps:$4 sm:$0x77]  }
 0x203   : > { %22767 = vmatprep.subr.bf16.mxu0 %v26967_v1  ;;  %22779 = vmatprep.subr.bf16.mxu1 %v26967_v1  ;;  %v4726_v14 = vor.u32 %v4724_v60, %v4722_v45  ;;  %v27002_v61 = vpop.f32.mrf.mxu0  ;;  %v27006_v8 = vpop.f32.mrf.mxu1  ;;  %v4865_v21 = vsel %vm490_vm0, %v4860_v20, %v4864_v33  ;;  %v4928_v17 = vshll.u32 %v26594_v3, 16 }
 0x204   : > { %v4789_v47 = vor.u32 %v4788_v57, %v4784_v46  ;;  %33245 = vst [vmem:[#allocation88_spill] sm:$0xff] %v27002_v61  ;;  %33246 = vst [vmem:[#allocation89_spill] sm:$0xff] %v27006_v8  ;;  %v4999_v46 = vshll.u32 %v26600_v41, 16  ;;  %v4795_v57 = vshrl.u32 %v26975_v34, 16  ;;  %v5004_v8 = vshll.u32 %v27033_v10, 16 }
 0x206   : > { %22768 = vmatpush3.bf16.msra.mxu0 %v26967_v1  ;;  %22780 = vmatpush3.bf16.msra.mxu1 %v26967_v1  ;;  %v4794_v19 = vsel %vm490_vm0, %v4789_v47, %v4793_v38  ;;  %v4930_v47 = vrot.slane %v4928_v17, 1  ;;  %v4797_v34 = vor.u32 %v4795_v57, %v4793_v38 }
 0x207   : > { %22769 = vmatprep.subr.bf16.mxu0 %v26988_v23  ;;  %22781 = vmatprep.subr.bf16.mxu1 %v26988_v23 }
 0x20a   : > { %22770 = vmatpush3.bf16.msra.mxu0 %v26988_v23  ;;  %22782 = vmatpush3.bf16.msra.mxu1 %v26988_v23 }
 0x20b   : > { %22787 = vmatprep.subr.bf16.mxu0 %v26933_v30  ;;  %22799 = vmatprep.subr.bf16.mxu1 %v26933_v30 }
 0x20d   : > { %v27009_v25 = vpop.f32.mrf.mxu0  ;;  %22772 = vmatmul.mubr.msk.bf16.vlgmr.msra.gmra.mxu0 %vm530_vm1, %v4631_v56  ;;  %v27013_v45 = vpop.f32.mrf.mxu1  ;;  %22784 = vmatmul.mubr.msk.bf16.vlgmr.msra.gmra.mxu1 %vm530_vm1, %v4726_v14  ;;  %v27028_v14 = vld [vmem:[%s25616_s12 + $0x44] ss:$0 sps:$4 sm:$0x77]   ;;  %v4926_v56 = vshrl.u32 %v26594_v3, 16 }
 0x20e   : > { %22788 = vmatpush3.bf16.msra.mxu0 %v26933_v30  ;;  %22800 = vmatpush3.bf16.msra.mxu1 %v26933_v30 }
 0x20f   : > { %v27019_v36 = vpop.f32.mrf.mxu0  ;;  %22789 = vmatprep.subr.bf16.mxu0 %v26946_v28  ;;  %v27022_v31 = vpop.f32.mrf.mxu1  ;;  %22801 = vmatprep.subr.bf16.mxu1 %v26946_v28  ;;  %v4931_v3 = vor.u32 %v4930_v47, %v4926_v56 }
 0x210   : > { %33247 = vst [vmem:[#allocation90_spill] sm:$0xff] %v27019_v36  ;;  %33248 = vst [vmem:[#allocation91_spill] sm:$0xff] %v27022_v31  ;;  %22795 = vmatprep.mubr.msk.bf16.mxu0 %vm530_vm1, %v4794_v19  ;;  %22807 = vmatprep.mubr.msk.bf16.mxu1 %vm530_vm1, %v4865_v21  ;;  %v4933_v19 = vshll.u32 %v27028_v14, 16  ;;  %v4866_v21 = vshrl.u32 %v26980_v55, 16  ;;  %v5006_v36 = vrot.slane %v5004_v8, 1 }
 0x211   : > { %v22486_v60 = vpop.f32.mrf.mxu0  ;;  %v22498_v20 = vpop.f32.mrf.mxu1 }
 0x212   : > { %22790 = vmatpush3.bf16.msra.mxu0 %v26946_v28  ;;  %22802 = vmatpush3.bf16.msra.mxu1 %v26946_v28  ;;  %v4997_v60 = vshrl.u32 %v26600_v41, 16  ;;  %v5001_v20 = vrot.slane %v4999_v46, 1  ;;  %v4935_v17 = vrot.slane %v4933_v19, 1  ;;  %v4868_v61 = vor.u32 %v4866_v21, %v4864_v33  ;;  %v27081_v21 = vld [vmem:[%s25616_s12 + $0x68] ss:$0 sps:$4 sm:$0x77]  }
 0x213   : > { %22791 = vmatprep.subr.bf16.mxu0 %v26967_v1  ;;  %22803 = vmatprep.subr.bf16.mxu1 %v26967_v1  ;;  %v27050_v55 = vpop.f32.mrf.mxu0  ;;  %v27054_v41 = vpop.f32.mrf.mxu1  ;;  %v5070_v19 = vshll.u32 %v26636_v26, 16 }
 0x214   : > { %v5002_v31 = vor.u32 %v5001_v20, %v4997_v60  ;;  %33249 = vst [vmem:[#allocation92_spill] sm:$0xff] %v27050_v55  ;;  %33250 = vst [vmem:[#allocation93_spill] sm:$0xff] %v27054_v41  ;;  %v4936_v38 = vsel %vm490_vm0, %v4931_v3, %v4935_v17  ;;  %v5141_v60 = vshll.u32 %v26642_v49, 16  ;;  %v4937_v20 = vshrl.u32 %v27028_v14, 16 }
 0x215   : > { %v5072_v3 = vrot.slane %v5070_v19, 1  ;;  %v5146_v41 = vshll.u32 %v27081_v21, 16 }
 0x216   : > { %22792 = vmatpush3.bf16.msra.mxu0 %v26967_v1  ;;  %22804 = vmatpush3.bf16.msra.mxu1 %v26967_v1  ;;  %v5007_v8 = vsel %vm490_vm0, %v5002_v31, %v5006_v36  ;;  %v4939_v14 = vor.u32 %v4937_v20, %v4935_v17  ;;  %v2179_v17 = vadd.f32 %v26644_v62, %v26222_v53 }
 0x217   : > { %22793 = vmatprep.subr.bf16.mxu0 %v26988_v23  ;;  %22805 = vmatprep.subr.bf16.mxu1 %v26988_v23  ;;  %v2171_v53 = vadd.f32 %v26652_v4, %v26231_v58  ;;  %v27132_v58 = vld [vmem:[%s25616_s12 + $0x74] ss:$0 sps:$4 sm:$0x77]   ;;  %v5212_v4 = vshll.u32 %v26678_v16, 16 }
 0x21a   : > { %22794 = vmatpush3.bf16.msra.mxu0 %v26988_v23  ;;  %22806 = vmatpush3.bf16.msra.mxu1 %v26988_v23 }
 0x21b   : > { %22811 = vmatprep.subr.bf16.mxu0 %v26933_v30  ;;  %22823 = vmatprep.subr.bf16.mxu1 %v26933_v30 }
 0x21d   : > { %v27057_v46 = vpop.f32.mrf.mxu0  ;;  %22796 = vmatmul.mubr.msk.bf16.vlgmr.msra.gmra.mxu0 %vm530_vm1, %v4797_v34  ;;  %v27061_v33 = vpop.f32.mrf.mxu1  ;;  %22808 = vmatmul.mubr.msk.bf16.vlgmr.msra.gmra.mxu1 %vm530_vm1, %v4868_v61  ;;  %v27076_v61 = vld [vmem:[%s25616_s12 + $0x5c] ss:$0 sps:$4 sm:$0x77]   ;;  %v5068_v34 = vshrl.u32 %v26636_v26, 16 }
 0x21e   : > { %22812 = vmatpush3.bf16.msra.mxu0 %v26933_v30  ;;  %22824 = vmatpush3.bf16.msra.mxu1 %v26933_v30 }
 0x21f   : > { %v27067_v57 = vpop.f32.mrf.mxu0  ;;  %22813 = vmatprep.subr.bf16.mxu0 %v26946_v28  ;;  %v27070_v56 = vpop.f32.mrf.mxu1  ;;  %22825 = vmatprep.subr.bf16.mxu1 %v26946_v28  ;;  %v5073_v26 = vor.u32 %v5072_v3, %v5068_v34 }
 0x220   : > { %33251 = vst [vmem:[#allocation94_spill] sm:$0xff] %v27067_v57  ;;  %33252 = vst [vmem:[#allocation95_spill] sm:$0xff] %v27070_v56  ;;  %22819 = vmatprep.mubr.msk.bf16.mxu0 %vm530_vm1, %v4936_v38  ;;  %22831 = vmatprep.mubr.msk.bf16.mxu1 %vm530_vm1, %v5007_v8  ;;  %v5075_v38 = vshll.u32 %v27076_v61, 16  ;;  %v5008_v8 = vshrl.u32 %v27033_v10, 16  ;;  %v5148_v57 = vrot.slane %v5146_v41, 1  ;;  %v2115_v41 = vadd.f32 %v26649_v15, %v26225_v54 }
 0x221   : > { %v22510_v47 = vpop.f32.mrf.mxu0  ;;  %v22522_v31 = vpop.f32.mrf.mxu1 }
 0x222   : > { %22814 = vmatpush3.bf16.msra.mxu0 %v26946_v28  ;;  %22826 = vmatpush3.bf16.msra.mxu1 %v26946_v28  ;;  %v5139_v47 = vshrl.u32 %v26642_v49, 16  ;;  %v5143_v31 = vrot.slane %v5141_v60, 1  ;;  %v5077_v19 = vrot.slane %v5075_v38, 1  ;;  %v5010_v55 = vor.u32 %v5008_v8, %v5006_v36  ;;  %v27137_v8 = vld [vmem:[%s25616_s12 + $0x80] ss:$0 sps:$4 sm:$0x77]  }
 0x223   : > { %22815 = vmatprep.subr.bf16.mxu0 %v26967_v1  ;;  %22827 = vmatprep.subr.bf16.mxu1 %v26967_v1  ;;  %v27098_v10 = vpop.f32.mrf.mxu0  ;;  %v2123_v49 = vadd.f32 %v26638_v32, %v26217_v50  ;;  %v27104_v60 = vpop.f32.mrf.mxu1 }
 0x224   : > { %v5144_v56 = vor.u32 %v5143_v31, %v5139_v47  ;;  %v5078_v36 = vsel %vm490_vm0, %v5073_v26, %v5077_v19  ;;  %v5283_v47 = vshll.u32 %v26684_v44, 16  ;;  %v5079_v31 = vshrl.u32 %v27076_v61, 16 }
 0x225   : > { %v5214_v26 = vrot.slane %v5212_v4, 1  ;;  %v2227_v4 = vadd.f32 %v26691_v52, %v26261_v13 }
 0x226   : > { %22816 = vmatpush3.bf16.msra.mxu0 %v26967_v1  ;;  %22828 = vmatpush3.bf16.msra.mxu1 %v26967_v1  ;;  %v5149_v50 = vsel %vm490_vm0, %v5144_v56, %v5148_v57  ;;  %v5081_v61 = vor.u32 %v5079_v31, %v5077_v19  ;;  %v2291_v19 = vadd.f32 %v26686_v59, %v26258_v0 }
 0x227   : > { %22817 = vmatprep.subr.bf16.mxu0 %v26988_v23  ;;  %22829 = vmatprep.subr.bf16.mxu1 %v26988_v23  ;;  %v2283_v59 = vadd.f32 %v26694_v11, %v26267_v2  ;;  %v27188_v2 = vld [vmem:[%s25616_s12 + $0x8c] ss:$0 sps:$4 sm:$0x77]   ;;  %v5354_v11 = vshll.u32 %v26720_v48, 16 }
 0x22a   : > { %22818 = vmatpush3.bf16.msra.mxu0 %v26988_v23  ;;  %22830 = vmatpush3.bf16.msra.mxu1 %v26988_v23 }
 0x22b   : > { %22835 = vmatprep.subr.bf16.mxu0 %v26933_v30  ;;  %22847 = vmatprep.subr.bf16.mxu1 %v26933_v30 }
 0x22d   : > { %v22533_v20 = vpop.f32.mrf.mxu0  ;;  %22820 = vmatmul.mubr.msk.bf16.vlgmr.msra.gmra.mxu0 %vm530_vm1, %v4939_v14  ;;  %v22545_v3 = vpop.f32.mrf.mxu1  ;;  %22832 = vmatmul.mubr.msk.bf16.vlgmr.msra.gmra.mxu1 %vm530_vm1, %v5010_v55  ;;  %v5210_v14 = vshrl.u32 %v26678_v16, 16 }
 0x22e   : > { %v27113_v34 = vadd.f32 %v22533_v20, %v2123_v49  ;;  %22836 = vmatpush3.bf16.msra.mxu0 %v26933_v30  ;;  %v27120_v62 = vadd.f32 %v22545_v3, %v2179_v17  ;;  %22848 = vmatpush3.bf16.msra.mxu1 %v26933_v30  ;;  %v5217_v49 = vshll.u32 %v27132_v58, 16  ;;  %v5150_v17 = vshrl.u32 %v27081_v21, 16 }
 0x22f   : > { %v3334_v32 = vpop.f32.mrf.mxu0  ;;  %22837 = vmatprep.subr.bf16.mxu0 %v26946_v28  ;;  %v3396_v15 = vpop.f32.mrf.mxu1  ;;  %22849 = vmatprep.subr.bf16.mxu1 %v26946_v28  ;;  %v5281_v20 = vshrl.u32 %v26684_v44, 16  ;;  %v5215_v16 = vor.u32 %v5214_v26, %v5210_v14  ;;  %v2235_v44 = vadd.f32 %v26680_v7, %v26253_v63 }
 0x230   : > { %v27124_v54 = vadd.f32 %v3334_v32, %v2115_v41  ;;  %22843 = vmatprep.mubr.msk.bf16.mxu0 %vm530_vm1, %v5078_v36  ;;  %v27128_v55 = vadd.f32 %v3396_v15, %v2171_v53  ;;  %22855 = vmatprep.mubr.msk.bf16.mxu1 %vm530_vm1, %v5149_v50  ;;  %v5285_v36 = vrot.slane %v5283_v47, 1  ;;  %v5288_v41 = vshll.u32 %v27137_v8, 16 }
 0x231   : > { %v22534_v56 = vpop.f32.mrf.mxu0  ;;  %v22546_v38 = vpop.f32.mrf.mxu1  ;;  %v5219_v3 = vrot.slane %v5217_v49, 1  ;;  %v5152_v50 = vor.u32 %v5150_v17, %v5148_v57  ;;  %v27193_v49 = vld [vmem:[%s25616_s12 + $0x98] ss:$0 sps:$4 sm:$0x77]   ;;  %v5425_v17 = vshll.u32 %v26726_v39, 16 }
 0x232   : > { %22838 = vmatpush3.bf16.msra.mxu0 %v26946_v28  ;;  %22850 = vmatpush3.bf16.msra.mxu1 %v26946_v28  ;;  %v5286_v53 = vor.u32 %v5285_v36, %v5281_v20  ;;  %v5290_v32 = vrot.slane %v5288_v41, 1  ;;  %v5221_v20 = vshrl.u32 %v27132_v58, 16  ;;  %v5352_v36 = vshrl.u32 %v26720_v48, 16 }
 0x233   : > { %22839 = vmatprep.subr.bf16.mxu0 %v26967_v1  ;;  %22851 = vmatprep.subr.bf16.mxu1 %v26967_v1  ;;  %v27154_v21 = vpop.f32.mrf.mxu0  ;;  %v27160_v15 = vpop.f32.mrf.mxu1  ;;  %v5220_v57 = vsel %vm490_vm0, %v5215_v16, %v5219_v3  ;;  %v5356_v41 = vrot.slane %v5354_v11, 1  ;;  %v5292_v16 = vshrl.u32 %v27137_v8, 16 }
 0x234   : > { %v5291_v63 = vsel %vm490_vm0, %v5286_v53, %v5290_v32  ;;  %v5427_v53 = vrot.slane %v5425_v17, 1  ;;  %v5223_v58 = vor.u32 %v5221_v20, %v5219_v3  ;;  %v2403_v3 = vadd.f32 %v26728_v35, %v26294_v27  ;;  %v27249_v17 = vld [vmem:[%s25616_s12 + $0xb0] ss:$0 sps:$4 sm:$0x77]  }
 0x235   : > { %v5357_v48 = vor.u32 %v5356_v41, %v5352_v36  ;;  %v2395_v27 = vadd.f32 %v26736_v51, %v26303_v6  ;;  %v27244_v6 = vld [vmem:[%s25616_s12 + $0xa4] ss:$0 sps:$4 sm:$0x77]   ;;  %v5496_v51 = vshll.u32 %v26762_v42, 16  ;;  %v5567_v20 = vshll.u32 %v26768_v43, 16 }
 0x236   : > { %22840 = vmatpush3.bf16.msra.mxu0 %v26967_v1  ;;  %22852 = vmatpush3.bf16.msra.mxu1 %v26967_v1  ;;  %v5363_v36 = vshrl.u32 %v27188_v2, 16  ;;  %v5494_v41 = vshrl.u32 %v26762_v42, 16 }
 0x237   : > { %22841 = vmatprep.subr.bf16.mxu0 %v26988_v23  ;;  %22853 = vmatprep.subr.bf16.mxu1 %v26988_v23 }
 0x23a   : > { %22842 = vmatpush3.bf16.msra.mxu0 %v26988_v23  ;;  %22854 = vmatpush3.bf16.msra.mxu1 %v26988_v23 }
 0x23b   : > { %22859 = vmatprep.subr.bf16.mxu0 %v26933_v30  ;;  %22871 = vmatprep.subr.bf16.mxu1 %v26933_v30 }
 0x23d   : > { %v22557_v56 = vpop.f32.mrf.mxu0  ;;  %22844 = vmatmul.mubr.msk.bf16.vlgmr.msra.gmra.mxu0 %vm530_vm1, %v5081_v61  ;;  %v22569_v47 = vpop.f32.mrf.mxu1  ;;  %22856 = vmatmul.mubr.msk.bf16.vlgmr.msra.gmra.mxu1 %vm530_vm1, %v5152_v50  ;;  %v5359_v61 = vshll.u32 %v27188_v2, 16  ;;  %v5423_v50 = vshrl.u32 %v26726_v39, 16  ;;  %v2347_v39 = vadd.f32 %v26722_v24, %v26289_v9 }
 0x23e   : > { %v27169_v38 = vadd.f32 %v22557_v56, %v2235_v44  ;;  %22860 = vmatpush3.bf16.msra.mxu0 %v26933_v30  ;;  %v27176_v0 = vadd.f32 %v22569_v47, %v2291_v19  ;;  %22872 = vmatpush3.bf16.msra.mxu1 %v26933_v30  ;;  %v5430_v44 = vshll.u32 %v27193_v49, 16  ;;  %v5294_v56 = vor.u32 %v5292_v16, %v5290_v32 }
 0x23f   : > { %v3458_v7 = vpop.f32.mrf.mxu0  ;;  %22861 = vmatprep.subr.bf16.mxu0 %v26946_v28  ;;  %v3520_v52 = vpop.f32.mrf.mxu1  ;;  %22873 = vmatprep.subr.bf16.mxu1 %v26946_v28  ;;  %v5361_v19 = vrot.slane %v5359_v61, 1  ;;  %v5498_v61 = vrot.slane %v5496_v51, 1  ;;  %v5501_v16 = vshll.u32 %v27244_v6, 16 }
 0x240   : > { %v27180_v13 = vadd.f32 %v3458_v7, %v2227_v4  ;;  %22867 = vmatprep.mubr.msk.bf16.mxu0 %vm530_vm1, %v5220_v57  ;;  %v27184_v31 = vadd.f32 %v3520_v52, %v2283_v59  ;;  %22879 = vmatprep.mubr.msk.bf16.mxu1 %vm530_vm1, %v5291_v63  ;;  %v5428_v57 = vor.u32 %v5427_v53, %v5423_v50  ;;  %v5432_v4 = vrot.slane %v5430_v44, 1 }
 0x241   : > { %v22558_v14 = vpop.f32.mrf.mxu0  ;;  %v22570_v26 = vpop.f32.mrf.mxu1  ;;  %v5362_v32 = vsel %vm490_vm0, %v5357_v48, %v5361_v19  ;;  %v2339_v59 = vadd.f32 %v26733_v5, %v26297_v29  ;;  %v5434_v50 = vshrl.u32 %v27193_v49, 16  ;;  %v5565_v53 = vshrl.u32 %v26768_v43, 16 }
 0x242   : > { %22862 = vmatpush3.bf16.msra.mxu0 %v26946_v28  ;;  %22874 = vmatpush3.bf16.msra.mxu1 %v26946_v28  ;;  %v5433_v9 = vsel %vm490_vm0, %v5428_v57, %v5432_v4  ;;  %v5569_v44 = vrot.slane %v5567_v20, 1  ;;  %v5365_v2 = vor.u32 %v5363_v36, %v5361_v19  ;;  %v5499_v42 = vor.u32 %v5498_v61, %v5494_v41  ;;  %v33256_v20 = vld [vmem:[#allocation60_spill] sm:$0xff]  ;;  %v27305_v61 = vld [vmem:[%s25616_s12 + $0xc8] ss:$0 sps:$4 sm:$0x77]  }
 0x243   : > { %22863 = vmatprep.subr.bf16.mxu0 %v26967_v1  ;;  %22875 = vmatprep.subr.bf16.mxu1 %v26967_v1  ;;  %v27210_v8 = vpop.f32.mrf.mxu0  ;;  %v27216_v47 = vpop.f32.mrf.mxu1  ;;  %v5503_v48 = vrot.slane %v5501_v16, 1  ;;  %v2459_v43 = vadd.f32 %v26764_v22, %v26325_v12  ;;  %v2515_v19 = vadd.f32 %v26770_v37, %v26330_v40  ;;  %v33254_v22 = vld [vmem:[#allocation11_spill] sm:$0xff]  ;;  %v33255_v40 = vld [vmem:[#allocation57_spill] sm:$0xff]  ;;  %v5638_v36 = vshll.u32 %v33256_v20, 16  ;;  %v33257_v16 = vld [vmem:[#allocation62_spill] sm:$0xff] }
 0x244   : > { %v5570_v57 = vor.u32 %v5569_v44, %v5565_v53  ;;  %v2507_v37 = vadd.f32 %v33255_v40, %v33254_v22  ;;  %v5505_v53 = vshrl.u32 %v27244_v6, 16  ;;  %v5636_v44 = vshrl.u32 %v33256_v20, 16  ;;  %v33263_v20 = vld [vmem:[#allocation64_spill] sm:$0xff] }
 0x246   : > { %22864 = vmatpush3.bf16.msra.mxu0 %v26967_v1  ;;  %22876 = vmatpush3.bf16.msra.mxu1 %v26967_v1  ;;  %v5507_v6 = vor.u32 %v5505_v53, %v5503_v48  ;;  %v33264_v53 = vld [vmem:[#allocation17_spill] sm:$0xff] }
 0x247   : > { %22865 = vmatprep.subr.bf16.mxu0 %v26988_v23  ;;  %22877 = vmatprep.subr.bf16.mxu1 %v26988_v23 }
 0x24a   : > { %22866 = vmatpush3.bf16.msra.mxu0 %v26988_v23  ;;  %22878 = vmatpush3.bf16.msra.mxu1 %v26988_v23 }
 0x24b   : > { %22883 = vmatprep.subr.bf16.mxu0 %v26933_v30  ;;  %22895 = vmatprep.subr.bf16.mxu1 %v26933_v30 }
 0x24d   : > { %v22581_v63 = vpop.f32.mrf.mxu0  ;;  %22868 = vmatmul.mubr.msk.bf16.vlgmr.msra.gmra.mxu0 %vm530_vm1, %v5223_v58  ;;  %v22593_v52 = vpop.f32.mrf.mxu1  ;;  %22880 = vmatmul.mubr.msk.bf16.vlgmr.msra.gmra.mxu1 %vm530_vm1, %v5294_v56  ;;  %v5572_v58 = vshll.u32 %v27249_v17, 16  ;;  %v5436_v56 = vor.u32 %v5434_v50, %v5432_v4  ;;  %v5504_v4 = vsel %vm490_vm0, %v5499_v42, %v5503_v48  ;;  %v5709_v50 = vshll.u32 %v33257_v16, 16  ;;  %v33260_v48 = vld [vmem:[#allocation15_spill] sm:$0xff] }
 0x24e   : > { %v27225_v7 = vadd.f32 %v22581_v63, %v2347_v39  ;;  %22884 = vmatpush3.bf16.msra.mxu0 %v26933_v30  ;;  %v27232_v24 = vadd.f32 %v22593_v52, %v2403_v3  ;;  %22896 = vmatpush3.bf16.msra.mxu1 %v26933_v30  ;;  %v5576_v42 = vshrl.u32 %v27249_v17, 16 }
 0x24f   : > { %v3582_v35 = vpop.f32.mrf.mxu0  ;;  %22885 = vmatprep.subr.bf16.mxu0 %v26946_v28  ;;  %v3644_v5 = vpop.f32.mrf.mxu1  ;;  %22897 = vmatprep.subr.bf16.mxu1 %v26946_v28  ;;  %v5574_v39 = vrot.slane %v5572_v58, 1  ;;  %v5640_v58 = vrot.slane %v5638_v36, 1 }
 0x250   : > { %v27236_v29 = vadd.f32 %v3582_v35, %v2339_v59  ;;  %22891 = vmatprep.mubr.msk.bf16.mxu0 %vm530_vm1, %v5362_v32  ;;  %v27240_v14 = vadd.f32 %v3644_v5, %v2395_v27  ;;  %22903 = vmatprep.mubr.msk.bf16.mxu1 %vm530_vm1, %v5433_v9  ;;  %v33253_v32 = vld [vmem:[#allocation56_spill] sm:$0xff] }
 0x251   : > { %v22582_v11 = vpop.f32.mrf.mxu0  ;;  %v22594_v26 = vpop.f32.mrf.mxu1  ;;  %v2451_v59 = vadd.f32 %v33253_v32, %v26333_v18  ;;  %v5575_v12 = vsel %vm490_vm0, %v5570_v57, %v5574_v39  ;;  %v5711_v57 = vrot.slane %v5709_v50, 1 }
 0x252   : > { %22886 = vmatpush3.bf16.msra.mxu0 %v26946_v28  ;;  %22898 = vmatpush3.bf16.msra.mxu1 %v26946_v28  ;;  %v27300_v26 = vld [vmem:[%s25616_s12 + $0xbc] ss:$0 sps:$4 sm:$0x77]  }
 0x253   : > { %22887 = vmatprep.subr.bf16.mxu0 %v26967_v1  ;;  %22899 = vmatprep.subr.bf16.mxu1 %v26967_v1  ;;  %v27266_v49 = vpop.f32.mrf.mxu0  ;;  %v27272_v3 = vpop.f32.mrf.mxu1 }
 0x256   : > { %22888 = vmatpush3.bf16.msra.mxu0 %v26967_v1  ;;  %22900 = vmatpush3.bf16.msra.mxu1 %v26967_v1 }
 0x257   : > { %22889 = vmatprep.subr.bf16.mxu0 %v26988_v23  ;;  %22901 = vmatprep.subr.bf16.mxu1 %v26988_v23 }
 0x25a   : > { %22890 = vmatpush3.bf16.msra.mxu0 %v26988_v23  ;;  %22902 = vmatpush3.bf16.msra.mxu1 %v26988_v23 }
 0x25b   : > { %22907 = vmatprep.subr.bf16.mxu0 %v26933_v30  ;;  %22919 = vmatprep.subr.bf16.mxu1 %v26933_v30 }
 0x25d   : > { %v22605_v63 = vpop.f32.mrf.mxu0  ;;  %22892 = vmatmul.mubr.msk.bf16.vlgmr.msra.gmra.mxu0 %vm530_vm1, %v5365_v2  ;;  %v22617_v9 = vpop.f32.mrf.mxu1  ;;  %22904 = vmatmul.mubr.msk.bf16.vlgmr.msra.gmra.mxu1 %vm530_vm1, %v5436_v56  ;;  %v5643_v2 = vshll.u32 %v27300_v26, 16  ;;  %v5707_v56 = vshrl.u32 %v33257_v16, 16 }
 0x25e   : > { %v27281_v52 = vadd.f32 %v22605_v63, %v2459_v43  ;;  %22908 = vmatpush3.bf16.msra.mxu0 %v26933_v30  ;;  %v27288_v27 = vadd.f32 %v22617_v9, %v2515_v19  ;;  %22920 = vmatpush3.bf16.msra.mxu1 %v26933_v30  ;;  %v5714_v43 = vshll.u32 %v27305_v61, 16  ;;  %v5641_v19 = vor.u32 %v5640_v58, %v5636_v44  ;;  %v33258_v9 = vld [vmem:[#allocation14_spill] sm:$0xff]  ;;  %v33265_v44 = vld [vmem:[#allocation65_spill] sm:$0xff] }
 0x25f   : > { %v3706_v35 = vpop.f32.mrf.mxu0  ;;  %22909 = vmatprep.subr.bf16.mxu0 %v26946_v28  ;;  %v3768_v5 = vpop.f32.mrf.mxu1  ;;  %22921 = vmatprep.subr.bf16.mxu1 %v26946_v28  ;;  %v5645_v63 = vrot.slane %v5643_v2, 1  ;;  %v5712_v32 = vor.u32 %v5711_v57, %v5707_v56  ;;  %v2619_v58 = vadd.f32 %v33265_v44, %v33264_v53 }
 0x260   : > { %v27292_v18 = vadd.f32 %v3706_v35, %v2451_v59  ;;  %22915 = vmatprep.mubr.msk.bf16.mxu0 %vm530_vm1, %v5504_v4  ;;  %v27296_v11 = vadd.f32 %v3768_v5, %v2507_v37  ;;  %22927 = vmatprep.mubr.msk.bf16.mxu1 %vm530_vm1, %v5575_v12  ;;  %v5578_v4 = vor.u32 %v5576_v42, %v5574_v39  ;;  %v5716_v59 = vrot.slane %v5714_v43, 1  ;;  %v33259_v12 = vld [vmem:[#allocation61_spill] sm:$0xff]  ;;  %v33261_v37 = vld [vmem:[#allocation63_spill] sm:$0xff] }
 0x261   : > { %v22606_v51 = vpop.f32.mrf.mxu0  ;;  %v22618_v41 = vpop.f32.mrf.mxu1  ;;  %v2571_v22 = vadd.f32 %v33259_v12, %v33258_v9  ;;  %v2627_v35 = vadd.f32 %v33261_v37, %v33260_v48  ;;  %v5646_v39 = vsel %vm490_vm0, %v5641_v19, %v5645_v63  ;;  %v27356_v19 = vld [vmem:[%s25616_s12 + $0xd4] ss:$0 sps:$4 sm:$0x77]   ;;  %v27361_v12 = vld [vmem:[%s25616_s12 + $0xe0] ss:$0 sps:$4 sm:$0x77]  }
 0x262   : > { %22910 = vmatpush3.bf16.msra.mxu0 %v26946_v28  ;;  %22922 = vmatpush3.bf16.msra.mxu1 %v26946_v28  ;;  %v33262_v51 = vld [vmem:[#allocation16_spill] sm:$0xff]  ;;  %v5717_v50 = vsel %vm490_vm0, %v5712_v32, %v5716_v59  ;;  %v5647_v37 = vshrl.u32 %v27300_v26, 16 }
 0x263   : > { %22911 = vmatprep.subr.bf16.mxu0 %v26967_v1  ;;  %22923 = vmatprep.subr.bf16.mxu1 %v26967_v1  ;;  %v27322_v17 = vpop.f32.mrf.mxu0  ;;  %v27328_v40 = vpop.f32.mrf.mxu1  ;;  %v2563_v36 = vadd.f32 %v33263_v20, %v33262_v51  ;;  %v5718_v51 = vshrl.u32 %v27305_v61, 16 }
 0x264   : > { %v5649_v26 = vor.u32 %v5647_v37, %v5645_v63  ;;  %v33270_v63 = vld [vmem:[#allocation21_spill] sm:$0xff]  ;;  %v33272_v37 = vld [vmem:[#allocation22_spill] sm:$0xff] }
 0x265   : > { %v5720_v44 = vor.u32 %v5718_v51, %v5716_v59 }
 0x266   : > { %22912 = vmatpush3.bf16.msra.mxu0 %v26967_v1  ;;  %22924 = vmatpush3.bf16.msra.mxu1 %v26967_v1 }
 0x267   : > { %22913 = vmatprep.subr.bf16.mxu0 %v26988_v23  ;;  %22925 = vmatprep.subr.bf16.mxu1 %v26988_v23 }
 0x26a   : > { %22914 = vmatpush3.bf16.msra.mxu0 %v26988_v23  ;;  %22926 = vmatpush3.bf16.msra.mxu1 %v26988_v23 }
 0x26b   : > { %22931 = vmatprep.subr.bf16.mxu0 %v26933_v30  ;;  %22943 = vmatprep.subr.bf16.mxu1 %v26933_v30 }
 0x26d   : > { %v22629_v5 = vpop.f32.mrf.mxu0  ;;  %22916 = vmatmul.mubr.msk.bf16.vlgmr.msra.gmra.mxu0 %vm530_vm1, %v5507_v6  ;;  %v22641_v16 = vpop.f32.mrf.mxu1  ;;  %22928 = vmatmul.mubr.msk.bf16.vlgmr.msra.gmra.mxu1 %vm530_vm1, %v5578_v4  ;;  %v33266_v4 = vld [vmem:[#allocation68_spill] sm:$0xff] }
 0x26e   : > { %v27337_v41 = vadd.f32 %v22629_v5, %v2571_v22  ;;  %22932 = vmatpush3.bf16.msra.mxu0 %v26933_v30  ;;  %v27344_v2 = vadd.f32 %v22641_v16, %v2627_v35  ;;  %22944 = vmatpush3.bf16.msra.mxu1 %v26933_v30  ;;  %v5780_v32 = vshll.u32 %v33266_v4, 16  ;;  %v33267_v22 = vld [vmem:[#allocation70_spill] sm:$0xff]  ;;  %v5778_v35 = vshrl.u32 %v33266_v4, 16 }
 0x26f   : > { %v3830_v42 = vpop.f32.mrf.mxu0  ;;  %22933 = vmatprep.subr.bf16.mxu0 %v26946_v28  ;;  %v3892_v57 = vpop.f32.mrf.mxu1  ;;  %22945 = vmatprep.subr.bf16.mxu1 %v26946_v28  ;;  %v5851_v48 = vshll.u32 %v33267_v22, 16  ;;  %v5849_v20 = vshrl.u32 %v33267_v22, 16  ;;  %v5856_v16 = vshll.u32 %v27361_v12, 16 }
 0x270   : > { %v27348_v56 = vadd.f32 %v3830_v42, %v2563_v36  ;;  %22939 = vmatprep.mubr.msk.bf16.mxu0 %vm530_vm1, %v5646_v39  ;;  %v27352_v43 = vadd.f32 %v3892_v57, %v2619_v58  ;;  %22951 = vmatprep.mubr.msk.bf16.mxu1 %vm530_vm1, %v5717_v50  ;;  %v5782_v5 = vrot.slane %v5780_v32, 1  ;;  %v5785_v39 = vshll.u32 %v27356_v19, 16  ;;  %v33268_v57 = vld [vmem:[#allocation20_spill] sm:$0xff] }
 0x271   : > { %v22630_v6 = vpop.f32.mrf.mxu0  ;;  %v22642_v9 = vpop.f32.mrf.mxu1  ;;  %v5853_v36 = vrot.slane %v5851_v48, 1  ;;  %v5858_v42 = vrot.slane %v5856_v16, 1  ;;  %v33276_v16 = vld [vmem:[#allocation73_spill] sm:$0xff] }
 0x272   : > { %22934 = vmatpush3.bf16.msra.mxu0 %v26946_v28  ;;  %22946 = vmatpush3.bf16.msra.mxu1 %v26946_v28  ;;  %v5783_v50 = vor.u32 %v5782_v5, %v5778_v35  ;;  %v5787_v53 = vrot.slane %v5785_v39, 1  ;;  %v33269_v6 = vld [vmem:[#allocation69_spill] sm:$0xff]  ;;  %v33271_v9 = vld [vmem:[#allocation71_spill] sm:$0xff]  ;;  %v33273_v35 = vld [vmem:[#allocation72_spill] sm:$0xff] }
 0x273   : > { %22935 = vmatprep.subr.bf16.mxu0 %v26967_v1  ;;  %22947 = vmatprep.subr.bf16.mxu1 %v26967_v1  ;;  %v5854_v58 = vor.u32 %v5853_v36, %v5849_v20  ;;  %v27378_v61 = vpop.f32.mrf.mxu0  ;;  %v2683_v4 = vadd.f32 %v33269_v6, %v33268_v57  ;;  %v27384_v32 = vpop.f32.mrf.mxu1  ;;  %v2739_v22 = vadd.f32 %v33271_v9, %v33270_v63  ;;  %v33275_v36 = vld [vmem:[#allocation23_spill] sm:$0xff]  ;;  %v27412_v63 = vld [vmem:[%s25616_s12 + $0xec] ss:$0 sps:$4 sm:$0x77]   ;;  %v33280_v9 = vld [vmem:[#allocation76_spill] sm:$0xff] }
 0x274   : > { %v5788_v59 = vsel %vm490_vm0, %v5783_v50, %v5787_v53  ;;  %v2675_v5 = vadd.f32 %v33273_v35, %v33272_v37  ;;  %v2731_v57 = vadd.f32 %v33276_v16, %v33275_v36  ;;  %v27417_v37 = vld [vmem:[%s25616_s12 + $0xf8] ss:$0 sps:$4 sm:$0x77]   ;;  %v33281_v35 = vld [vmem:[#allocation78_spill] sm:$0xff]  ;;  %v5927_v36 = vshll.u32 %v27412_v63, 16  ;;  %s20541_s12 = sshll.u32 %s25558_s21, 4 }
 0x275   : > { %v5859_v20 = vsel %vm490_vm0, %v5854_v58, %v5858_v42  ;;  %v5860_v16 = vshrl.u32 %v27361_v12, 16  ;;  %s19477_s30 = scalar_lea.hbm %s33031_s11, %s20541_s12  ;;  %s25417_s21 = scalar_lea.vmem %s25416_s0, 32 }
 0x276   : > { %22936 = vmatpush3.bf16.msra.mxu0 %v26967_v1  ;;  %22948 = vmatpush3.bf16.msra.mxu1 %v26967_v1  ;;  %p25419_p1 = scmp.lt.s32.totalorder %s25417_s21, %s25411_s14 }
 0x277   : > { %22937 = vmatprep.subr.bf16.mxu0 %v26988_v23  ;;  %22949 = vmatprep.subr.bf16.mxu1 %v26988_v23 }
 0x278   : > { %p25420_p2 = por %p25419_p1, %p25418_p0 }
 0x27a   : > { %22938 = vmatpush3.bf16.msra.mxu0 %v26988_v23  ;;  %22950 = vmatpush3.bf16.msra.mxu1 %v26988_v23  ;;  %p25421_p3 = pnand %p25420_p2, %p25414_p13 }
 0x27b   : > { %22955 = vmatprep.subr.bf16.mxu0 %v26933_v30  ;;  %22967 = vmatprep.subr.bf16.mxu1 %v26933_v30 }
 0x27d   : > { %v22653_v48 = vpop.f32.mrf.mxu0  ;;  %22940 = vmatmul.mubr.msk.bf16.vlgmr.msra.gmra.mxu0 %vm530_vm1, %v5649_v26  ;;  %v22665_v51 = vpop.f32.mrf.mxu1  ;;  %22952 = vmatmul.mubr.msk.bf16.vlgmr.msra.gmra.mxu1 %vm530_vm1, %v5720_v44 }
 0x27e   : > { %v27393_v39 = vadd.f32 %v22653_v48, %v2683_v4  ;;  %22956 = vmatpush3.bf16.msra.mxu0 %v26933_v30  ;;  %v27400_v26 = vadd.f32 %v22665_v51, %v2739_v22  ;;  %22968 = vmatpush3.bf16.msra.mxu1 %v26933_v30  ;;  %v5922_v22 = vshll.u32 %v33280_v9, 16  ;;  %v5920_v51 = vshrl.u32 %v33280_v9, 16 }
 0x27f   : > { %v3954_v50 = vpop.f32.mrf.mxu0  ;;  %22957 = vmatprep.subr.bf16.mxu0 %v26946_v28  ;;  %v4016_v4 = vpop.f32.mrf.mxu1  ;;  %22969 = vmatprep.subr.bf16.mxu1 %v26946_v28  ;;  %v5929_v9 = vrot.slane %v5927_v36, 1  ;;  %v33286_v36 = vld [vmem:[#allocation28_spill] sm:$0xff] }
 0x280   : > { %33274 = vst [vmem:[#allocation56_spill] sm:$0xff] %v27393_v39  ;;  %33277 = vst [vmem:[#allocation11_spill] sm:$0xff] %v27400_v26  ;;  %v27404_v6 = vadd.f32 %v3954_v50, %v2675_v5  ;;  %22963 = vmatprep.mubr.msk.bf16.mxu0 %vm530_vm1, %v5788_v59  ;;  %v27408_v44 = vadd.f32 %v4016_v4, %v2731_v57  ;;  %22975 = vmatprep.mubr.msk.bf16.mxu1 %vm530_vm1, %v5859_v20  ;;  %v5993_v5 = vshll.u32 %v33281_v35, 16  ;;  %v33290_v39 = vld [vmem:[#allocation81_spill] sm:$0xff] }
 0x281   : > { %v22654_v58 = vpop.f32.mrf.mxu0  ;;  %v22666_v48 = vpop.f32.mrf.mxu1  ;;  %v5789_v59 = vshrl.u32 %v27356_v19, 16  ;;  %v5924_v20 = vrot.slane %v5922_v22, 1  ;;  %v5991_v57 = vshrl.u32 %v33281_v35, 16  ;;  %v5998_v4 = vshll.u32 %v27417_v37, 16  ;;  %v33282_v35 = vld [vmem:[#allocation26_spill] sm:$0xff] }
 0x282   : > { %33278 = vst [vmem:[#allocation57_spill] sm:$0xff] %v27404_v6  ;;  %33279 = vst [vmem:[#allocation60_spill] sm:$0xff] %v27408_v44  ;;  %22958 = vmatpush3.bf16.msra.mxu0 %v26946_v28  ;;  %22970 = vmatpush3.bf16.msra.mxu1 %v26946_v28  ;;  %v5995_v50 = vrot.slane %v5993_v5, 1  ;;  %v5862_v22 = vor.u32 %v5860_v16, %v5858_v42  ;;  %v33283_v5 = vld [vmem:[#allocation77_spill] sm:$0xff]  ;;  %v33287_v16 = vld [vmem:[#allocation80_spill] sm:$0xff] }
 0x283   : > { %22959 = vmatprep.subr.bf16.mxu0 %v26967_v1  ;;  %22971 = vmatprep.subr.bf16.mxu1 %v26967_v1  ;;  %v5791_v19 = vor.u32 %v5789_v59, %v5787_v53  ;;  %v5925_v58 = vor.u32 %v5924_v20, %v5920_v51  ;;  %v6000_v44 = vrot.slane %v5998_v4, 1  ;;  %v27434_v12 = vpop.f32.mrf.mxu0  ;;  %v2795_v6 = vadd.f32 %v33283_v5, %v33282_v35  ;;  %v27440_v26 = vpop.f32.mrf.mxu1  ;;  %v33284_v53 = vld [vmem:[#allocation27_spill] sm:$0xff]  ;;  %v33289_v5 = vld [vmem:[#allocation29_spill] sm:$0xff] }
 0x284   : > { %v5996_v48 = vor.u32 %v5995_v50, %v5991_v57  ;;  %v33285_v59 = vld [vmem:[#allocation79_spill] sm:$0xff]  ;;  %v2787_v57 = vadd.f32 %v33287_v16, %v33286_v36  ;;  %v33295_v36 = vld [vmem:[#allocation84_spill] sm:$0xff] }
 0x285   : > { %v2851_v51 = vadd.f32 %v33285_v59, %v33284_v53  ;;  %v5930_v42 = vsel %vm490_vm0, %v5925_v58, %v5929_v9  ;;  %v2843_v53 = vadd.f32 %v33290_v39, %v33289_v5  ;;  %v33298_v5 = vld [vmem:[#allocation34_spill] sm:$0xff] }
 0x286   : > { %22960 = vmatpush3.bf16.msra.mxu0 %v26967_v1  ;;  %22972 = vmatpush3.bf16.msra.mxu1 %v26967_v1  ;;  %v6001_v35 = vsel %vm490_vm0, %v5996_v48, %v6000_v44 }
 0x287   : > { %22961 = vmatprep.subr.bf16.mxu0 %v26988_v23  ;;  %22973 = vmatprep.subr.bf16.mxu1 %v26988_v23 }
 0x28a   : > { %22962 = vmatpush3.bf16.msra.mxu0 %v26988_v23  ;;  %22974 = vmatpush3.bf16.msra.mxu1 %v26988_v23 }
 0x28b   : > { %22979 = vmatprep.subr.bf16.mxu0 %v26933_v30  ;;  %22991 = vmatprep.subr.bf16.mxu1 %v26933_v30 }
 0x28d   : > { %v22677_v20 = vpop.f32.mrf.mxu0  ;;  %22964 = vmatmul.mubr.msk.bf16.vlgmr.msra.gmra.mxu0 %vm530_vm1, %v5791_v19  ;;  %v22689_v4 = vpop.f32.mrf.mxu1  ;;  %22976 = vmatmul.mubr.msk.bf16.vlgmr.msra.gmra.mxu1 %vm530_vm1, %v5862_v22 }
 0x28e   : > { %v27449_v50 = vadd.f32 %v22677_v20, %v2795_v6  ;;  %22980 = vmatpush3.bf16.msra.mxu0 %v26933_v30  ;;  %v27456_v59 = vadd.f32 %v22689_v4, %v2851_v51  ;;  %22992 = vmatpush3.bf16.msra.mxu1 %v26933_v30  ;;  %v5931_v30 = vshrl.u32 %v27412_v63, 16  ;;  %v6002_v51 = vshrl.u32 %v27417_v37, 16 }
 0x28f   : > { %v4078_v19 = vpop.f32.mrf.mxu0  ;;  %22981 = vmatprep.subr.bf16.mxu0 %v26946_v28  ;;  %v4140_v6 = vpop.f32.mrf.mxu1  ;;  %22993 = vmatprep.subr.bf16.mxu1 %v26946_v28  ;;  %v33044_v37 = vmov 0.0  }
 0x290   : > { %33288 = vst [vmem:[#allocation62_spill] sm:$0xff] %v27449_v50  ;;  %33291 = vst [vmem:[#allocation14_spill] sm:$0xff] %v27456_v59  ;;  %v27460_v58 = vadd.f32 %v4078_v19, %v2787_v57  ;;  %22987 = vmatprep.mubr.msk.bf16.mxu0 %vm530_vm1, %v5930_v42  ;;  %v27464_v22 = vadd.f32 %v4140_v6, %v2843_v53  ;;  %22999 = vmatprep.mubr.msk.bf16.mxu1 %vm530_vm1, %v6001_v35  ;;  %v27481_v42 = vld [vmem:[%s33023_s3 + $0x28] sm:$0xff]  }
 0x291   : > { %v22678_v48 = vpop.f32.mrf.mxu0  ;;  %v22690_v39 = vpop.f32.mrf.mxu1  ;;  %v5933_v20 = vor.u32 %v5931_v30, %v5929_v9  ;;  %v33297_v9 = vld [vmem:[#allocation85_spill] sm:$0xff]  ;;  %v33299_v53 = vld [vmem:[#allocation86_spill] sm:$0xff]  ;;  %v33302_v30 = vld [vmem:[#allocation87_spill] sm:$0xff] }
 0x292   : > { %33292 = vst [vmem:[#allocation61_spill] sm:$0xff] %v27460_v58  ;;  %33293 = vst [vmem:[#allocation15_spill] sm:$0xff] %v27464_v22  ;;  %22982 = vmatpush3.bf16.msra.mxu0 %v26946_v28  ;;  %22994 = vmatpush3.bf16.msra.mxu1 %v26946_v28  ;;  %v6004_v28 = vor.u32 %v6002_v51, %v6000_v44  ;;  %v33296_v44 = vld [vmem:[#allocation33_spill] sm:$0xff]  ;;  %v2899_v19 = vadd.f32 %v33299_v53, %v33298_v5  ;;  %v33301_v39 = vld [vmem:[#allocation35_spill] sm:$0xff] }
 0x293   : > { %22983 = vmatprep.subr.bf16.mxu0 %v26967_v1  ;;  %22995 = vmatprep.subr.bf16.mxu1 %v26967_v1  ;;  %v27483_v63 = vpop.f32.mrf.mxu0  ;;  %v27489_v57 = vpop.f32.mrf.mxu1  ;;  %v2963_v4 = vadd.f32 %v33297_v9, %v33296_v44  ;;  %v27504_v48 = vld [vmem:[%s33023_s3 + $0x20] sm:$0xff]   ;;  %v2955_v51 = vadd.f32 %v33302_v30, %v33301_v39 }
 0x294   : > { %v33308_v30 = vld [vmem:[#allocation40_spill] sm:$0xff] }
 0x295   : > { %v33317_v58 = vld [vmem:[#allocation44_spill] sm:$0xff] }
 0x296   : > { %22984 = vmatpush3.bf16.msra.mxu0 %v26967_v1  ;;  %22996 = vmatpush3.bf16.msra.mxu1 %v26967_v1  ;;  %v33294_v1 = vld [vmem:[#allocation32_spill] sm:$0xff] }
 0x297   : > { %22985 = vmatprep.subr.bf16.mxu0 %v26988_v23  ;;  %22997 = vmatprep.subr.bf16.mxu1 %v26988_v23  ;;  %v2907_v16 = vadd.f32 %v33295_v36, %v33294_v1 }
 0x29a   : > { %22986 = vmatpush3.bf16.msra.mxu0 %v26988_v23  ;;  %22998 = vmatpush3.bf16.msra.mxu1 %v26988_v23 }
 0x29b   : > { %23003 = vmatprep.subr.bf16.mxu0 %v33044_v37  ;;  %23011 = vmatprep.subr.bf16.mxu1 %v33044_v37 }
 0x29d   : > { %v22701_v35 = vpop.f32.mrf.mxu0  ;;  %22988 = vmatmul.mubr.msk.bf16.vlgmr.msra.gmra.mxu0 %vm530_vm1, %v5933_v20  ;;  %v22713_v6 = vpop.f32.mrf.mxu1  ;;  %23000 = vmatmul.mubr.msk.bf16.vlgmr.msra.gmra.mxu1 %vm530_vm1, %v6004_v28 }
 0x29e   : > { %v27497_v23 = vadd.f32 %v22701_v35, %v2907_v16  ;;  %23004 = vmatpush3.bf16.msra.mxu0 %v27481_v42  ;;  %v27508_v1 = vadd.f32 %v22713_v6, %v2963_v4  ;;  %23007 = vmatprep.mubr.msk.bf16.mxu0 %vm25474_vm2, %v33044_v37  ;;  %v33306_v35 = vld [vmem:[#allocation38_spill] sm:$0xff] }
 0x29f   : > { %v4202_v20 = vpop.f32.mrf.mxu0  ;;  %23005 = vmatprep.subr.bf16.mxu0 %v33044_v37  ;;  %v4264_v36 = vpop.f32.mrf.mxu1  ;;  %23012 = vmatpush3.bf16.msra.mxu1 %v27481_v42  ;;  %v3019_v5 = vadd.f32 %v27009_v25, %v33306_v35 }
 0x2a0   : > { %33300 = vst [vmem:[#allocation63_spill] sm:$0xff] %v27497_v23  ;;  %33303 = vst [vmem:[#allocation16_spill] sm:$0xff] %v27508_v1  ;;  %v27513_v28 = vadd.f32 %v4202_v20, %v2899_v19  ;;  %23015 = vmatprep.mubr.msk.bf16.mxu1 %vm25474_vm2, %v33044_v37  ;;  %v27518_v16 = vadd.f32 %v4264_v36, %v2955_v51  ;;  %23013 = vmatprep.subr.bf16.mxu1 %v33044_v37  ;;  %v33307_v19 = vld [vmem:[#allocation39_spill] sm:$0xff]  ;;  %v33309_v51 = vld [vmem:[#allocation90_spill] sm:$0xff] }
 0x2a1   : > { %v22702_v44 = vpop.f32.mrf.mxu0  ;;  %v22714_v9 = vpop.f32.mrf.mxu1  ;;  %v3075_v6 = vadd.f32 %v27013_v45, %v33307_v19  ;;  %v3011_v20 = vadd.f32 %v33309_v51, %v33308_v30  ;;  %v33319_v30 = vld [vmem:[#allocation45_spill] sm:$0xff]  ;;  %v33320_v51 = vld [vmem:[#allocation46_spill] sm:$0xff] }
 0x2a2   : > { %33304 = vst [vmem:[#allocation64_spill] sm:$0xff] %v27513_v28  ;;  %33305 = vst [vmem:[#allocation17_spill] sm:$0xff] %v27518_v16  ;;  %23006 = vmatpush3.bf16.msra.mxu0 %v27504_v48  ;;  %v33311_v9 = vld [vmem:[#allocation41_spill] sm:$0xff]  ;;  %v33312_v16 = vld [vmem:[#allocation91_spill] sm:$0xff] }
 0x2a3   : > { %23019 = vmatprep.subr.bf16.mxu0 %v33044_v37  ;;  %23014 = vmatpush3.bf16.msra.mxu1 %v27504_v48  ;;  %v27525_v4 = vpop.f32.mrf.mxu0  ;;  %v27529_v53 = vpop.f32.mrf.mxu1 }
 0x2a4   : > { %23027 = vmatprep.subr.bf16.mxu1 %v33044_v37  ;;  %v3067_v37 = vadd.f32 %v33312_v16, %v33311_v9  ;;  %v3187_v16 = vadd.f32 %v27061_v33, %v33319_v30  ;;  %v33323_v9 = vld [vmem:[#allocation47_spill] sm:$0xff] }
 0x2ad   : > { %v22725_v39 = vpop.f32.mrf.mxu0  ;;  %v22737_v44 = vpop.f32.mrf.mxu1 }
 0x2ae   : > { %v27535_v36 = vadd.f32 %v22725_v39, %v3019_v5  ;;  %v27539_v28 = vadd.f32 %v22737_v44, %v3075_v6  ;;  %v3131_v5 = vadd.f32 %v27057_v46, %v33317_v58  ;;  %v33321_v44 = vld [vmem:[#allocation94_spill] sm:$0xff] }
 0x2af   : > { %v4326_v1 = vpop.f32.mrf.mxu0  ;;  %v4388_v25 = vpop.f32.mrf.mxu1 }
 0x2b0   : > { %33310 = vst [vmem:[#allocation65_spill] sm:$0xff] %v27535_v36  ;;  %33313 = vst [vmem:[#allocation68_spill] sm:$0xff] %v27539_v28  ;;  %v27541_v23 = vadd.f32 %v4326_v1, %v3011_v20  ;;  %v27543_v35 = vadd.f32 %v4388_v25, %v3067_v37  ;;  %v3123_v1 = vadd.f32 %v33321_v44, %v33320_v51 }
 0x2b1   : > { %v22726_v22 = vpop.f32.mrf.mxu0  ;;  %v22738_v45 = vpop.f32.mrf.mxu1 }
 0x2b2   : > { %33314 = vst [vmem:[#allocation70_spill] sm:$0xff] %v27541_v23  ;;  %33315 = vst [vmem:[#allocation20_spill] sm:$0xff] %v27543_v35  ;;  %v33324_v22 = vld [vmem:[#allocation95_spill] sm:$0xff] }
 0x2b3   : > { %v27545_v19 = vpop.f32.mrf.mxu0  ;;  %v27549_v39 = vpop.f32.mrf.mxu1  ;;  %v3179_v25 = vadd.f32 %v33324_v22, %v33323_v9 }
 0x2b4   : > { %33316 = vst [vmem:[#allocation69_spill] sm:$0xff] %v27545_v19  ;;  %33318 = vst [vmem:[#allocation21_spill] sm:$0xff] %v27549_v39 }
 0x2bd   : > { %v22749_v6 = vpop.f32.mrf.mxu0  ;;  %v22761_v37 = vpop.f32.mrf.mxu1 }
 0x2be   : > { %v27555_v20 = vadd.f32 %v22749_v6, %v3131_v5  ;;  %v27559_v45 = vadd.f32 %v22761_v37, %v3187_v16  ;;  %v27572_v6 = vld [vmem:[%s33022_s2] ss:$0 sm:$0xff]  ;;  %v33331_v37 = vld [vmem:[#allocation50_spill] sm:$0xff] }
 0x2bf   : > { %v4450_v35 = vpop.f32.mrf.mxu0  ;;  %v4512_v46 = vpop.f32.mrf.mxu1 }
 0x2c0   : > { %33322 = vst [vmem:[#allocation71_spill] sm:$0xff] %v27555_v20  ;;  %33325 = vst [vmem:[#allocation22_spill] sm:$0xff] %v27559_v45  ;;  %v27561_v23 = vadd.f32 %v4450_v35, %v3123_v1  ;;  %v27563_v58 = vadd.f32 %v4512_v46, %v3179_v25  ;;  %v33330_v1 = vld [vmem:[#allocation6_spill] sm:$0xff]  ;;  %v33332_v46 = vld [vmem:[#allocation5_spill] sm:$0xff] }
 0x2c1   : > { %v22750_v28 = vpop.f32.mrf.mxu0  ;;  %v22762_v33 = vpop.f32.mrf.mxu1 }
 0x2c2   : > { %33326 = vst [vmem:[#allocation72_spill] sm:$0xff] %v27561_v23  ;;  %33327 = vst [vmem:[#allocation23_spill] sm:$0xff] %v27563_v58  ;;  %v2118_v28 = vadd.f32 %v33331_v37, %v33330_v1  ;;  %v33333_v33 = vld [vmem:[#allocation51_spill] sm:$0xff] }
 0x2c3   : > { %v27565_v30 = vpop.f32.mrf.mxu0  ;;  %v27567_v36 = vpop.f32.mrf.mxu1  ;;  %v2174_v58 = vadd.f32 %v33333_v33, %v33332_v46 }
 0x2c4   : > { %33328 = vst [vmem:[#allocation73_spill] sm:$0xff] %v27565_v30  ;;  %33329 = vst [vmem:[#allocation76_spill] sm:$0xff] %v27567_v36  ;;  %v33337_v36 = vld [vmem:[#allocation52_spill] sm:$0xff] }
 0x2cd   : > { %v22773_v5 = vpop.f32.mrf.mxu0  ;;  %v22785_v51 = vpop.f32.mrf.mxu1 }
 0x2ce   : > { %v6061_v16 = vadd.f32 %v22773_v5, %v27113_v34  ;;  %v6064_v35 = vadd.f32 %v22785_v51, %v27120_v62  ;;  %v4527_v5 = vadd.f32 %v27154_v21, %v2118_v28 }
 0x2cf   : > { %v4696_v44 = vpop.f32.mrf.mxu0  ;;  %v4767_v25 = vpop.f32.mrf.mxu1 }
 0x2d0   : > { %v6128_v9 = vadd.f32 %v27572_v6, %v6061_v16  ;;  %v6059_v22 = vadd.f32 %v4696_v44, %v27124_v54  ;;  %v6131_v23 = vadd.f32 %v27572_v6, %v6064_v35  ;;  %v6062_v45 = vadd.f32 %v4767_v25, %v27128_v55 }
 0x2d1   : > { %v22774_v34 = vpop.f32.mrf.mxu0  ;;  %v22786_v1 = vpop.f32.mrf.mxu1  ;;  %v4530_v16 = vadd.f32 %v27160_v15, %v2174_v58 }
 0x2d2   : > { %v27585_v62 = vmax.f32 %v6128_v9, 0.0  ;;  %v6126_v51 = vadd.f32 %v27572_v6, %v6059_v22  ;;  %v27589_v54 = vmax.f32 %v6131_v23, 0.0  ;;  %v6129_v44 = vadd.f32 %v27572_v6, %v6062_v45 }
 0x2d3   : > { %v4699_v37 = vpop.f32.mrf.mxu0  ;;  %v4770_v21 = vpop.f32.mrf.mxu1 }
 0x2d4   : > { %33334 = vst [vmem:[#allocation78_spill] sm:$0xff] %v27589_v54  ;;  %v33046_v35 = vrot.slane %v27585_v62, 1  ;;  %v6833_v55 = vrot.slane %v27585_v62, 2  ;;  %v6186_v25 = vmax.f32 %v6126_v51, 0.0  ;;  %v33047_v28 = vrot.slane %v27589_v54, 1 }
 0x2d5   : > { %v6834_v9 = vrot.slane %v27589_v54, 2  ;;  %v27596_v22 = vmax.f32 %v6129_v44, 0.0  ;;  %v6060_v58 = vadd.f32 %v4699_v37, %v4527_v5  ;;  %v6063_v51 = vadd.f32 %v4770_v21, %v4530_v16 }
 0x2d6   : > { %v27601_v15 = vsel %vm6626_vm3, %v33046_v35, %v6833_v55  ;;  %v6266_v23 = vrot.slane %v6186_v25, 1  ;;  %v6306_v45 = vrot.slane %v6186_v25, 2  ;;  %v6346_v33 = vrot.slane %v6186_v25, 3  ;;  %v33336_v35 = vld [vmem:[#allocation8_spill] sm:$0xff] }
 0x2d7   : > { %v27606_v46 = vsel %vm6626_vm3, %v33047_v28, %v6834_v9  ;;  %v6793_v34 = vrot.slane %v6186_v25, 4  ;;  %v33052_v20 = vrot.slane %v27596_v22, 1  ;;  %v33050_v55 = vrot.slane %v27596_v22, 2  ;;  %v33338_v9 = vld [vmem:[#allocation7_spill] sm:$0xff]  ;;  %v33339_v28 = vld [vmem:[#allocation53_spill] sm:$0xff] }
 0x2d8   : > { %33335 = vst [vmem:[#allocation26_spill] sm:$0xff] %v27606_v46  ;;  %v6627_v1 = vsel %vm6626_vm3, %v6186_v25, %v6266_v23  ;;  %v6873_v44 = vsel %vm6626_vm3, %v6266_v23, %v6306_v45  ;;  %v2230_v30 = vadd.f32 %v33337_v36, %v33336_v35  ;;  %v33051_v37 = vrot.slane %v27596_v22, 3 }
 0x2d9   : > { %v6893_v5 = vsel %vm6647_vm4, %v6873_v44, %v6346_v33  ;;  %v2286_v46 = vadd.f32 %v33339_v28, %v33338_v9  ;;  %v6794_v25 = vrot.slane %v27596_v22, 4  ;;  %v6874_v21 = vsel %vm6626_vm3, %v33052_v20, %v33050_v55 }
 0x2da   : > { %v6913_v16 = vsel %vm6668_vm5, %v6893_v5, %v6793_v34  ;;  %v6648_v23 = vsel %vm6647_vm4, %v6627_v1, %v6306_v45  ;;  %v6894_v36 = vsel %vm6647_vm4, %v6874_v21, %v33051_v37  ;;  %v6127_v35 = vadd.f32 %v27572_v6, %v6060_v58 }
 0x2db   : > { %v6130_v28 = vadd.f32 %v27572_v6, %v6063_v51  ;;  %v6914_v34 = vsel %vm6668_vm5, %v6894_v36, %v6794_v25  ;;  %v4533_v44 = vadd.f32 %v27210_v8, %v2230_v30  ;;  %v4536_v5 = vadd.f32 %v27216_v47, %v2286_v46 }
 0x2dc   : > { %v6187_v9 = vmax.f32 %v6127_v35, 0.0  ;;  %v6669_v45 = vsel %vm6668_vm5, %v6648_v23, %v6346_v33 }
 0x2dd   : > { %v27634_v54 = vmax.f32 %v6130_v28, 0.0  ;;  %v22797_v55 = vpop.f32.mrf.mxu0  ;;  %v22809_v21 = vpop.f32.mrf.mxu1 }
 0x2de   : > { %v6067_v1 = vadd.f32 %v22797_v55, %v27169_v38  ;;  %v6406_v58 = vrot.slane %v6187_v9, 4  ;;  %v6446_v37 = vrot.slane %v6187_v9, 5  ;;  %v6486_v51 = vrot.slane %v6187_v9, 6 }
 0x2df   : > { %33340 = vst [vmem:[#allocation77_spill] sm:$0xff] %v27634_v54  ;;  %v4838_v25 = vpop.f32.mrf.mxu0  ;;  %v6526_v36 = vrot.slane %v6187_v9, 7  ;;  %v33054_v8 = vrot.slane %v27634_v54, 5  ;;  %v4909_v30 = vpop.f32.mrf.mxu1  ;;  %v6070_v38 = vadd.f32 %v22809_v21, %v27176_v0  ;;  %v33053_v20 = vrot.slane %v27634_v54, 7 }
 0x2e0   : > { %v6690_v46 = vsel %vm6689_vm6, %v6669_v45, %v6406_v58  ;;  %v6933_v33 = vsel %vm6689_vm6, %v6913_v16, %v6446_v37  ;;  %v6134_v23 = vadd.f32 %v27572_v6, %v6067_v1  ;;  %v33341_v45 = vrot.slane %v27585_v62, 1 }
 0x2e1   : > { %v22798_v55 = vpop.f32.mrf.mxu0  ;;  %v6711_v35 = vsel %vm6710_vm7, %v6690_v46, %v6446_v37  ;;  %v6953_v28 = vsel %vm6710_vm7, %v6933_v33, %v6486_v51  ;;  %v6934_v47 = vsel %vm6689_vm6, %v6914_v34, %v33054_v8  ;;  %v22810_v59 = vpop.f32.mrf.mxu1  ;;  %v33342_v37 = vrot.slane %v27634_v54, 6 }
 0x2e2   : > { %v6773_v16 = vsel %vm6626_vm3, %v27585_v62, %v33341_v45  ;;  %v6732_v1 = vsel %vm6731_vm8, %v6711_v35, %v6486_v51  ;;  %v6973_v0 = vsel %vm6731_vm8, %v6953_v28, %v6526_v36  ;;  %v27664_v34 = vmax.f32 %v6134_v23, 0.0  ;;  %v33345_v23 = vld [vmem:[#allocation10_spill] sm:$0xff] }
 0x2e3   : > { %v6954_v21 = vsel %vm6710_vm7, %v6934_v47, %v33342_v37  ;;  %v4841_v58 = vpop.f32.mrf.mxu0  ;;  %v6753_v46 = vsel %vm6752_vm9, %v6732_v1, %v6526_v36  ;;  %v6993_v33 = vsel %vm6752_vm9, %v6973_v0, %v6187_v9  ;;  %v4912_v62 = vpop.f32.mrf.mxu1  ;;  %v6137_v47 = vadd.f32 %v27572_v6, %v6070_v38  ;;  %v33346_v1 = vld [vmem:[#allocation54_spill] sm:$0xff] }
 0x2e4   : > { %v6974_v59 = vsel %vm6731_vm8, %v6954_v21, %v33053_v20  ;;  %v27666_v55 = vpack.c.bf16 %v6773_v16, %v6753_v46  ;;  %v6065_v35 = vadd.f32 %v4838_v25, %v27180_v13  ;;  %v33056_v36 = vrot.slane %v27664_v34, 1  ;;  %v33348_v46 = vld [vmem:[#allocation9_spill] sm:$0xff] }
 0x2e5   : > { %v27670_v51 = vsel %vm6752_vm9, %v6974_v59, %v27634_v54  ;;  %v6835_v9 = vrot.slane %v27664_v34, 2  ;;  %v6068_v28 = vadd.f32 %v4909_v30, %v27184_v31  ;;  %v6066_v45 = vadd.f32 %v4841_v58, %v4533_v44  ;;  %v33349_v59 = vld [vmem:[#allocation55_spill] sm:$0xff]  ;;  %v33350_v25 = vld [vmem:[#allocation13_spill] sm:$0xff]  ;;  %v33351_v30 = vld [vmem:[#allocation58_spill] sm:$0xff] }
 0x2e6   : > { %33343 = vst [vmem:[#allocation27_spill] sm:$0xff] %v27666_v55  ;;  %33344 = vst [vmem:[#allocation79_spill] sm:$0xff] %v27670_v51  ;;  %v2342_v0 = vadd.f32 %v33346_v1, %v33345_v23  ;;  %v27679_v16 = vmax.f32 %v6137_v47, 0.0  ;;  %v6132_v37 = vadd.f32 %v27572_v6, %v6065_v35  ;;  %v6069_v21 = vadd.f32 %v4912_v62, %v4536_v5  ;;  %v33352_v35 = vld [vmem:[#allocation12_spill] sm:$0xff]  ;;  %v33353_v23 = vld [vmem:[#allocation59_spill] sm:$0xff] }
 0x2e7   : > { %v27684_v38 = vadd.f32 %v33349_v59, %v33348_v46  ;;  %v27689_v13 = vsel %vm6626_vm3, %v33056_v36, %v6835_v9  ;;  %v6135_v31 = vadd.f32 %v27572_v6, %v6068_v28  ;;  %v6133_v44 = vadd.f32 %v27572_v6, %v6066_v45 }
 0x2e8   : > { %33347 = vst [vmem:[#allocation28_spill] sm:$0xff] %v27679_v16  ;;  %v27695_v58 = vadd.f32 %v33351_v30, %v33350_v25  ;;  %v33055_v47 = vrot.slane %v27679_v16, 1  ;;  %v6836_v5 = vrot.slane %v27679_v16, 2  ;;  %v6192_v62 = vmax.f32 %v6132_v37, 0.0 }
 0x2e9   : > { %v27701_v1 = vadd.f32 %v33353_v23, %v33352_v35  ;;  %v27703_v46 = vmax.f32 %v6135_v31, 0.0  ;;  %v6136_v9 = vadd.f32 %v27572_v6, %v6069_v21  ;;  %v27707_v28 = vpack.c.bf16 %v27601_v15, %v6993_v33 }
 0x2ea   : > { %v27712_v45 = vsel %vm6626_vm3, %v33055_v47, %v6836_v5  ;;  %v6268_v59 = vrot.slane %v6192_v62, 1  ;;  %v6308_v25 = vrot.slane %v6192_v62, 2  ;;  %v6193_v30 = vmax.f32 %v6133_v44, 0.0 }
 0x2eb   : > { %33354 = vst [vmem:[#allocation80_spill] sm:$0xff] %v27703_v46  ;;  %33355 = vst [vmem:[#allocation29_spill] sm:$0xff] %v27707_v28  ;;  %v6348_v37 = vrot.slane %v6192_v62, 3  ;;  %v33063_v20 = vrot.slane %v27703_v46, 1  ;;  %v33062_v35 = vrot.slane %v27703_v46, 2  ;;  %v7085_v31 = vshll.u32 %v27666_v55, 16 }
 0x2ec   : > { %33356 = vst [vmem:[#allocation81_spill] sm:$0xff] %v27712_v45  ;;  %v6629_v21 = vsel %vm6626_vm3, %v6192_v62, %v6268_v59  ;;  %v6795_v23 = vrot.slane %v6192_v62, 4  ;;  %v6875_v15 = vsel %vm6626_vm3, %v6268_v59, %v6308_v25  ;;  %v6796_v44 = vrot.slane %v27703_v46, 4 }
 0x2ed   : > { %v22821_v8 = vpop.f32.mrf.mxu0  ;;  %v6650_v5 = vsel %vm6647_vm4, %v6629_v21, %v6308_v25  ;;  %v6895_v47 = vsel %vm6647_vm4, %v6875_v15, %v6348_v37  ;;  %v6876_v36 = vsel %vm6626_vm3, %v33063_v20, %v33062_v35  ;;  %v22833_v28 = vpop.f32.mrf.mxu1  ;;  %v4539_v62 = vadd.f32 %v27266_v49, %v2342_v0 }
 0x2ee   : > { %v6671_v59 = vsel %vm6668_vm5, %v6650_v5, %v6348_v37  ;;  %v6915_v33 = vsel %vm6668_vm5, %v6895_v47, %v6795_v23  ;;  %v33357_v51 = vrot.slane %v27703_v46, 3  ;;  %v6408_v45 = vrot.slane %v6193_v30, 4 }
 0x2ef   : > { %v4980_v21 = vpop.f32.mrf.mxu0  ;;  %v6448_v16 = vrot.slane %v6193_v30, 5  ;;  %v5051_v50 = vpop.f32.mrf.mxu1  ;;  %v6488_v54 = vrot.slane %v6193_v30, 6  ;;  %v6528_v35 = vrot.slane %v6193_v30, 7  ;;  %v27735_v20 = vmax.f32 %v6136_v9, 0.0 }
 0x2f0   : > { %v6896_v25 = vsel %vm6647_vm4, %v6876_v36, %v33357_v51  ;;  %v7083_v49 = vshrl.u32 %v27666_v55, 16  ;;  %v6692_v47 = vsel %vm6689_vm6, %v6671_v59, %v6408_v45  ;;  %v7087_v23 = vrot.slane %v7085_v31, 1 }
 0x2f1   : > { %v6916_v15 = vsel %vm6668_vm5, %v6896_v25, %v6796_v44  ;;  %33358 = vst [vmem:[#allocation32_spill] sm:$0xff] %v27735_v20  ;;  %v22822_v0 = vpop.f32.mrf.mxu0  ;;  %v6935_v37 = vsel %vm6689_vm6, %v6915_v33, %v6448_v16  ;;  %v6076_v51 = vadd.f32 %v22833_v28, %v27232_v24  ;;  %v22834_v36 = vpop.f32.mrf.mxu1  ;;  %v6713_v5 = vsel %vm6710_vm7, %v6692_v47, %v6448_v16 }
 0x2f2   : > { %v6955_v44 = vsel %vm6710_vm7, %v6935_v37, %v6488_v54  ;;  %v33069_v25 = vrot.slane %v27735_v20, 5  ;;  %v6073_v9 = vadd.f32 %v22821_v8, %v27225_v7  ;;  %v33359_v46 = vrot.slane %v27664_v34, 1 }
 0x2f3   : > { %v6734_v45 = vsel %vm6731_vm8, %v6713_v5, %v6488_v54  ;;  %v6975_v31 = vsel %vm6731_vm8, %v6955_v44, %v6528_v35  ;;  %v33067_v24 = vrot.slane %v27735_v20, 6  ;;  %v33066_v33 = vrot.slane %v27735_v20, 7  ;;  %v4983_v8 = vpop.f32.mrf.mxu0  ;;  %v5054_v59 = vpop.f32.mrf.mxu1  ;;  %v33363_v5 = vld [vmem:[#allocation66_spill] sm:$0xff] }
 0x2f4   : > { %v6775_v0 = vsel %vm6626_vm3, %v27664_v34, %v33359_v46  ;;  %v6755_v28 = vsel %vm6752_vm9, %v6734_v45, %v6528_v35  ;;  %v27754_v16 = vsel %vm6752_vm9, %v6975_v31, %v6193_v30  ;;  %v6936_v7 = vsel %vm6689_vm6, %v6916_v15, %v33069_v25  ;;  %v33367_v45 = vld [vmem:[#allocation67_spill] sm:$0xff] }
 0x2f5   : > { %v4542_v54 = vadd.f32 %v27272_v3, %v27684_v38  ;;  %v27762_v34 = vpack.c.bf16 %v6775_v0, %v6755_v28  ;;  %v6956_v46 = vsel %vm6710_vm7, %v6936_v7, %v33067_v24  ;;  %v7088_v35 = vor.u32 %v7087_v23, %v7083_v49  ;;  %v33362_v23 = vld [vmem:[#allocation19_spill] sm:$0xff] }
 0x2f6   : > { %v6976_v30 = vsel %vm6731_vm8, %v6956_v46, %v33066_v33  ;;  %v6140_v47 = vadd.f32 %v27572_v6, %v6073_v9  ;;  %v6143_v15 = vadd.f32 %v27572_v6, %v6076_v51  ;;  %v6071_v37 = vadd.f32 %v4980_v21, %v27236_v29  ;;  %v33366_v51 = vld [vmem:[#allocation18_spill] sm:$0xff] }
 0x2f7   : > { %33360 = vst [vmem:[#allocation84_spill] sm:$0xff] %v27762_v34  ;;  %v27775_v3 = vsel %vm6752_vm9, %v6976_v30, %v27735_v20  ;;  %23008 = vmatmul.mubr.msk.bf16.vlgmr.msra.gmra.mxu0 %vm7101_vm10, %v7088_v35  ;;  %v6074_v38 = vadd.f32 %v5051_v50, %v27240_v14  ;;  %v6072_v36 = vadd.f32 %v4983_v8, %v4539_v62  ;;  %v33365_v21 = vmov 0.0   ;;  %v33369_v46 = vld [vmem:[#allocation74_spill] sm:$0xff] }
 0x2f8   : > { %33361 = vst [vmem:[#allocation33_spill] sm:$0xff] %v27775_v3  ;;  %v6075_v49 = vadd.f32 %v5054_v59, %v4542_v54  ;;  %v27781_v44 = vadd.f32 %v33363_v5, %v33362_v23  ;;  %v27783_v0 = vmax.f32 %v6140_v47, 0.0  ;;  %v27785_v9 = vmax.f32 %v6143_v15, 0.0  ;;  %23020 = vmatpush3.bf16.msra.mxu0 %v27481_v42  ;;  %23023 = vmatprep.mubr.msk.bf16.mxu0 %vm25474_vm2, %v33365_v21  ;;  %v33368_v54 = vld [vmem:[#allocation25_spill] sm:$0xff]  ;;  %v33373_v23 = vld [vmem:[#allocation82_spill] sm:$0xff] }
 0x2f9   : > { %v6138_v29 = vadd.f32 %v27572_v6, %v6071_v37  ;;  %v27793_v14 = vadd.f32 %v33367_v45, %v33366_v51  ;;  %v6141_v50 = vadd.f32 %v27572_v6, %v6074_v38  ;;  %v6139_v62 = vadd.f32 %v27572_v6, %v6072_v36  ;;  %23021 = vmatprep.subr.bf16.mxu0 %v33365_v21  ;;  %v33370_v37 = vld [vmem:[#allocation24_spill] sm:$0xff]  ;;  %v33371_v38 = vld [vmem:[#allocation75_spill] sm:$0xff] }
 0x2fa   : > { %33364 = vst [vmem:[#allocation85_spill] sm:$0xff] %v27785_v9  ;;  %v6142_v31 = vadd.f32 %v27572_v6, %v6075_v49  ;;  %v6590_v28 = vrot.slane %v27783_v0, 1  ;;  %v6837_v7 = vrot.slane %v27783_v0, 2  ;;  %v33068_v8 = vrot.slane %v27785_v9, 1  ;;  %v33372_v49 = vld [vmem:[#allocation31_spill] sm:$0xff] }
 0x2fb   : > { %v6838_v59 = vrot.slane %v27785_v9, 2  ;;  %v27805_v35 = vadd.f32 %v33369_v46, %v33368_v54  ;;  %v6198_v30 = vmax.f32 %v6138_v29, 0.0  ;;  %v27807_v47 = vmax.f32 %v6141_v50, 0.0 }
 0x2fc   : > { %v6199_v15 = vmax.f32 %v6139_v62, 0.0  ;;  %v27811_v36 = vadd.f32 %v33371_v38, %v33370_v37  ;;  %v27815_v5 = vadd.f32 %v33373_v23, %v33372_v49  ;;  %v27818_v51 = vsel %vm6626_vm3, %v6590_v28, %v6837_v7  ;;  %23022 = vmatpush3.bf16.msra.mxu0 %v27504_v48 }
 0x2fd   : > { %33374 = vst [vmem:[#allocation34_spill] sm:$0xff] %v27818_v51  ;;  %v27823_v45 = vsel %vm6626_vm3, %v33068_v8, %v6838_v59  ;;  %v22845_v29 = vpop.f32.mrf.mxu0  ;;  %v6270_v50 = vrot.slane %v6198_v30, 1  ;;  %v6310_v62 = vrot.slane %v6198_v30, 2  ;;  %v6350_v54 = vrot.slane %v6198_v30, 3  ;;  %v22857_v37 = vpop.f32.mrf.mxu1  ;;  %23035 = vmatprep.subr.bf16.mxu0 %v33365_v21 }
 0x2fe   : > { %33375 = vst [vmem:[#allocation86_spill] sm:$0xff] %v27823_v45  ;;  %v27826_v46 = vmax.f32 %v6142_v31, 0.0  ;;  %v6797_v38 = vrot.slane %v6198_v30, 4  ;;  %v33079_v7 = vrot.slane %v27807_v47, 1  ;;  %v33075_v49 = vrot.slane %v27807_v47, 2 }
 0x2ff   : > { %v5122_v59 = vpop.f32.mrf.mxu0  ;;  %v6631_v33 = vsel %vm6626_vm3, %v6198_v30, %v6270_v50  ;;  %v6877_v24 = vsel %vm6626_vm3, %v6270_v50, %v6310_v62  ;;  %v6410_v8 = vrot.slane %v6199_v15, 4  ;;  %v6450_v25 = vrot.slane %v6199_v15, 5  ;;  %v5193_v45 = vpop.f32.mrf.mxu1 }
 0x300   : > { %v6652_v31 = vsel %vm6647_vm4, %v6631_v33, %v6310_v62  ;;  %v6897_v3 = vsel %vm6647_vm4, %v6877_v24, %v6350_v54  ;;  %v6798_v9 = vrot.slane %v27807_v47, 4  ;;  %v6878_v23 = vsel %vm6626_vm3, %v33079_v7, %v33075_v49 }
 0x301   : > { %v22846_v51 = vpop.f32.mrf.mxu0  ;;  %v4545_v30 = vadd.f32 %v27322_v17, %v27695_v58  ;;  %v6673_v50 = vsel %vm6668_vm5, %v6652_v31, %v6350_v54  ;;  %v6917_v55 = vsel %vm6668_vm5, %v6897_v3, %v6797_v38  ;;  %v33376_v33 = vrot.slane %v27807_v47, 3  ;;  %v22858_v62 = vpop.f32.mrf.mxu1 }
 0x302   : > { %v4548_v20 = vadd.f32 %v27328_v40, %v27701_v1  ;;  %v6490_v19 = vrot.slane %v6199_v15, 6  ;;  %v7149_v51 = vshll.u32 %v27762_v34, 16  ;;  %v6530_v49 = vrot.slane %v6199_v15, 7 }
 0x303   : > { %v6898_v24 = vsel %vm6647_vm4, %v6878_v23, %v33376_v33  ;;  %v6694_v17 = vsel %vm6689_vm6, %v6673_v50, %v6410_v8  ;;  %v6937_v58 = vsel %vm6689_vm6, %v6917_v55, %v6450_v25  ;;  %v33078_v3 = vrot.slane %v27826_v46, 5  ;;  %v5125_v33 = vpop.f32.mrf.mxu0 }
 0x304   : > { %v6918_v39 = vsel %vm6668_vm5, %v6898_v24, %v6798_v9  ;;  %v6715_v54 = vsel %vm6710_vm7, %v6694_v17, %v6450_v25  ;;  %v6957_v38 = vsel %vm6710_vm7, %v6937_v58, %v6490_v19  ;;  %v33077_v23 = vrot.slane %v27826_v46, 6  ;;  %v5196_v24 = vpop.f32.mrf.mxu1 }
 0x305   : > { %v7147_v40 = vshrl.u32 %v27762_v34, 16  ;;  %v6736_v1 = vsel %vm6731_vm8, %v6715_v54, %v6490_v19  ;;  %v6977_v9 = vsel %vm6731_vm8, %v6957_v38, %v6530_v49  ;;  %v33076_v31 = vrot.slane %v27826_v46, 7 }
 0x306   : > { %v6938_v55 = vsel %vm6689_vm6, %v6918_v39, %v33078_v3  ;;  %v6777_v8 = vsel %vm6626_vm3, %v27783_v0, %v6590_v28  ;;  %v6757_v25 = vsel %vm6752_vm9, %v6736_v1, %v6530_v49  ;;  %v27870_v50 = vsel %vm6752_vm9, %v6977_v9, %v6199_v15 }
 0x307   : > { %v6958_v19 = vsel %vm6710_vm7, %v6938_v55, %v33077_v23  ;;  %v27875_v62 = vpack.c.bf16 %v6777_v8, %v6757_v25  ;;  %v7151_v17 = vrot.slane %v7149_v51, 1  ;;  %v6079_v0 = vadd.f32 %v22845_v29, %v27281_v52  ;;  %v33379_v55 = vld [vmem:[#allocation30_spill] sm:$0xff]  ;;  %v33380_v51 = vld [vmem:[#allocation83_spill] sm:$0xff] }
 0x308   : > { %v6978_v39 = vsel %vm6731_vm8, %v6958_v19, %v33076_v31  ;;  %v6082_v15 = vadd.f32 %v22857_v37, %v27288_v27  ;;  %v6077_v49 = vadd.f32 %v5122_v59, %v27292_v18  ;;  %v6080_v58 = vadd.f32 %v5193_v45, %v27296_v11  ;;  %v33381_v37 = vld [vmem:[#allocation37_spill] sm:$0xff]  ;;  %v33382_v18 = vld [vmem:[#allocation88_spill] sm:$0xff]  ;;  %v33385_v25 = vld [vmem:[#allocation43_spill] sm:$0xff] }
 0x309   : > { %v27883_v28 = vsel %vm6752_vm9, %v6978_v39, %v27826_v46  ;;  %v27888_v54 = vor.u32 %v7151_v17, %v7147_v40  ;;  %v6146_v38 = vadd.f32 %v27572_v6, %v6079_v0  ;;  %v6078_v1 = vadd.f32 %v5125_v33, %v4545_v30  ;;  %v33383_v11 = vld [vmem:[#allocation36_spill] sm:$0xff]  ;;  %v33384_v45 = vld [vmem:[#allocation89_spill] sm:$0xff] }
 0x30a   : > { %33377 = vst [vmem:[#allocation35_spill] sm:$0xff] %v27883_v28  ;;  %v6081_v9 = vadd.f32 %v5196_v24, %v4548_v20  ;;  %v27893_v8 = vadd.f32 %v33380_v51, %v33379_v55  ;;  %v6149_v52 = vadd.f32 %v27572_v6, %v6082_v15  ;;  %v6144_v29 = vadd.f32 %v27572_v6, %v6077_v49  ;;  %v33386_v19 = vld [vmem:[#allocation92_spill] sm:$0xff] }
 0x30b   : > { %33378 = vst [vmem:[#allocation87_spill] sm:$0xff] %v27888_v54  ;;  %v6147_v27 = vadd.f32 %v27572_v6, %v6080_v58  ;;  %v27900_v59 = vadd.f32 %v33382_v18, %v33381_v37  ;;  %v27904_v40 = vadd.f32 %v33384_v45, %v33383_v11  ;;  %23016 = vmatmul.mubr.msk.bf16.vlgmr.msra.gmra.mxu1 %vm7101_vm10, %v27888_v54  ;;  %v6206_v20 = vmax.f32 %v6146_v38, 0.0  ;;  %v33389_v18 = vld [vmem:[#allocation42_spill] sm:$0xff]  ;;  %v33390_v11 = vld [vmem:[#allocation93_spill] sm:$0xff] }
 0x30c   : > { %v6145_v30 = vadd.f32 %v27572_v6, %v6078_v1  ;;  %v27911_v33 = vadd.f32 %v33386_v19, %v33385_v25  ;;  %v27913_v24 = vmax.f32 %v6149_v52, 0.0  ;;  %v6204_v39 = vmax.f32 %v6144_v29, 0.0  ;;  %23028 = vmatpush3.bf16.msra.mxu1 %v27481_v42  ;;  %23031 = vmatprep.mubr.msk.bf16.mxu1 %vm25474_vm2, %v33365_v21 }
 0x30d   : > { %v27915_v17 = vpop.f32.mrf.mxu0  ;;  %v27922_v0 = vpack.c.bf16 %v27689_v13, %v27754_v16  ;;  %v6592_v15 = vrot.slane %v6206_v20, 1  ;;  %v6839_v49 = vrot.slane %v6206_v20, 2  ;;  %v27924_v58 = vmax.f32 %v6147_v27, 0.0  ;;  %v22881_v1 = vpop.f32.mrf.mxu1  ;;  %23029 = vmatprep.subr.bf16.mxu1 %v33365_v21 }
 0x30e   : > { %33387 = vst [vmem:[#allocation38_spill] sm:$0xff] %v27913_v24  ;;  %v6148_v38 = vadd.f32 %v27572_v6, %v6081_v9  ;;  %v33080_v55 = vrot.slane %v27913_v24, 1  ;;  %v6840_v51 = vrot.slane %v27913_v24, 2  ;;  %v6272_v52 = vrot.slane %v6204_v39, 1 }
 0x30f   : > { %33388 = vst [vmem:[#allocation39_spill] sm:$0xff] %v27922_v0  ;;  %v6312_v29 = vrot.slane %v6204_v39, 2  ;;  %v5264_v37 = vpop.f32.mrf.mxu0  ;;  %v27932_v13 = vadd.f32 %v33390_v11, %v33389_v18  ;;  %v27935_v16 = vsel %vm6626_vm3, %v6592_v15, %v6839_v49  ;;  %v6352_v27 = vrot.slane %v6204_v39, 3  ;;  %v5335_v9 = vpop.f32.mrf.mxu1 }
 0x310   : > { %v6205_v45 = vmax.f32 %v6145_v30, 0.0  ;;  %v27940_v25 = vsel %vm6626_vm3, %v33080_v55, %v6840_v51  ;;  %v6633_v19 = vsel %vm6626_vm3, %v6204_v39, %v6272_v52  ;;  %v6799_v31 = vrot.slane %v6204_v39, 4  ;;  %23030 = vmatpush3.bf16.msra.mxu1 %v27504_v48 }
 0x311   : > { %33391 = vst [vmem:[#allocation40_spill] sm:$0xff] %v27940_v25  ;;  %v6879_v23 = vsel %vm6626_vm3, %v6272_v52, %v6312_v29  ;;  %v22870_v3 = vpop.f32.mrf.mxu0  ;;  %v6654_v18 = vsel %vm6647_vm4, %v6633_v19, %v6312_v29  ;;  %v33084_v30 = vrot.slane %v27924_v58, 1  ;;  %v33083_v11 = vrot.slane %v27924_v58, 2  ;;  %v22882_v7 = vpop.f32.mrf.mxu1  ;;  %23043 = vmatprep.subr.bf16.mxu1 %v33365_v21 }
 0x312   : > { %v6899_v49 = vsel %vm6647_vm4, %v6879_v23, %v6352_v27  ;;  %v6675_v51 = vsel %vm6668_vm5, %v6654_v18, %v6352_v27  ;;  %v33085_v52 = vrot.slane %v27924_v58, 3  ;;  %v27953_v3 = vmax.f32 %v6148_v38, 0.0 }
 0x313   : > { %v6919_v39 = vsel %vm6668_vm5, %v6899_v49, %v6799_v31  ;;  %v6800_v55 = vrot.slane %v27924_v58, 4  ;;  %v6880_v23 = vsel %vm6626_vm3, %v33084_v30, %v33083_v11  ;;  %v6412_v29 = vrot.slane %v6205_v45, 4 }
 0x314   : > { %v6452_v7 = vrot.slane %v6205_v45, 5  ;;  %v4551_v19 = vadd.f32 %v27378_v61, %v27781_v44  ;;  %v6900_v31 = vsel %vm6647_vm4, %v6880_v23, %v33085_v52  ;;  %v6492_v27 = vrot.slane %v6205_v45, 6 }
 0x315   : > { %v7200_v38 = vshll.u32 %v27875_v62, 16  ;;  %v6920_v18 = vsel %vm6668_vm5, %v6900_v31, %v6800_v55  ;;  %v6532_v49 = vrot.slane %v6205_v45, 7  ;;  %v6696_v0 = vsel %vm6689_vm6, %v6675_v51, %v6412_v29 }
 0x316   : > { %v6939_v54 = vsel %vm6689_vm6, %v6919_v39, %v6452_v7  ;;  %v4554_v11 = vadd.f32 %v27384_v32, %v27793_v14  ;;  %v6717_v30 = vsel %vm6710_vm7, %v6696_v0, %v6452_v7  ;;  %v33089_v44 = vrot.slane %v27953_v3, 5 }
 0x317   : > { %v6959_v61 = vsel %vm6710_vm7, %v6939_v54, %v6492_v27  ;;  %v6779_v23 = vsel %vm6626_vm3, %v6206_v20, %v6592_v15  ;;  %v6738_v52 = vsel %vm6731_vm8, %v6717_v30, %v6492_v27  ;;  %v33087_v31 = vrot.slane %v27953_v3, 6  ;;  %v5267_v54 = vpop.f32.mrf.mxu0 }
 0x318   : > { %v6979_v55 = vsel %vm6731_vm8, %v6959_v61, %v6532_v49  ;;  %v6759_v51 = vsel %vm6752_vm9, %v6738_v52, %v6532_v49  ;;  %v33086_v32 = vrot.slane %v27953_v3, 7  ;;  %v6940_v14 = vsel %vm6689_vm6, %v6920_v18, %v33089_v44  ;;  %v5338_v52 = vpop.f32.mrf.mxu1 }
 0x319   : > { %v27981_v39 = vsel %vm6752_vm9, %v6979_v55, %v6205_v45  ;;  %v27987_v0 = vpack.c.bf16 %v6779_v23, %v6759_v51  ;;  %v6960_v20 = vsel %vm6710_vm7, %v6940_v14, %v33087_v31  ;;  %v7198_v15 = vshrl.u32 %v27875_v62, 16 }
 0x31a   : > { %v7202_v30 = vrot.slane %v7200_v38, 1  ;;  %v6980_v45 = vsel %vm6731_vm8, %v6960_v20, %v33086_v32  ;;  %v6085_v29 = vadd.f32 %v27915_v17, %v27337_v41  ;;  %v6088_v7 = vadd.f32 %v22881_v1, %v27344_v2  ;;  %v33395_v2 = vld [vmem:[#allocation49_spill] sm:$0xff]  ;;  %v33396_v1 = vld [vmem:[#allocation48_spill] sm:$0xff] }
 0x31b   : > { %33392 = vst [vmem:[#allocation90_spill] sm:$0xff] %v27987_v0  ;;  %v6083_v27 = vadd.f32 %v5264_v37, %v27348_v56  ;;  %v28002_v18 = vsel %vm6752_vm9, %v6980_v45, %v27953_v3  ;;  %v6086_v38 = vadd.f32 %v5335_v9, %v27352_v43  ;;  %v6084_v61 = vadd.f32 %v5267_v54, %v4551_v19  ;;  %v33399_v32 = vld [vmem:[#allocation56_spill] sm:$0xff] }
 0x31c   : > { %33393 = vst [vmem:[#allocation41_spill] sm:$0xff] %v28002_v18  ;;  %v28004_v49 = vor.u32 %v7202_v30, %v7198_v15  ;;  %v6152_v23 = vadd.f32 %v27572_v6, %v6085_v29  ;;  %v6155_v55 = vadd.f32 %v27572_v6, %v6088_v7  ;;  %v6087_v41 = vadd.f32 %v5338_v52, %v4554_v11 }
 0x31d   : > { %v6150_v51 = vadd.f32 %v27572_v6, %v6083_v27  ;;  %v22893_v17 = vpop.f32.mrf.mxu0  ;;  %v28012_v56 = vadd.f32 %v27098_v10, %v33395_v2  ;;  %v28016_v37 = vadd.f32 %v27104_v60, %v33396_v1  ;;  %v6153_v43 = vadd.f32 %v27572_v6, %v6086_v38  ;;  %v22905_v19 = vpop.f32.mrf.mxu1 }
 0x31e   : > { %33394 = vst [vmem:[#allocation91_spill] sm:$0xff] %v28004_v49  ;;  %23024 = vmatmul.mubr.msk.bf16.vlgmr.msra.gmra.mxu0 %vm7101_vm10, %v28004_v49  ;;  %v6151_v9 = vadd.f32 %v27572_v6, %v6084_v61  ;;  %v28022_v14 = vmax.f32 %v6152_v23, 0.0  ;;  %v28024_v11 = vmax.f32 %v6155_v55, 0.0  ;;  %v7251_v10 = vshll.u32 %v27987_v0, 16 }
 0x31f   : > { %v6210_v54 = vmax.f32 %v6150_v51, 0.0  ;;  %v28027_v20 = vpop.f32.mrf.mxu0  ;;  %23036 = vmatpush3.bf16.msra.mxu0 %v27481_v42  ;;  %23039 = vmatprep.mubr.msk.bf16.mxu0 %vm25474_vm2, %v33365_v21  ;;  %v28034_v60 = vadd.f32 %v27434_v12, %v27805_v35  ;;  %v28038_v15 = vadd.f32 %v27440_v26, %v27811_v36  ;;  %v28040_v30 = vmax.f32 %v6153_v43, 0.0  ;;  %v28043_v45 = vpop.f32.mrf.mxu1 }
 0x320   : > { %33397 = vst [vmem:[#allocation44_spill] sm:$0xff] %v28024_v11  ;;  %v6154_v52 = vadd.f32 %v27572_v6, %v6087_v41  ;;  %23037 = vmatprep.subr.bf16.mxu0 %v33365_v21  ;;  %v6594_v29 = vrot.slane %v28022_v14, 1  ;;  %v6841_v7 = vrot.slane %v28022_v14, 2  ;;  %v33088_v27 = vrot.slane %v28024_v11, 1 }
 0x321   : > { %v6842_v12 = vrot.slane %v28024_v11, 2  ;;  %v22894_v35 = vpop.f32.mrf.mxu0  ;;  %v6274_v38 = vrot.slane %v6210_v54, 1  ;;  %v6314_v26 = vrot.slane %v6210_v54, 2  ;;  %v6354_v36 = vrot.slane %v6210_v54, 3  ;;  %v22906_v23 = vpop.f32.mrf.mxu1 }
 0x322   : > { %v6211_v61 = vmax.f32 %v6151_v9, 0.0  ;;  %v28051_v55 = vsel %vm6626_vm3, %v6594_v29, %v6841_v7  ;;  %v6801_v41 = vrot.slane %v6210_v54, 4  ;;  %v7253_v2 = vrot.slane %v7251_v10, 1 }
 0x323   : > { %v28056_v51 = vsel %vm6626_vm3, %v33088_v27, %v6842_v12  ;;  %23038 = vmatpush3.bf16.msra.mxu0 %v27504_v48  ;;  %v6635_v1 = vsel %vm6626_vm3, %v6210_v54, %v6274_v38  ;;  %v6881_v43 = vsel %vm6626_vm3, %v6274_v38, %v6314_v26  ;;  %v33091_v35 = vrot.slane %v28040_v30, 1 }
 0x324   : > { %33398 = vst [vmem:[#allocation45_spill] sm:$0xff] %v28056_v51  ;;  %v33090_v9 = vrot.slane %v28040_v30, 2  ;;  %23051 = vmatprep.subr.bf16.mxu0 %v33365_v21  ;;  %v6656_v7 = vsel %vm6647_vm4, %v6635_v1, %v6314_v26  ;;  %v6901_v23 = vsel %vm6647_vm4, %v6881_v43, %v6354_v36  ;;  %v33092_v12 = vrot.slane %v28040_v30, 3  ;;  %v33415_v51 = vld [vmem:[#allocation14_spill] sm:$0xff] }
 0x325   : > { %v6091_v10 = vadd.f32 %v22893_v17, %v33399_v32  ;;  %v6677_v31 = vsel %vm6668_vm5, %v6656_v7, %v6354_v36  ;;  %v6921_v54 = vsel %vm6668_vm5, %v6901_v23, %v6801_v41  ;;  %v6802_v38 = vrot.slane %v28040_v30, 4 }
 0x326   : > { %v6882_v27 = vsel %vm6626_vm3, %v33091_v35, %v33090_v9  ;;  %v6414_v1 = vrot.slane %v6211_v61, 4  ;;  %v6454_v43 = vrot.slane %v6211_v61, 5  ;;  %v7249_v32 = vshrl.u32 %v27987_v0, 16 }
 0x327   : > { %v6902_v26 = vsel %vm6647_vm4, %v6882_v27, %v33092_v12  ;;  %v28082_v17 = vadd.f32 %v27483_v63, %v27815_v5  ;;  %v6494_v41 = vrot.slane %v6211_v61, 6  ;;  %v6534_v7 = vrot.slane %v6211_v61, 7  ;;  %v33401_v63 = vld [vmem:[#allocation11_spill] sm:$0xff] }
 0x328   : > { %v6922_v36 = vsel %vm6668_vm5, %v6902_v26, %v6802_v38  ;;  %v6698_v23 = vsel %vm6689_vm6, %v6677_v31, %v6414_v1  ;;  %v6941_v44 = vsel %vm6689_vm6, %v6921_v54, %v6454_v43  ;;  %v28087_v9 = vmax.f32 %v6154_v52, 0.0 }
 0x329   : > { %v28089_v35 = vor.u32 %v7253_v2, %v7249_v32  ;;  %v6719_v27 = vsel %vm6710_vm7, %v6698_v23, %v6454_v43  ;;  %v6961_v12 = vsel %vm6710_vm7, %v6941_v44, %v6494_v41  ;;  %v6158_v49 = vadd.f32 %v27572_v6, %v6091_v10  ;;  %v5409_v2 = vpop.f32.mrf.mxu0 }
 0x32a   : > { %v6094_v5 = vadd.f32 %v22905_v19, %v33401_v63  ;;  %v28097_v38 = vadd.f32 %v27489_v57, %v27893_v8  ;;  %v6740_v31 = vsel %vm6731_vm8, %v6719_v27, %v6494_v41  ;;  %v6981_v54 = vsel %vm6731_vm8, %v6961_v12, %v6534_v7  ;;  %v5480_v8 = vpop.f32.mrf.mxu1  ;;  %v33404_v41 = vld [vmem:[#allocation57_spill] sm:$0xff]  ;;  %v33405_v63 = vld [vmem:[#allocation60_spill] sm:$0xff] }
 0x32b   : > { %33400 = vst [vmem:[#allocation46_spill] sm:$0xff] %v28089_v35  ;;  %v33097_v52 = vrot.slane %v28087_v9, 5  ;;  %23032 = vmatmul.mubr.msk.bf16.vlgmr.msra.gmra.mxu1 %vm7101_vm10, %v28089_v35  ;;  %v6781_v44 = vsel %vm6626_vm3, %v28022_v14, %v6594_v29  ;;  %v6761_v10 = vsel %vm6752_vm9, %v6740_v31, %v6534_v7  ;;  %v28108_v19 = vsel %vm6752_vm9, %v6981_v54, %v6211_v61 }
 0x32c   : > { %v33095_v57 = vrot.slane %v28087_v9, 6  ;;  %23044 = vmatpush3.bf16.msra.mxu1 %v27481_v42  ;;  %23047 = vmatprep.mubr.msk.bf16.mxu1 %vm25474_vm2, %v33365_v21  ;;  %v28114_v12 = vpack.c.bf16 %v6781_v44, %v6761_v10  ;;  %v33094_v26 = vrot.slane %v28087_v9, 7  ;;  %v28120_v29 = vmax.f32 %v6158_v49, 0.0 }
 0x32d   : > { %v6942_v14 = vsel %vm6689_vm6, %v6922_v36, %v33097_v52  ;;  %v22917_v61 = vpop.f32.mrf.mxu0  ;;  %23045 = vmatprep.subr.bf16.mxu1 %v33365_v21  ;;  %v33403_v1 = vrot.slane %v27596_v22, 1  ;;  %v6161_v32 = vadd.f32 %v27572_v6, %v6094_v5  ;;  %v6089_v7 = vadd.f32 %v28027_v20, %v33404_v41  ;;  %v22929_v36 = vpop.f32.mrf.mxu1 }
 0x32e   : > { %33402 = vst [vmem:[#allocation94_spill] sm:$0xff] %v28114_v12  ;;  %v6962_v43 = vsel %vm6710_vm7, %v6942_v14, %v33095_v57  ;;  %v33098_v23 = vrot.slane %v28120_v29, 1  ;;  %v6843_v27 = vrot.slane %v28120_v29, 2  ;;  %v6092_v31 = vadd.f32 %v28043_v45, %v33405_v63  ;;  %v33411_v57 = vld [vmem:[#allocation21_spill] sm:$0xff] }
 0x32f   : > { %v6628_v42 = vsel %vm6626_vm3, %v27596_v22, %v33403_v1  ;;  %v6982_v49 = vsel %vm6731_vm8, %v6962_v43, %v33094_v26  ;;  %v5548_v54 = vpop.f32.mrf.mxu0  ;;  %v28144_v5 = vmax.f32 %v6161_v32, 0.0  ;;  %v6156_v20 = vadd.f32 %v27572_v6, %v6089_v7  ;;  %v28148_v14 = vpop.f32.mrf.mxu1  ;;  %v33408_v7 = vld [vmem:[#allocation69_spill] sm:$0xff] }
 0x330   : > { %v28142_v44 = vsel %vm6752_vm9, %v6982_v49, %v28087_v9  ;;  %v6090_v10 = vadd.f32 %v5409_v2, %v28034_v60  ;;  %23046 = vmatpush3.bf16.msra.mxu1 %v27504_v48  ;;  %v28153_v1 = vadd.f32 %v27525_v4, %v27900_v59  ;;  %v28158_v45 = vsel %vm6626_vm3, %v33098_v23, %v6843_v27 }
 0x331   : > { %33406 = vst [vmem:[#allocation47_spill] sm:$0xff] %v28142_v44  ;;  %33407 = vst [vmem:[#allocation95_spill] sm:$0xff] %v28144_v5  ;;  %v6159_v43 = vadd.f32 %v27572_v6, %v6092_v31  ;;  %v6093_v32 = vadd.f32 %v5480_v8, %v28038_v15  ;;  %v22918_v41 = vpop.f32.mrf.mxu0  ;;  %23059 = vmatprep.subr.bf16.mxu1 %v33365_v21  ;;  %v28165_v60 = vadd.f32 %v27529_v53, %v27904_v40  ;;  %v22930_v2 = vpop.f32.mrf.mxu1 }
 0x332   : > { %v33096_v48 = vrot.slane %v28144_v5, 1  ;;  %v6844_v4 = vrot.slane %v28144_v5, 2  ;;  %v6216_v59 = vmax.f32 %v6156_v20, 0.0  ;;  %v28171_v49 = vadd.f32 %v33408_v7, %v27911_v33 }
 0x333   : > { %v33409_v27 = vrot.slane %v27596_v22, 2  ;;  %v28176_v8 = vmax.f32 %v6159_v43, 0.0  ;;  %v6157_v63 = vadd.f32 %v27572_v6, %v6090_v10  ;;  %v6160_v20 = vadd.f32 %v27572_v6, %v6093_v32 }
 0x334   : > { %v28182_v53 = vsel %vm6626_vm3, %v33096_v48, %v6844_v4  ;;  %v6276_v40 = vrot.slane %v6216_v59, 1  ;;  %v6316_v31 = vrot.slane %v6216_v59, 2  ;;  %v6356_v41 = vrot.slane %v6216_v59, 3 }
 0x335   : > { %v6649_v15 = vsel %vm6647_vm4, %v6628_v42, %v33409_v27  ;;  %33410 = vst [vmem:[#allocation6_spill] sm:$0xff] %v28182_v53  ;;  %v33101_v33 = vrot.slane %v28176_v8, 1  ;;  %v33100_v2 = vrot.slane %v28176_v8, 2  ;;  %v7302_v42 = vshll.u32 %v28114_v12, 16 }
 0x336   : > { %v6637_v43 = vsel %vm6626_vm3, %v6216_v59, %v6276_v40  ;;  %v6803_v7 = vrot.slane %v6216_v59, 4  ;;  %v6883_v10 = vsel %vm6626_vm3, %v6276_v40, %v6316_v31  ;;  %v33102_v27 = vrot.slane %v28176_v8, 3 }
 0x337   : > { %v6658_v4 = vsel %vm6647_vm4, %v6637_v43, %v6316_v31  ;;  %v6903_v26 = vsel %vm6647_vm4, %v6883_v10, %v6356_v41  ;;  %v6804_v6 = vrot.slane %v28176_v8, 4  ;;  %v6884_v32 = vsel %vm6626_vm3, %v33101_v33, %v33100_v2  ;;  %v33413_v10 = vld [vmem:[#allocation77_spill] sm:$0xff]  ;;  %v33414_v33 = vld [vmem:[#allocation62_spill] sm:$0xff] }
 0x338   : > { %v28201_v48 = vadd.f32 %v33411_v57, %v27932_v13  ;;  %v33412_v59 = vrot.slane %v27596_v22, 3  ;;  %v6923_v31 = vsel %vm6668_vm5, %v6903_v26, %v6803_v7  ;;  %v6904_v43 = vsel %vm6647_vm4, %v6884_v32, %v33102_v27  ;;  %v5551_v32 = vpop.f32.mrf.mxu0 }
 0x339   : > { %v6407_v52 = vrot.slane %v33413_v10, 4  ;;  %v6924_v23 = vsel %vm6668_vm5, %v6904_v43, %v6804_v6  ;;  %v6217_v35 = vmax.f32 %v6157_v63, 0.0  ;;  %v28212_v2 = vmax.f32 %v6160_v20, 0.0  ;;  %v33416_v20 = vld [vmem:[#allocation61_spill] sm:$0xff]  ;;  %v28221_v43 = vpop.f32.mrf.mxu1 }
 0x33a   : > { %v6670_v40 = vsel %vm6668_vm5, %v6649_v15, %v33412_v59  ;;  %v6679_v13 = vsel %vm6668_vm5, %v6658_v4, %v6356_v41  ;;  %v7304_v57 = vrot.slane %v7302_v42, 1  ;;  %v6097_v22 = vadd.f32 %v22917_v61, %v33414_v33 }
 0x33b   : > { %v6100_v15 = vadd.f32 %v22929_v36, %v33415_v51  ;;  %v6416_v59 = vrot.slane %v6217_v35, 4  ;;  %v6456_v26 = vrot.slane %v6217_v35, 5  ;;  %v6496_v7 = vrot.slane %v6217_v35, 6  ;;  %v28230_v36 = vld [vmem:[%s33022_s2] ss:$0 sm:$0xff] }
 0x33c   : > { %v7300_v44 = vshrl.u32 %v28114_v12, 16  ;;  %v6536_v27 = vrot.slane %v6217_v35, 7  ;;  %v33105_v53 = vrot.slane %v28212_v2, 5  ;;  %v33104_v63 = vrot.slane %v28212_v2, 6 }
 0x33d   : > { %v6095_v6 = vadd.f32 %v5548_v54, %v33416_v20  ;;  %v6700_v41 = vsel %vm6689_vm6, %v6679_v13, %v6416_v59  ;;  %v6943_v61 = vsel %vm6689_vm6, %v6923_v31, %v6456_v26  ;;  %v6164_v33 = vadd.f32 %v28230_v36, %v6097_v22  ;;  %v28233_v42 = vpop.f32.mrf.mxu0  ;;  %v28241_v31 = vpop.f32.mrf.mxu1 }
 0x33e   : > { %v28225_v51 = vor.u32 %v7304_v57, %v7300_v44  ;;  %v6721_v4 = vsel %vm6710_vm7, %v6700_v41, %v6456_v26  ;;  %v6963_v54 = vsel %vm6710_vm7, %v6943_v61, %v6496_v7  ;;  %v33103_v20 = vrot.slane %v28212_v2, 7 }
 0x33f   : > { %v6944_v44 = vsel %vm6689_vm6, %v6924_v23, %v33105_v53  ;;  %v33418_v13 = vrot.slane %v28120_v29, 1  ;;  %v6742_v22 = vsel %vm6731_vm8, %v6721_v4, %v6496_v7  ;;  %v6983_v59 = vsel %vm6731_vm8, %v6963_v54, %v6536_v27  ;;  %v28254_v41 = vpop.f32.mrf.mxu0  ;;  %v28263_v4 = vpop.f32.mrf.mxu1  ;;  %v28268_v54 = vld [vmem:[%s33023_s3 + $0x28] sm:$0xff]  }
 0x340   : > { %33417 = vst [vmem:[#allocation50_spill] sm:$0xff] %v28225_v51  ;;  %v6964_v26 = vsel %vm6710_vm7, %v6944_v44, %v33104_v63  ;;  %23040 = vmatmul.mubr.msk.bf16.vlgmr.msra.gmra.mxu0 %vm7101_vm10, %v28225_v51  ;;  %v6763_v23 = vsel %vm6752_vm9, %v6742_v22, %v6536_v27  ;;  %v28258_v61 = vsel %vm6752_vm9, %v6983_v59, %v6217_v35  ;;  %v6224_v7 = vmax.f32 %v6164_v33, 0.0 }
 0x341   : > { %v6783_v57 = vsel %vm6626_vm3, %v28120_v29, %v33418_v13  ;;  %v6984_v29 = vsel %vm6731_vm8, %v6964_v26, %v33103_v20  ;;  %23052 = vmatpush3.bf16.msra.mxu0 %v28268_v54  ;;  %23055 = vmatprep.mubr.msk.bf16.mxu0 %vm25474_vm2, %v33365_v21  ;;  %v6167_v33 = vadd.f32 %v28230_v36, %v6100_v15  ;;  %v22942_v13 = vpop.f32.mrf.mxu0  ;;  %v33421_v26 = vld [vmem:[#allocation15_spill] sm:$0xff] }
 0x342   : > { %v28273_v27 = vpack.c.bf16 %v6783_v57, %v6763_v23  ;;  %v28277_v35 = vsel %vm6752_vm9, %v6984_v29, %v28212_v2  ;;  %v6162_v44 = vadd.f32 %v28230_v36, %v6095_v6  ;;  %23053 = vmatprep.subr.bf16.mxu0 %v33365_v21  ;;  %v6598_v22 = vrot.slane %v6224_v7, 1  ;;  %v22954_v57 = vpop.f32.mrf.mxu1  ;;  %v33422_v23 = vld [vmem:[#allocation73_spill] sm:$0xff]  ;;  %v33423_v29 = vld [vmem:[#allocation76_spill] sm:$0xff] }
 0x343   : > { %33420 = vst [vmem:[#allocation51_spill] sm:$0xff] %v28277_v35  ;;  %v6845_v59 = vrot.slane %v6224_v7, 2  ;;  %v6098_v20 = vadd.f32 %v28148_v14, %v33421_v26  ;;  %v6096_v63 = vadd.f32 %v5551_v32, %v28082_v17  ;;  %v28287_v53 = vadd.f32 %v33422_v23, %v28012_v56  ;;  %v28306_v56 = vld [vmem:[%s33023_s3 + $0x20] sm:$0xff]  }
 0x344   : > { %33419 = vst [vmem:[#allocation5_spill] sm:$0xff] %v28273_v27  ;;  %v28291_v15 = vadd.f32 %v33423_v29, %v28016_v37  ;;  %v28293_v6 = vmax.f32 %v6167_v33, 0.0  ;;  %v6222_v13 = vmax.f32 %v6162_v44, 0.0  ;;  %v28296_v51 = vsel %vm6689_vm6, %v6670_v40, %v6407_v52  ;;  %v33425_v33 = vld [vmem:[#allocation80_spill] sm:$0xff] }
 0x345   : > { %v28299_v35 = vsel %vm6626_vm3, %v6598_v22, %v6845_v59  ;;  %v6165_v17 = vadd.f32 %v28230_v36, %v6098_v20  ;;  %v6163_v14 = vadd.f32 %v28230_v36, %v6096_v63  ;;  %23054 = vmatpush3.bf16.msra.mxu0 %v28306_v56  ;;  %v33426_v44 = vrot.slane %v33425_v33, 1 }
 0x346   : > { %33424 = vst [vmem:[#allocation8_spill] sm:$0xff] %v28293_v6  ;;  %v33109_v37 = vrot.slane %v28293_v6, 1  ;;  %v6846_v32 = vrot.slane %v28293_v6, 2  ;;  %v6278_v52 = vrot.slane %v6222_v13, 1  ;;  %v6318_v40 = vrot.slane %v6222_v13, 2  ;;  %23067 = vmatprep.subr.bf16.mxu0 %v33365_v21 }
 0x347   : > { %v6630_v63 = vsel %vm6626_vm3, %v33425_v33, %v33426_v44  ;;  %v6358_v20 = vrot.slane %v6222_v13, 3  ;;  %v28316_v59 = vmax.f32 %v6165_v17, 0.0  ;;  %v6223_v26 = vmax.f32 %v6163_v14, 0.0 }
 0x348   : > { %v28321_v57 = vsel %vm6626_vm3, %v33109_v37, %v6846_v32  ;;  %v6639_v23 = vsel %vm6626_vm3, %v6222_v13, %v6278_v52  ;;  %v6805_v29 = vrot.slane %v6222_v13, 4  ;;  %v6885_v28 = vsel %vm6626_vm3, %v6278_v52, %v6318_v40 }
 0x349   : > { %33427 = vst [vmem:[#allocation52_spill] sm:$0xff] %v28321_v57  ;;  %v6660_v25 = vsel %vm6647_vm4, %v6639_v23, %v6318_v40  ;;  %v6905_v18 = vsel %vm6647_vm4, %v6885_v28, %v6358_v20  ;;  %v33113_v44 = vrot.slane %v28316_v59, 1  ;;  %v33112_v17 = vrot.slane %v28316_v59, 2 }
 0x34a   : > { %v6681_v14 = vsel %vm6668_vm5, %v6660_v25, %v6358_v20  ;;  %v6925_v6 = vsel %vm6668_vm5, %v6905_v18, %v6805_v29  ;;  %v33114_v32 = vrot.slane %v28316_v59, 3  ;;  %v6099_v37 = vadd.f32 %v28221_v43, %v28097_v38  ;;  %v5693_v38 = vpop.f32.mrf.mxu0 }
 0x34b   : > { %v6806_v13 = vrot.slane %v28316_v59, 4  ;;  %v6886_v28 = vsel %vm6626_vm3, %v33113_v44, %v33112_v17  ;;  %v6418_v52 = vrot.slane %v6223_v26, 4  ;;  %v6458_v40 = vrot.slane %v6223_v26, 5  ;;  %v28348_v17 = vpop.f32.mrf.mxu1 }
 0x34c   : > { %v6785_v23 = vsel %vm6626_vm3, %v6224_v7, %v6598_v22  ;;  %v6906_v25 = vsel %vm6647_vm4, %v6886_v28, %v33114_v32  ;;  %v6498_v18 = vrot.slane %v6223_v26, 6  ;;  %v7351_v20 = vshrl.u32 %v28273_v27, 16 }
 0x34d   : > { %v6926_v43 = vsel %vm6668_vm5, %v6906_v25, %v6806_v13  ;;  %v6538_v29 = vrot.slane %v6223_v26, 7  ;;  %v6702_v57 = vsel %vm6689_vm6, %v6681_v14, %v6418_v52  ;;  %v6945_v0 = vsel %vm6689_vm6, %v6925_v6, %v6458_v40  ;;  %v28354_v32 = vpop.f32.mrf.mxu0  ;;  %v33428_v25 = vld [vmem:[#allocation63_spill] sm:$0xff]  ;;  %v33429_v6 = vld [vmem:[#allocation16_spill] sm:$0xff]  ;;  %v28362_v34 = vpop.f32.mrf.mxu1 }
 0x34e   : > { %v6723_v44 = vsel %vm6710_vm7, %v6702_v57, %v6458_v40  ;;  %v6965_v7 = vsel %vm6710_vm7, %v6945_v0, %v6498_v18  ;;  %v6166_v22 = vadd.f32 %v28230_v36, %v6099_v37  ;;  %v7353_v28 = vshll.u32 %v28273_v27, 16 }
 0x34f   : > { %v6744_v12 = vsel %vm6731_vm8, %v6723_v44, %v6498_v18  ;;  %v6985_v13 = vsel %vm6731_vm8, %v6965_v7, %v6538_v29  ;;  %v6103_v14 = vadd.f32 %v28233_v42, %v33428_v25  ;;  %v6106_v52 = vadd.f32 %v28241_v31, %v33429_v6  ;;  %v28370_v27 = vpop.f32.mrf.mxu0  ;;  %v33430_v7 = vld [vmem:[#allocation64_spill] sm:$0xff]  ;;  %v28378_v25 = vpop.f32.mrf.mxu1 }
 0x350   : > { %v6765_v0 = vsel %vm6752_vm9, %v6744_v12, %v6538_v29  ;;  %v28366_v37 = vsel %vm6752_vm9, %v6985_v13, %v6223_v26  ;;  %v28368_v57 = vmax.f32 %v6166_v22, 0.0  ;;  %v7355_v40 = vrot.slane %v7353_v28, 1  ;;  %v33431_v12 = vld [vmem:[#allocation78_spill] sm:$0xff] }
 0x351   : > { %v28372_v44 = vpack.c.bf16 %v6785_v23, %v6765_v0  ;;  %v6170_v18 = vadd.f32 %v28230_v36, %v6103_v14  ;;  %v6173_v42 = vadd.f32 %v28230_v36, %v6106_v52  ;;  %v6101_v31 = vadd.f32 %v28254_v41, %v33430_v7  ;;  %v22966_v14 = vpop.f32.mrf.mxu0  ;;  %v22978_v7 = vpop.f32.mrf.mxu1 }
 0x352   : > { %v33432_v29 = vrot.slane %v33431_v12, 1  ;;  %v33434_v22 = vrot.slane %v33413_v10, 5  ;;  %v33123_v28 = vrot.slane %v28368_v57, 5  ;;  %v33122_v13 = vrot.slane %v28368_v57, 6  ;;  %v33439_v14 = vld [vmem:[#allocation17_spill] sm:$0xff] }
 0x353   : > { %v28394_v41 = vor.u32 %v7355_v40, %v7351_v20  ;;  %v28396_v6 = vmax.f32 %v6170_v18, 0.0  ;;  %v28398_v52 = vmax.f32 %v6173_v42, 0.0  ;;  %v6168_v0 = vadd.f32 %v28230_v36, %v6101_v31 }
 0x354   : > { %v28384_v26 = vsel %vm6626_vm3, %v33431_v12, %v33432_v29  ;;  %v28390_v23 = vsel %vm6710_vm7, %v28296_v51, %v33434_v22  ;;  %v33438_v12 = vrot.slane %v33425_v33, 2  ;;  %v33121_v51 = vrot.slane %v28368_v57, 7 }
 0x355   : > { %33433 = vst [vmem:[#allocation7_spill] sm:$0xff] %v28384_v26  ;;  %33435 = vst [vmem:[#allocation53_spill] sm:$0xff] %v28390_v23  ;;  %v6946_v22 = vsel %vm6689_vm6, %v6926_v43, %v33123_v28  ;;  %v6104_v20 = vadd.f32 %v28263_v4, %v33439_v14  ;;  %23048 = vmatmul.mubr.msk.bf16.vlgmr.msra.gmra.mxu1 %vm7101_vm10, %v28394_v41  ;;  %v6600_v18 = vrot.slane %v28396_v6, 1  ;;  %v33125_v31 = vrot.slane %v28398_v52, 1 }
 0x356   : > { %33436 = vst [vmem:[#allocation10_spill] sm:$0xff] %v28394_v41  ;;  %33437 = vst [vmem:[#allocation54_spill] sm:$0xff] %v28398_v52  ;;  %v6651_v29 = vsel %vm6647_vm4, %v6630_v63, %v33438_v12  ;;  %v6966_v40 = vsel %vm6710_vm7, %v6946_v22, %v33122_v13  ;;  %v6847_v63 = vrot.slane %v28396_v6, 2  ;;  %v6102_v42 = vadd.f32 %v5693_v38, %v28153_v1  ;;  %v33440_v12 = vld [vmem:[#allocation28_spill] sm:$0xff] }
 0x357   : > { %v6986_v43 = vsel %vm6731_vm8, %v6966_v40, %v33121_v51  ;;  %v6848_v4 = vrot.slane %v28398_v52, 2  ;;  %v6228_v7 = vmax.f32 %v6168_v0, 0.0  ;;  %23060 = vmatpush3.bf16.msra.mxu1 %v28268_v54  ;;  %23063 = vmatprep.mubr.msk.bf16.mxu1 %vm25474_vm2, %v33365_v21  ;;  %v33441_v22 = vrot.slane %v33440_v12, 1  ;;  %v33444_v40 = vld [vmem:[#allocation32_spill] sm:$0xff] }
 0x358   : > { %v28434_v1 = vsel %vm6752_vm9, %v6986_v43, %v28368_v57  ;;  %v28437_v38 = vsel %vm6626_vm3, %v6600_v18, %v6847_v63  ;;  %v6171_v0 = vadd.f32 %v28230_v36, %v6104_v20  ;;  %23061 = vmatprep.subr.bf16.mxu1 %v33365_v21  ;;  %v6409_v51 = vrot.slane %v33444_v40, 4 }
 0x359   : > { %v28430_v14 = vsel %vm6626_vm3, %v33440_v12, %v33441_v22  ;;  %33443 = vst [vmem:[#allocation55_spill] sm:$0xff] %v28434_v1  ;;  %v28445_v13 = vsel %vm6626_vm3, %v33125_v31, %v6848_v4  ;;  %v6280_v12 = vrot.slane %v6228_v7, 1  ;;  %v6320_v22 = vrot.slane %v6228_v7, 2 }
 0x35a   : > { %33442 = vst [vmem:[#allocation9_spill] sm:$0xff] %v28430_v14  ;;  %33445 = vst [vmem:[#allocation13_spill] sm:$0xff] %v28445_v13  ;;  %v33446_v28 = vrot.slane %v33425_v33, 3  ;;  %v6360_v41 = vrot.slane %v6228_v7, 3  ;;  %v28450_v63 = vmax.f32 %v6171_v0, 0.0  ;;  %v6169_v20 = vadd.f32 %v28230_v36, %v6102_v42  ;;  %v5835_v0 = vpop.f32.mrf.mxu0 }
 0x35b   : > { %v6641_v1 = vsel %vm6626_vm3, %v6228_v7, %v6280_v12  ;;  %v6807_v26 = vrot.slane %v6228_v7, 4  ;;  %v6887_v14 = vsel %vm6626_vm3, %v6280_v12, %v6320_v22  ;;  %v6105_v4 = vadd.f32 %v28348_v17, %v28165_v60  ;;  %23062 = vmatpush3.bf16.msra.mxu1 %v28306_v56 }
 0x35c   : > { %v6672_v43 = vsel %vm6668_vm5, %v6651_v29, %v33446_v28  ;;  %v6662_v31 = vsel %vm6647_vm4, %v6641_v1, %v6320_v22  ;;  %v6907_v33 = vsel %vm6647_vm4, %v6887_v14, %v6360_v41  ;;  %v33130_v28 = vrot.slane %v28450_v63, 1  ;;  %23075 = vmatprep.subr.bf16.mxu1 %v33365_v21 }
 0x35d   : > { %v33129_v29 = vrot.slane %v28450_v63, 2  ;;  %v28464_v42 = vsel %vm6689_vm6, %v6672_v43, %v6409_v51  ;;  %v33448_v7 = vrot.slane %v27807_v47, 1  ;;  %v6927_v17 = vsel %vm6668_vm5, %v6907_v33, %v6807_v26  ;;  %v5906_v43 = vpop.f32.mrf.mxu1  ;;  %v28486_v10 = vpop.f32.mrf.mxu0 }
 0x35e   : > { %33447 = vst [vmem:[#allocation58_spill] sm:$0xff] %v28464_v42  ;;  %v33131_v1 = vrot.slane %v28450_v63, 3  ;;  %v6808_v14 = vrot.slane %v28450_v63, 4  ;;  %v6229_v51 = vmax.f32 %v6169_v20, 0.0  ;;  %v6172_v22 = vadd.f32 %v28230_v36, %v6105_v4 }
 0x35f   : > { %v6632_v60 = vsel %vm6626_vm3, %v27807_v47, %v33448_v7  ;;  %v6888_v12 = vsel %vm6626_vm3, %v33130_v28, %v33129_v29  ;;  %v6683_v13 = vsel %vm6668_vm5, %v6662_v31, %v6360_v41  ;;  %v7404_v33 = vshll.u32 %v28372_v44, 16  ;;  %v33449_v7 = vld [vmem:[#allocation65_spill] sm:$0xff]  ;;  %v28492_v41 = vpop.f32.mrf.mxu1 }
 0x360   : > { %v6908_v26 = vsel %vm6647_vm4, %v6888_v12, %v33131_v1  ;;  %v6109_v23 = vadd.f32 %v28354_v32, %v33449_v7  ;;  %v33450_v52 = vrot.slane %v27807_v47, 2  ;;  %v6420_v29 = vrot.slane %v6229_v51, 4  ;;  %v28498_v32 = vpop.f32.mrf.mxu0 }
 0x361   : > { %v6928_v4 = vsel %vm6668_vm5, %v6908_v26, %v6808_v14  ;;  %v6460_v28 = vrot.slane %v6229_v51, 5  ;;  %v6787_v31 = vsel %vm6626_vm3, %v28396_v6, %v6600_v18  ;;  %v6500_v12 = vrot.slane %v6229_v51, 6  ;;  %v28504_v26 = vpop.f32.mrf.mxu1 }
 0x362   : > { %v6653_v20 = vsel %vm6647_vm4, %v6632_v60, %v33450_v52  ;;  %v6540_v1 = vrot.slane %v6229_v51, 7  ;;  %v28496_v5 = vmax.f32 %v6172_v22, 0.0  ;;  %v6704_v7 = vsel %vm6689_vm6, %v6683_v13, %v6420_v29  ;;  %v33451_v60 = vld [vmem:[#allocation68_spill] sm:$0xff]  ;;  %v22990_v42 = vpop.f32.mrf.mxu0 }
 0x363   : > { %v6947_v11 = vsel %vm6689_vm6, %v6927_v17, %v6460_v28  ;;  %v7406_v52 = vrot.slane %v7404_v33, 1  ;;  %v6112_v14 = vadd.f32 %v28362_v34, %v33451_v60  ;;  %v6725_v24 = vsel %vm6710_vm7, %v6704_v7, %v6460_v28  ;;  %v23002_v34 = vpop.f32.mrf.mxu1  ;;  %v33455_v60 = vld [vmem:[#allocation70_spill] sm:$0xff] }
 0x364   : > { %v6967_v6 = vsel %vm6710_vm7, %v6947_v11, %v6500_v12  ;;  %v33141_v18 = vrot.slane %v28496_v5, 5  ;;  %v6176_v22 = vadd.f32 %v28230_v36, %v6109_v23  ;;  %v6746_v40 = vsel %vm6731_vm8, %v6725_v24, %v6500_v12 }
 0x365   : > { %v6987_v13 = vsel %vm6731_vm8, %v6967_v6, %v6540_v1  ;;  %v33140_v29 = vrot.slane %v28496_v5, 6  ;;  %v7402_v17 = vshrl.u32 %v28372_v44, 16  ;;  %v6767_v33 = vsel %vm6752_vm9, %v6746_v40, %v6540_v1 }
 0x366   : > { %v28516_v28 = vsel %vm6752_vm9, %v6987_v13, %v6229_v51  ;;  %v33139_v11 = vrot.slane %v28496_v5, 7  ;;  %v6948_v23 = vsel %vm6689_vm6, %v6928_v4, %v33141_v18  ;;  %v33452_v24 = vrot.slane %v27924_v58, 1 }
 0x367   : > { %v28526_v12 = vpack.c.bf16 %v6787_v31, %v6767_v33  ;;  %v6968_v40 = vsel %vm6710_vm7, %v6948_v23, %v33140_v29  ;;  %v28531_v1 = vor.u32 %v7406_v52, %v7402_v17  ;;  %v28536_v7 = vmax.f32 %v6176_v22, 0.0  ;;  %v33457_v52 = vld [vmem:[#allocation20_spill] sm:$0xff] }
 0x368   : > { %v6634_v42 = vsel %vm6626_vm3, %v27924_v58, %v33452_v24  ;;  %v6988_v51 = vsel %vm6731_vm8, %v6968_v40, %v33139_v11  ;;  %v6179_v4 = vadd.f32 %v28230_v36, %v6112_v14  ;;  %v6107_v6 = vadd.f32 %v28370_v27, %v33455_v60 }
 0x369   : > { %33453 = vst [vmem:[#allocation12_spill] sm:$0xff] %v28526_v12  ;;  %33454 = vst [vmem:[#allocation59_spill] sm:$0xff] %v28531_v1  ;;  %v28543_v31 = vsel %vm6752_vm9, %v6988_v51, %v28496_v5  ;;  %23056 = vmatmul.mubr.msk.bf16.vlgmr.msra.gmra.mxu0 %vm7101_vm10, %v28531_v1  ;;  %v6110_v13 = vadd.f32 %v28378_v25, %v33457_v52  ;;  %v6108_v17 = vadd.f32 %v5835_v0, %v28171_v49 }
 0x36a   : > { %33456 = vst [vmem:[#allocation19_spill] sm:$0xff] %v28543_v31  ;;  %v6111_v22 = vadd.f32 %v5906_v43, %v28201_v48  ;;  %v6602_v34 = vrot.slane %v28536_v7, 1  ;;  %v6849_v14 = vrot.slane %v28536_v7, 2  ;;  %v28553_v33 = vmax.f32 %v6179_v4, 0.0  ;;  %23068 = vmatpush3.bf16.msra.mxu0 %v28268_v54  ;;  %23071 = vmatprep.mubr.msk.bf16.mxu0 %vm25474_vm2, %v33365_v21 }
 0x36b   : > { %v6174_v27 = vadd.f32 %v28230_v36, %v6107_v6  ;;  %v33458_v23 = vrot.slane %v27924_v58, 2  ;;  %v6177_v49 = vadd.f32 %v28230_v36, %v6110_v13  ;;  %v6175_v48 = vadd.f32 %v28230_v36, %v6108_v17  ;;  %23069 = vmatprep.subr.bf16.mxu0 %v33365_v21  ;;  %v33462_v17 = vld [vmem:[#allocation71_spill] sm:$0xff] }
 0x36c   : > { %v6178_v0 = vadd.f32 %v28230_v36, %v6111_v22  ;;  %v33459_v43 = vrot.slane %v27807_v47, 3  ;;  %v28572_v54 = vsel %vm6626_vm3, %v6602_v34, %v6849_v14  ;;  %v33138_v40 = vrot.slane %v28553_v33, 1 }
 0x36d   : > { %v6655_v25 = vsel %vm6647_vm4, %v6634_v42, %v33458_v23  ;;  %v6850_v42 = vrot.slane %v28553_v33, 2  ;;  %v6234_v4 = vmax.f32 %v6174_v27, 0.0  ;;  %v28577_v60 = vmax.f32 %v6177_v49, 0.0 }
 0x36e   : > { %v28569_v24 = vsel %vm6668_vm5, %v6653_v20, %v33459_v43  ;;  %v6235_v6 = vmax.f32 %v6175_v48, 0.0  ;;  %v33460_v52 = vrot.slane %v27924_v58, 3  ;;  %v6115_v22 = vadd.f32 %v28486_v10, %v33462_v17  ;;  %23070 = vmatpush3.bf16.msra.mxu0 %v28306_v56 }
 0x36f   : > { %v28588_v13 = vsel %vm6626_vm3, %v33138_v40, %v6850_v42  ;;  %v6282_v14 = vrot.slane %v6234_v4, 1  ;;  %v6322_v27 = vrot.slane %v6234_v4, 2  ;;  %v6362_v23 = vrot.slane %v6234_v4, 3  ;;  %23083 = vmatprep.subr.bf16.mxu0 %v33365_v21 }
 0x370   : > { %v28582_v47 = vsel %vm6668_vm5, %v6655_v25, %v33460_v52  ;;  %33461 = vst [vmem:[#allocation66_spill] sm:$0xff] %v28588_v13  ;;  %v28593_v49 = vmax.f32 %v6178_v0, 0.0  ;;  %v6809_v58 = vrot.slane %v6234_v4, 4  ;;  %v33143_v25 = vrot.slane %v28577_v60, 1 }
 0x371   : > { %v33142_v48 = vrot.slane %v28577_v60, 2  ;;  %v33144_v43 = vrot.slane %v28577_v60, 3  ;;  %v6643_v42 = vsel %vm6626_vm3, %v6234_v4, %v6282_v14  ;;  %v6889_v10 = vsel %vm6626_vm3, %v6282_v14, %v6322_v27 }
 0x372   : > { %v6422_v52 = vrot.slane %v6235_v6, 4  ;;  %v6462_v56 = vrot.slane %v6235_v6, 5  ;;  %v6664_v17 = vsel %vm6647_vm4, %v6643_v42, %v6322_v27  ;;  %v6909_v0 = vsel %vm6647_vm4, %v6889_v10, %v6362_v23 }
 0x373   : > { %v6810_v40 = vrot.slane %v28577_v60, 4  ;;  %v6890_v11 = vsel %vm6626_vm3, %v33143_v25, %v33142_v48  ;;  %v33463_v29 = vrot.slane %v28040_v30, 1  ;;  %v6685_v14 = vsel %vm6668_vm5, %v6664_v17, %v6362_v23 }
 0x374   : > { %v6929_v18 = vsel %vm6668_vm5, %v6909_v0, %v6809_v58  ;;  %v6910_v27 = vsel %vm6647_vm4, %v6890_v11, %v33144_v43  ;;  %v33464_v42 = vrot.slane %v28176_v8, 1  ;;  %v6502_v20 = vrot.slane %v6235_v6, 6 }
 0x375   : > { %v6636_v4 = vsel %vm6626_vm3, %v28040_v30, %v33463_v29  ;;  %v6930_v48 = vsel %vm6668_vm5, %v6910_v27, %v6810_v40  ;;  %v7455_v51 = vshll.u32 %v28526_v12, 16  ;;  %v6542_v25 = vrot.slane %v6235_v6, 7 }
 0x376   : > { %v6638_v10 = vsel %vm6626_vm3, %v28176_v8, %v33464_v42  ;;  %v6706_v29 = vsel %vm6689_vm6, %v6685_v14, %v6422_v52  ;;  %v6949_v23 = vsel %vm6689_vm6, %v6929_v18, %v6462_v56  ;;  %v33147_v58 = vrot.slane %v28593_v49, 5 }
 0x377   : > { %v6727_v17 = vsel %vm6710_vm7, %v6706_v29, %v6462_v56  ;;  %v6969_v11 = vsel %vm6710_vm7, %v6949_v23, %v6502_v20  ;;  %v33146_v0 = vrot.slane %v28593_v49, 6  ;;  %v7453_v42 = vshrl.u32 %v28526_v12, 16  ;;  %v5977_v29 = vpop.f32.mrf.mxu0  ;;  %v6048_v23 = vpop.f32.mrf.mxu1 }
 0x378   : > { %v6748_v40 = vsel %vm6731_vm8, %v6727_v17, %v6502_v20  ;;  %v6989_v27 = vsel %vm6731_vm8, %v6969_v11, %v6542_v25  ;;  %v33145_v43 = vrot.slane %v28593_v49, 7  ;;  %v6950_v18 = vsel %vm6689_vm6, %v6930_v48, %v33147_v58 }
 0x379   : > { %v6789_v52 = vsel %vm6626_vm3, %v28536_v7, %v6602_v34  ;;  %v6769_v56 = vsel %vm6752_vm9, %v6748_v40, %v6542_v25  ;;  %v28641_v14 = vsel %vm6752_vm9, %v6989_v27, %v6235_v6  ;;  %v6970_v20 = vsel %vm6710_vm7, %v6950_v18, %v33146_v0  ;;  %v28659_v6 = vld [vmem:[%s33023_s3 + $0x8] sm:$0xff]   ;;  %v33467_v27 = vld [vmem:[#allocation72_spill] sm:$0xff] }
 0x37a   : > { %v28646_v17 = vpack.c.bf16 %v6789_v52, %v6769_v56  ;;  %v6990_v48 = vsel %vm6731_vm8, %v6970_v20, %v33145_v43  ;;  %v7457_v11 = vrot.slane %v7455_v51, 1  ;;  %v6182_v7 = vadd.f32 %v28230_v36, %v6115_v22  ;;  %v33466_v25 = vld [vmem:[#allocation22_spill] sm:$0xff]  ;;  %v33468_v52 = vld [vmem:[#allocation23_spill] sm:$0xff] }
 0x37b   : > { %v28654_v34 = vsel %vm6752_vm9, %v6990_v48, %v28593_v49  ;;  %v6118_v40 = vadd.f32 %v28492_v41, %v33466_v25  ;;  %v6113_v18 = vadd.f32 %v28498_v32, %v33467_v27  ;;  %v6116_v51 = vadd.f32 %v28504_v26, %v33468_v52 }
 0x37c   : > { %33465 = vst [vmem:[#allocation18_spill] sm:$0xff] %v28654_v34  ;;  %v28667_v56 = vor.u32 %v7457_v11, %v7453_v42  ;;  %v28669_v22 = vmax.f32 %v6182_v7, 0.0  ;;  %v6114_v20 = vadd.f32 %v5977_v29, %v28287_v53  ;;  %v6117_v48 = vadd.f32 %v6048_v23, %v28291_v15 }
 0x37d   : > { %v33470_v43 = vrot.slane %v28316_v59, 1  ;;  %v6185_v41 = vadd.f32 %v28230_v36, %v6118_v40  ;;  %v6180_v32 = vadd.f32 %v28230_v36, %v6113_v18  ;;  %v6183_v25 = vadd.f32 %v28230_v36, %v6116_v51 }
 0x37e   : > { %33469 = vst [vmem:[#allocation67_spill] sm:$0xff] %v28667_v56  ;;  %v33471_v26 = vrot.slane %v28040_v30, 2  ;;  %23064 = vmatmul.mubr.msk.bf16.vlgmr.msra.gmra.mxu1 %vm7101_vm10, %v28667_v56  ;;  %v6604_v53 = vrot.slane %v28669_v22, 1  ;;  %v6851_v15 = vrot.slane %v28669_v22, 2  ;;  %v33472_v40 = vrot.slane %v28176_v8, 2 }
 0x37f   : > { %v6640_v0 = vsel %vm6626_vm3, %v28316_v59, %v33470_v43  ;;  %v6181_v43 = vadd.f32 %v28230_v36, %v6114_v20  ;;  %23076 = vmatpush3.bf16.msra.mxu1 %v28659_v6  ;;  %v28692_v23 = vmax.f32 %v6185_v41, 0.0  ;;  %v6240_v11 = vmax.f32 %v6180_v32, 0.0  ;;  %23079 = vmatprep.mubr.msk.bf16.mxu1 %vm25474_vm2, %v33365_v21 }
 0x380   : > { %v28683_v42 = vsel %vm6647_vm4, %v6636_v4, %v33471_v26  ;;  %v28697_v4 = vld [vmem:[%s33023_s3] sm:$0xff]   ;;  %v28699_v7 = vmax.f32 %v6183_v25, 0.0  ;;  %v28706_v27 = vsel %vm6647_vm4, %v6638_v10, %v33472_v40  ;;  %v33473_v18 = vrot.slane %v28316_v59, 2  ;;  %23077 = vmatprep.subr.bf16.mxu1 %v33365_v21  ;;  %v33478_v40 = vld [vmem:[#allocation27_spill] sm:$0xff] }
 0x381   : > { %v28715_v51 = vsel %vm6626_vm3, %v6604_v53, %v6851_v15  ;;  %v6184_v20 = vadd.f32 %v28230_v36, %v6117_v48  ;;  %v33149_v41 = vrot.slane %v28692_v23, 1  ;;  %v6852_v32 = vrot.slane %v28692_v23, 2 }
 0x382   : > { %v28711_v52 = vsel %vm6647_vm4, %v6640_v0, %v33473_v18  ;;  %v6284_v25 = vrot.slane %v6240_v11, 1  ;;  %v6324_v26 = vrot.slane %v6240_v11, 2  ;;  %v6364_v10 = vrot.slane %v6240_v11, 3 }
 0x383   : > { %v6241_v0 = vmax.f32 %v6181_v43, 0.0  ;;  %v28725_v18 = vsel %vm6626_vm3, %v33149_v41, %v6852_v32  ;;  %23078 = vmatpush3.bf16.msra.mxu1 %v28697_v4  ;;  %v6811_v48 = vrot.slane %v6240_v11, 4  ;;  %v28734_v43 = vmax.f32 %v6184_v20, 0.0 }
 0x384   : > { %33474 = vst [vmem:[#allocation25_spill] sm:$0xff] %v28725_v18  ;;  %v6645_v36 = vsel %vm6626_vm3, %v6240_v11, %v6284_v25  ;;  %v6891_v15 = vsel %vm6626_vm3, %v6284_v25, %v6324_v26  ;;  %23091 = vmatprep.subr.bf16.mxu1 %v33365_v21  ;;  %v33475_v32 = vrot.slane %v28450_v63, 1  ;;  %v7506_v25 = vshll.u32 %v28646_v17, 16 }
 0x385   : > { %v6666_v29 = vsel %vm6647_vm4, %v6645_v36, %v6324_v26  ;;  %v6911_v1 = vsel %vm6647_vm4, %v6891_v15, %v6364_v10  ;;  %v6812_v26 = vrot.slane %v28699_v7, 4  ;;  %v33476_v36 = vrot.slane %v28699_v7, 2 }
 0x386   : > { %v6642_v41 = vsel %vm6626_vm3, %v28450_v63, %v33475_v32  ;;  %v6687_v58 = vsel %vm6668_vm5, %v6666_v29, %v6364_v10  ;;  %v6931_v11 = vsel %vm6668_vm5, %v6911_v1, %v6811_v48  ;;  %v33477_v15 = vrot.slane %v28699_v7, 1  ;;  %23080 = vmatmul.mubr.msk.bf16.vlgmr.msra.gmra.mxu1 %vm7101_vm10, %v33478_v40 }
 0x387   : > { %v6424_v56 = vrot.slane %v6241_v0, 4  ;;  %v6464_v18 = vrot.slane %v6241_v0, 5  ;;  %v33479_v32 = vrot.slane %v28577_v60, 1  ;;  %v33480_v29 = vrot.slane %v28699_v7, 3  ;;  %23092 = vmatpush3.bf16.msra.mxu1 %v28659_v6  ;;  %23095 = vmatprep.mubr.msk.bf16.mxu1 %vm25474_vm2, %v33365_v21 }
 0x388   : > { %v6892_v20 = vsel %vm6626_vm3, %v33477_v15, %v33476_v36  ;;  %v6504_v48 = vrot.slane %v6241_v0, 6  ;;  %v6544_v13 = vrot.slane %v6241_v0, 7  ;;  %v6465_v34 = vrot.slane %v28734_v43, 5  ;;  %23093 = vmatprep.subr.bf16.mxu1 %v33365_v21 }
 0x389   : > { %v6644_v1 = vsel %vm6626_vm3, %v28577_v60, %v33479_v32  ;;  %v6912_v10 = vsel %vm6647_vm4, %v6892_v20, %v33480_v29  ;;  %v6708_v36 = vsel %vm6689_vm6, %v6687_v58, %v6424_v56  ;;  %v6951_v15 = vsel %vm6689_vm6, %v6931_v11, %v6464_v18 }
 0x38a   : > { %v6932_v40 = vsel %vm6668_vm5, %v6912_v10, %v6812_v26  ;;  %v6729_v32 = vsel %vm6710_vm7, %v6708_v36, %v6464_v18  ;;  %v6971_v20 = vsel %vm6710_vm7, %v6951_v15, %v6504_v48  ;;  %v6505_v29 = vrot.slane %v28734_v43, 6 }
 0x38b   : > { %v7504_v12 = vshrl.u32 %v28646_v17, 16  ;;  %v6991_v31 = vsel %vm6731_vm8, %v6971_v20, %v6544_v13  ;;  %v6545_v26 = vrot.slane %v28734_v43, 7  ;;  %v6952_v58 = vsel %vm6689_vm6, %v6932_v40, %v6465_v34  ;;  %23094 = vmatpush3.bf16.msra.mxu1 %v28697_v4 }
 0x38c   : > { %v7508_v56 = vrot.slane %v7506_v25, 1  ;;  %v6791_v11 = vsel %vm6626_vm3, %v28669_v22, %v6604_v53  ;;  %v28778_v18 = vsel %vm6752_vm9, %v6991_v31, %v6241_v0  ;;  %v6972_v10 = vsel %vm6710_vm7, %v6952_v58, %v6505_v29  ;;  %23107 = vmatprep.subr.bf16.mxu1 %v33365_v21  ;;  %v33481_v25 = vld [vmem:[#allocation34_spill] sm:$0xff] }
 0x38d   : > { %v6750_v36 = vsel %vm6731_vm8, %v6729_v32, %v6504_v48  ;;  %v6992_v15 = vsel %vm6731_vm8, %v6972_v10, %v6545_v26  ;;  %v28794_v31 = vpack.c.bf16 %v27935_v16, %v27981_v39  ;;  %v28804_v48 = vpack.c.bf16 %v33481_v25, %v27870_v50 }
 0x38e   : > { %v28788_v40 = vor.u32 %v7508_v56, %v7504_v12  ;;  %v6771_v22 = vsel %vm6752_vm9, %v6750_v36, %v6544_v13  ;;  %v28798_v53 = vsel %vm6752_vm9, %v6992_v15, %v28734_v43  ;;  %v28808_v12 = vpack.c.bf16 %v28158_v45, %v28258_v61  ;;  %23096 = vmatmul.mubr.msk.bf16.vlgmr.msra.gmra.mxu1 %vm7101_vm10, %v27875_v62 }
 0x38f   : > { %v28800_v0 = vpack.c.bf16 %v6791_v11, %v6771_v22  ;;  %v6417_v13 = vrot.slane %v28212_v2, 4  ;;  %v28817_v16 = vpack.c.bf16 %v28051_v55, %v28108_v19  ;;  %v28821_v50 = vpack.c.bf16 %v28437_v38, %v28516_v28  ;;  %23108 = vmatpush3.bf16.msra.mxu1 %v28659_v6  ;;  %23111 = vmatprep.mubr.msk.bf16.mxu1 %vm25474_vm2, %v33365_v21 }
 0x390   : > { %23072 = vmatmul.mubr.msk.bf16.vlgmr.msra.gmra.mxu0 %vm7101_vm10, %v28788_v40  ;;  %v28825_v39 = vpack.c.bf16 %v28299_v35, %v28366_v37  ;;  %v33482_v45 = vrot.slane %v28040_v30, 3  ;;  %v33483_v32 = vrot.slane %v28176_v8, 3  ;;  %v6419_v55 = vrot.slane %v28368_v57, 4  ;;  %23109 = vmatprep.subr.bf16.mxu1 %v33365_v21 }
 0x391   : > { %23084 = vmatpush3.bf16.msra.mxu0 %v28659_v6  ;;  %v28840_v19 = vpack.c.bf16 %v28572_v54, %v28641_v14  ;;  %v33484_v30 = vrot.slane %v27826_v46, 4  ;;  %v33485_v8 = vrot.slane %v28316_v59, 3  ;;  %v33486_v38 = vrot.slane %v28450_v63, 2  ;;  %v33487_v54 = vld [vmem:[#allocation32_spill] sm:$0xff]  ;;  %23087 = vmatprep.mubr.msk.bf16.mxu0 %vm25474_vm2, %v33365_v21 }
 0x392   : > { %v6678_v61 = vsel %vm6668_vm5, %v28683_v42, %v33482_v45  ;;  %v6680_v20 = vsel %vm6668_vm5, %v28706_v27, %v33483_v32  ;;  %23085 = vmatprep.subr.bf16.mxu0 %v33365_v21  ;;  %v33488_v14 = vrot.slane %v33487_v54, 5  ;;  %v33489_v42 = vld [vmem:[#allocation58_spill] sm:$0xff]  ;;  %v33494_v10 = vrot.slane %v28087_v9, 4 }
 0x393   : > { %v6695_v35 = vsel %vm6689_vm6, %v28569_v24, %v33484_v30  ;;  %v6682_v37 = vsel %vm6668_vm5, %v28711_v52, %v33485_v8  ;;  %v6663_v28 = vsel %vm6647_vm4, %v6642_v41, %v33486_v38  ;;  %v33490_v24 = vrot.slane %v27953_v3, 4  ;;  %v33492_v41 = vld [vmem:[#allocation85_spill] sm:$0xff]  ;;  %23110 = vmatpush3.bf16.msra.mxu1 %v28697_v4 }
 0x394   : > { %v6714_v27 = vsel %vm6710_vm7, %v33489_v42, %v33488_v14  ;;  %v33491_v52 = vrot.slane %v28577_v60, 2  ;;  %v33493_v56 = vrot.slane %v33492_v41, 1  ;;  %v6699_v36 = vsel %vm6689_vm6, %v6678_v61, %v33494_v10  ;;  %v33497_v61 = vld [vmem:[#allocation38_spill] sm:$0xff]  ;;  %23123 = vmatprep.subr.bf16.mxu1 %v33365_v21 }
 0x395   : > { %v6697_v59 = vsel %vm6689_vm6, %v28582_v47, %v33490_v24  ;;  %v6701_v47 = vsel %vm6689_vm6, %v6680_v20, %v6417_v13  ;;  %v6421_v15 = vrot.slane %v28496_v5, 4  ;;  %v6703_v25 = vsel %vm6689_vm6, %v6682_v37, %v6419_v55  ;;  %23086 = vmatpush3.bf16.msra.mxu0 %v28697_v4  ;;  %v33501_v37 = vld [vmem:[#allocation44_spill] sm:$0xff]  ;;  %v33504_v24 = vld [vmem:[#allocation95_spill] sm:$0xff]  ;;  %v33508_v10 = vld [vmem:[#allocation54_spill] sm:$0xff] }
 0x396   : > { %v6665_v58 = vsel %vm6647_vm4, %v6644_v1, %v33491_v52  ;;  %v6778_v11 = vsel %vm6626_vm3, %v33492_v41, %v33493_v56  ;;  %v33495_v1 = vrot.slane %v27826_v46, 5  ;;  %v33496_v45 = vrot.slane %v28450_v63, 3  ;;  %23099 = vmatprep.subr.bf16.mxu0 %v33365_v21 }
 0x397   : > { %v6423_v30 = vrot.slane %v28593_v49, 4  ;;  %v33498_v13 = vrot.slane %v33497_v61, 1  ;;  %v33499_v8 = vrot.slane %v27953_v3, 5  ;;  %v33500_v55 = vrot.slane %v28577_v60, 3 }
 0x398   : > { %v6716_v22 = vsel %vm6710_vm7, %v6695_v35, %v33495_v1  ;;  %v6684_v32 = vsel %vm6668_vm5, %v6663_v28, %v33496_v45  ;;  %v33502_v38 = vrot.slane %v33501_v37, 1  ;;  %v33503_v14 = vrot.slane %v28087_v9, 5 }
 0x399   : > { %v6780_v20 = vsel %vm6626_vm3, %v33497_v61, %v33498_v13  ;;  %v6718_v35 = vsel %vm6710_vm7, %v6697_v59, %v33499_v8  ;;  %v6686_v63 = vsel %vm6668_vm5, %v6665_v58, %v33500_v55  ;;  %v33505_v52 = vrot.slane %v33504_v24, 1  ;;  %v33510_v61 = vld [vmem:[#allocation84_spill] sm:$0xff]  ;;  %v33511_v13 = vld [vmem:[#allocation94_spill] sm:$0xff]  ;;  %v33513_v55 = vld [vmem:[#allocation77_spill] sm:$0xff] }
 0x39a   : > { %v6782_v28 = vsel %vm6626_vm3, %v33501_v37, %v33502_v38  ;;  %v6720_v42 = vsel %vm6710_vm7, %v6699_v36, %v33503_v14  ;;  %v33506_v59 = vrot.slane %v28212_v2, 5  ;;  %v33507_v41 = vrot.slane %v28368_v57, 5  ;;  %23088 = vmatmul.mubr.msk.bf16.vlgmr.msra.gmra.mxu0 %vm7101_vm10, %v33510_v61  ;;  %23112 = vmatmul.mubr.msk.bf16.vlgmr.msra.gmra.mxu1 %vm7101_vm10, %v33511_v13  ;;  %v33515_v38 = vld [vmem:[#allocation53_spill] sm:$0xff] }
 0x39b   : > { %v6784_v60 = vsel %vm6626_vm3, %v33504_v24, %v33505_v52  ;;  %v33509_v1 = vrot.slane %v33508_v10, 1  ;;  %v6705_v36 = vsel %vm6689_vm6, %v6684_v32, %v6421_v15  ;;  %v6707_v8 = vsel %vm6689_vm6, %v6686_v63, %v6423_v30  ;;  %23100 = vmatpush3.bf16.msra.mxu0 %v28659_v6  ;;  %23124 = vmatpush3.bf16.msra.mxu1 %v28659_v6 }
 0x39c   : > { %v6722_v58 = vsel %vm6710_vm7, %v6701_v47, %v33506_v59  ;;  %v6724_v56 = vsel %vm6710_vm7, %v6703_v25, %v33507_v41  ;;  %v33512_v47 = vrot.slane %v33487_v54, 6  ;;  %v33514_v37 = vrot.slane %v33513_v55, 6  ;;  %23101 = vmatprep.subr.bf16.mxu0 %v33365_v21  ;;  %23125 = vmatprep.subr.bf16.mxu1 %v33365_v21  ;;  %v33520_v41 = vld [vmem:[#allocation9_spill] sm:$0xff] }
 0x39d   : > { %v6788_v45 = vsel %vm6626_vm3, %v33508_v10, %v33509_v1  ;;  %v33516_v32 = vrot.slane %v28699_v7, 1  ;;  %v33517_v30 = vrot.slane %v33487_v54, 7  ;;  %v33519_v52 = vrot.slane %v28496_v5, 5  ;;  %23103 = vmatprep.mubr.msk.bf16.mxu0 %vm25474_vm2, %v33365_v21  ;;  %23127 = vmatprep.mubr.msk.bf16.mxu1 %vm25474_vm2, %v33365_v21  ;;  %v33521_v54 = vld [vmem:[#allocation7_spill] sm:$0xff] }
 0x39e   : > { %v6735_v25 = vsel %vm6731_vm8, %v6714_v27, %v33512_v47  ;;  %v6733_v15 = vsel %vm6731_vm8, %v33515_v38, %v33514_v37  ;;  %v33518_v27 = vrot.slane %v33513_v55, 7  ;;  %v33522_v47 = vrot.slane %v28593_v49, 5 }
 0x39f   : > { %v6646_v14 = vsel %vm6626_vm3, %v28699_v7, %v33516_v32  ;;  %v6756_v63 = vsel %vm6752_vm9, %v6735_v25, %v33517_v30  ;;  %v6726_v59 = vsel %vm6710_vm7, %v6705_v36, %v33519_v52  ;;  %v33523_v55 = vrot.slane %v27953_v3, 6  ;;  %23102 = vmatpush3.bf16.msra.mxu0 %v28697_v4  ;;  %23126 = vmatpush3.bf16.msra.mxu1 %v28697_v4 }
 0x3a0   : > { %v6754_v24 = vsel %vm6752_vm9, %v6733_v15, %v33518_v27  ;;  %v28957_v10 = vpack.c.bf16 %v33520_v41, %v6756_v63  ;;  %v6728_v25 = vsel %vm6710_vm7, %v6707_v8, %v33522_v47  ;;  %v33524_v37 = vrot.slane %v27826_v46, 6  ;;  %23115 = vmatprep.subr.bf16.mxu0 %v33365_v21  ;;  %23139 = vmatprep.subr.bf16.mxu1 %v33365_v21 }
 0x3a1   : > { %v28960_v1 = vpack.c.bf16 %v33521_v54, %v6754_v24  ;;  %v6739_v36 = vsel %vm6731_vm8, %v6718_v35, %v33523_v55  ;;  %v33525_v15 = vrot.slane %v28212_v2, 6  ;;  %v33526_v30 = vrot.slane %v28699_v7, 2  ;;  %v33532_v55 = vld [vmem:[#allocation90_spill] sm:$0xff] }
 0x3a2   : > { %v6737_v38 = vsel %vm6731_vm8, %v6716_v22, %v33524_v37  ;;  %v33527_v8 = vrot.slane %v27953_v3, 7  ;;  %v33528_v27 = vrot.slane %v27826_v46, 7  ;;  %v28996_v3 = vpack.c.bf16 %v28715_v51, %v28778_v18  ;;  %23104 = vmatmul.mubr.msk.bf16.vlgmr.msra.gmra.mxu0 %vm7101_vm10, %v33532_v55  ;;  %23128 = vmatmul.mubr.msk.bf16.vlgmr.msra.gmra.mxu1 %vm7101_vm10, %v28372_v44 }
 0x3a3   : > { %v6743_v32 = vsel %vm6731_vm8, %v6722_v58, %v33525_v15  ;;  %v6667_v63 = vsel %vm6647_vm4, %v6646_v14, %v33526_v30  ;;  %v33529_v14 = vrot.slane %v28212_v2, 7  ;;  %v33530_v46 = vrot.slane %v28087_v9, 6  ;;  %23116 = vmatpush3.bf16.msra.mxu0 %v28659_v6  ;;  %23140 = vmatpush3.bf16.msra.mxu1 %v28659_v6  ;;  %v33537_v15 = vld [vmem:[#allocation8_spill] sm:$0xff] }
 0x3a4   : > { %v6760_v35 = vsel %vm6752_vm9, %v6739_v36, %v33527_v8  ;;  %v6758_v22 = vsel %vm6752_vm9, %v6737_v38, %v33528_v27  ;;  %v33531_v47 = vrot.slane %v28496_v5, 6  ;;  %v33533_v2 = vrot.slane %v28087_v9, 7  ;;  %23117 = vmatprep.subr.bf16.mxu0 %v33365_v21  ;;  %23141 = vmatprep.subr.bf16.mxu1 %v33365_v21 }
 0x3a5   : > { %v28987_v58 = vpack.c.bf16 %v6780_v20, %v6760_v35  ;;  %v28989_v24 = vpack.c.bf16 %v6778_v11, %v6758_v22  ;;  %v6764_v52 = vsel %vm6752_vm9, %v6743_v32, %v33529_v14  ;;  %v6741_v54 = vsel %vm6731_vm8, %v6720_v42, %v33530_v46  ;;  %23119 = vmatprep.mubr.msk.bf16.mxu0 %vm25474_vm2, %v33365_v21  ;;  %v33543_v22 = vld [vmem:[#allocation5_spill] sm:$0xff] }
 0x3a6   : > { %v28998_v41 = vpack.c.bf16 %v6784_v60, %v6764_v52  ;;  %v6747_v20 = vsel %vm6731_vm8, %v6726_v59, %v33531_v47  ;;  %v6425_v11 = vrot.slane %v28734_v43, 4  ;;  %v6762_v51 = vsel %vm6752_vm9, %v6741_v54, %v33533_v2  ;;  %23143 = vmatprep.mubr.msk.bf16.mxu1 %vm25474_vm2, %v33365_v21  ;;  %v29078_v14 = vld [vmem:[%s33023_s3 + $0x80] sm:$0xff]   ;;  %v33548_v2 = vld [vmem:[#allocation26_spill] sm:$0xff]  ;;  %v33551_v43 = vld [vmem:[#allocation35_spill] sm:$0xff] }
 0x3a7   : > { %v33534_v18 = vrot.slane %v28496_v5, 7  ;;  %v33535_v60 = vrot.slane %v28368_v57, 6  ;;  %v33536_v36 = vrot.slane %v28699_v7, 3  ;;  %v29025_v38 = vpack.c.bf16 %v6782_v28, %v6762_v51  ;;  %23118 = vmatpush3.bf16.msra.mxu0 %v28697_v4  ;;  %23142 = vmatpush3.bf16.msra.mxu1 %v28697_v4  ;;  %v33545_v54 = vld [vmem:[#allocation33_spill] sm:$0xff] }
 0x3a8   : > { %v33538_v5 = vrot.slane %v33537_v15, 1  ;;  %v33539_v7 = vrot.slane %v28368_v57, 7  ;;  %v33540_v30 = vrot.slane %v28593_v49, 6  ;;  %v33542_v57 = vrot.slane %v28593_v49, 7  ;;  %23131 = vmatprep.subr.bf16.mxu0 %v33365_v21  ;;  %23155 = vmatprep.subr.bf16.mxu1 %v33365_v21  ;;  %v33546_v47 = vld [vmem:[#allocation81_spill] sm:$0xff] }
 0x3a9   : > { %v6768_v42 = vsel %vm6752_vm9, %v6747_v20, %v33534_v18  ;;  %v6745_v59 = vsel %vm6731_vm8, %v6724_v56, %v33535_v60  ;;  %v6688_v37 = vsel %vm6668_vm5, %v6667_v63, %v33536_v36  ;;  %v33544_v52 = vrot.slane %v28692_v23, 1  ;;  %v33550_v18 = vld [vmem:[#allocation40_spill] sm:$0xff]  ;;  %v33554_v36 = vld [vmem:[#allocation6_spill] sm:$0xff] }
 0x3aa   : > { %v29027_v9 = vpack.c.bf16 %v6788_v45, %v6768_v42  ;;  %v6786_v32 = vsel %vm6626_vm3, %v33537_v15, %v33538_v5  ;;  %v6766_v56 = vsel %vm6752_vm9, %v6745_v59, %v33539_v7  ;;  %v6749_v28 = vsel %vm6731_vm8, %v6728_v25, %v33540_v30  ;;  %23120 = vmatmul.mubr.msk.bf16.vlgmr.msra.gmra.mxu0 %vm7101_vm10, %v33543_v22  ;;  %v33553_v59 = vld [vmem:[#allocation51_spill] sm:$0xff]  ;;  %v33556_v5 = vld [vmem:[#allocation45_spill] sm:$0xff] }
 0x3ab   : > { %v33541_v45 = vrot.slane %v28553_v33, 1  ;;  %v29049_v8 = vpack.c.bf16 %v6786_v32, %v6766_v56  ;;  %v6770_v35 = vsel %vm6752_vm9, %v6749_v28, %v33542_v57  ;;  %v6709_v27 = vsel %vm6689_vm6, %v6688_v37, %v6425_v11  ;;  %23144 = vmatmul.mubr.msk.bf16.vlgmr.msra.gmra.mxu1 %vm7101_vm10, %v28646_v17  ;;  %23132 = vmatpush3.bf16.msra.mxu0 %v28659_v6  ;;  %v33547_v11 = vld [vmem:[#allocation79_spill] sm:$0xff]  ;;  %v33560_v28 = vld [vmem:[#allocation52_spill] sm:$0xff]  ;;  %v33563_v57 = vld [vmem:[#allocation18_spill] sm:$0xff] }
 0x3ac   : > { %v6730_v49 = vsel %vm6710_vm7, %v6709_v27, %v6465_v34  ;;  %23133 = vmatprep.subr.bf16.mxu0 %v33365_v21  ;;  %v6792_v6 = vsel %vm6626_vm3, %v28692_v23, %v33544_v52  ;;  %23135 = vmatprep.mubr.msk.bf16.mxu0 %vm25474_vm2, %v33365_v21  ;;  %v29098_v20 = vpack.c.bf16 %v33546_v47, %v33545_v54  ;;  %v33549_v23 = vld [vmem:[#allocation41_spill] sm:$0xff]  ;;  %v33555_v15 = vld [vmem:[#allocation47_spill] sm:$0xff]  ;;  %v33571_v54 = vld [vmem:[#allocation10_spill] sm:$0xff] }
 0x3ad   : > { %v6790_v63 = vsel %vm6626_vm3, %v28553_v33, %v33541_v45  ;;  %v29062_v33 = vld [vmem:[%s33023_s3 + $0x88] sm:$0xff]   ;;  %v6751_v34 = vsel %vm6731_vm8, %v6730_v49, %v6505_v29  ;;  %23159 = vmatprep.mubr.msk.bf16.mxu1 %vm25474_vm2, %v33365_v21  ;;  %v29104_v51 = vpack.c.bf16 %v33548_v2, %v33547_v11  ;;  %v29108_v42 = vpack.c.bf16 %v33550_v18, %v33549_v23  ;;  %v33557_v7 = vld [vmem:[#allocation19_spill] sm:$0xff] }
 0x3ae   : > { %v29055_v25 = vpack.c.bf16 %v6790_v63, %v6770_v35  ;;  %23156 = vmatpush3.bf16.msra.mxu1 %v29062_v33  ;;  %v6772_v46 = vsel %vm6752_vm9, %v6751_v34, %v6545_v26  ;;  %v33552_v26 = vld [vmem:[#allocation86_spill] sm:$0xff]  ;;  %v29118_v37 = vpack.c.bf16 %v33554_v36, %v33553_v59  ;;  %v29124_v32 = vpack.c.bf16 %v33556_v5, %v33555_v15  ;;  %v33559_v30 = vld [vmem:[#allocation55_spill] sm:$0xff]  ;;  %v33562_v63 = vld [vmem:[#allocation12_spill] sm:$0xff] }
 0x3af   : > { %23157 = vmatprep.subr.bf16.mxu1 %v33365_v21  ;;  %v29100_v29 = vpack.c.bf16 %v6792_v6, %v6772_v46  ;;  %23134 = vmatpush3.bf16.msra.mxu0 %v28697_v4  ;;  %v29114_v60 = vpack.c.bf16 %v33552_v26, %v33551_v43  ;;  %v33558_v4 = vld [vmem:[#allocation13_spill] sm:$0xff]  ;;  %v29132_v45 = vpack.c.bf16 %v33560_v28, %v33559_v30  ;;  %v33564_v35 = vld [vmem:[#allocation66_spill] sm:$0xff]  ;;  %v8707_v11 = vshll.u32 %v28800_v0, 16  ;;  %v33573_v18 = vld [vmem:[#allocation67_spill] sm:$0xff] }
 0x3b0   : > { %23147 = vmatprep.subr.bf16.mxu0 %v33365_v21  ;;  %v29128_v56 = vpack.c.bf16 %v33558_v4, %v33557_v7  ;;  %v29140_v27 = vpack.c.bf16 %v33564_v35, %v33563_v57  ;;  %v29208_v34 = vld [vmem:[%s33023_s3 + $0xa0] sm:$0xff]   ;;  %v33569_v6 = vld [vmem:[#allocation46_spill] sm:$0xff]  ;;  %v8705_v36 = vshrl.u32 %v28800_v0, 16  ;;  %v29295_v15 = vld [vmem:[%s33023_s3 + $0x18] sm:$0xff]  }
 0x3b1   : > { %33561 = vst [vmem:[#allocation74_spill] sm:$0xff] %v29132_v45  ;;  %v33572_v23 = vld [vmem:[#allocation50_spill] sm:$0xff]  ;;  %v8709_v26 = vrot.slane %v8707_v11, 1  ;;  %v33574_v7 = vld [vmem:[#allocation59_spill] sm:$0xff] }
 0x3b2   : > { %23158 = vmatpush3.bf16.msra.mxu1 %v29078_v14  ;;  %23136 = vmatmul.mubr.msk.bf16.vlgmr.msra.gmra.mxu0 %vm7101_vm10, %v33562_v63  ;;  %33565 = vst [vmem:[#allocation24_spill] sm:$0xff] %v29140_v27  ;;  %v33575_v57 = vld [vmem:[#allocation39_spill] sm:$0xff] }
 0x3b3   : > { %23171 = vmatprep.subr.bf16.mxu1 %v33365_v21  ;;  %23148 = vmatpush3.bf16.msra.mxu0 %v29062_v33  ;;  %v8710_v5 = vor.u32 %v8709_v26, %v8705_v36  ;;  %v9423_v36 = vshll.u32 %v28817_v16, 16 }
 0x3b4   : > { %23149 = vmatprep.subr.bf16.mxu0 %v33365_v21  ;;  %23151 = vmatprep.mubr.msk.bf16.mxu0 %vm25474_vm2, %v33365_v21 }
 0x3b5   : > { %23160 = vmatmul.mubr.msk.bf16.vlgmr.msra.gmra.mxu1 %vm7101_vm10, %v27875_v62  ;;  %v33566_v62 = vld [vmem:[#allocation25_spill] sm:$0xff] }
 0x3b6   : > { %23172 = vmatpush3.bf16.msra.mxu1 %v29062_v33  ;;  %23175 = vmatprep.mubr.msk.bf16.mxu1 %vm25474_vm2, %v33365_v21 }
 0x3b7   : > { %23173 = vmatprep.subr.bf16.mxu1 %v33365_v21  ;;  %23150 = vmatpush3.bf16.msra.mxu0 %v29078_v14 }
 0x3b8   : > { %23163 = vmatprep.subr.bf16.mxu0 %v33365_v21 }
 0x3ba   : > { %23174 = vmatpush3.bf16.msra.mxu1 %v29078_v14  ;;  %23152 = vmatmul.mubr.msk.bf16.vlgmr.msra.gmra.mxu0 %vm7101_vm10, %v33510_v61  ;;  %v29170_v61 = vpack.c.bf16 %v33566_v62, %v28798_v53 }
 0x3bb   : > { %23187 = vmatprep.subr.bf16.mxu1 %v33365_v21  ;;  %23164 = vmatpush3.bf16.msra.mxu0 %v29062_v33 }
 0x3bc   : > { %23165 = vmatprep.subr.bf16.mxu0 %v33365_v21  ;;  %23167 = vmatprep.mubr.msk.bf16.mxu0 %vm25474_vm2, %v33365_v21  ;;  %33567 = vst [vmem:[#allocation75_spill] sm:$0xff] %v29170_v61 }
 0x3bd   : > { %23176 = vmatmul.mubr.msk.bf16.vlgmr.msra.gmra.mxu1 %vm7101_vm10, %v33511_v13  ;;  %v29174_v13 = vpop.f32.mrf.mxu0 }
 0x3be   : > { %23188 = vmatpush3.bf16.msra.mxu1 %v29062_v33  ;;  %23191 = vmatprep.mubr.msk.bf16.mxu1 %vm25474_vm2, %v33365_v21 }
 0x3bf   : > { %23189 = vmatprep.subr.bf16.mxu1 %v33365_v21  ;;  %23166 = vmatpush3.bf16.msra.mxu0 %v29078_v14  ;;  %v23009_v49 = vpop.f32.mrf.mxu0 }
 0x3c0   : > { %23179 = vmatprep.subr.bf16.mxu0 %v33365_v21 }
 0x3c1   : > { %v29184_v53 = vpop.f32.mrf.mxu0 }
 0x3c2   : > { %23190 = vmatpush3.bf16.msra.mxu1 %v29078_v14  ;;  %23168 = vmatmul.mubr.msk.bf16.vlgmr.msra.gmra.mxu0 %vm7101_vm10, %v33532_v55 }
 0x3c3   : > { %23203 = vmatprep.subr.bf16.mxu1 %v33365_v21  ;;  %23180 = vmatpush3.bf16.msra.mxu0 %v29062_v33  ;;  %v23010_v55 = vpop.f32.mrf.mxu0 }
 0x3c4   : > { %23181 = vmatprep.subr.bf16.mxu0 %v33365_v21  ;;  %23183 = vmatprep.mubr.msk.bf16.mxu0 %vm25474_vm2, %v33365_v21 }
 0x3c5   : > { %23192 = vmatmul.mubr.msk.bf16.vlgmr.msra.gmra.mxu1 %vm7101_vm10, %v28372_v44  ;;  %v29195_v44 = vld [vmem:[%s33023_s3 + $0xa8] sm:$0xff]  }
 0x3c6   : > { %23204 = vmatpush3.bf16.msra.mxu1 %v29062_v33  ;;  %23207 = vmatprep.mubr.msk.bf16.mxu1 %vm25474_vm2, %v33365_v21 }
 0x3c7   : > { %23205 = vmatprep.subr.bf16.mxu1 %v33365_v21  ;;  %23182 = vmatpush3.bf16.msra.mxu0 %v29078_v14 }
 0x3c8   : > { %23195 = vmatprep.subr.bf16.mxu0 %v33365_v21 }
 0x3ca   : > { %23206 = vmatpush3.bf16.msra.mxu1 %v29078_v14  ;;  %23184 = vmatmul.mubr.msk.bf16.vlgmr.msra.gmra.mxu0 %vm7101_vm10, %v33543_v22 }
 0x3cb   : > { %23219 = vmatprep.subr.bf16.mxu1 %v33365_v21  ;;  %23196 = vmatpush3.bf16.msra.mxu0 %v29062_v33  ;;  %v29228_v22 = vpop.f32.mrf.mxu1 }
 0x3cc   : > { %23197 = vmatprep.subr.bf16.mxu0 %v33365_v21  ;;  %23199 = vmatprep.mubr.msk.bf16.mxu0 %vm25474_vm2, %v33365_v21 }
 0x3cd   : > { %23208 = vmatmul.mubr.msk.bf16.vlgmr.msra.gmra.mxu1 %vm7101_vm10, %v28646_v17  ;;  %v33568_v17 = vld [vmem:[#allocation87_spill] sm:$0xff]  ;;  %v23017_v52 = vpop.f32.mrf.mxu1 }
 0x3ce   : > { %23220 = vmatpush3.bf16.msra.mxu1 %v29195_v44  ;;  %23223 = vmatprep.mubr.msk.bf16.mxu1 %vm25474_vm2, %v33365_v21 }
 0x3cf   : > { %23221 = vmatprep.subr.bf16.mxu1 %v33365_v21  ;;  %23198 = vmatpush3.bf16.msra.mxu0 %v29078_v14 }
 0x3d0   : > { %23211 = vmatprep.subr.bf16.mxu0 %v33365_v21 }
 0x3d2   : > { %23222 = vmatpush3.bf16.msra.mxu1 %v29208_v34  ;;  %23200 = vmatmul.mubr.msk.bf16.vlgmr.msra.gmra.mxu0 %vm7101_vm10, %v33562_v63 }
 0x3d3   : > { %23235 = vmatprep.subr.bf16.mxu1 %v33365_v21  ;;  %23212 = vmatpush3.bf16.msra.mxu0 %v29062_v33  ;;  %v29238_v33 = vpop.f32.mrf.mxu1 }
 0x3d4   : > { %23213 = vmatprep.subr.bf16.mxu0 %v33365_v21  ;;  %23215 = vmatprep.mubr.msk.bf16.mxu0 %vm25474_vm2, %v33365_v21 }
 0x3d5   : > { %23224 = vmatmul.mubr.msk.bf16.vlgmr.msra.gmra.mxu1 %vm7101_vm10, %v33568_v17  ;;  %v23018_v46 = vpop.f32.mrf.mxu1  ;;  %v29390_v17 = vld [vmem:[%s33023_s3 + $0x30] sm:$0xff]  }
 0x3d6   : > { %23236 = vmatpush3.bf16.msra.mxu1 %v29195_v44  ;;  %23239 = vmatprep.mubr.msk.bf16.mxu1 %vm25474_vm2, %v33365_v21 }
 0x3d7   : > { %23237 = vmatprep.subr.bf16.mxu1 %v33365_v21  ;;  %23214 = vmatpush3.bf16.msra.mxu0 %v29078_v14  ;;  %v33570_v14 = vld [vmem:[#allocation91_spill] sm:$0xff] }
 0x3d8   : > { %23227 = vmatprep.subr.bf16.mxu0 %v33365_v21 }
 0x3da   : > { %23238 = vmatpush3.bf16.msra.mxu1 %v29208_v34  ;;  %23216 = vmatmul.mubr.msk.bf16.vlgmr.msra.gmra.mxu0 %vm7101_vm10, %v28800_v0  ;;  %v29307_v0 = vld [vmem:[%s33023_s3 + $0x10] sm:$0xff]  }
 0x3db   : > { %23251 = vmatprep.subr.bf16.mxu1 %v33365_v21  ;;  %23228 = vmatpush3.bf16.msra.mxu0 %v29195_v44 }
 0x3dc   : > { %23229 = vmatprep.subr.bf16.mxu0 %v33365_v21  ;;  %23231 = vmatprep.mubr.msk.bf16.mxu0 %vm25474_vm2, %v33365_v21 }
 0x3dd   : > { %23240 = vmatmul.mubr.msk.bf16.vlgmr.msra.gmra.mxu1 %vm7101_vm10, %v33569_v6 }
 0x3de   : > { %23252 = vmatpush3.bf16.msra.mxu1 %v29195_v44  ;;  %23255 = vmatprep.mubr.msk.bf16.mxu1 %vm25474_vm2, %v33365_v21  ;;  %v29268_v47 = vpop.f32.mrf.mxu0 }
 0x3df   : > { %23253 = vmatprep.subr.bf16.mxu1 %v33365_v21  ;;  %23230 = vmatpush3.bf16.msra.mxu0 %v29208_v34 }
 0x3e0   : > { %23243 = vmatprep.subr.bf16.mxu0 %v33365_v21  ;;  %v23025_v2 = vpop.f32.mrf.mxu0 }
 0x3e1   : > { %v9321_v2 = vshrl.u32 %v28804_v48, 16 }
 0x3e2   : > { %23254 = vmatpush3.bf16.msra.mxu1 %v29208_v34  ;;  %23232 = vmatmul.mubr.msk.bf16.vlgmr.msra.gmra.mxu0 %vm7101_vm10, %v33570_v14  ;;  %v29279_v43 = vpop.f32.mrf.mxu0  ;;  %v9323_v14 = vshll.u32 %v28804_v48, 16 }
 0x3e3   : > { %23267 = vmatprep.subr.bf16.mxu1 %v33365_v21  ;;  %23244 = vmatpush3.bf16.msra.mxu0 %v29195_v44 }
 0x3e4   : > { %23245 = vmatprep.subr.bf16.mxu0 %v33365_v21  ;;  %23247 = vmatprep.mubr.msk.bf16.mxu0 %vm25474_vm2, %v33365_v21  ;;  %v23026_v59 = vpop.f32.mrf.mxu0  ;;  %v9325_v11 = vrot.slane %v9323_v14, 1  ;;  %v9521_v14 = vshrl.u32 %v28825_v39, 16 }
 0x3e5   : > { %23256 = vmatmul.mubr.msk.bf16.vlgmr.msra.gmra.mxu1 %vm7101_vm10, %v33571_v54  ;;  %v9273_v59 = vshll.u32 %v33575_v57, 16 }
 0x3e6   : > { %23268 = vmatpush3.bf16.msra.mxu1 %v29195_v44  ;;  %23271 = vmatprep.mubr.msk.bf16.mxu1 %vm25474_vm2, %v33365_v21 }
 0x3e7   : > { %23269 = vmatprep.subr.bf16.mxu1 %v33365_v21  ;;  %23246 = vmatpush3.bf16.msra.mxu0 %v29208_v34 }
 0x3e8   : > { %23259 = vmatprep.subr.bf16.mxu0 %v33365_v21 }
 0x3ea   : > { %23270 = vmatpush3.bf16.msra.mxu1 %v29208_v34  ;;  %23248 = vmatmul.mubr.msk.bf16.vlgmr.msra.gmra.mxu0 %vm7101_vm10, %v33572_v23 }
 0x3eb   : > { %23283 = vmatprep.subr.bf16.mxu1 %v33365_v21  ;;  %23260 = vmatpush3.bf16.msra.mxu0 %v29195_v44  ;;  %v29309_v4 = vpop.f32.mrf.mxu1 }
 0x3ec   : > { %23261 = vmatprep.subr.bf16.mxu0 %v33365_v21  ;;  %23263 = vmatprep.mubr.msk.bf16.mxu0 %vm25474_vm2, %v33365_v21 }
 0x3ed   : > { %23272 = vmatmul.mubr.msk.bf16.vlgmr.msra.gmra.mxu1 %vm7101_vm10, %v33573_v18  ;;  %v23033_v30 = vpop.f32.mrf.mxu1  ;;  %v29421_v18 = vor.u32 %v9325_v11, %v9321_v2 }
 0x3ee   : > { %23284 = vmatpush3.bf16.msra.mxu1 %v29195_v44  ;;  %23287 = vmatprep.mubr.msk.bf16.mxu1 %vm25474_vm2, %v33365_v21  ;;  %v9421_v30 = vshrl.u32 %v28817_v16, 16 }
 0x3ef   : > { %23285 = vmatprep.subr.bf16.mxu1 %v33365_v21  ;;  %23262 = vmatpush3.bf16.msra.mxu0 %v29208_v34  ;;  %v29319_v28 = vpop.f32.mrf.mxu1 }
 0x3f0   : > { %23275 = vmatprep.subr.bf16.mxu0 %v33365_v21 }
 0x3f1   : > { %v23034_v63 = vpop.f32.mrf.mxu1 }
 0x3f2   : > { %23286 = vmatpush3.bf16.msra.mxu1 %v29208_v34  ;;  %23264 = vmatmul.mubr.msk.bf16.vlgmr.msra.gmra.mxu0 %vm7101_vm10, %v33574_v7  ;;  %v9425_v7 = vrot.slane %v9423_v36, 1  ;;  %v9623_v36 = vshll.u32 %v28840_v19, 16 }
 0x3f3   : > { %23299 = vmatprep.subr.bf16.mxu1 %v33365_v21  ;;  %23276 = vmatpush3.bf16.msra.mxu0 %v29195_v44  ;;  %v29376_v44 = vld [vmem:[%s33023_s3 + $0x38] sm:$0xff]  }
 0x3f4   : > { %23277 = vmatprep.subr.bf16.mxu0 %v33365_v21  ;;  %23279 = vmatprep.mubr.msk.bf16.mxu0 %vm25474_vm2, %v33365_v21 }
 0x3f5   : > { %23288 = vmatmul.mubr.msk.bf16.vlgmr.msra.gmra.mxu1 %vm7101_vm10, %v8710_v5  ;;  %v9275_v5 = vrot.slane %v9273_v59, 1  ;;  %v9473_v59 = vshll.u32 %v28808_v12, 16 }
 0x3f6   : > { %23300 = vmatpush3.bf16.msra.mxu1 %v29295_v15  ;;  %23303 = vmatprep.mubr.msk.bf16.mxu1 %vm25474_vm2, %v33365_v21 }
 0x3f7   : > { %23301 = vmatprep.subr.bf16.mxu1 %v33365_v21  ;;  %23278 = vmatpush3.bf16.msra.mxu0 %v29208_v34 }
 0x3f8   : > { %23291 = vmatprep.subr.bf16.mxu0 %v33365_v21 }
 0x3fa   : > { %23302 = vmatpush3.bf16.msra.mxu1 %v29307_v0  ;;  %23280 = vmatmul.mubr.msk.bf16.vlgmr.msra.gmra.mxu0 %vm7101_vm10, %v28788_v40  ;;  %v33576_v40 = vld [vmem:[#allocation29_spill] sm:$0xff] }
 0x3fb   : > { %23315 = vmatprep.subr.bf16.mxu1 %v33365_v21  ;;  %23292 = vmatpush3.bf16.msra.mxu0 %v29295_v15  ;;  %v9211_v34 = vshll.u32 %v33576_v40, 16  ;;  %v9209_v6 = vshrl.u32 %v33576_v40, 16 }
 0x3fc   : > { %23293 = vmatprep.subr.bf16.mxu0 %v33365_v21  ;;  %23295 = vmatprep.mubr.msk.bf16.mxu0 %vm25474_vm2, %v33365_v21 }
 0x3fd   : > { %23304 = vmatmul.mubr.msk.bf16.vlgmr.msra.gmra.mxu1 %vm7101_vm10, %v33575_v57  ;;  %v9213_v52 = vrot.slane %v9211_v34, 1 }
 0x3fe   : > { %23316 = vmatpush3.bf16.msra.mxu1 %v29295_v15  ;;  %23319 = vmatprep.mubr.msk.bf16.mxu1 %vm25474_vm2, %v33365_v21 }
 0x3ff   : > { %23317 = vmatprep.subr.bf16.mxu1 %v33365_v21  ;;  %23294 = vmatpush3.bf16.msra.mxu0 %v29307_v0  ;;  %v9214_v46 = vor.u32 %v9213_v52, %v9209_v6 }
 0x400   : > { %23307 = vmatprep.subr.bf16.mxu0 %v33365_v21  ;;  %v29353_v35 = vpop.f32.mrf.mxu0 }
 0x402   : > { %23318 = vmatpush3.bf16.msra.mxu1 %v29307_v0  ;;  %23296 = vmatmul.mubr.msk.bf16.vlgmr.msra.gmra.mxu0 %vm7101_vm10, %v33576_v40  ;;  %v23041_v62 = vpop.f32.mrf.mxu0  ;;  %v29447_v40 = vor.u32 %v9425_v7, %v9421_v30  ;;  %v9475_v7 = vrot.slane %v9473_v59, 1  ;;  %v9471_v30 = vshrl.u32 %v28808_v12, 16 }
 0x403   : > { %23331 = vmatprep.subr.bf16.mxu1 %v33365_v21  ;;  %23308 = vmatpush3.bf16.msra.mxu0 %v29295_v15  ;;  %v9373_v62 = vshll.u32 %v28794_v31, 16 }
 0x404   : > { %23309 = vmatprep.subr.bf16.mxu0 %v33365_v21  ;;  %23311 = vmatprep.mubr.msk.bf16.mxu0 %vm25474_vm2, %v33365_v21  ;;  %v29363_v49 = vpop.f32.mrf.mxu0 }
 0x405   : > { %23320 = vmatmul.mubr.msk.bf16.vlgmr.msra.gmra.mxu1 %vm7101_vm10, %v28794_v31  ;;  %v9375_v34 = vrot.slane %v9373_v62, 1  ;;  %v9621_v62 = vshrl.u32 %v28840_v19, 16 }
 0x406   : > { %23332 = vmatpush3.bf16.msra.mxu1 %v29295_v15  ;;  %23335 = vmatprep.mubr.msk.bf16.mxu1 %vm25474_vm2, %v33365_v21  ;;  %v23042_v55 = vpop.f32.mrf.mxu0 }
 0x407   : > { %23333 = vmatprep.subr.bf16.mxu1 %v33365_v21  ;;  %23310 = vmatpush3.bf16.msra.mxu0 %v29307_v0  ;;  %v9523_v55 = vshll.u32 %v28825_v39, 16 }
 0x408   : > { %23323 = vmatprep.subr.bf16.mxu0 %v33365_v21 }
 0x409   : > { %v9525_v52 = vrot.slane %v9523_v55, 1  ;;  %v29499_v55 = vld [vmem:[%s33023_s3 + $0x98] sm:$0xff]  }
 0x40a   : > { %23334 = vmatpush3.bf16.msra.mxu1 %v29307_v0  ;;  %23312 = vmatmul.mubr.msk.bf16.vlgmr.msra.gmra.mxu0 %vm7101_vm10, %v28804_v48 }
 0x40b   : > { %23347 = vmatprep.subr.bf16.mxu1 %v33365_v21  ;;  %23324 = vmatpush3.bf16.msra.mxu0 %v29295_v15  ;;  %v29473_v2 = vor.u32 %v9525_v52, %v9521_v14  ;;  %v29517_v14 = vld [vmem:[%s33023_s3 + $0x90] sm:$0xff]  }
 0x40c   : > { %23325 = vmatprep.subr.bf16.mxu0 %v33365_v21  ;;  %23327 = vmatprep.mubr.msk.bf16.mxu0 %vm25474_vm2, %v33365_v21 }
 0x40d   : > { %23336 = vmatmul.mubr.msk.bf16.vlgmr.msra.gmra.mxu1 %vm7101_vm10, %v28808_v12 }
 0x40e   : > { %23348 = vmatpush3.bf16.msra.mxu1 %v29295_v15  ;;  %23351 = vmatprep.mubr.msk.bf16.mxu1 %vm25474_vm2, %v33365_v21 }
 0x40f   : > { %23349 = vmatprep.subr.bf16.mxu1 %v33365_v21  ;;  %23326 = vmatpush3.bf16.msra.mxu0 %v29307_v0 }
 0x410   : > { %23339 = vmatprep.subr.bf16.mxu0 %v33365_v21 }
 0x412   : > { %23350 = vmatpush3.bf16.msra.mxu1 %v29307_v0  ;;  %23328 = vmatmul.mubr.msk.bf16.vlgmr.msra.gmra.mxu0 %vm7101_vm10, %v28817_v16 }
 0x413   : > { %23363 = vmatprep.subr.bf16.mxu1 %v33365_v21  ;;  %23340 = vmatpush3.bf16.msra.mxu0 %v29295_v15 }
 0x414   : > { %23341 = vmatprep.subr.bf16.mxu0 %v33365_v21  ;;  %23343 = vmatprep.mubr.msk.bf16.mxu0 %vm25474_vm2, %v33365_v21 }
 0x415   : > { %23352 = vmatmul.mubr.msk.bf16.vlgmr.msra.gmra.mxu1 %vm7101_vm10, %v28821_v50  ;;  %v29411_v54 = vpop.f32.mrf.mxu1 }
 0x416   : > { %23364 = vmatpush3.bf16.msra.mxu1 %v29376_v44  ;;  %23367 = vmatprep.mubr.msk.bf16.mxu1 %vm25474_vm2, %v33365_v21 }
 0x417   : > { %23365 = vmatprep.subr.bf16.mxu1 %v33365_v21  ;;  %23342 = vmatpush3.bf16.msra.mxu0 %v29307_v0  ;;  %v23049_v23 = vpop.f32.mrf.mxu1 }
 0x418   : > { %23355 = vmatprep.subr.bf16.mxu0 %v33365_v21 }
 0x419   : > { %v29424_v26 = vpop.f32.mrf.mxu1 }
 0x41a   : > { %23366 = vmatpush3.bf16.msra.mxu1 %v29390_v17  ;;  %23344 = vmatmul.mubr.msk.bf16.vlgmr.msra.gmra.mxu0 %vm7101_vm10, %v28825_v39 }
 0x41b   : > { %23379 = vmatprep.subr.bf16.mxu1 %v33365_v21  ;;  %23356 = vmatpush3.bf16.msra.mxu0 %v29295_v15  ;;  %v23050_v15 = vpop.f32.mrf.mxu1 }
 0x41c   : > { %23357 = vmatprep.subr.bf16.mxu0 %v33365_v21  ;;  %23359 = vmatprep.mubr.msk.bf16.mxu0 %vm25474_vm2, %v33365_v21 }
 0x41d   : > { %23368 = vmatmul.mubr.msk.bf16.vlgmr.msra.gmra.mxu1 %vm7101_vm10, %v9214_v46  ;;  %v9371_v46 = vshrl.u32 %v28794_v31, 16 }
 0x41e   : > { %23380 = vmatpush3.bf16.msra.mxu1 %v29376_v44  ;;  %23383 = vmatprep.mubr.msk.bf16.mxu1 %vm25474_vm2, %v33365_v21 }
 0x41f   : > { %23381 = vmatprep.subr.bf16.mxu1 %v33365_v21  ;;  %23358 = vmatpush3.bf16.msra.mxu0 %v29307_v0  ;;  %v9271_v0 = vshrl.u32 %v33575_v57, 16  ;;  %v29471_v11 = vor.u32 %v9375_v34, %v9371_v46  ;;  %v29502_v34 = vor.u32 %v9475_v7, %v9471_v30  ;;  %v9573_v46 = vshll.u32 %v28821_v50, 16 }
 0x420   : > { %23371 = vmatprep.subr.bf16.mxu0 %v33365_v21 }
 0x421   : > { %v29445_v63 = vor.u32 %v9275_v5, %v9271_v0  ;;  %v9625_v0 = vrot.slane %v9623_v36, 1 }
 0x422   : > { %23382 = vmatpush3.bf16.msra.mxu1 %v29390_v17  ;;  %23360 = vmatmul.mubr.msk.bf16.vlgmr.msra.gmra.mxu0 %vm7101_vm10, %v28840_v19 }
 0x423   : > { %23395 = vmatprep.subr.bf16.mxu1 %v33365_v21  ;;  %23372 = vmatpush3.bf16.msra.mxu0 %v29376_v44  ;;  %v29504_v52 = vor.u32 %v9625_v0, %v9621_v62 }
 0x424   : > { %23373 = vmatprep.subr.bf16.mxu0 %v33365_v21  ;;  %23375 = vmatprep.mubr.msk.bf16.mxu0 %vm25474_vm2, %v33365_v21 }
 0x425   : > { %23384 = vmatmul.mubr.msk.bf16.vlgmr.msra.gmra.mxu1 %vm7101_vm10, %v29421_v18 }
 0x426   : > { %23396 = vmatpush3.bf16.msra.mxu1 %v29376_v44  ;;  %23399 = vmatprep.mubr.msk.bf16.mxu1 %vm25474_vm2, %v33365_v21 }
 0x427   : > { %23397 = vmatprep.subr.bf16.mxu1 %v33365_v21  ;;  %23374 = vmatpush3.bf16.msra.mxu0 %v29390_v17 }
 0x428   : > { %23387 = vmatprep.subr.bf16.mxu0 %v33365_v21 }
 0x429   : > { %v29464_v6 = vpop.f32.mrf.mxu0 }
 0x42a   : > { %23398 = vmatpush3.bf16.msra.mxu1 %v29390_v17  ;;  %23376 = vmatmul.mubr.msk.bf16.vlgmr.msra.gmra.mxu0 %vm7101_vm10, %v29445_v63 }
 0x42b   : > { %23411 = vmatprep.subr.bf16.mxu1 %v33365_v21  ;;  %23388 = vmatpush3.bf16.msra.mxu0 %v29376_v44  ;;  %v23057_v23 = vpop.f32.mrf.mxu0 }
 0x42c   : > { %23389 = vmatprep.subr.bf16.mxu0 %v33365_v21  ;;  %23391 = vmatprep.mubr.msk.bf16.mxu0 %vm25474_vm2, %v33365_v21  ;;  %v9575_v23 = vrot.slane %v9573_v46, 1 }
 0x42d   : > { %23400 = vmatmul.mubr.msk.bf16.vlgmr.msra.gmra.mxu1 %vm7101_vm10, %v29447_v40  ;;  %v29482_v15 = vpop.f32.mrf.mxu0 }
 0x42e   : > { %23412 = vmatpush3.bf16.msra.mxu1 %v29376_v44  ;;  %23415 = vmatprep.mubr.msk.bf16.mxu1 %vm25474_vm2, %v33365_v21 }
 0x42f   : > { %23413 = vmatprep.subr.bf16.mxu1 %v33365_v21  ;;  %23390 = vmatpush3.bf16.msra.mxu0 %v29390_v17  ;;  %v23058_v5 = vpop.f32.mrf.mxu0 }
 0x430   : > { %23403 = vmatprep.subr.bf16.mxu0 %v33365_v21 }
 0x432   : > { %23414 = vmatpush3.bf16.msra.mxu1 %v29390_v17  ;;  %23392 = vmatmul.mubr.msk.bf16.vlgmr.msra.gmra.mxu0 %vm7101_vm10, %v29471_v11 }
 0x433   : > { %23427 = vmatprep.subr.bf16.mxu1 %v33365_v21  ;;  %23404 = vmatpush3.bf16.msra.mxu0 %v29376_v44 }
 0x434   : > { %23405 = vmatprep.subr.bf16.mxu0 %v33365_v21  ;;  %23407 = vmatprep.mubr.msk.bf16.mxu0 %vm25474_vm2, %v33365_v21 }
 0x435   : > { %23416 = vmatmul.mubr.msk.bf16.vlgmr.msra.gmra.mxu1 %vm7101_vm10, %v29473_v2 }
 0x436   : > { %23428 = vmatpush3.bf16.msra.mxu1 %v29376_v44  ;;  %23431 = vmatprep.mubr.msk.bf16.mxu1 %vm25474_vm2, %v33365_v21 }
 0x437   : > { %23429 = vmatprep.subr.bf16.mxu1 %v33365_v21  ;;  %23406 = vmatpush3.bf16.msra.mxu0 %v29390_v17 }
 0x438   : > { %23419 = vmatprep.subr.bf16.mxu0 %v33365_v21 }
 0x43a   : > { %23430 = vmatpush3.bf16.msra.mxu1 %v29390_v17  ;;  %23408 = vmatmul.mubr.msk.bf16.vlgmr.msra.gmra.mxu0 %vm7101_vm10, %v29502_v34 }
 0x43b   : > { %23443 = vmatprep.subr.bf16.mxu1 %v33365_v21  ;;  %23420 = vmatpush3.bf16.msra.mxu0 %v29376_v44  ;;  %v9571_v44 = vshrl.u32 %v28821_v50, 16 }
 0x43c   : > { %23421 = vmatprep.subr.bf16.mxu0 %v33365_v21  ;;  %23423 = vmatprep.mubr.msk.bf16.mxu0 %vm25474_vm2, %v33365_v21 }
 0x43d   : > { %23432 = vmatmul.mubr.msk.bf16.vlgmr.msra.gmra.mxu1 %vm7101_vm10, %v29504_v52  ;;  %v29529_v59 = vor.u32 %v9575_v23, %v9571_v44 }
 0x43e   : > { %23444 = vmatpush3.bf16.msra.mxu1 %v29499_v55  ;;  %23447 = vmatprep.mubr.msk.bf16.mxu1 %vm25474_vm2, %v33365_v21  ;;  %v29532_v36 = vpop.f32.mrf.mxu1 }
 0x43f   : > { %23445 = vmatprep.subr.bf16.mxu1 %v33365_v21  ;;  %23422 = vmatpush3.bf16.msra.mxu0 %v29390_v17 }
 0x440   : > { %23435 = vmatprep.subr.bf16.mxu0 %v33365_v21  ;;  %v23065_v17 = vpop.f32.mrf.mxu1 }
 0x442   : > { %23446 = vmatpush3.bf16.msra.mxu1 %v29517_v14  ;;  %23424 = vmatmul.mubr.msk.bf16.vlgmr.msra.gmra.mxu0 %vm7101_vm10, %v29529_v59  ;;  %v29546_v5 = vpop.f32.mrf.mxu1 }
 0x443   : > { %23459 = vmatprep.subr.bf16.mxu1 %v33365_v21  ;;  %23436 = vmatpush3.bf16.msra.mxu0 %v29499_v55 }
 0x444   : > { %23437 = vmatprep.subr.bf16.mxu0 %v33365_v21  ;;  %23439 = vmatprep.mubr.msk.bf16.mxu0 %vm25474_vm2, %v33365_v21 }
 0x445   : > { %23448 = vmatmul.mubr.msk.bf16.vlgmr.msra.gmra.mxu1 %vm7101_vm10, %v28804_v48  ;;  %v23066_v48 = vpop.f32.mrf.mxu1 }
 0x446   : > { %23460 = vmatpush3.bf16.msra.mxu1 %v29499_v55  ;;  %23463 = vmatprep.mubr.msk.bf16.mxu1 %vm25474_vm2, %v33365_v21 }
 0x447   : > { %23461 = vmatprep.subr.bf16.mxu1 %v33365_v21  ;;  %23438 = vmatpush3.bf16.msra.mxu0 %v29517_v14  ;;  %v29552_v7 = vpop.f32.mrf.mxu1 }
 0x448   : > { %23451 = vmatprep.subr.bf16.mxu0 %v33365_v21 }
 0x449   : > { %v23081_v0 = vpop.f32.mrf.mxu1 }
 0x44a   : > { %23462 = vmatpush3.bf16.msra.mxu1 %v29517_v14  ;;  %23440 = vmatmul.mubr.msk.bf16.vlgmr.msra.gmra.mxu0 %vm7101_vm10, %v33575_v57 }
 0x44b   : > { %23475 = vmatprep.subr.bf16.mxu1 %v33365_v21  ;;  %23452 = vmatpush3.bf16.msra.mxu0 %v29499_v55  ;;  %v29566_v30 = vpop.f32.mrf.mxu1 }
 0x44c   : > { %23453 = vmatprep.subr.bf16.mxu0 %v33365_v21  ;;  %23455 = vmatprep.mubr.msk.bf16.mxu0 %vm25474_vm2, %v33365_v21 }
 0x44d   : > { %23464 = vmatmul.mubr.msk.bf16.vlgmr.msra.gmra.mxu1 %vm7101_vm10, %v28817_v16  ;;  %v23082_v16 = vpop.f32.mrf.mxu1 }
 0x44e   : > { %23476 = vmatpush3.bf16.msra.mxu1 %v29499_v55  ;;  %23479 = vmatprep.mubr.msk.bf16.mxu1 %vm25474_vm2, %v33365_v21 }
 0x44f   : > { %23477 = vmatprep.subr.bf16.mxu1 %v33365_v21  ;;  %23454 = vmatpush3.bf16.msra.mxu0 %v29517_v14  ;;  %v29574_v62 = vpop.f32.mrf.mxu1 }
 0x450   : > { %23467 = vmatprep.subr.bf16.mxu0 %v33365_v21  ;;  %v29572_v57 = vpop.f32.mrf.mxu0 }
 0x451   : > { %v23097_v23 = vpop.f32.mrf.mxu1 }
 0x452   : > { %23478 = vmatpush3.bf16.msra.mxu1 %v29517_v14  ;;  %23456 = vmatmul.mubr.msk.bf16.vlgmr.msra.gmra.mxu0 %vm7101_vm10, %v28794_v31  ;;  %v23073_v46 = vpop.f32.mrf.mxu0 }
 0x453   : > { %23491 = vmatprep.subr.bf16.mxu1 %v33365_v21  ;;  %23468 = vmatpush3.bf16.msra.mxu0 %v29499_v55  ;;  %v29590_v44 = vpop.f32.mrf.mxu1  ;;  %v29614_v46 = vld [vmem:[%s33023_s3 + $0xb0] sm:$0xff]  }
 0x454   : > { %23469 = vmatprep.subr.bf16.mxu0 %v33365_v21  ;;  %23471 = vmatprep.mubr.msk.bf16.mxu0 %vm25474_vm2, %v33365_v21  ;;  %v29588_v31 = vpop.f32.mrf.mxu0 }
 0x455   : > { %23480 = vmatmul.mubr.msk.bf16.vlgmr.msra.gmra.mxu1 %vm7101_vm10, %v28825_v39  ;;  %v29597_v39 = vld [vmem:[%s33023_s3 + $0xb8] sm:$0xff]   ;;  %v23098_v48 = vpop.f32.mrf.mxu1 }
 0x456   : > { %23492 = vmatpush3.bf16.msra.mxu1 %v29499_v55  ;;  %23495 = vmatprep.mubr.msk.bf16.mxu1 %vm25474_vm2, %v33365_v21  ;;  %v23074_v17 = vpop.f32.mrf.mxu0 }
 0x457   : > { %23493 = vmatprep.subr.bf16.mxu1 %v33365_v21  ;;  %23470 = vmatpush3.bf16.msra.mxu0 %v29517_v14 }
 0x458   : > { %23483 = vmatprep.subr.bf16.mxu0 %v33365_v21 }
 0x45a   : > { %23494 = vmatpush3.bf16.msra.mxu1 %v29517_v14  ;;  %v29601_v0 = vpop.f32.mrf.mxu0  ;;  %v29603_v16 = vpop.f32.mrf.mxu1  ;;  %23472 = vmatmul.mubr.msk.bf16.vlgmr.msra.gmra.mxu0 %vm7101_vm10, %v28808_v12 }
 0x45b   : > { %23507 = vmatprep.subr.bf16.mxu1 %v33365_v21  ;;  %23484 = vmatpush3.bf16.msra.mxu0 %v29499_v55 }
 0x45c   : > { %v23089_v23 = vpop.f32.mrf.mxu0  ;;  %v23113_v17 = vpop.f32.mrf.mxu1  ;;  %23485 = vmatprep.subr.bf16.mxu0 %v33365_v21  ;;  %23487 = vmatprep.mubr.msk.bf16.mxu0 %vm25474_vm2, %v33365_v21 }
 0x45d   : > { %23496 = vmatmul.mubr.msk.bf16.vlgmr.msra.gmra.mxu1 %vm7101_vm10, %v28840_v19 }
 0x45e   : > { %23508 = vmatpush3.bf16.msra.mxu1 %v29597_v39  ;;  %23511 = vmatprep.mubr.msk.bf16.mxu1 %vm25474_vm2, %v33365_v21  ;;  %v29622_v12 = vpop.f32.mrf.mxu0  ;;  %v29624_v19 = vpop.f32.mrf.mxu1 }
 0x45f   : > { %23509 = vmatprep.subr.bf16.mxu1 %v33365_v21  ;;  %23486 = vmatpush3.bf16.msra.mxu0 %v29517_v14 }
 0x460   : > { %v23090_v48 = vpop.f32.mrf.mxu0  ;;  %v23114_v23 = vpop.f32.mrf.mxu1  ;;  %23499 = vmatprep.subr.bf16.mxu0 %v33365_v21 }
 0x462   : > { %23510 = vmatpush3.bf16.msra.mxu1 %v29614_v46  ;;  %v29630_v17 = vpop.f32.mrf.mxu0  ;;  %v7860_v61 = vpop.f32.mrf.mxu1  ;;  %23488 = vmatmul.mubr.msk.bf16.vlgmr.msra.gmra.mxu0 %vm7101_vm10, %v28821_v50 }
 0x463   : > { %23523 = vmatprep.subr.bf16.mxu1 %v33365_v21  ;;  %v29637_v27 = vadd.f32 %v7860_v61, %v29464_v6  ;;  %23500 = vmatpush3.bf16.msra.mxu0 %v29499_v55 }
 0x464   : > { %v23105_v48 = vpop.f32.mrf.mxu0  ;;  %v23129_v23 = vpop.f32.mrf.mxu1  ;;  %23501 = vmatprep.subr.bf16.mxu0 %v33365_v21  ;;  %23503 = vmatprep.mubr.msk.bf16.mxu0 %vm25474_vm2, %v33365_v21 }
 0x465   : > { %23512 = vmatmul.mubr.msk.bf16.vlgmr.msra.gmra.mxu1 %vm7101_vm10, %v29445_v63 }
 0x466   : > { %23524 = vmatpush3.bf16.msra.mxu1 %v29597_v39  ;;  %23527 = vmatprep.mubr.msk.bf16.mxu1 %vm25474_vm2, %v33365_v21  ;;  %v29647_v50 = vpop.f32.mrf.mxu0  ;;  %v7863_v61 = vpop.f32.mrf.mxu1 }
 0x467   : > { %23525 = vmatprep.subr.bf16.mxu1 %v33365_v21  ;;  %v29650_v63 = vadd.f32 %v7863_v61, %v29482_v15  ;;  %23502 = vmatpush3.bf16.msra.mxu0 %v29517_v14 }
 0x468   : > { %v23106_v6 = vpop.f32.mrf.mxu0  ;;  %v23130_v55 = vpop.f32.mrf.mxu1  ;;  %23515 = vmatprep.subr.bf16.mxu0 %v33365_v21 }
 0x46a   : > { %23526 = vmatpush3.bf16.msra.mxu1 %v29614_v46  ;;  %v29656_v48 = vpop.f32.mrf.mxu0  ;;  %23504 = vmatmul.mubr.msk.bf16.vlgmr.msra.gmra.mxu0 %vm7101_vm10, %v28996_v3 }
 0x46b   : > { %23539 = vmatprep.subr.bf16.mxu1 %v33365_v21  ;;  %v7946_v23 = vpop.f32.mrf.mxu1  ;;  %23516 = vmatpush3.bf16.msra.mxu0 %v29597_v39 }
 0x46c   : > { %v29663_v15 = vadd.f32 %v7946_v23, %v29572_v57  ;;  %v23121_v14 = vpop.f32.mrf.mxu0  ;;  %23517 = vmatprep.subr.bf16.mxu0 %v33365_v21  ;;  %23519 = vmatprep.mubr.msk.bf16.mxu0 %vm25474_vm2, %v33365_v21 }
 0x46d   : > { %23528 = vmatmul.mubr.msk.bf16.vlgmr.msra.gmra.mxu1 %vm7101_vm10, %v29471_v11  ;;  %v23145_v61 = vpop.f32.mrf.mxu1  ;;  %v7646_v14 = vadd.f32 %v29601_v0, %v29228_v22  ;;  %v7649_v22 = vadd.f32 %v29622_v12, %v29238_v33  ;;  %v10443_v33 = vshll.u32 %v28996_v3, 16  ;;  %v7603_v12 = vadd.f32 %v29552_v7, %v29174_v13 }
 0x46e   : > { %23540 = vmatpush3.bf16.msra.mxu1 %v29597_v39  ;;  %23543 = vmatprep.mubr.msk.bf16.mxu1 %vm25474_vm2, %v33365_v21  ;;  %v29673_v11 = vpop.f32.mrf.mxu0 }
 0x46f   : > { %23541 = vmatprep.subr.bf16.mxu1 %v33365_v21  ;;  %v7949_v57 = vpop.f32.mrf.mxu1  ;;  %23518 = vmatpush3.bf16.msra.mxu0 %v29614_v46 }
 0x470   : > { %v29676_v6 = vadd.f32 %v7949_v57, %v29588_v31  ;;  %v23122_v55 = vpop.f32.mrf.mxu0  ;;  %23531 = vmatprep.subr.bf16.mxu0 %v33365_v21 }
 0x471   : > { %v23146_v23 = vpop.f32.mrf.mxu1 }
 0x472   : > { %23542 = vmatpush3.bf16.msra.mxu1 %v29614_v46  ;;  %v7903_v61 = vpop.f32.mrf.mxu0  ;;  %23520 = vmatmul.mubr.msk.bf16.vlgmr.msra.gmra.mxu0 %vm7101_vm10, %v29421_v18 }
 0x473   : > { %23555 = vmatprep.subr.bf16.mxu1 %v33365_v21  ;;  %v29689_v31 = vadd.f32 %v7903_v61, %v29532_v36  ;;  %23532 = vmatpush3.bf16.msra.mxu0 %v29597_v39 }
 0x474   : > { %v23137_v55 = vpop.f32.mrf.mxu0  ;;  %23533 = vmatprep.subr.bf16.mxu0 %v33365_v21  ;;  %23535 = vmatprep.mubr.msk.bf16.mxu0 %vm25474_vm2, %v33365_v21 }
 0x475   : > { %v8045_v45 = vpop.f32.mrf.mxu1  ;;  %23544 = vmatmul.mubr.msk.bf16.vlgmr.msra.gmra.mxu1 %vm7101_vm10, %v29502_v34 }
 0x476   : > { %v29691_v57 = vadd.f32 %v8045_v45, %v7646_v14  ;;  %23556 = vmatpush3.bf16.msra.mxu1 %v29597_v39  ;;  %23559 = vmatprep.mubr.msk.bf16.mxu1 %vm25474_vm2, %v33365_v21  ;;  %v7906_v45 = vpop.f32.mrf.mxu0 }
 0x477   : > { %v23161_v23 = vpop.f32.mrf.mxu1  ;;  %23557 = vmatprep.subr.bf16.mxu1 %v33365_v21  ;;  %v29704_v34 = vadd.f32 %v7906_v45, %v29546_v5  ;;  %23534 = vmatpush3.bf16.msra.mxu0 %v29614_v46  ;;  %v7732_v5 = vadd.f32 %v29630_v17, %v29309_v4  ;;  %v10445_v4 = vrot.slane %v10443_v33, 1  ;;  %v7818_v33 = vadd.f32 %v29656_v48, %v29411_v54 }
 0x478   : > { %v23138_v0 = vpop.f32.mrf.mxu0  ;;  %23547 = vmatprep.subr.bf16.mxu0 %v33365_v21  ;;  %v7821_v48 = vadd.f32 %v29673_v11, %v29424_v26  ;;  %v7775_v26 = vadd.f32 %v29603_v16, %v29353_v35  ;;  %v7778_v35 = vadd.f32 %v29624_v19, %v29363_v49 }
 0x479   : > { %v8048_v18 = vpop.f32.mrf.mxu1 }
 0x47a   : > { %v29706_v36 = vadd.f32 %v8048_v18, %v7649_v22  ;;  %23558 = vmatpush3.bf16.msra.mxu1 %v29614_v46  ;;  %v8004_v61 = vpop.f32.mrf.mxu0  ;;  %23536 = vmatmul.mubr.msk.bf16.vlgmr.msra.gmra.mxu0 %vm7101_vm10, %v29447_v40  ;;  %v7606_v40 = vadd.f32 %v29566_v30, %v29184_v53  ;;  %v10441_v18 = vshrl.u32 %v28996_v3, 16  ;;  %v29747_v53 = vld [vmem:[%s33023_s3 + $0x48] sm:$0xff]   ;;  %v7689_v3 = vadd.f32 %v29574_v62, %v29268_v47  ;;  %v29767_v47 = vld [vmem:[%s33023_s3 + $0x40] sm:$0xff]  }
 0x47b   : > { %v23162_v14 = vpop.f32.mrf.mxu1  ;;  %23571 = vmatprep.subr.bf16.mxu1 %v33365_v21  ;;  %v29721_v23 = vadd.f32 %v8004_v61, %v7603_v12  ;;  %23548 = vmatpush3.bf16.msra.mxu0 %v29597_v39 }
 0x47c   : > { %v23153_v13 = vpop.f32.mrf.mxu0  ;;  %23549 = vmatprep.subr.bf16.mxu0 %v33365_v21  ;;  %23551 = vmatprep.mubr.msk.bf16.mxu0 %vm25474_vm2, %v33365_v21 }
 0x47d   : > { %v8127_v55 = vpop.f32.mrf.mxu1  ;;  %23560 = vmatmul.mubr.msk.bf16.vlgmr.msra.gmra.mxu1 %vm7101_vm10, %v29529_v59  ;;  %v7735_v59 = vadd.f32 %v29647_v50, %v29319_v28  ;;  %v10446_v50 = vor.u32 %v10445_v4, %v10441_v18 }
 0x47e   : > { %v29723_v22 = vadd.f32 %v8127_v55, %v7732_v5  ;;  %23572 = vmatpush3.bf16.msra.mxu1 %v29597_v39  ;;  %23575 = vmatprep.mubr.msk.bf16.mxu1 %vm25474_vm2, %v33365_v21  ;;  %v8007_v17 = vpop.f32.mrf.mxu0 }
 0x47f   : > { %v23177_v7 = vpop.f32.mrf.mxu1  ;;  %23573 = vmatprep.subr.bf16.mxu1 %v33365_v21  ;;  %v29738_v0 = vadd.f32 %v8007_v17, %v7606_v40  ;;  %23550 = vmatpush3.bf16.msra.mxu0 %v29614_v46 }
 0x480   : > { %v23154_v28 = vpop.f32.mrf.mxu0  ;;  %23563 = vmatprep.subr.bf16.mxu0 %v33365_v21 }
 0x481   : > { %v8130_v45 = vpop.f32.mrf.mxu1 }
 0x482   : > { %v29740_v14 = vadd.f32 %v8130_v45, %v7735_v59  ;;  %23574 = vmatpush3.bf16.msra.mxu1 %v29614_v46  ;;  %v8086_v12 = vpop.f32.mrf.mxu0  ;;  %23552 = vmatmul.mubr.msk.bf16.vlgmr.msra.gmra.mxu0 %vm7101_vm10, %v29473_v2  ;;  %v7692_v2 = vadd.f32 %v29590_v44, %v29279_v43 }
 0x483   : > { %v23178_v30 = vpop.f32.mrf.mxu1  ;;  %23587 = vmatprep.subr.bf16.mxu1 %v33365_v21  ;;  %v29758_v61 = vadd.f32 %v8086_v12, %v7689_v3  ;;  %23564 = vmatpush3.bf16.msra.mxu0 %v29597_v39 }
 0x484   : > { %v23169_v54 = vpop.f32.mrf.mxu0  ;;  %23565 = vmatprep.subr.bf16.mxu0 %v33365_v21  ;;  %23567 = vmatprep.mubr.msk.bf16.mxu0 %vm25474_vm2, %v33365_v21 }
 0x485   : > { %v8209_v5 = vpop.f32.mrf.mxu1  ;;  %23576 = vmatmul.mubr.msk.bf16.vlgmr.msra.gmra.mxu1 %vm7101_vm10, %v10446_v50 }
 0x486   : > { %v29760_v55 = vadd.f32 %v8209_v5, %v7818_v33  ;;  %23588 = vmatpush3.bf16.msra.mxu1 %v29747_v53  ;;  %23591 = vmatprep.mubr.msk.bf16.mxu1 %vm25474_vm2, %v33365_v21  ;;  %v8089_v39 = vpop.f32.mrf.mxu0 }
 0x487   : > { %v23193_v62 = vpop.f32.mrf.mxu1  ;;  %23589 = vmatprep.subr.bf16.mxu1 %v33365_v21  ;;  %v29779_v7 = vadd.f32 %v8089_v39, %v7692_v2  ;;  %23566 = vmatpush3.bf16.msra.mxu0 %v29614_v46 }
 0x488   : > { %v23170_v43 = vpop.f32.mrf.mxu0  ;;  %23579 = vmatprep.subr.bf16.mxu0 %v33365_v21 }
 0x489   : > { %v8212_v13 = vpop.f32.mrf.mxu1 }
 0x48a   : > { %v29781_v4 = vadd.f32 %v8212_v13, %v7821_v48  ;;  %23590 = vmatpush3.bf16.msra.mxu1 %v29767_v47  ;;  %v8168_v11 = vpop.f32.mrf.mxu0  ;;  %23568 = vmatmul.mubr.msk.bf16.vlgmr.msra.gmra.mxu0 %vm7101_vm10, %v29504_v52 }
 0x48b   : > { %v23194_v44 = vpop.f32.mrf.mxu1  ;;  %23603 = vmatprep.subr.bf16.mxu1 %v33365_v21  ;;  %v29793_v46 = vadd.f32 %v8168_v11, %v7775_v26  ;;  %23580 = vmatpush3.bf16.msra.mxu0 %v29747_v53  ;;  %v29874_v26 = vld [vmem:[%s33023_s3 + $0x68] sm:$0xff]  }
 0x48c   : > { %v23185_v17 = vpop.f32.mrf.mxu0  ;;  %23581 = vmatprep.subr.bf16.mxu0 %v33365_v21  ;;  %23583 = vmatprep.mubr.msk.bf16.mxu0 %vm25474_vm2, %v33365_v21 }
 0x48d   : > { %v8291_v40 = vpop.f32.mrf.mxu1  ;;  %23592 = vmatmul.mubr.msk.bf16.vlgmr.msra.gmra.mxu1 %vm7101_vm10, %v28957_v10 }
 0x48e   : > { %v29796_v59 = vadd.f32 %v8291_v40, %v29689_v31  ;;  %23604 = vmatpush3.bf16.msra.mxu1 %v29747_v53  ;;  %23607 = vmatprep.mubr.msk.bf16.mxu1 %vm25474_vm2, %v33365_v21  ;;  %v8171_v52 = vpop.f32.mrf.mxu0 }
 0x48f   : > { %v23209_v45 = vpop.f32.mrf.mxu1  ;;  %23605 = vmatprep.subr.bf16.mxu1 %v33365_v21  ;;  %v29808_v31 = vadd.f32 %v8171_v52, %v7778_v35  ;;  %23582 = vmatpush3.bf16.msra.mxu0 %v29767_v47  ;;  %v29894_v52 = vld [vmem:[%s33023_s3 + $0x60] sm:$0xff]  }
 0x490   : > { %v23186_v28 = vpop.f32.mrf.mxu0  ;;  %23595 = vmatprep.subr.bf16.mxu0 %v33365_v21 }
 0x491   : > { %v8294_v16 = vpop.f32.mrf.mxu1 }
 0x492   : > { %v29811_v18 = vadd.f32 %v8294_v16, %v29704_v34  ;;  %23606 = vmatpush3.bf16.msra.mxu1 %v29767_v47  ;;  %v8250_v49 = vpop.f32.mrf.mxu0  ;;  %23584 = vmatmul.mubr.msk.bf16.vlgmr.msra.gmra.mxu0 %vm7101_vm10, %v28960_v1 }
 0x493   : > { %v23210_v30 = vpop.f32.mrf.mxu1  ;;  %23619 = vmatprep.subr.bf16.mxu1 %v33365_v21  ;;  %v29822_v34 = vadd.f32 %v8250_v49, %v29637_v27  ;;  %23596 = vmatpush3.bf16.msra.mxu0 %v29747_v53  ;;  %v10945_v49 = vshrl.u32 %v28960_v1, 16 }
 0x494   : > { %v23201_v3 = vpop.f32.mrf.mxu0  ;;  %23597 = vmatprep.subr.bf16.mxu0 %v33365_v21  ;;  %23599 = vmatprep.mubr.msk.bf16.mxu0 %vm25474_vm2, %v33365_v21 }
 0x495   : > { %v8411_v19 = vpop.f32.mrf.mxu1  ;;  %23608 = vmatmul.mubr.msk.bf16.vlgmr.msra.gmra.mxu1 %vm7101_vm10, %v28987_v58 }
 0x496   : > { %v29825_v50 = vadd.f32 %v8411_v19, %v29721_v23  ;;  %23620 = vmatpush3.bf16.msra.mxu1 %v29747_v53  ;;  %23623 = vmatprep.mubr.msk.bf16.mxu1 %vm25474_vm2, %v33365_v21  ;;  %v8253_v27 = vpop.f32.mrf.mxu0 }
 0x497   : > { %v23225_v33 = vpop.f32.mrf.mxu1  ;;  %23621 = vmatprep.subr.bf16.mxu1 %v33365_v21  ;;  %v29836_v23 = vadd.f32 %v8253_v27, %v29650_v63  ;;  %23598 = vmatpush3.bf16.msra.mxu0 %v29767_v47 }
 0x498   : > { %v23202_v54 = vpop.f32.mrf.mxu0  ;;  %23611 = vmatprep.subr.bf16.mxu0 %v33365_v21 }
 0x499   : > { %v8414_v12 = vpop.f32.mrf.mxu1  ;;  %v11059_v54 = vshll.u32 %v28989_v24, 16 }
 0x49a   : > { %v29839_v5 = vadd.f32 %v8414_v12, %v29738_v0  ;;  %23622 = vmatpush3.bf16.msra.mxu1 %v29767_v47  ;;  %v8335_v2 = vpop.f32.mrf.mxu0  ;;  %23600 = vmatmul.mubr.msk.bf16.vlgmr.msra.gmra.mxu0 %vm7101_vm10, %v28989_v24 }
 0x49b   : > { %v23226_v62 = vpop.f32.mrf.mxu1  ;;  %23635 = vmatprep.subr.bf16.mxu1 %v33365_v21  ;;  %v29850_v63 = vadd.f32 %v8335_v2, %v29663_v15  ;;  %23612 = vmatpush3.bf16.msra.mxu0 %v29747_v53 }
 0x49c   : > { %v23217_v39 = vpop.f32.mrf.mxu0  ;;  %23613 = vmatprep.subr.bf16.mxu0 %v33365_v21  ;;  %23615 = vmatprep.mubr.msk.bf16.mxu0 %vm25474_vm2, %v33365_v21 }
 0x49d   : > { %v8493_v48 = vpop.f32.mrf.mxu1  ;;  %23624 = vmatmul.mubr.msk.bf16.vlgmr.msra.gmra.mxu1 %vm7101_vm10, %v28998_v41  ;;  %v11061_v39 = vrot.slane %v11059_v54, 1 }
 0x49e   : > { %v29853_v0 = vadd.f32 %v8493_v48, %v29758_v61  ;;  %23636 = vmatpush3.bf16.msra.mxu1 %v29747_v53  ;;  %23639 = vmatprep.mubr.msk.bf16.mxu1 %vm25474_vm2, %v33365_v21  ;;  %v8338_v15 = vpop.f32.mrf.mxu0 }
 0x49f   : > { %v23241_v13 = vpop.f32.mrf.mxu1  ;;  %23637 = vmatprep.subr.bf16.mxu1 %v33365_v21  ;;  %v29864_v61 = vadd.f32 %v8338_v15, %v29676_v6  ;;  %23614 = vmatpush3.bf16.msra.mxu0 %v29767_v47  ;;  %v10947_v6 = vshll.u32 %v28960_v1, 16 }
 0x4a0   : > { %v23218_v11 = vpop.f32.mrf.mxu0  ;;  %23627 = vmatprep.subr.bf16.mxu0 %v33365_v21  ;;  %v11057_v13 = vshrl.u32 %v28989_v24, 16 }
 0x4a1   : > { %v8496_v43 = vpop.f32.mrf.mxu1 }
 0x4a2   : > { %v29867_v44 = vadd.f32 %v8496_v43, %v29779_v7  ;;  %23638 = vmatpush3.bf16.msra.mxu1 %v29767_v47  ;;  %v8452_v17 = vpop.f32.mrf.mxu0  ;;  %23616 = vmatmul.mubr.msk.bf16.vlgmr.msra.gmra.mxu0 %vm7101_vm10, %v29025_v38 }
 0x4a3   : > { %v23242_v40 = vpop.f32.mrf.mxu1  ;;  %23651 = vmatprep.subr.bf16.mxu1 %v33365_v21  ;;  %v29884_v45 = vadd.f32 %v8452_v17, %v29691_v57  ;;  %23628 = vmatpush3.bf16.msra.mxu0 %v29747_v53  ;;  %v10949_v57 = vrot.slane %v10947_v6, 1  ;;  %v11009_v6 = vshll.u32 %v28957_v10, 16 }
 0x4a4   : > { %v23233_v16 = vpop.f32.mrf.mxu0  ;;  %23629 = vmatprep.subr.bf16.mxu0 %v33365_v21  ;;  %23631 = vmatprep.mubr.msk.bf16.mxu0 %vm25474_vm2, %v33365_v21  ;;  %v29941_v40 = vor.u32 %v11061_v39, %v11057_v13 }
 0x4a5   : > { %v8575_v7 = vpop.f32.mrf.mxu1  ;;  %23640 = vmatmul.mubr.msk.bf16.vlgmr.msra.gmra.mxu1 %vm7101_vm10, %v29027_v9  ;;  %v10950_v12 = vor.u32 %v10949_v57, %v10945_v49  ;;  %v11011_v57 = vrot.slane %v11009_v6, 1  ;;  %v11157_v49 = vshrl.u32 %v29025_v38, 16  ;;  %v11107_v6 = vshrl.u32 %v28987_v58, 16 }
 0x4a6   : > { %v29887_v35 = vadd.f32 %v8575_v7, %v29793_v46  ;;  %23652 = vmatpush3.bf16.msra.mxu1 %v29874_v26  ;;  %23655 = vmatprep.mubr.msk.bf16.mxu1 %vm25474_vm2, %v33365_v21  ;;  %v8455_v46 = vpop.f32.mrf.mxu0 }
 0x4a7   : > { %v23257_v28 = vpop.f32.mrf.mxu1  ;;  %23653 = vmatprep.subr.bf16.mxu1 %v33365_v21  ;;  %v29904_v19 = vadd.f32 %v8455_v46, %v29706_v36  ;;  %23630 = vmatpush3.bf16.msra.mxu0 %v29767_v47 }
 0x4a8   : > { %v23234_v33 = vpop.f32.mrf.mxu0  ;;  %23643 = vmatprep.subr.bf16.mxu0 %v33365_v21 }
 0x4a9   : > { %v8578_v30 = vpop.f32.mrf.mxu1 }
 0x4aa   : > { %v29907_v3 = vadd.f32 %v8578_v30, %v29808_v31  ;;  %23654 = vmatpush3.bf16.msra.mxu1 %v29894_v52  ;;  %v8534_v1 = vpop.f32.mrf.mxu0  ;;  %23632 = vmatmul.mubr.msk.bf16.vlgmr.msra.gmra.mxu0 %vm7101_vm10, %v29049_v8  ;;  %v11007_v30 = vshrl.u32 %v28957_v10, 16 }
 0x4ab   : > { %v23258_v27 = vpop.f32.mrf.mxu1  ;;  %23667 = vmatprep.subr.bf16.mxu1 %v33365_v21  ;;  %v29918_v36 = vadd.f32 %v8534_v1, %v29723_v22  ;;  %23644 = vmatpush3.bf16.msra.mxu0 %v29747_v53 }
 0x4ac   : > { %v23249_v2 = vpop.f32.mrf.mxu0  ;;  %23645 = vmatprep.subr.bf16.mxu0 %v33365_v21  ;;  %23647 = vmatprep.mubr.msk.bf16.mxu0 %vm25474_vm2, %v33365_v21  ;;  %v29975_v1 = vor.u32 %v11011_v57, %v11007_v30 }
 0x4ad   : > { %v8657_v62 = vpop.f32.mrf.mxu1  ;;  %23656 = vmatmul.mubr.msk.bf16.vlgmr.msra.gmra.mxu1 %vm7101_vm10, %v10950_v12  ;;  %v11259_v2 = vshll.u32 %v29049_v8, 16 }
 0x4ae   : > { %v29921_v31 = vadd.f32 %v8657_v62, %v29822_v34  ;;  %23668 = vmatpush3.bf16.msra.mxu1 %v29874_v26  ;;  %23671 = vmatprep.mubr.msk.bf16.mxu1 %vm25474_vm2, %v33365_v21  ;;  %v8537_v22 = vpop.f32.mrf.mxu0 }
 0x4af   : > { %v23273_v48 = vpop.f32.mrf.mxu1  ;;  %23669 = vmatprep.subr.bf16.mxu1 %v33365_v21  ;;  %v29933_v53 = vadd.f32 %v8537_v22, %v29740_v14  ;;  %23646 = vmatpush3.bf16.msra.mxu0 %v29767_v47  ;;  %v11159_v14 = vshll.u32 %v29025_v38, 16 }
 0x4b0   : > { %v23250_v43 = vpop.f32.mrf.mxu0  ;;  %23659 = vmatprep.subr.bf16.mxu0 %v33365_v21 }
 0x4b1   : > { %v8660_v34 = vpop.f32.mrf.mxu1  ;;  %v11161_v46 = vrot.slane %v11159_v14, 1  ;;  %v11257_v14 = vshrl.u32 %v29049_v8, 16 }
 0x4b2   : > { %v29936_v15 = vadd.f32 %v8660_v34, %v29836_v23  ;;  %23670 = vmatpush3.bf16.msra.mxu1 %v29894_v52  ;;  %v8616_v17 = vpop.f32.mrf.mxu0  ;;  %23648 = vmatmul.mubr.msk.bf16.vlgmr.msra.gmra.mxu0 %vm7101_vm10, %v29055_v25 }
 0x4b3   : > { %v23274_v11 = vpop.f32.mrf.mxu1  ;;  %23683 = vmatprep.subr.bf16.mxu1 %v33365_v21  ;;  %v29951_v47 = vadd.f32 %v8616_v17, %v29760_v55  ;;  %23660 = vmatpush3.bf16.msra.mxu0 %v29874_v26  ;;  %v29977_v62 = vor.u32 %v11161_v46, %v11157_v49 }
 0x4b4   : > { %v23265_v16 = vpop.f32.mrf.mxu0  ;;  %23661 = vmatprep.subr.bf16.mxu0 %v33365_v21  ;;  %23663 = vmatprep.mubr.msk.bf16.mxu0 %vm25474_vm2, %v33365_v21  ;;  %v11261_v11 = vrot.slane %v11259_v2, 1 }
 0x4b5   : > { %v8748_v7 = vpop.f32.mrf.mxu1  ;;  %23672 = vmatmul.mubr.msk.bf16.vlgmr.msra.gmra.mxu1 %vm7101_vm10, %v29941_v40 }
 0x4b6   : > { %v29954_v23 = vadd.f32 %v8748_v7, %v29850_v63  ;;  %23684 = vmatpush3.bf16.msra.mxu1 %v29874_v26  ;;  %23687 = vmatprep.mubr.msk.bf16.mxu1 %vm25474_vm2, %v33365_v21  ;;  %v8619_v55 = vpop.f32.mrf.mxu0  ;;  %v30013_v46 = vor.u32 %v11261_v11, %v11257_v14 }
 0x4b7   : > { %v23289_v28 = vpop.f32.mrf.mxu1  ;;  %23685 = vmatprep.subr.bf16.mxu1 %v33365_v21  ;;  %v29967_v33 = vadd.f32 %v8619_v55, %v29781_v4  ;;  %23662 = vmatpush3.bf16.msra.mxu0 %v29894_v52  ;;  %v11109_v4 = vshll.u32 %v28987_v58, 16  ;;  %v11359_v55 = vshll.u32 %v29055_v25, 16 }
 0x4b8   : > { %v23266_v12 = vpop.f32.mrf.mxu0  ;;  %23675 = vmatprep.subr.bf16.mxu0 %v33365_v21 }
 0x4b9   : > { %v8751_v63 = vpop.f32.mrf.mxu1  ;;  %v11111_v43 = vrot.slane %v11109_v4, 1  ;;  %v11361_v2 = vrot.slane %v11359_v55, 1 }
 0x4ba   : > { %v29970_v27 = vadd.f32 %v8751_v63, %v29864_v61  ;;  %23686 = vmatpush3.bf16.msra.mxu1 %v29894_v52  ;;  %v8698_v61 = vpop.f32.mrf.mxu0  ;;  %23664 = vmatmul.mubr.msk.bf16.vlgmr.msra.gmra.mxu0 %vm7101_vm10, %v29975_v1 }
 0x4bb   : > { %v23290_v54 = vpop.f32.mrf.mxu1  ;;  %23699 = vmatprep.subr.bf16.mxu1 %v33365_v21  ;;  %v29987_v39 = vadd.f32 %v8698_v61, %v29796_v59  ;;  %23676 = vmatpush3.bf16.msra.mxu0 %v29874_v26  ;;  %v30011_v57 = vor.u32 %v11111_v43, %v11107_v6  ;;  %v11207_v61 = vshrl.u32 %v28998_v41, 16  ;;  %v30049_v43 = vld [vmem:[%s33023_s3 + $0xc8] sm:$0xff]  }
 0x4bc   : > { %v23281_v34 = vpop.f32.mrf.mxu0  ;;  %23677 = vmatprep.subr.bf16.mxu0 %v33365_v21  ;;  %23679 = vmatprep.mubr.msk.bf16.mxu0 %vm25474_vm2, %v33365_v21 }
 0x4bd   : > { %v8871_v48 = vpop.f32.mrf.mxu1  ;;  %23688 = vmatmul.mubr.msk.bf16.vlgmr.msra.gmra.mxu1 %vm7101_vm10, %v29977_v62 }
 0x4be   : > { %v29990_v22 = vadd.f32 %v8871_v48, %v29884_v45  ;;  %23700 = vmatpush3.bf16.msra.mxu1 %v29874_v26  ;;  %23703 = vmatprep.mubr.msk.bf16.mxu1 %vm25474_vm2, %v33365_v21  ;;  %v8701_v59 = vpop.f32.mrf.mxu0  ;;  %v11357_v48 = vshrl.u32 %v29055_v25, 16 }
 0x4bf   : > { %v23305_v13 = vpop.f32.mrf.mxu1  ;;  %23701 = vmatprep.subr.bf16.mxu1 %v33365_v21  ;;  %v30003_v17 = vadd.f32 %v8701_v59, %v29811_v18  ;;  %23678 = vmatpush3.bf16.msra.mxu0 %v29894_v52  ;;  %v11209_v18 = vshll.u32 %v28998_v41, 16 }
 0x4c0   : > { %v23282_v16 = vpop.f32.mrf.mxu0  ;;  %23691 = vmatprep.subr.bf16.mxu0 %v33365_v21 }
 0x4c1   : > { %v8874_v45 = vpop.f32.mrf.mxu1  ;;  %v11211_v4 = vrot.slane %v11209_v18, 1  ;;  %v30073_v18 = vld [vmem:[%s33023_s3 + $0xc0] sm:$0xff]  }
 0x4c2   : > { %v30006_v7 = vadd.f32 %v8874_v45, %v29904_v19  ;;  %23702 = vmatpush3.bf16.msra.mxu1 %v29894_v52  ;;  %v8827_v19 = vpop.f32.mrf.mxu0  ;;  %23680 = vmatmul.mubr.msk.bf16.vlgmr.msra.gmra.mxu0 %vm7101_vm10, %v30011_v57 }
 0x4c3   : > { %v23306_v28 = vpop.f32.mrf.mxu1  ;;  %23715 = vmatprep.subr.bf16.mxu1 %v33365_v21  ;;  %v30023_v30 = vadd.f32 %v8827_v19, %v29825_v50  ;;  %23692 = vmatpush3.bf16.msra.mxu0 %v29874_v26  ;;  %v30052_v45 = vor.u32 %v11211_v4, %v11207_v61 }
 0x4c4   : > { %v23297_v12 = vpop.f32.mrf.mxu0  ;;  %23693 = vmatprep.subr.bf16.mxu0 %v33365_v21  ;;  %23695 = vmatprep.mubr.msk.bf16.mxu0 %vm25474_vm2, %v33365_v21 }
 0x4c5   : > { %v8959_v63 = vpop.f32.mrf.mxu1  ;;  %23704 = vmatmul.mubr.msk.bf16.vlgmr.msra.gmra.mxu1 %vm7101_vm10, %v30013_v46 }
 0x4c6   : > { %v30026_v49 = vadd.f32 %v8959_v63, %v29918_v36  ;;  %23716 = vmatpush3.bf16.msra.mxu1 %v29874_v26  ;;  %23719 = vmatprep.mubr.msk.bf16.mxu1 %vm25474_vm2, %v33365_v21  ;;  %v8830_v50 = vpop.f32.mrf.mxu0  ;;  %v11307_v63 = vshrl.u32 %v29027_v9, 16 }
 0x4c7   : > { %v23321_v54 = vpop.f32.mrf.mxu1  ;;  %23717 = vmatprep.subr.bf16.mxu1 %v33365_v21  ;;  %v30039_v34 = vadd.f32 %v8830_v50, %v29839_v5  ;;  %23694 = vmatpush3.bf16.msra.mxu0 %v29894_v52  ;;  %v30054_v5 = vor.u32 %v11361_v2, %v11357_v48 }
 0x4c8   : > { %v23298_v11 = vpop.f32.mrf.mxu0  ;;  %23707 = vmatprep.subr.bf16.mxu0 %v33365_v21 }
 0x4c9   : > { %v8962_v36 = vpop.f32.mrf.mxu1 }
 0x4ca   : > { %v30042_v13 = vadd.f32 %v8962_v36, %v29933_v53  ;;  %23718 = vmatpush3.bf16.msra.mxu1 %v29894_v52  ;;  %v11309_v53 = vshll.u32 %v29027_v9, 16  ;;  %v8915_v6 = vpop.f32.mrf.mxu0  ;;  %23696 = vmatmul.mubr.msk.bf16.vlgmr.msra.gmra.mxu0 %vm7101_vm10, %v30052_v45 }
 0x4cb   : > { %v23322_v59 = vpop.f32.mrf.mxu1  ;;  %23731 = vmatprep.subr.bf16.mxu1 %v33365_v21  ;;  %v30063_v16 = vadd.f32 %v8915_v6, %v29853_v0  ;;  %23708 = vmatpush3.bf16.msra.mxu0 %v29874_v26 }
 0x4cc   : > { %v23313_v55 = vpop.f32.mrf.mxu0  ;;  %23709 = vmatprep.subr.bf16.mxu0 %v33365_v21  ;;  %v11311_v0 = vrot.slane %v11309_v53, 1  ;;  %23711 = vmatprep.mubr.msk.bf16.mxu0 %vm25474_vm2, %v33365_v21 }
 0x4cd   : > { %v9047_v14 = vpop.f32.mrf.mxu1  ;;  %23720 = vmatmul.mubr.msk.bf16.vlgmr.msra.gmra.mxu1 %vm7101_vm10, %v30054_v5 }
 0x4ce   : > { %v30066_v28 = vadd.f32 %v9047_v14, %v29951_v47  ;;  %23732 = vmatpush3.bf16.msra.mxu1 %v30049_v43  ;;  %23735 = vmatprep.mubr.msk.bf16.mxu1 %vm25474_vm2, %v33365_v21  ;;  %v8918_v26 = vpop.f32.mrf.mxu0  ;;  %v30091_v50 = vor.u32 %v11311_v0, %v11307_v63 }
 0x4cf   : > { %v23337_v19 = vpop.f32.mrf.mxu1  ;;  %23733 = vmatprep.subr.bf16.mxu1 %v33365_v21  ;;  %v30083_v12 = vadd.f32 %v8918_v26, %v29867_v44  ;;  %23710 = vmatpush3.bf16.msra.mxu0 %v29894_v52 }
 0x4d0   : > { %v23314_v4 = vpop.f32.mrf.mxu0  ;;  %23723 = vmatprep.subr.bf16.mxu0 %v33365_v21 }
 0x4d1   : > { %v9050_v47 = vpop.f32.mrf.mxu1 }
 0x4d2   : > { %v30086_v54 = vadd.f32 %v9050_v47, %v29967_v33  ;;  %23734 = vmatpush3.bf16.msra.mxu1 %v30073_v18  ;;  %v9003_v36 = vpop.f32.mrf.mxu0  ;;  %23712 = vmatmul.mubr.msk.bf16.vlgmr.msra.gmra.mxu0 %vm7101_vm10, %v30091_v50 }
 0x4d3   : > { %v23338_v2 = vpop.f32.mrf.mxu1  ;;  %23747 = vmatprep.subr.bf16.mxu1 %v33365_v21  ;;  %v30099_v44 = vadd.f32 %v9003_v36, %v29887_v35  ;;  %23724 = vmatpush3.bf16.msra.mxu0 %v30049_v43  ;;  %v30179_v36 = vld [vmem:[%s33023_s3 + $0xe8] sm:$0xff]  }
 0x4d4   : > { %v23329_v33 = vpop.f32.mrf.mxu0  ;;  %23725 = vmatprep.subr.bf16.mxu0 %v33365_v21  ;;  %23727 = vmatprep.mubr.msk.bf16.mxu0 %vm25474_vm2, %v33365_v21 }
 0x4d5   : > { %v9135_v61 = vpop.f32.mrf.mxu1  ;;  %23736 = vmatmul.mubr.msk.bf16.vlgmr.msra.gmra.mxu1 %vm7101_vm10, %v28989_v24 }
 0x4d6   : > { %v30102_v52 = vadd.f32 %v9135_v61, %v29987_v39  ;;  %23748 = vmatpush3.bf16.msra.mxu1 %v30049_v43  ;;  %23751 = vmatprep.mubr.msk.bf16.mxu1 %vm25474_vm2, %v33365_v21  ;;  %v9006_v24 = vpop.f32.mrf.mxu0 }
 0x4d7   : > { %v23353_v48 = vpop.f32.mrf.mxu1  ;;  %23749 = vmatprep.subr.bf16.mxu1 %v33365_v21  ;;  %v30113_v39 = vadd.f32 %v9006_v24, %v29907_v3  ;;  %23726 = vmatpush3.bf16.msra.mxu0 %v30073_v18 }
 0x4d8   : > { %v23330_v59 = vpop.f32.mrf.mxu0  ;;  %23739 = vmatprep.subr.bf16.mxu0 %v33365_v21 }
 0x4d9   : > { %v9138_v35 = vpop.f32.mrf.mxu1 }
 0x4da   : > { %v30116_v11 = vadd.f32 %v9138_v35, %v30003_v17  ;;  %23750 = vmatpush3.bf16.msra.mxu1 %v30073_v18  ;;  %v9091_v6 = vpop.f32.mrf.mxu0  ;;  %23728 = vmatmul.mubr.msk.bf16.vlgmr.msra.gmra.mxu0 %vm7101_vm10, %v28957_v10  ;;  %v30198_v35 = vld [vmem:[%s33023_s3 + $0xe0] sm:$0xff]  }
 0x4db   : > { %v23354_v53 = vpop.f32.mrf.mxu1  ;;  %23763 = vmatprep.subr.bf16.mxu1 %v33365_v21  ;;  %v30127_v3 = vadd.f32 %v9091_v6, %v29921_v31  ;;  %23740 = vmatpush3.bf16.msra.mxu0 %v30049_v43 }
 0x4dc   : > { %v23345_v55 = vpop.f32.mrf.mxu0  ;;  %23741 = vmatprep.subr.bf16.mxu0 %v33365_v21  ;;  %23743 = vmatprep.mubr.msk.bf16.mxu0 %vm25474_vm2, %v33365_v21 }
 0x4dd   : > { %v9264_v14 = vpop.f32.mrf.mxu1  ;;  %23752 = vmatmul.mubr.msk.bf16.vlgmr.msra.gmra.mxu1 %vm7101_vm10, %v29025_v38 }
 0x4de   : > { %v30130_v17 = vadd.f32 %v9264_v14, %v30023_v30  ;;  %23764 = vmatpush3.bf16.msra.mxu1 %v30049_v43  ;;  %23767 = vmatprep.mubr.msk.bf16.mxu1 %vm25474_vm2, %v33365_v21  ;;  %v9094_v10 = vpop.f32.mrf.mxu0 }
 0x4df   : > { %v23369_v19 = vpop.f32.mrf.mxu1  ;;  %23765 = vmatprep.subr.bf16.mxu1 %v33365_v21  ;;  %v30141_v31 = vadd.f32 %v9094_v10, %v29936_v15  ;;  %23742 = vmatpush3.bf16.msra.mxu0 %v30073_v18 }
 0x4e0   : > { %v23346_v0 = vpop.f32.mrf.mxu0  ;;  %23755 = vmatprep.subr.bf16.mxu0 %v33365_v21 }
 0x4e1   : > { %v9267_v38 = vpop.f32.mrf.mxu1 }
 0x4e2   : > { %v30144_v30 = vadd.f32 %v9267_v38, %v30039_v34  ;;  %23766 = vmatpush3.bf16.msra.mxu1 %v30073_v18  ;;  %v9179_v47 = vpop.f32.mrf.mxu0  ;;  %23744 = vmatmul.mubr.msk.bf16.vlgmr.msra.gmra.mxu0 %vm7101_vm10, %v28987_v58 }
 0x4e3   : > { %v23370_v26 = vpop.f32.mrf.mxu1  ;;  %23779 = vmatprep.subr.bf16.mxu1 %v33365_v21  ;;  %v30155_v15 = vadd.f32 %v9179_v47, %v29954_v23  ;;  %23756 = vmatpush3.bf16.msra.mxu0 %v30049_v43 }
 0x4e4   : > { %v23361_v4 = vpop.f32.mrf.mxu0  ;;  %23757 = vmatprep.subr.bf16.mxu0 %v33365_v21  ;;  %23759 = vmatprep.mubr.msk.bf16.mxu0 %vm25474_vm2, %v33365_v21 }
 0x4e5   : > { %v9364_v63 = vpop.f32.mrf.mxu1  ;;  %23768 = vmatmul.mubr.msk.bf16.vlgmr.msra.gmra.mxu1 %vm7101_vm10, %v29049_v8 }
 0x4e6   : > { %v30158_v34 = vadd.f32 %v9364_v63, %v30063_v16  ;;  %23780 = vmatpush3.bf16.msra.mxu1 %v30049_v43  ;;  %23783 = vmatprep.mubr.msk.bf16.mxu1 %vm25474_vm2, %v33365_v21  ;;  %v9182_v58 = vpop.f32.mrf.mxu0 }
 0x4e7   : > { %v23385_v2 = vpop.f32.mrf.mxu1  ;;  %23781 = vmatprep.subr.bf16.mxu1 %v33365_v21  ;;  %v30169_v23 = vadd.f32 %v9182_v58, %v29970_v27  ;;  %23758 = vmatpush3.bf16.msra.mxu0 %v30073_v18 }
 0x4e8   : > { %v23362_v61 = vpop.f32.mrf.mxu0  ;;  %23771 = vmatprep.subr.bf16.mxu0 %v33365_v21 }
 0x4e9   : > { %v9367_v8 = vpop.f32.mrf.mxu1 }
 0x4ea   : > { %v30172_v16 = vadd.f32 %v9367_v8, %v30083_v12  ;;  %23782 = vmatpush3.bf16.msra.mxu1 %v30073_v18  ;;  %v9314_v27 = vpop.f32.mrf.mxu0  ;;  %23760 = vmatmul.mubr.msk.bf16.vlgmr.msra.gmra.mxu0 %vm7101_vm10, %v28998_v41 }
 0x4eb   : > { %v23386_v33 = vpop.f32.mrf.mxu1  ;;  %23795 = vmatprep.subr.bf16.mxu1 %v33365_v21  ;;  %v30188_v12 = vadd.f32 %v9314_v27, %v29990_v22  ;;  %23772 = vmatpush3.bf16.msra.mxu0 %v30049_v43 }
 0x4ec   : > { %v23377_v59 = vpop.f32.mrf.mxu0  ;;  %23773 = vmatprep.subr.bf16.mxu0 %v33365_v21  ;;  %23775 = vmatprep.mubr.msk.bf16.mxu0 %vm25474_vm2, %v33365_v21 }
 0x4ed   : > { %v9464_v48 = vpop.f32.mrf.mxu1  ;;  %23784 = vmatmul.mubr.msk.bf16.vlgmr.msra.gmra.mxu1 %vm7101_vm10, %v29055_v25 }
 0x4ee   : > { %v30191_v24 = vadd.f32 %v9464_v48, %v30099_v44  ;;  %23796 = vmatpush3.bf16.msra.mxu1 %v30179_v36  ;;  %23799 = vmatprep.mubr.msk.bf16.mxu1 %vm25474_vm2, %v33365_v21  ;;  %v9317_v25 = vpop.f32.mrf.mxu0 }
 0x4ef   : > { %v23401_v41 = vpop.f32.mrf.mxu1  ;;  %23797 = vmatprep.subr.bf16.mxu1 %v33365_v21  ;;  %v30207_v44 = vadd.f32 %v9317_v25, %v30006_v7  ;;  %23774 = vmatpush3.bf16.msra.mxu0 %v30073_v18 }
 0x4f0   : > { %v23378_v6 = vpop.f32.mrf.mxu0  ;;  %23787 = vmatprep.subr.bf16.mxu0 %v33365_v21  ;;  %v12179_v41 = vshll.u32 %v29100_v29, 16 }
 0x4f1   : > { %v9467_v22 = vpop.f32.mrf.mxu1 }
 0x4f2   : > { %v30210_v53 = vadd.f32 %v9467_v22, %v30113_v39  ;;  %23798 = vmatpush3.bf16.msra.mxu1 %v30198_v35  ;;  %v9414_v55 = vpop.f32.mrf.mxu0  ;;  %23776 = vmatmul.mubr.msk.bf16.vlgmr.msra.gmra.mxu0 %vm7101_vm10, %v29027_v9 }
 0x4f3   : > { %v23402_v14 = vpop.f32.mrf.mxu1  ;;  %23811 = vmatprep.subr.bf16.mxu1 %v33365_v21  ;;  %v30221_v7 = vadd.f32 %v9414_v55, %v30026_v49  ;;  %23788 = vmatpush3.bf16.msra.mxu0 %v30049_v43  ;;  %v12177_v55 = vshrl.u32 %v29100_v29, 16 }
 0x4f4   : > { %v23393_v10 = vpop.f32.mrf.mxu0  ;;  %23789 = vmatprep.subr.bf16.mxu0 %v33365_v21  ;;  %23791 = vmatprep.mubr.msk.bf16.mxu0 %vm25474_vm2, %v33365_v21 }
 0x4f5   : > { %v9564_v19 = vpop.f32.mrf.mxu1  ;;  %23800 = vmatmul.mubr.msk.bf16.vlgmr.msra.gmra.mxu1 %vm7101_vm10, %v29975_v1  ;;  %v30331_v10 = vld [vmem:[%s33023_s3 + $0x58] sm:$0xff]  }
 0x4f6   : > { %v30224_v39 = vadd.f32 %v9564_v19, %v30127_v3  ;;  %23812 = vmatpush3.bf16.msra.mxu1 %v30179_v36  ;;  %23815 = vmatprep.mubr.msk.bf16.mxu1 %vm25474_vm2, %v33365_v21  ;;  %v9417_v9 = vpop.f32.mrf.mxu0 }
 0x4f7   : > { %v23417_v38 = vpop.f32.mrf.mxu1  ;;  %23813 = vmatprep.subr.bf16.mxu1 %v33365_v21  ;;  %v30235_v49 = vadd.f32 %v9417_v9, %v30042_v13  ;;  %23790 = vmatpush3.bf16.msra.mxu0 %v30073_v18 }
 0x4f8   : > { %v23394_v3 = vpop.f32.mrf.mxu0  ;;  %23803 = vmatprep.subr.bf16.mxu0 %v33365_v21 }
 0x4f9   : > { %v9567_v1 = vpop.f32.mrf.mxu1 }
 0x4fa   : > { %v30238_v43 = vadd.f32 %v9567_v1, %v30141_v31  ;;  %23814 = vmatpush3.bf16.msra.mxu1 %v30198_v35  ;;  %v9514_v26 = vpop.f32.mrf.mxu0  ;;  %23792 = vmatmul.mubr.msk.bf16.vlgmr.msra.gmra.mxu0 %vm7101_vm10, %v29100_v29 }
 0x4fb   : > { %v23418_v0 = vpop.f32.mrf.mxu1  ;;  %23827 = vmatprep.subr.bf16.mxu1 %v33365_v21  ;;  %v30249_v13 = vadd.f32 %v9514_v26, %v30066_v28  ;;  %23804 = vmatpush3.bf16.msra.mxu0 %v30179_v36 }
 0x4fc   : > { %v23409_v31 = vpop.f32.mrf.mxu0  ;;  %23805 = vmatprep.subr.bf16.mxu0 %v33365_v21  ;;  %23807 = vmatprep.mubr.msk.bf16.mxu0 %vm25474_vm2, %v33365_v21  ;;  %v30349_v0 = vld [vmem:[%s33023_s3 + $0x50] sm:$0xff]  }
 0x4fd   : > { %v9664_v47 = vpop.f32.mrf.mxu1  ;;  %23816 = vmatmul.mubr.msk.bf16.vlgmr.msra.gmra.mxu1 %vm7101_vm10, %v30011_v57 }
 0x4fe   : > { %v30252_v18 = vadd.f32 %v9664_v47, %v30155_v15  ;;  %23828 = vmatpush3.bf16.msra.mxu1 %v30179_v36  ;;  %23831 = vmatprep.mubr.msk.bf16.mxu1 %vm25474_vm2, %v33365_v21  ;;  %v9517_v57 = vpop.f32.mrf.mxu0 }
 0x4ff   : > { %v23433_v63 = vpop.f32.mrf.mxu1  ;;  %23829 = vmatprep.subr.bf16.mxu1 %v33365_v21  ;;  %v30263_v15 = vadd.f32 %v9517_v57, %v30086_v54  ;;  %23806 = vmatpush3.bf16.msra.mxu0 %v30198_v35 }
 0x500   : > { %v23410_v2 = vpop.f32.mrf.mxu0  ;;  %23819 = vmatprep.subr.bf16.mxu0 %v33365_v21 }
 0x501   : > { %v9667_v28 = vpop.f32.mrf.mxu1 }
 0x502   : > { %v30266_v4 = vadd.f32 %v9667_v28, %v30169_v23  ;;  %23830 = vmatpush3.bf16.msra.mxu1 %v30198_v35  ;;  %v9614_v8 = vpop.f32.mrf.mxu0  ;;  %23808 = vmatmul.mubr.msk.bf16.vlgmr.msra.gmra.mxu0 %vm7101_vm10, %v29941_v40 }
 0x503   : > { %v23434_v58 = vpop.f32.mrf.mxu1  ;;  %23843 = vmatprep.subr.bf16.mxu1 %v33365_v21  ;;  %v30277_v54 = vadd.f32 %v9614_v8, %v30102_v52  ;;  %23820 = vmatpush3.bf16.msra.mxu0 %v30179_v36 }
 0x504   : > { %v23425_v33 = vpop.f32.mrf.mxu0  ;;  %23821 = vmatprep.subr.bf16.mxu0 %v33365_v21  ;;  %23823 = vmatprep.mubr.msk.bf16.mxu0 %vm25474_vm2, %v33365_v21 }
 0x505   : > { %v9781_v61 = vpop.f32.mrf.mxu1  ;;  %23832 = vmatmul.mubr.msk.bf16.vlgmr.msra.gmra.mxu1 %vm7101_vm10, %v30052_v45 }
 0x506   : > { %v30280_v23 = vadd.f32 %v9781_v61, %v30188_v12  ;;  %23844 = vmatpush3.bf16.msra.mxu1 %v30179_v36  ;;  %23847 = vmatprep.mubr.msk.bf16.mxu1 %vm25474_vm2, %v33365_v21  ;;  %v9617_v40 = vpop.f32.mrf.mxu0 }
 0x507   : > { %v23449_v27 = vpop.f32.mrf.mxu1  ;;  %23845 = vmatprep.subr.bf16.mxu1 %v33365_v21  ;;  %v30291_v52 = vadd.f32 %v9617_v40, %v30116_v11  ;;  %23822 = vmatpush3.bf16.msra.mxu0 %v30198_v35 }
 0x508   : > { %v23426_v12 = vpop.f32.mrf.mxu0  ;;  %23835 = vmatprep.subr.bf16.mxu0 %v33365_v21 }
 0x509   : > { %v9784_v45 = vpop.f32.mrf.mxu1 }
 0x50a   : > { %v30294_v48 = vadd.f32 %v9784_v45, %v30207_v44  ;;  %23846 = vmatpush3.bf16.msra.mxu1 %v30198_v35  ;;  %v9740_v25 = vpop.f32.mrf.mxu0  ;;  %23824 = vmatmul.mubr.msk.bf16.vlgmr.msra.gmra.mxu0 %vm7101_vm10, %v29977_v62  ;;  %v12181_v62 = vrot.slane %v12179_v41, 1 }
 0x50b   : > { %v23450_v59 = vpop.f32.mrf.mxu1  ;;  %23859 = vmatprep.subr.bf16.mxu1 %v33365_v21  ;;  %v30306_v11 = vadd.f32 %v9740_v25, %v30130_v17  ;;  %23836 = vmatpush3.bf16.msra.mxu0 %v30179_v36 }
 0x50c   : > { %v23441_v6 = vpop.f32.mrf.mxu0  ;;  %23837 = vmatprep.subr.bf16.mxu0 %v33365_v21  ;;  %23839 = vmatprep.mubr.msk.bf16.mxu0 %vm25474_vm2, %v33365_v21  ;;  %v12182_v29 = vor.u32 %v12181_v62, %v12177_v55 }
 0x50d   : > { %v9863_v22 = vpop.f32.mrf.mxu1  ;;  %23848 = vmatmul.mubr.msk.bf16.vlgmr.msra.gmra.mxu1 %vm7101_vm10, %v30091_v50 }
 0x50e   : > { %v30309_v44 = vadd.f32 %v9863_v22, %v30221_v7  ;;  %23860 = vmatpush3.bf16.msra.mxu1 %v30179_v36  ;;  %23863 = vmatprep.mubr.msk.bf16.mxu1 %vm25474_vm2, %v33365_v21  ;;  %v9743_v50 = vpop.f32.mrf.mxu0 }
 0x50f   : > { %v23465_v14 = vpop.f32.mrf.mxu1  ;;  %23861 = vmatprep.subr.bf16.mxu1 %v33365_v21  ;;  %v30321_v19 = vadd.f32 %v9743_v50, %v30144_v30  ;;  %23838 = vmatpush3.bf16.msra.mxu0 %v30198_v35 }
 0x510   : > { %v23442_v38 = vpop.f32.mrf.mxu0  ;;  %23851 = vmatprep.subr.bf16.mxu0 %v33365_v21 }
 0x511   : > { %v9866_v17 = vpop.f32.mrf.mxu1  ;;  %v30452_v38 = vld [vmem:[%s33023_s3 + $0x78] sm:$0xff]  }
 0x512   : > { %v30324_v7 = vadd.f32 %v9866_v17, %v30235_v49  ;;  %23862 = vmatpush3.bf16.msra.mxu1 %v30198_v35  ;;  %v9822_v30 = vpop.f32.mrf.mxu0  ;;  %23840 = vmatmul.mubr.msk.bf16.vlgmr.msra.gmra.mxu0 %vm7101_vm10, %v30013_v46 }
 0x513   : > { %v23466_v9 = vpop.f32.mrf.mxu1  ;;  %23875 = vmatprep.subr.bf16.mxu1 %v33365_v21  ;;  %v30339_v49 = vadd.f32 %v9822_v30, %v30158_v34  ;;  %23852 = vmatpush3.bf16.msra.mxu0 %v30179_v36 }
 0x514   : > { %v23457_v26 = vpop.f32.mrf.mxu0  ;;  %23853 = vmatprep.subr.bf16.mxu0 %v33365_v21  ;;  %23855 = vmatprep.mubr.msk.bf16.mxu0 %vm25474_vm2, %v33365_v21 }
 0x515   : > { %v9945_v1 = vpop.f32.mrf.mxu1  ;;  %23864 = vmatmul.mubr.msk.bf16.vlgmr.msra.gmra.mxu1 %vm7101_vm10, %v12182_v29 }
 0x516   : > { %v30342_v3 = vadd.f32 %v9945_v1, %v30249_v13  ;;  %23876 = vmatpush3.bf16.msra.mxu1 %v30331_v10  ;;  %23879 = vmatprep.mubr.msk.bf16.mxu1 %vm25474_vm2, %v33365_v21  ;;  %v9825_v46 = vpop.f32.mrf.mxu0 }
 0x517   : > { %v23481_v47 = vpop.f32.mrf.mxu1  ;;  %23877 = vmatprep.subr.bf16.mxu1 %v33365_v21  ;;  %v30358_v36 = vadd.f32 %v9825_v46, %v30172_v16  ;;  %23854 = vmatpush3.bf16.msra.mxu0 %v30198_v35 }
 0x518   : > { %v23458_v31 = vpop.f32.mrf.mxu0  ;;  %23867 = vmatprep.subr.bf16.mxu0 %v33365_v21  ;;  %v30472_v47 = vld [vmem:[%s33023_s3 + $0x70] sm:$0xff]  }
 0x519   : > { %v9948_v34 = vpop.f32.mrf.mxu1 }
 0x51a   : > { %v30361_v13 = vadd.f32 %v9948_v34, %v30263_v15  ;;  %23878 = vmatpush3.bf16.msra.mxu1 %v30349_v0  ;;  %v9904_v57 = vpop.f32.mrf.mxu0  ;;  %23856 = vmatmul.mubr.msk.bf16.vlgmr.msra.gmra.mxu0 %vm7101_vm10, %v30054_v5 }
 0x51b   : > { %v23482_v63 = vpop.f32.mrf.mxu1  ;;  %23891 = vmatprep.subr.bf16.mxu1 %v33365_v21  ;;  %v30372_v16 = vadd.f32 %v9904_v57, %v30191_v24  ;;  %23868 = vmatpush3.bf16.msra.mxu0 %v30331_v10 }
 0x51c   : > { %v23473_v15 = vpop.f32.mrf.mxu0  ;;  %23869 = vmatprep.subr.bf16.mxu0 %v33365_v21  ;;  %23871 = vmatprep.mubr.msk.bf16.mxu0 %vm25474_vm2, %v33365_v21  ;;  %v12681_v63 = vshrl.u32 %v29104_v51, 16 }
 0x51d   : > { %v10027_v28 = vpop.f32.mrf.mxu1  ;;  %23880 = vmatmul.mubr.msk.bf16.vlgmr.msra.gmra.mxu1 %vm7101_vm10, %v29098_v20 }
 0x51e   : > { %v30375_v35 = vadd.f32 %v10027_v28, %v30277_v54  ;;  %23892 = vmatpush3.bf16.msra.mxu1 %v30331_v10  ;;  %23895 = vmatprep.mubr.msk.bf16.mxu1 %vm25474_vm2, %v33365_v21  ;;  %v9907_v5 = vpop.f32.mrf.mxu0 }
 0x51f   : > { %v23497_v2 = vpop.f32.mrf.mxu1  ;;  %23893 = vmatprep.subr.bf16.mxu1 %v33365_v21  ;;  %v30386_v58 = vadd.f32 %v9907_v5, %v30210_v53  ;;  %23870 = vmatpush3.bf16.msra.mxu0 %v30349_v0  ;;  %v12795_v5 = vshll.u32 %v29114_v60, 16 }
 0x520   : > { %v23474_v61 = vpop.f32.mrf.mxu0  ;;  %23883 = vmatprep.subr.bf16.mxu0 %v33365_v21 }
 0x521   : > { %v10030_v24 = vpop.f32.mrf.mxu1 }
 0x522   : > { %v30389_v8 = vadd.f32 %v10030_v24, %v30291_v52  ;;  %23894 = vmatpush3.bf16.msra.mxu1 %v30349_v0  ;;  %v9986_v33 = vpop.f32.mrf.mxu0  ;;  %23872 = vmatmul.mubr.msk.bf16.vlgmr.msra.gmra.mxu0 %vm7101_vm10, %v29104_v51 }
 0x523   : > { %v23498_v54 = vpop.f32.mrf.mxu1  ;;  %23907 = vmatprep.subr.bf16.mxu1 %v33365_v21  ;;  %v30400_v53 = vadd.f32 %v9986_v33, %v30224_v39  ;;  %23884 = vmatpush3.bf16.msra.mxu0 %v30331_v10 }
 0x524   : > { %v23489_v45 = vpop.f32.mrf.mxu0  ;;  %23885 = vmatprep.subr.bf16.mxu0 %v33365_v21  ;;  %23887 = vmatprep.mubr.msk.bf16.mxu0 %vm25474_vm2, %v33365_v21 }
 0x525   : > { %v10147_v27 = vpop.f32.mrf.mxu1  ;;  %23896 = vmatmul.mubr.msk.bf16.vlgmr.msra.gmra.mxu1 %vm7101_vm10, %v29108_v42  ;;  %v12793_v45 = vshrl.u32 %v29114_v60, 16 }
 0x526   : > { %v30403_v40 = vadd.f32 %v10147_v27, %v30306_v11  ;;  %23908 = vmatpush3.bf16.msra.mxu1 %v30331_v10  ;;  %23911 = vmatprep.mubr.msk.bf16.mxu1 %vm25474_vm2, %v33365_v21  ;;  %v9989_v39 = vpop.f32.mrf.mxu0  ;;  %v12797_v27 = vrot.slane %v12795_v5, 1 }
 0x527   : > { %v23513_v52 = vpop.f32.mrf.mxu1  ;;  %23909 = vmatprep.subr.bf16.mxu1 %v33365_v21  ;;  %v30414_v59 = vadd.f32 %v9989_v39, %v30238_v43  ;;  %23886 = vmatpush3.bf16.msra.mxu0 %v30349_v0 }
 0x528   : > { %v23490_v25 = vpop.f32.mrf.mxu0  ;;  %23899 = vmatprep.subr.bf16.mxu0 %v33365_v21 }
 0x529   : > { %v10150_v12 = vpop.f32.mrf.mxu1  ;;  %v30519_v25 = vor.u32 %v12797_v27, %v12793_v45 }
 0x52a   : > { %v30417_v41 = vadd.f32 %v10150_v12, %v30321_v19  ;;  %23910 = vmatpush3.bf16.msra.mxu1 %v30349_v0  ;;  %v10071_v11 = vpop.f32.mrf.mxu0  ;;  %23888 = vmatmul.mubr.msk.bf16.vlgmr.msra.gmra.mxu0 %vm7101_vm10, %v29114_v60 }
 0x52b   : > { %v23514_v22 = vpop.f32.mrf.mxu1  ;;  %23923 = vmatprep.subr.bf16.mxu1 %v33365_v21  ;;  %v30428_v43 = vadd.f32 %v10071_v11, %v30252_v18  ;;  %23900 = vmatpush3.bf16.msra.mxu0 %v30331_v10 }
 0x52c   : > { %v23505_v62 = vpop.f32.mrf.mxu0  ;;  %23901 = vmatprep.subr.bf16.mxu0 %v33365_v21  ;;  %23903 = vmatprep.mubr.msk.bf16.mxu0 %vm25474_vm2, %v33365_v21  ;;  %v12745_v22 = vshll.u32 %v29098_v20, 16 }
 0x52d   : > { %v10229_v6 = vpop.f32.mrf.mxu1  ;;  %23912 = vmatmul.mubr.msk.bf16.vlgmr.msra.gmra.mxu1 %vm7101_vm10, %v29118_v37 }
 0x52e   : > { %v30431_v14 = vadd.f32 %v10229_v6, %v30339_v49  ;;  %23924 = vmatpush3.bf16.msra.mxu1 %v30331_v10  ;;  %23927 = vmatprep.mubr.msk.bf16.mxu1 %vm25474_vm2, %v33365_v21  ;;  %v10074_v18 = vpop.f32.mrf.mxu0 }
 0x52f   : > { %v23529_v50 = vpop.f32.mrf.mxu1  ;;  %23925 = vmatprep.subr.bf16.mxu1 %v33365_v21  ;;  %v30442_v55 = vadd.f32 %v10074_v18, %v30266_v4  ;;  %23902 = vmatpush3.bf16.msra.mxu0 %v30349_v0  ;;  %v12683_v4 = vshll.u32 %v29104_v51, 16 }
 0x530   : > { %v23506_v9 = vpop.f32.mrf.mxu0  ;;  %23915 = vmatprep.subr.bf16.mxu0 %v33365_v21 }
 0x531   : > { %v10232_v17 = vpop.f32.mrf.mxu1 }
 0x532   : > { %v30445_v19 = vadd.f32 %v10232_v17, %v30358_v36  ;;  %23926 = vmatpush3.bf16.msra.mxu1 %v30349_v0  ;;  %v10188_v30 = vpop.f32.mrf.mxu0  ;;  %23904 = vmatmul.mubr.msk.bf16.vlgmr.msra.gmra.mxu0 %vm7101_vm10, %v29124_v32  ;;  %v12747_v17 = vrot.slane %v12745_v22, 1 }
 0x533   : > { %v23530_v29 = vpop.f32.mrf.mxu1  ;;  %23939 = vmatprep.subr.bf16.mxu1 %v33365_v21  ;;  %v30462_v49 = vadd.f32 %v10188_v30, %v30280_v23  ;;  %23916 = vmatpush3.bf16.msra.mxu0 %v30331_v10  ;;  %v12685_v23 = vrot.slane %v12683_v4, 1  ;;  %v12893_v4 = vshrl.u32 %v29124_v32, 16 }
 0x534   : > { %v23521_v46 = vpop.f32.mrf.mxu0  ;;  %23917 = vmatprep.subr.bf16.mxu0 %v33365_v21  ;;  %23919 = vmatprep.mubr.msk.bf16.mxu0 %vm25474_vm2, %v33365_v21  ;;  %v12743_v29 = vshrl.u32 %v29098_v20, 16 }
 0x535   : > { %v10311_v1 = vpop.f32.mrf.mxu1  ;;  %23928 = vmatmul.mubr.msk.bf16.vlgmr.msra.gmra.mxu1 %vm7101_vm10, %v29128_v56  ;;  %v12686_v2 = vor.u32 %v12685_v23, %v12681_v63 }
 0x536   : > { %v30465_v26 = vadd.f32 %v10311_v1, %v30372_v16  ;;  %23940 = vmatpush3.bf16.msra.mxu1 %v30452_v38  ;;  %23943 = vmatprep.mubr.msk.bf16.mxu1 %vm25474_vm2, %v33365_v21  ;;  %v10191_v36 = vpop.f32.mrf.mxu0  ;;  %v30553_v23 = vor.u32 %v12747_v17, %v12743_v29 }
 0x537   : > { %v23545_v34 = vpop.f32.mrf.mxu1  ;;  %23941 = vmatprep.subr.bf16.mxu1 %v33365_v21  ;;  %v30482_v57 = vadd.f32 %v10191_v36, %v30294_v48  ;;  %23918 = vmatpush3.bf16.msra.mxu0 %v30349_v0  ;;  %v33577_v48 = vld [vmem:[#allocation74_spill] sm:$0xff] }
 0x538   : > { %v23522_v16 = vpop.f32.mrf.mxu0  ;;  %23931 = vmatprep.subr.bf16.mxu0 %v33365_v21 }
 0x539   : > { %v10314_v31 = vpop.f32.mrf.mxu1 }
 0x53a   : > { %v30485_v28 = vadd.f32 %v10314_v31, %v30386_v58  ;;  %23942 = vmatpush3.bf16.msra.mxu1 %v30472_v47  ;;  %v10270_v51 = vpop.f32.mrf.mxu0  ;;  %23920 = vmatmul.mubr.msk.bf16.vlgmr.msra.gmra.mxu0 %vm7101_vm10, %v33577_v48  ;;  %v12995_v31 = vshll.u32 %v33577_v48, 16 }
 0x53b   : > { %v23546_v15 = vpop.f32.mrf.mxu1  ;;  %23955 = vmatprep.subr.bf16.mxu1 %v33365_v21  ;;  %v30496_v58 = vadd.f32 %v10270_v51, %v30309_v44  ;;  %23932 = vmatpush3.bf16.msra.mxu0 %v30331_v10 }
 0x53c   : > { %v23537_v54 = vpop.f32.mrf.mxu0  ;;  %23933 = vmatprep.subr.bf16.mxu0 %v33365_v21  ;;  %23935 = vmatprep.mubr.msk.bf16.mxu0 %vm25474_vm2, %v33365_v21 }
 0x53d   : > { %v10393_v24 = vpop.f32.mrf.mxu1  ;;  %23944 = vmatmul.mubr.msk.bf16.vlgmr.msra.gmra.mxu1 %vm7101_vm10, %v12686_v2  ;;  %v12843_v54 = vshrl.u32 %v29108_v42, 16 }
 0x53e   : > { %v30499_v61 = vadd.f32 %v10393_v24, %v30400_v53  ;;  %23956 = vmatpush3.bf16.msra.mxu1 %v30452_v38  ;;  %23959 = vmatprep.mubr.msk.bf16.mxu1 %vm25474_vm2, %v33365_v21  ;;  %v10273_v44 = vpop.f32.mrf.mxu0  ;;  %v12997_v24 = vrot.slane %v12995_v31, 1 }
 0x53f   : > { %v23561_v33 = vpop.f32.mrf.mxu1  ;;  %23957 = vmatprep.subr.bf16.mxu1 %v33365_v21  ;;  %v30511_v10 = vadd.f32 %v10273_v44, %v30324_v7  ;;  %23934 = vmatpush3.bf16.msra.mxu0 %v30349_v0  ;;  %v12895_v7 = vshll.u32 %v29124_v32, 16 }
 0x540   : > { %v23538_v39 = vpop.f32.mrf.mxu0  ;;  %23947 = vmatprep.subr.bf16.mxu0 %v33365_v21  ;;  %v12993_v33 = vshrl.u32 %v33577_v48, 16 }
 0x541   : > { %v10396_v53 = vpop.f32.mrf.mxu1  ;;  %v12897_v9 = vrot.slane %v12895_v7, 1 }
 0x542   : > { %v30514_v52 = vadd.f32 %v10396_v53, %v30414_v59  ;;  %23958 = vmatpush3.bf16.msra.mxu1 %v30472_v47  ;;  %v10352_v11 = vpop.f32.mrf.mxu0  ;;  %v33578_v59 = vld [vmem:[#allocation24_spill] sm:$0xff] }
 0x543   : > { %v23562_v12 = vpop.f32.mrf.mxu1  ;;  %23971 = vmatprep.subr.bf16.mxu1 %v33365_v21  ;;  %23936 = vmatmul.mubr.msk.bf16.vlgmr.msra.gmra.mxu0 %vm7101_vm10, %v33578_v59  ;;  %v30529_v0 = vadd.f32 %v10352_v11, %v30342_v3  ;;  %v30555_v36 = vor.u32 %v12897_v9, %v12893_v4  ;;  %v13095_v22 = vshll.u32 %v33578_v59, 16 }
 0x544   : > { %23948 = vmatpush3.bf16.msra.mxu0 %v30452_v38  ;;  %v23553_v50 = vpop.f32.mrf.mxu0  ;;  %23951 = vmatprep.mubr.msk.bf16.mxu0 %vm25474_vm2, %v33365_v21  ;;  %v30591_v12 = vor.u32 %v12997_v24, %v12993_v33 }
 0x545   : > { %v10484_v6 = vpop.f32.mrf.mxu1  ;;  %23960 = vmatmul.mubr.msk.bf16.vlgmr.msra.gmra.mxu1 %vm7101_vm10, %v30519_v25  ;;  %23949 = vmatprep.subr.bf16.mxu0 %v33365_v21  ;;  %v13097_v9 = vrot.slane %v13095_v22, 1 }
 0x546   : > { %v30532_v62 = vadd.f32 %v10484_v6, %v30428_v43  ;;  %23972 = vmatpush3.bf16.msra.mxu1 %v30452_v38  ;;  %23975 = vmatprep.mubr.msk.bf16.mxu1 %vm25474_vm2, %v33365_v21  ;;  %v10355_v3 = vpop.f32.mrf.mxu0 }
 0x547   : > { %v23577_v18 = vpop.f32.mrf.mxu1  ;;  %23973 = vmatprep.subr.bf16.mxu1 %v33365_v21  ;;  %v30545_v30 = vadd.f32 %v10355_v3, %v30361_v13  ;;  %v12845_v13 = vshll.u32 %v29108_v42, 16  ;;  %v12943_v3 = vshrl.u32 %v29118_v37, 16 }
 0x548   : > { %23950 = vmatpush3.bf16.msra.mxu0 %v30472_v47  ;;  %v23554_v46 = vpop.f32.mrf.mxu0 }
 0x549   : > { %v10487_v43 = vpop.f32.mrf.mxu1  ;;  %23963 = vmatprep.subr.bf16.mxu0 %v33365_v21  ;;  %v12847_v51 = vrot.slane %v12845_v13, 1  ;;  %v30627_v46 = vld [vmem:[%s33023_s3 + $0xd8] sm:$0xff]  }
 0x54a   : > { %v30548_v1 = vadd.f32 %v10487_v43, %v30442_v55  ;;  %23974 = vmatpush3.bf16.msra.mxu1 %v30472_v47  ;;  %v10434_v55 = vpop.f32.mrf.mxu0  ;;  %v13093_v43 = vshrl.u32 %v33578_v59, 16 }
 0x54b   : > { %v23578_v34 = vpop.f32.mrf.mxu1  ;;  %23987 = vmatprep.subr.bf16.mxu1 %v33365_v21  ;;  %23952 = vmatmul.mubr.msk.bf16.vlgmr.msra.gmra.mxu0 %vm7101_vm10, %v30553_v23  ;;  %v30565_v16 = vadd.f32 %v10434_v55, %v30375_v35  ;;  %v30589_v39 = vor.u32 %v12847_v51, %v12843_v54  ;;  %v30651_v51 = vld [vmem:[%s33023_s3 + $0xd0] sm:$0xff]  }
 0x54c   : > { %23964 = vmatpush3.bf16.msra.mxu0 %v30452_v38  ;;  %v23569_v2 = vpop.f32.mrf.mxu0  ;;  %23967 = vmatprep.mubr.msk.bf16.mxu0 %vm25474_vm2, %v33365_v21 }
 0x54d   : > { %v10607_v63 = vpop.f32.mrf.mxu1  ;;  %23976 = vmatmul.mubr.msk.bf16.vlgmr.msra.gmra.mxu1 %vm7101_vm10, %v30555_v36  ;;  %23965 = vmatprep.subr.bf16.mxu0 %v33365_v21 }
 0x54e   : > { %v30568_v15 = vadd.f32 %v10607_v63, %v30462_v49  ;;  %23988 = vmatpush3.bf16.msra.mxu1 %v30452_v38  ;;  %23991 = vmatprep.mubr.msk.bf16.mxu1 %vm25474_vm2, %v33365_v21  ;;  %v10437_v35 = vpop.f32.mrf.mxu0 }
 0x54f   : > { %v23593_v5 = vpop.f32.mrf.mxu1  ;;  %23989 = vmatprep.subr.bf16.mxu1 %v33365_v21  ;;  %v30581_v27 = vadd.f32 %v10437_v35, %v30389_v8  ;;  %v12945_v8 = vshll.u32 %v29118_v37, 16 }
 0x550   : > { %23966 = vmatpush3.bf16.msra.mxu0 %v30472_v47  ;;  %v23570_v53 = vpop.f32.mrf.mxu0 }
 0x551   : > { %v10610_v49 = vpop.f32.mrf.mxu1  ;;  %23979 = vmatprep.subr.bf16.mxu0 %v33365_v21  ;;  %v12947_v17 = vrot.slane %v12945_v8, 1 }
 0x552   : > { %v30584_v44 = vadd.f32 %v10610_v49, %v30482_v57  ;;  %23990 = vmatpush3.bf16.msra.mxu1 %v30472_v47  ;;  %v10563_v57 = vpop.f32.mrf.mxu0  ;;  %v13043_v49 = vshrl.u32 %v29128_v56, 16 }
 0x553   : > { %v23594_v45 = vpop.f32.mrf.mxu1  ;;  %24003 = vmatprep.subr.bf16.mxu1 %v33365_v21  ;;  %23968 = vmatmul.mubr.msk.bf16.vlgmr.msra.gmra.mxu0 %vm7101_vm10, %v30589_v39  ;;  %v30601_v11 = vadd.f32 %v10563_v57, %v30403_v40  ;;  %v30630_v31 = vor.u32 %v12947_v17, %v12943_v3 }
 0x554   : > { %23980 = vmatpush3.bf16.msra.mxu0 %v30452_v38  ;;  %v23585_v50 = vpop.f32.mrf.mxu0  ;;  %23983 = vmatprep.mubr.msk.bf16.mxu0 %vm25474_vm2, %v33365_v21 }
 0x555   : > { %v10695_v7 = vpop.f32.mrf.mxu1  ;;  %23992 = vmatmul.mubr.msk.bf16.vlgmr.msra.gmra.mxu1 %vm7101_vm10, %v30591_v12  ;;  %23981 = vmatprep.subr.bf16.mxu0 %v33365_v21 }
 0x556   : > { %v30604_v6 = vadd.f32 %v10695_v7, %v30496_v58  ;;  %24004 = vmatpush3.bf16.msra.mxu1 %v30452_v38  ;;  %24007 = vmatprep.mubr.msk.bf16.mxu1 %vm25474_vm2, %v33365_v21  ;;  %v10566_v40 = vpop.f32.mrf.mxu0 }
 0x557   : > { %v23609_v18 = vpop.f32.mrf.mxu1  ;;  %24005 = vmatprep.subr.bf16.mxu1 %v33365_v21  ;;  %v30617_v29 = vadd.f32 %v10566_v40, %v30417_v41  ;;  %v30632_v41 = vor.u32 %v13097_v9, %v13093_v43 }
 0x558   : > { %23982 = vmatpush3.bf16.msra.mxu0 %v30472_v47  ;;  %v23586_v34 = vpop.f32.mrf.mxu0 }
 0x559   : > { %v10698_v58 = vpop.f32.mrf.mxu1  ;;  %23995 = vmatprep.subr.bf16.mxu0 %v33365_v21 }
 0x55a   : > { %v30620_v4 = vadd.f32 %v10698_v58, %v30511_v10  ;;  %24006 = vmatpush3.bf16.msra.mxu1 %v30472_v47  ;;  %v13045_v10 = vshll.u32 %v29128_v56, 16  ;;  %v10651_v55 = vpop.f32.mrf.mxu0 }
 0x55b   : > { %v23610_v13 = vpop.f32.mrf.mxu1  ;;  %24019 = vmatprep.subr.bf16.mxu1 %v33365_v21  ;;  %23984 = vmatmul.mubr.msk.bf16.vlgmr.msra.gmra.mxu0 %vm7101_vm10, %v30630_v31  ;;  %v30641_v2 = vadd.f32 %v10651_v55, %v30431_v14 }
 0x55c   : > { %23996 = vmatpush3.bf16.msra.mxu0 %v30452_v38  ;;  %v23601_v24 = vpop.f32.mrf.mxu0  ;;  %v13047_v14 = vrot.slane %v13045_v10, 1  ;;  %23999 = vmatprep.mubr.msk.bf16.mxu0 %vm25474_vm2, %v33365_v21 }
 0x55d   : > { %v10783_v63 = vpop.f32.mrf.mxu1  ;;  %24008 = vmatmul.mubr.msk.bf16.vlgmr.msra.gmra.mxu1 %vm7101_vm10, %v30632_v41  ;;  %23997 = vmatprep.subr.bf16.mxu0 %v33365_v21  ;;  %v30757_v24 = vld [vmem:[%s33023_s3 + $0xf8] sm:$0xff]  }
 0x55e   : > { %v30644_v5 = vadd.f32 %v10783_v63, %v30529_v0  ;;  %24020 = vmatpush3.bf16.msra.mxu1 %v30627_v46  ;;  %24023 = vmatprep.mubr.msk.bf16.mxu1 %vm25474_vm2, %v33365_v21  ;;  %v10654_v38 = vpop.f32.mrf.mxu0  ;;  %v30669_v8 = vor.u32 %v13047_v14, %v13043_v49 }
 0x55f   : > { %v23625_v35 = vpop.f32.mrf.mxu1  ;;  %24021 = vmatprep.subr.bf16.mxu1 %v33365_v21  ;;  %v30661_v54 = vadd.f32 %v10654_v38, %v30445_v19 }
 0x560   : > { %23998 = vmatpush3.bf16.msra.mxu0 %v30472_v47  ;;  %v23602_v53 = vpop.f32.mrf.mxu0 }
 0x561   : > { %v10786_v0 = vpop.f32.mrf.mxu1  ;;  %24011 = vmatprep.subr.bf16.mxu0 %v33365_v21 }
 0x562   : > { %v30664_v33 = vadd.f32 %v10786_v0, %v30545_v30  ;;  %24022 = vmatpush3.bf16.msra.mxu1 %v30651_v51  ;;  %v10739_v22 = vpop.f32.mrf.mxu0 }
 0x563   : > { %v23626_v45 = vpop.f32.mrf.mxu1  ;;  %24035 = vmatprep.subr.bf16.mxu1 %v33365_v21  ;;  %24000 = vmatmul.mubr.msk.bf16.vlgmr.msra.gmra.mxu0 %vm7101_vm10, %v30669_v8  ;;  %v30677_v19 = vadd.f32 %v10739_v22, %v30465_v26 }
 0x564   : > { %24012 = vmatpush3.bf16.msra.mxu0 %v30627_v46  ;;  %v23617_v30 = vpop.f32.mrf.mxu0  ;;  %24015 = vmatprep.mubr.msk.bf16.mxu0 %vm25474_vm2, %v33365_v21 }
 0x565   : > { %v10871_v57 = vpop.f32.mrf.mxu1  ;;  %24024 = vmatmul.mubr.msk.bf16.vlgmr.msra.gmra.mxu1 %vm7101_vm10, %v29114_v60  ;;  %24013 = vmatprep.subr.bf16.mxu0 %v33365_v21 }
 0x566   : > { %v30680_v47 = vadd.f32 %v10871_v57, %v30565_v16  ;;  %24036 = vmatpush3.bf16.msra.mxu1 %v30627_v46  ;;  %24039 = vmatprep.mubr.msk.bf16.mxu1 %vm25474_vm2, %v33365_v21  ;;  %v10742_v60 = vpop.f32.mrf.mxu0 }
 0x567   : > { %v23641_v7 = vpop.f32.mrf.mxu1  ;;  %24037 = vmatprep.subr.bf16.mxu1 %v33365_v21  ;;  %v30691_v16 = vadd.f32 %v10742_v60, %v30485_v28 }
 0x568   : > { %24014 = vmatpush3.bf16.msra.mxu0 %v30651_v51  ;;  %v23618_v18 = vpop.f32.mrf.mxu0 }
 0x569   : > { %v10874_v26 = vpop.f32.mrf.mxu1  ;;  %24027 = vmatprep.subr.bf16.mxu0 %v33365_v21 }
 0x56a   : > { %v30694_v50 = vadd.f32 %v10874_v26, %v30581_v27  ;;  %24038 = vmatpush3.bf16.msra.mxu1 %v30651_v51  ;;  %v10827_v9 = vpop.f32.mrf.mxu0 }
 0x56b   : > { %v23642_v17 = vpop.f32.mrf.mxu1  ;;  %24051 = vmatprep.subr.bf16.mxu1 %v33365_v21  ;;  %24016 = vmatmul.mubr.msk.bf16.vlgmr.msra.gmra.mxu0 %vm7101_vm10, %v29098_v20  ;;  %v30705_v28 = vadd.f32 %v10827_v9, %v30499_v61 }
 0x56c   : > { %24028 = vmatpush3.bf16.msra.mxu0 %v30627_v46  ;;  %v23633_v58 = vpop.f32.mrf.mxu0  ;;  %24031 = vmatprep.mubr.msk.bf16.mxu0 %vm25474_vm2, %v33365_v21 }
 0x56d   : > { %v11000_v40 = vpop.f32.mrf.mxu1  ;;  %24040 = vmatmul.mubr.msk.bf16.vlgmr.msra.gmra.mxu1 %vm7101_vm10, %v29124_v32  ;;  %24029 = vmatprep.subr.bf16.mxu0 %v33365_v21 }
 0x56e   : > { %v30708_v27 = vadd.f32 %v11000_v40, %v30601_v11  ;;  %24052 = vmatpush3.bf16.msra.mxu1 %v30627_v46  ;;  %24055 = vmatprep.mubr.msk.bf16.mxu1 %vm25474_vm2, %v33365_v21  ;;  %v10830_v20 = vpop.f32.mrf.mxu0 }
 0x56f   : > { %v23657_v3 = vpop.f32.mrf.mxu1  ;;  %24053 = vmatprep.subr.bf16.mxu1 %v33365_v21  ;;  %v30719_v61 = vadd.f32 %v10830_v20, %v30514_v52 }
 0x570   : > { %24030 = vmatpush3.bf16.msra.mxu0 %v30651_v51  ;;  %v23634_v43 = vpop.f32.mrf.mxu0 }
 0x571   : > { %v11003_v32 = vpop.f32.mrf.mxu1  ;;  %24043 = vmatprep.subr.bf16.mxu0 %v33365_v21 }
 0x572   : > { %v30722_v11 = vadd.f32 %v11003_v32, %v30617_v29  ;;  %24054 = vmatpush3.bf16.msra.mxu1 %v30651_v51  ;;  %v10915_v13 = vpop.f32.mrf.mxu0 }
 0x573   : > { %v23658_v34 = vpop.f32.mrf.mxu1  ;;  %24067 = vmatprep.subr.bf16.mxu1 %v33365_v21  ;;  %24032 = vmatmul.mubr.msk.bf16.vlgmr.msra.gmra.mxu0 %vm7101_vm10, %v29108_v42  ;;  %v30733_v52 = vadd.f32 %v10915_v13, %v30532_v62 }
 0x574   : > { %24044 = vmatpush3.bf16.msra.mxu0 %v30627_v46  ;;  %v23649_v55 = vpop.f32.mrf.mxu0  ;;  %24047 = vmatprep.mubr.msk.bf16.mxu0 %vm25474_vm2, %v33365_v21 }
 0x575   : > { %v11100_v10 = vpop.f32.mrf.mxu1  ;;  %24056 = vmatmul.mubr.msk.bf16.vlgmr.msra.gmra.mxu1 %vm7101_vm10, %v33577_v48  ;;  %24045 = vmatprep.subr.bf16.mxu0 %v33365_v21 }
 0x576   : > { %v30736_v29 = vadd.f32 %v11100_v10, %v30641_v2  ;;  %24068 = vmatpush3.bf16.msra.mxu1 %v30627_v46  ;;  %24071 = vmatprep.mubr.msk.bf16.mxu1 %vm25474_vm2, %v33365_v21  ;;  %v10918_v42 = vpop.f32.mrf.mxu0 }
 0x577   : > { %v23673_v63 = vpop.f32.mrf.mxu1  ;;  %24069 = vmatprep.subr.bf16.mxu1 %v33365_v21  ;;  %v30747_v62 = vadd.f32 %v10918_v42, %v30548_v1 }
 0x578   : > { %24046 = vmatpush3.bf16.msra.mxu0 %v30651_v51  ;;  %v23650_v35 = vpop.f32.mrf.mxu0 }
 0x579   : > { %v11103_v48 = vpop.f32.mrf.mxu1  ;;  %24059 = vmatprep.subr.bf16.mxu0 %v33365_v21 }
 0x57a   : > { %v30750_v2 = vadd.f32 %v11103_v48, %v30661_v54  ;;  %24070 = vmatpush3.bf16.msra.mxu1 %v30651_v51  ;;  %v11050_v1 = vpop.f32.mrf.mxu0  ;;  %v30776_v54 = vld [vmem:[%s33023_s3 + $0xf0] sm:$0xff]  }
 0x57b   : > { %v23674_v14 = vpop.f32.mrf.mxu1  ;;  %24083 = vmatprep.subr.bf16.mxu1 %v33365_v21  ;;  %24048 = vmatmul.mubr.msk.bf16.vlgmr.msra.gmra.mxu0 %vm7101_vm10, %v29118_v37  ;;  %v30766_v0 = vadd.f32 %v11050_v1, %v30568_v15 }
 0x57c   : > { %24060 = vmatpush3.bf16.msra.mxu0 %v30627_v46  ;;  %v23665_v53 = vpop.f32.mrf.mxu0  ;;  %24063 = vmatprep.mubr.msk.bf16.mxu0 %vm25474_vm2, %v33365_v21 }
 0x57d   : > { %v11200_v38 = vpop.f32.mrf.mxu1  ;;  %24072 = vmatmul.mubr.msk.bf16.vlgmr.msra.gmra.mxu1 %vm7101_vm10, %v33578_v59  ;;  %24061 = vmatprep.subr.bf16.mxu0 %v33365_v21 }
 0x57e   : > { %v30769_v49 = vadd.f32 %v11200_v38, %v30677_v19  ;;  %24084 = vmatpush3.bf16.msra.mxu1 %v30757_v24  ;;  %24087 = vmatprep.mubr.msk.bf16.mxu1 %vm25474_vm2, %v33365_v21  ;;  %v11053_v59 = vpop.f32.mrf.mxu0 }
 0x57f   : > { %v23689_v37 = vpop.f32.mrf.mxu1  ;;  %24085 = vmatprep.subr.bf16.mxu1 %v33365_v21  ;;  %v30785_v45 = vadd.f32 %v11053_v59, %v30584_v44 }
 0x580   : > { %24062 = vmatpush3.bf16.msra.mxu0 %v30651_v51  ;;  %v23666_v57 = vpop.f32.mrf.mxu0 }
 0x581   : > { %v11203_v15 = vpop.f32.mrf.mxu1  ;;  %24075 = vmatprep.subr.bf16.mxu0 %v33365_v21 }
 0x582   : > { %v30788_v22 = vadd.f32 %v11203_v15, %v30691_v16  ;;  %24086 = vmatpush3.bf16.msra.mxu1 %v30776_v54  ;;  %v11150_v30 = vpop.f32.mrf.mxu0 }
 0x583   : > { %v23690_v19 = vpop.f32.mrf.mxu1  ;;  %24099 = vmatprep.subr.bf16.mxu1 %v33365_v21  ;;  %24064 = vmatmul.mubr.msk.bf16.vlgmr.msra.gmra.mxu0 %vm7101_vm10, %v29128_v56  ;;  %v30799_v44 = vadd.f32 %v11150_v30, %v30604_v6 }
 0x584   : > { %24076 = vmatpush3.bf16.msra.mxu0 %v30627_v46  ;;  %v23681_v26 = vpop.f32.mrf.mxu0  ;;  %24079 = vmatprep.mubr.msk.bf16.mxu0 %vm25474_vm2, %v33365_v21 }
 0x585   : > { %v11300_v7 = vpop.f32.mrf.mxu1  ;;  %24088 = vmatmul.mubr.msk.bf16.vlgmr.msra.gmra.mxu1 %vm7101_vm10, %v30553_v23  ;;  %24077 = vmatprep.subr.bf16.mxu0 %v33365_v21 }
 0x586   : > { %v30802_v60 = vadd.f32 %v11300_v7, %v30705_v28  ;;  %24100 = vmatpush3.bf16.msra.mxu1 %v30757_v24  ;;  %24103 = vmatprep.mubr.msk.bf16.mxu1 %vm25474_vm2, %v33365_v21  ;;  %v11153_v56 = vpop.f32.mrf.mxu0  ;;  %v33579_v28 = vld [vmem:[#allocation75_spill] sm:$0xff] }
 0x587   : > { %v23705_v16 = vpop.f32.mrf.mxu1  ;;  %24101 = vmatprep.subr.bf16.mxu1 %v33365_v21  ;;  %v30813_v6 = vadd.f32 %v11153_v56, %v30620_v4 }
 0x588   : > { %24078 = vmatpush3.bf16.msra.mxu0 %v30651_v51  ;;  %v23682_v18 = vpop.f32.mrf.mxu0 }
 0x589   : > { %v11303_v23 = vpop.f32.mrf.mxu1  ;;  %24091 = vmatprep.subr.bf16.mxu0 %v33365_v21 }
 0x58a   : > { %v30816_v46 = vadd.f32 %v11303_v23, %v30719_v61  ;;  %24102 = vmatpush3.bf16.msra.mxu1 %v30776_v54  ;;  %v11250_v9 = vpop.f32.mrf.mxu0 }
 0x58b   : > { %v23706_v17 = vpop.f32.mrf.mxu1  ;;  %24115 = vmatprep.subr.bf16.mxu1 %v33365_v21  ;;  %24080 = vmatmul.mubr.msk.bf16.vlgmr.msra.gmra.mxu0 %vm7101_vm10, %v33579_v28  ;;  %v30827_v4 = vadd.f32 %v11250_v9, %v30644_v5 }
 0x58c   : > { %24092 = vmatpush3.bf16.msra.mxu0 %v30757_v24  ;;  %v23697_v58 = vpop.f32.mrf.mxu0  ;;  %24095 = vmatprep.mubr.msk.bf16.mxu0 %vm25474_vm2, %v33365_v21 }
 0x58d   : > { %v11400_v40 = vpop.f32.mrf.mxu1  ;;  %24104 = vmatmul.mubr.msk.bf16.vlgmr.msra.gmra.mxu1 %vm7101_vm10, %v30589_v39  ;;  %24093 = vmatprep.subr.bf16.mxu0 %v33365_v21 }
 0x58e   : > { %v30830_v51 = vadd.f32 %v11400_v40, %v30733_v52  ;;  %24116 = vmatpush3.bf16.msra.mxu1 %v30757_v24  ;;  %24119 = vmatprep.mubr.msk.bf16.mxu1 %vm25474_vm2, %v33365_v21  ;;  %v11253_v39 = vpop.f32.mrf.mxu0 }
 0x58f   : > { %v23721_v3 = vpop.f32.mrf.mxu1  ;;  %24117 = vmatprep.subr.bf16.mxu1 %v33365_v21  ;;  %v30841_v20 = vadd.f32 %v11253_v39, %v30664_v33 }
 0x590   : > { %24094 = vmatpush3.bf16.msra.mxu0 %v30776_v54  ;;  %v23698_v61 = vpop.f32.mrf.mxu0 }
 0x591   : > { %v11403_v5 = vpop.f32.mrf.mxu1  ;;  %24107 = vmatprep.subr.bf16.mxu0 %v33365_v21 }
 0x592   : > { %v30844_v32 = vadd.f32 %v11403_v5, %v30747_v62  ;;  %24118 = vmatpush3.bf16.msra.mxu1 %v30776_v54  ;;  %v11350_v34 = vpop.f32.mrf.mxu0  ;;  %v13915_v62 = vshll.u32 %v33579_v28, 16 }
 0x593   : > { %v23722_v43 = vpop.f32.mrf.mxu1  ;;  %24131 = vmatprep.subr.bf16.mxu1 %v33365_v21  ;;  %24096 = vmatmul.mubr.msk.bf16.vlgmr.msra.gmra.mxu0 %vm7101_vm10, %v30519_v25  ;;  %v30855_v33 = vadd.f32 %v11350_v34, %v30680_v47 }
 0x594   : > { %24108 = vmatpush3.bf16.msra.mxu0 %v30757_v24  ;;  %v23713_v52 = vpop.f32.mrf.mxu0  ;;  %24111 = vmatprep.mubr.msk.bf16.mxu0 %vm25474_vm2, %v33365_v21  ;;  %v13917_v53 = vrot.slane %v13915_v62, 1 }
 0x595   : > { %v11517_v13 = vpop.f32.mrf.mxu1  ;;  %24120 = vmatmul.mubr.msk.bf16.vlgmr.msra.gmra.mxu1 %vm7101_vm10, %v30630_v31  ;;  %24109 = vmatprep.subr.bf16.mxu0 %v33365_v21 }
 0x596   : > { %v30858_v10 = vadd.f32 %v11517_v13, %v30766_v0  ;;  %24132 = vmatpush3.bf16.msra.mxu1 %v30757_v24  ;;  %24135 = vmatprep.mubr.msk.bf16.mxu1 %vm25474_vm2, %v33365_v21  ;;  %v11353_v25 = vpop.f32.mrf.mxu0 }
 0x597   : > { %v23737_v55 = vpop.f32.mrf.mxu1  ;;  %24133 = vmatprep.subr.bf16.mxu1 %v33365_v21  ;;  %v30869_v47 = vadd.f32 %v11353_v25, %v30694_v50 }
 0x598   : > { %24110 = vmatpush3.bf16.msra.mxu0 %v30776_v54  ;;  %v23714_v42 = vpop.f32.mrf.mxu0 }
 0x599   : > { %v11520_v31 = vpop.f32.mrf.mxu1  ;;  %24123 = vmatprep.subr.bf16.mxu0 %v33365_v21 }
 0x59a   : > { %v30872_v63 = vadd.f32 %v11520_v31, %v30785_v45  ;;  %24134 = vmatpush3.bf16.msra.mxu1 %v30776_v54  ;;  %v11476_v35 = vpop.f32.mrf.mxu0 }
 0x59b   : > { %v23738_v48 = vpop.f32.mrf.mxu1  ;;  %24147 = vmatprep.subr.bf16.mxu1 %v33365_v21  ;;  %24112 = vmatmul.mubr.msk.bf16.vlgmr.msra.gmra.mxu0 %vm7101_vm10, %v30555_v36  ;;  %v11814_v50 = vadd.f32 %v11476_v35, %v30708_v27  ;;  %v13913_v27 = vshrl.u32 %v33579_v28, 16 }
 0x59c   : > { %24124 = vmatpush3.bf16.msra.mxu0 %v30757_v24  ;;  %v23729_v38 = vpop.f32.mrf.mxu0  ;;  %24127 = vmatprep.mubr.msk.bf16.mxu0 %vm25474_vm2, %v33365_v21 }
 0x59d   : > { %v11599_v14 = vpop.f32.mrf.mxu1  ;;  %24136 = vmatmul.mubr.msk.bf16.vlgmr.msra.gmra.mxu1 %vm7101_vm10, %v30669_v8  ;;  %24125 = vmatprep.subr.bf16.mxu0 %v33365_v21  ;;  %v13918_v57 = vor.u32 %v13917_v53, %v13913_v27 }
 0x59e   : > { %v30885_v1 = vadd.f32 %v11599_v14, %v30799_v44  ;;  %24148 = vmatpush3.bf16.msra.mxu1 %v30757_v24  ;;  %24151 = vmatprep.mubr.msk.bf16.mxu1 %vm25474_vm2, %v33365_v21  ;;  %v11479_v36 = vpop.f32.mrf.mxu0 }
 0x59f   : > { %v23753_v0 = vpop.f32.mrf.mxu1  ;;  %24149 = vmatprep.subr.bf16.mxu1 %v33365_v21  ;;  %v11815_v37 = vadd.f32 %v11479_v36, %v30722_v11 }
 0x5a0   : > { %24126 = vmatpush3.bf16.msra.mxu0 %v30776_v54  ;;  %v23730_v15 = vpop.f32.mrf.mxu0 }
 0x5a1   : > { %v11602_v8 = vpop.f32.mrf.mxu1  ;;  %24139 = vmatprep.subr.bf16.mxu0 %v33365_v21 }
 0x5a2   : > { %v30898_v59 = vadd.f32 %v11602_v8, %v30813_v6  ;;  %24150 = vmatpush3.bf16.msra.mxu1 %v30776_v54  ;;  %v11558_v19 = vpop.f32.mrf.mxu0 }
 0x5a3   : > { %v23754_v45 = vpop.f32.mrf.mxu1  ;;  %24167 = vmatprep.subr.bf16.mxu1 %v33365_v21  ;;  %24128 = vmatmul.mubr.msk.bf16.vlgmr.msra.gmra.mxu0 %vm7101_vm10, %v30591_v12  ;;  %v11818_v11 = vadd.f32 %v11558_v19, %v30736_v29 }
 0x5a4   : > { %24140 = vmatpush3.bf16.msra.mxu0 %v30757_v24  ;;  %24143 = vmatprep.mubr.msk.bf16.mxu0 %vm25474_vm2, %v33365_v21  ;;  %v23745_v44 = vpop.f32.mrf.mxu0 }
 0x5a5   : > { %v11681_v30 = vpop.f32.mrf.mxu1  ;;  %24152 = vmatmul.mubr.msk.bf16.vlgmr.msra.gmra.mxu1 %vm7101_vm10, %v13918_v57  ;;  %24141 = vmatprep.subr.bf16.mxu0 %v33365_v21 }
 0x5a6   : > { %v30909_v7 = vadd.f32 %v11681_v30, %v30827_v4  ;;  %24175 = vmatprep.mubr.msk.bf16.mxu1 %vm25474_vm2, %v33365_v21  ;;  %v11561_v12 = vpop.f32.mrf.mxu0 }
 0x5a7   : > { %v23769_v26 = vpop.f32.mrf.mxu1  ;;  %v11819_v56 = vadd.f32 %v11561_v12, %v30750_v2 }
 0x5a8   : > { %24142 = vmatpush3.bf16.msra.mxu0 %v30776_v54  ;;  %v23746_v24 = vpop.f32.mrf.mxu0 }
 0x5a9   : > { %v11684_v16 = vpop.f32.mrf.mxu1  ;;  %24155 = vmatprep.subr.bf16.mxu0 %v33365_v21 }
 0x5aa   : > { %v30919_v29 = vadd.f32 %v11684_v16, %v30841_v20  ;;  %v11640_v6 = vpop.f32.mrf.mxu0 }
 0x5ab   : > { %v23770_v23 = vpop.f32.mrf.mxu1  ;;  %24144 = vmatmul.mubr.msk.bf16.vlgmr.msra.gmra.mxu0 %vm7101_vm10, %v30632_v41  ;;  %v11822_v17 = vadd.f32 %v11640_v6, %v30769_v49 }
 0x5ac   : > { %24163 = vmatprep.mubr.msk.bf16.mxu0 %vm25474_vm2, %v33365_v21  ;;  %v23761_v2 = vpop.f32.mrf.mxu0 }
 0x5ad   : > { %v11763_v18 = vpop.f32.mrf.mxu1 }
 0x5ae   : > { %v30927_v9 = vadd.f32 %v11763_v18, %v30855_v33  ;;  %v11643_v54 = vpop.f32.mrf.mxu0 }
 0x5af   : > { %v23785_v40 = vpop.f32.mrf.mxu1  ;;  %v11823_v4 = vadd.f32 %v11643_v54, %v30788_v22 }
 0x5b0   : > { %v23762_v3 = vpop.f32.mrf.mxu0 }
 0x5b1   : > { %v11766_v28 = vpop.f32.mrf.mxu1 }
 0x5b2   : > { %v30933_v58 = vadd.f32 %v11766_v28, %v30869_v47  ;;  %v11722_v41 = vpop.f32.mrf.mxu0 }
 0x5b3   : > { %v23786_v39 = vpop.f32.mrf.mxu1  ;;  %v11826_v49 = vadd.f32 %v11722_v41, %v30802_v60 }
 0x5b4   : > { %v23777_v61 = vpop.f32.mrf.mxu0 }
 0x5b5   : > { %v11883_v5 = vpop.f32.mrf.mxu1  ;;  %v30992_v61 = vld [vmem:[%s33025_s5 + $0x20] sm:$0xff]  }
 0x5b6   : > { %v30936_v20 = vadd.f32 %v11883_v5, %v11814_v50  ;;  %v11725_v34 = vpop.f32.mrf.mxu0 }
 0x5b7   : > { %v23801_v43 = vpop.f32.mrf.mxu1  ;;  %v11827_v33 = vadd.f32 %v11725_v34, %v30816_v46 }
 0x5b8   : > { %v23778_v22 = vpop.f32.mrf.mxu0 }
 0x5b9   : > { %v11886_v13 = vpop.f32.mrf.mxu1 }
 0x5ba   : > { %v30939_v52 = vadd.f32 %v11886_v13, %v11815_v37  ;;  %v11807_v25 = vpop.f32.mrf.mxu0 }
 0x5bb   : > { %v23802_v55 = vpop.f32.mrf.mxu1  ;;  %v11830_v47 = vadd.f32 %v11807_v25, %v30830_v51 }
 0x5bc   : > { %v23793_v48 = vpop.f32.mrf.mxu0 }
 0x5bd   : > { %v11965_v31 = vpop.f32.mrf.mxu1 }
 0x5be   : > { %v30942_v42 = vadd.f32 %v11965_v31, %v11818_v11  ;;  %v11810_v62 = vpop.f32.mrf.mxu0 }
 0x5bf   : > { %v23817_v60 = vpop.f32.mrf.mxu1  ;;  %v11831_v14 = vadd.f32 %v11810_v62, %v30844_v32  ;;  %v30956_v32 = vld [vmem:[%s33025_s5 + $0x38] sm:$0xff]  }
 0x5c0   : > { %v23794_v38 = vpop.f32.mrf.mxu0  ;;  %24156 = vmatpush3.bf16.msra.mxu0 %v30956_v32  ;;  %24168 = vmatpush3.bf16.msra.mxu1 %v30956_v32 }
 0x5c1   : > { %v11968_v35 = vpop.f32.mrf.mxu1  ;;  %24157 = vmatprep.subr.bf16.mxu0 %v33365_v21  ;;  %24169 = vmatprep.subr.bf16.mxu1 %v33365_v21 }
 0x5c2   : > { %v30945_v50 = vadd.f32 %v11968_v35, %v11819_v56  ;;  %v11924_v0 = vpop.f32.mrf.mxu0 }
 0x5c3   : > { %v23818_v46 = vpop.f32.mrf.mxu1  ;;  %v12229_v36 = vadd.f32 %v11924_v0, %v30858_v10 }
 0x5c4   : > { %v23809_v27 = vpop.f32.mrf.mxu0 }
 0x5c5   : > { %v12047_v53 = vpop.f32.mrf.mxu1 }
 0x5c6   : > { %v30948_v8 = vadd.f32 %v12047_v53, %v11822_v17  ;;  %v11927_v37 = vpop.f32.mrf.mxu0 }
 0x5c7   : > { %v23833_v51 = vpop.f32.mrf.mxu1  ;;  %v12230_v45 = vadd.f32 %v11927_v37, %v30872_v63 }
 0x5c8   : > { %v23810_v19 = vpop.f32.mrf.mxu0 }
 0x5c9   : > { %v12050_v15 = vpop.f32.mrf.mxu1 }
 0x5ca   : > { %v30951_v57 = vadd.f32 %v12050_v15, %v11823_v4  ;;  %v12006_v10 = vpop.f32.mrf.mxu0 }
 0x5cb   : > { %v23834_v30 = vpop.f32.mrf.mxu1  ;;  %v12233_v63 = vadd.f32 %v12006_v10, %v30885_v1  ;;  %v30974_v1 = vld [vmem:[%s33025_s5 + $0x30] sm:$0xff]  }
 0x5cc   : > { %v23825_v26 = vpop.f32.mrf.mxu0  ;;  %24158 = vmatpush3.bf16.msra.mxu0 %v30974_v1  ;;  %24170 = vmatpush3.bf16.msra.mxu1 %v30974_v1 }
 0x5cd   : > { %v12129_v11 = vpop.f32.mrf.mxu1  ;;  %24159 = vmatprep.subr.bf16.mxu0 %v33365_v21  ;;  %24171 = vmatprep.subr.bf16.mxu1 %v33365_v21 }
 0x5ce   : > { %v30963_v44 = vadd.f32 %v12129_v11, %v11826_v49  ;;  %v12009_v16 = vpop.f32.mrf.mxu0 }
 0x5cf   : > { %v23849_v12 = vpop.f32.mrf.mxu1  ;;  %v12234_v24 = vadd.f32 %v12009_v16, %v30898_v59  ;;  %v30980_v59 = vld [vmem:[%s33025_s5 + $0x28] sm:$0xff]  }
 0x5d0   : > { %v23826_v6 = vpop.f32.mrf.mxu0  ;;  %24160 = vmatpush3.bf16.msra.mxu0 %v30980_v59  ;;  %24172 = vmatpush3.bf16.msra.mxu1 %v30980_v59 }
 0x5d1   : > { %v12132_v56 = vpop.f32.mrf.mxu1  ;;  %24161 = vmatprep.subr.bf16.mxu0 %v33365_v21  ;;  %24173 = vmatprep.subr.bf16.mxu1 %v33365_v21 }
 0x5d2   : > { %v30966_v23 = vadd.f32 %v12132_v56, %v11827_v33  ;;  %v12088_v17 = vpop.f32.mrf.mxu0 }
 0x5d3   : > { %v23850_v18 = vpop.f32.mrf.mxu1  ;;  %v12237_v40 = vadd.f32 %v12088_v17, %v30909_v7 }
 0x5d4   : > { %v23841_v28 = vpop.f32.mrf.mxu0  ;;  %24162 = vmatpush3.bf16.msra.mxu0 %v30992_v61  ;;  %24174 = vmatpush3.bf16.msra.mxu1 %v30992_v61 }
 0x5d5   : > { %v12220_v2 = vpop.f32.mrf.mxu1  ;;  %24179 = vmatprep.subr.bf16.mxu0 %v33365_v21  ;;  %24191 = vmatprep.subr.bf16.mxu1 %v33365_v21 }
 0x5d6   : > { %v30969_v54 = vadd.f32 %v12220_v2, %v11830_v47  ;;  %v12091_v3 = vpop.f32.mrf.mxu0 }
 0x5d7   : > { %v23865_v4 = vpop.f32.mrf.mxu1  ;;  %v12238_v39 = vadd.f32 %v12091_v3, %v30919_v29 }
 0x5d8   : > { %v23842_v5 = vpop.f32.mrf.mxu0 }
 0x5d9   : > { %v12223_v7 = vpop.f32.mrf.mxu1 }
 0x5da   : > { %v30986_v41 = vadd.f32 %v12223_v7, %v11831_v14  ;;  %v12170_v43 = vpop.f32.mrf.mxu0 }
 0x5db   : > { %v23866_v49 = vpop.f32.mrf.mxu1  ;;  %v12241_v29 = vadd.f32 %v12170_v43, %v30927_v9 }
 0x5dc   : > { %v23857_v33 = vpop.f32.mrf.mxu0 }
 0x5dd   : > { %v12343_v34 = vpop.f32.mrf.mxu1 }
 0x5de   : > { %v30998_v13 = vadd.f32 %v12343_v34, %v12229_v36  ;;  %v12173_v55 = vpop.f32.mrf.mxu0 }
 0x5df   : > { %v23881_v22 = vpop.f32.mrf.mxu1  ;;  %v12242_v31 = vadd.f32 %v12173_v55, %v30933_v58 }
 0x5e0   : > { %v23858_v48 = vpop.f32.mrf.mxu0 }
 0x5e1   : > { %v12346_v25 = vpop.f32.mrf.mxu1 }
 0x5e2   : > { %v31005_v47 = vadd.f32 %v12346_v25, %v12230_v45  ;;  %v12299_v60 = vpop.f32.mrf.mxu0 }
 0x5e3   : > { %v23882_v9 = vpop.f32.mrf.mxu1  ;;  %v12658_v35 = vadd.f32 %v12299_v60, %v30936_v20 }
 0x5e4   : > { %v23873_v38 = vpop.f32.mrf.mxu0 }
 0x5e5   : > { %v12431_v62 = vpop.f32.mrf.mxu1 }
 0x5e6   : > { %v31008_v14 = vadd.f32 %v12431_v62, %v12233_v63  ;;  %v12302_v0 = vpop.f32.mrf.mxu0 }
 0x5e7   : > { %v23897_v46 = vpop.f32.mrf.mxu1  ;;  %v12659_v36 = vadd.f32 %v12302_v0, %v30939_v52 }
 0x5e8   : > { %v23874_v51 = vpop.f32.mrf.mxu0 }
 0x5e9   : > { %v12434_v53 = vpop.f32.mrf.mxu1 }
 0x5ea   : > { %v31011_v27 = vadd.f32 %v12434_v53, %v12234_v24  ;;  %v12387_v37 = vpop.f32.mrf.mxu0 }
 0x5eb   : > { %v23898_v58 = vpop.f32.mrf.mxu1  ;;  %v12662_v45 = vadd.f32 %v12387_v37, %v30942_v42 }
 0x5ec   : > { %v23889_v30 = vpop.f32.mrf.mxu0 }
 0x5ed   : > { %v12519_v15 = vpop.f32.mrf.mxu1 }
 0x5ee   : > { %v31014_v19 = vadd.f32 %v12519_v15, %v12237_v40  ;;  %v12390_v10 = vpop.f32.mrf.mxu0 }
 0x5ef   : > { %v23913_v20 = vpop.f32.mrf.mxu1  ;;  %v12663_v63 = vadd.f32 %v12390_v10, %v30945_v50 }
 0x5f0   : > { %v23890_v12 = vpop.f32.mrf.mxu0 }
 0x5f1   : > { %v12522_v11 = vpop.f32.mrf.mxu1 }
 0x5f2   : > { %v31017_v26 = vadd.f32 %v12522_v11, %v12238_v39  ;;  %v12475_v16 = vpop.f32.mrf.mxu0 }
 0x5f3   : > { %v23914_v52 = vpop.f32.mrf.mxu1  ;;  %v12666_v24 = vadd.f32 %v12475_v16, %v30948_v8 }
 0x5f4   : > { %v23905_v18 = vpop.f32.mrf.mxu0 }
 0x5f5   : > { %v12607_v56 = vpop.f32.mrf.mxu1 }
 0x5f6   : > { %v31020_v6 = vadd.f32 %v12607_v56, %v12241_v29  ;;  %v12478_v17 = vpop.f32.mrf.mxu0 }
 0x5f7   : > { %v23929_v42 = vpop.f32.mrf.mxu1  ;;  %v12667_v40 = vadd.f32 %v12478_v17, %v30951_v57 }
 0x5f8   : > { %v23906_v4 = vpop.f32.mrf.mxu0 }
 0x5f9   : > { %v12610_v2 = vpop.f32.mrf.mxu1 }
 0x5fa   : > { %v31023_v28 = vadd.f32 %v12610_v2, %v12242_v31  ;;  %v12563_v3 = vpop.f32.mrf.mxu0 }
 0x5fb   : > { %v23930_v50 = vpop.f32.mrf.mxu1  ;;  %v12670_v39 = vadd.f32 %v12563_v3, %v30963_v44 }
 0x5fc   : > { %v23921_v49 = vpop.f32.mrf.mxu0 }
 0x5fd   : > { %v12736_v7 = vpop.f32.mrf.mxu1 }
 0x5fe   : > { %v31026_v5 = vadd.f32 %v12736_v7, %v12658_v35  ;;  %v12566_v43 = vpop.f32.mrf.mxu0 }
 0x5ff   : > { %v23945_v8 = vpop.f32.mrf.mxu1  ;;  %v12671_v29 = vadd.f32 %v12566_v43, %v30966_v23 }
 0x600   : > { %v23922_v22 = vpop.f32.mrf.mxu0 }
 0x601   : > { %v12739_v34 = vpop.f32.mrf.mxu1 }
 0x602   : > { %v31029_v33 = vadd.f32 %v12739_v34, %v12659_v36 }
 0x603   : > { %v23946_v57 = vpop.f32.mrf.mxu1  ;;  %v12651_v55 = vpop.f32.mrf.mxu0 }
 0x604   : > { %v12674_v31 = vadd.f32 %v12651_v55, %v30969_v54 }
 0x605   : > { %v12836_v25 = vpop.f32.mrf.mxu1  ;;  %v23937_v9 = vpop.f32.mrf.mxu0 }
 0x606   : > { %v31032_v48 = vadd.f32 %v12836_v25, %v12662_v45 }
 0x607   : > { %v23961_v44 = vpop.f32.mrf.mxu1  ;;  %v12654_v60 = vpop.f32.mrf.mxu0 }
 0x608   : > { %v12675_v35 = vadd.f32 %v12654_v60, %v30986_v41 }
 0x609   : > { %v12839_v62 = vpop.f32.mrf.mxu1  ;;  %v23938_v46 = vpop.f32.mrf.mxu0 }
 0x60a   : > { %v31035_v38 = vadd.f32 %v12839_v62, %v12663_v63 }
 0x60b   : > { %v23962_v23 = vpop.f32.mrf.mxu1  ;;  %v12786_v0 = vpop.f32.mrf.mxu0 }
 0x60c   : > { %v31038_v36 = vadd.f32 %v12786_v0, %v30998_v13 }
 0x60d   : > { %v12936_v53 = vpop.f32.mrf.mxu1  ;;  %v23953_v54 = vpop.f32.mrf.mxu0 }
 0x60e   : > { %v31040_v51 = vadd.f32 %v12936_v53, %v12666_v24 }
 0x60f   : > { %v23977_v58 = vpop.f32.mrf.mxu1  ;;  %v12789_v37 = vpop.f32.mrf.mxu0 }
 0x610   : > { %v31043_v45 = vadd.f32 %v12789_v37, %v31005_v47 }
 0x611   : > { %v12939_v15 = vpop.f32.mrf.mxu1  ;;  %v23954_v41 = vpop.f32.mrf.mxu0 }
 0x612   : > { %v31045_v30 = vadd.f32 %v12939_v15, %v12667_v40 }
 0x613   : > { %v23978_v20 = vpop.f32.mrf.mxu1  ;;  %v12886_v10 = vpop.f32.mrf.mxu0 }
 0x614   : > { %v31048_v63 = vadd.f32 %v12886_v10, %v31008_v14 }
 0x615   : > { %v13036_v11 = vpop.f32.mrf.mxu1  ;;  %v23969_v12 = vpop.f32.mrf.mxu0 }
 0x616   : > { %v31050_v13 = vadd.f32 %v13036_v11, %v12670_v39 }
 0x617   : > { %v23993_v52 = vpop.f32.mrf.mxu1  ;;  %v12889_v16 = vpop.f32.mrf.mxu0 }
 0x618   : > { %v31053_v24 = vadd.f32 %v12889_v16, %v31011_v27 }
 0x619   : > { %v13039_v56 = vpop.f32.mrf.mxu1  ;;  %v23970_v18 = vpop.f32.mrf.mxu0 }
 0x61a   : > { %v31055_v47 = vadd.f32 %v13039_v56, %v12671_v29 }
 0x61b   : > { %v23994_v42 = vpop.f32.mrf.mxu1  ;;  %v12986_v17 = vpop.f32.mrf.mxu0 }
 0x61c   : > { %v13153_v40 = vadd.f32 %v12986_v17, %v31014_v19 }
 0x61d   : > { %v13136_v2 = vpop.f32.mrf.mxu1  ;;  %v23985_v14 = vpop.f32.mrf.mxu0 }
 0x61e   : > { %v31058_v4 = vadd.f32 %v13136_v2, %v12674_v31 }
 0x61f   : > { %v24009_v50 = vpop.f32.mrf.mxu1  ;;  %v12989_v3 = vpop.f32.mrf.mxu0 }
 0x620   : > { %v31061_v39 = vadd.f32 %v12989_v3, %v31017_v26 }
 0x621   : > { %v13139_v7 = vpop.f32.mrf.mxu1  ;;  %v23986_v27 = vpop.f32.mrf.mxu0 }
 0x622   : > { %v31063_v49 = vadd.f32 %v13139_v7, %v12675_v35  ;;  %v31089_v7 = vld [vmem:[%s33024_s4] ss:$0 sm:$0xff] }
 0x623   : > { %v24010_v8 = vpop.f32.mrf.mxu1  ;;  %v13086_v43 = vpop.f32.mrf.mxu0 }
 0x624   : > { %v13157_v29 = vadd.f32 %v13086_v43, %v31020_v6 }
 0x625   : > { %v31065_v34 = vpop.f32.mrf.mxu1  ;;  %v24001_v22 = vpop.f32.mrf.mxu0 }
 0x627   : > { %v24025_v19 = vpop.f32.mrf.mxu1  ;;  %v13089_v57 = vpop.f32.mrf.mxu0 }
 0x628   : > { %v13158_v25 = vadd.f32 %v13089_v57, %v31023_v28 }
 0x629   : > { %v31068_v55 = vpop.f32.mrf.mxu1  ;;  %v24002_v31 = vpop.f32.mrf.mxu0 }
 0x62b   : > { %v24026_v9 = vpop.f32.mrf.mxu1  ;;  %v13212_v26 = vpop.f32.mrf.mxu0 }
 0x62d   : > { %v31071_v44 = vpop.f32.mrf.mxu1  ;;  %v24017_v60 = vpop.f32.mrf.mxu0 }
 0x62f   : > { %v24041_v62 = vpop.f32.mrf.mxu1  ;;  %v13215_v35 = vpop.f32.mrf.mxu0 }
 0x630   : > { %v13551_v43 = vadd.f32 %v13215_v35, %v31029_v33 }
 0x631   : > { %v31073_v46 = vpop.f32.mrf.mxu1  ;;  %v24018_v23 = vpop.f32.mrf.mxu0 }
 0x633   : > { %v24042_v0 = vpop.f32.mrf.mxu1  ;;  %v13294_v6 = vpop.f32.mrf.mxu0 }
 0x634   : > { %v13554_v9 = vadd.f32 %v13294_v6, %v31032_v48 }
 0x635   : > { %v13417_v53 = vpop.f32.mrf.mxu1  ;;  %v24033_v58 = vpop.f32.mrf.mxu0 }
 0x636   : > { %v31075_v54 = vadd.f32 %v13417_v53, %v13153_v40  ;;  %v13550_v40 = vadd.f32 %v13212_v26, %v31026_v5 }
 0x637   : > { %v24057_v37 = vpop.f32.mrf.mxu1  ;;  %v13297_v15 = vpop.f32.mrf.mxu0 }
 0x638   : > { %v13555_v37 = vadd.f32 %v13297_v15, %v31035_v38 }
 0x639   : > { %v31077_v28 = vpop.f32.mrf.mxu1  ;;  %v24034_v41 = vpop.f32.mrf.mxu0 }
 0x63b   : > { %v24058_v20 = vpop.f32.mrf.mxu1  ;;  %v13376_v10 = vpop.f32.mrf.mxu0 }
 0x63d   : > { %v13499_v11 = vpop.f32.mrf.mxu1  ;;  %v24049_v52 = vpop.f32.mrf.mxu0 }
 0x63e   : > { %v31079_v12 = vadd.f32 %v13499_v11, %v13157_v29 }
 0x63f   : > { %v24073_v16 = vpop.f32.mrf.mxu1  ;;  %v13379_v56 = vpop.f32.mrf.mxu0 }
 0x641   : > { %v13502_v18 = vpop.f32.mrf.mxu1  ;;  %v24050_v17 = vpop.f32.mrf.mxu0 }
 0x642   : > { %v31081_v42 = vadd.f32 %v13502_v18, %v13158_v25  ;;  %v13552_v18 = vadd.f32 %v31065_v34, %v31038_v36  ;;  %v13558_v17 = vadd.f32 %v13376_v10, %v31040_v51  ;;  %v13559_v36 = vadd.f32 %v13379_v56, %v31045_v30 }
 0x643   : > { %v24074_v2 = vpop.f32.mrf.mxu1  ;;  %v31084_v14 = vpop.f32.mrf.mxu0 }
 0x645   : > { %v13619_v50 = vpop.f32.mrf.mxu1  ;;  %v24065_v27 = vpop.f32.mrf.mxu0 }
 0x646   : > { %v13963_v3 = vadd.f32 %v13619_v50, %v13550_v40 }
 0x647   : > { %v24089_v8 = vpop.f32.mrf.mxu1  ;;  %v31092_v29 = vpop.f32.mrf.mxu0 }
 0x648   : > { %v13988_v19 = vadd.f32 %v31089_v7, %v13963_v3 }
 0x649   : > { %v13622_v22 = vpop.f32.mrf.mxu1  ;;  %v24066_v5 = vpop.f32.mrf.mxu0 }
 0x64a   : > { %v13964_v57 = vadd.f32 %v13622_v22, %v13551_v43  ;;  %v14006_v62 = vmax.f32 %v13988_v19, 0.0 }
 0x64b   : > { %v24090_v25 = vpop.f32.mrf.mxu1  ;;  %v13543_v26 = vpop.f32.mrf.mxu0 }
 0x64c   : > { %v13989_v31 = vadd.f32 %v31089_v7, %v13964_v57  ;;  %v31098_v0 = vadd.f32 %v13543_v26, %v31058_v4  ;;  %v13553_v57 = vadd.f32 %v31068_v55, %v31043_v45  ;;  %v13556_v26 = vadd.f32 %v31071_v44, %v31048_v63 }
 0x64d   : > { %v13701_v60 = vpop.f32.mrf.mxu1  ;;  %v24081_v35 = vpop.f32.mrf.mxu0 }
 0x64e   : > { %v14007_v23 = vmax.f32 %v13989_v31, 0.0  ;;  %v13967_v33 = vadd.f32 %v13701_v60, %v13554_v9  ;;  %v13562_v60 = vadd.f32 %v31084_v14, %v31050_v13  ;;  %v13557_v13 = vadd.f32 %v31073_v46, %v31053_v24 }
 0x64f   : > { %v24105_v53 = vpop.f32.mrf.mxu1  ;;  %v13546_v41 = vpop.f32.mrf.mxu0  ;;  %v13563_v14 = vadd.f32 %v31092_v29, %v31055_v47 }
 0x650   : > { %v31100_v58 = vpack.c.bf16 %v14007_v23, %v14006_v62  ;;  %v13992_v48 = vadd.f32 %v31089_v7, %v13967_v33  ;;  %v31106_v6 = vadd.f32 %v13546_v41, %v31063_v49 }
 0x651   : > { %v13704_v20 = vpop.f32.mrf.mxu1  ;;  %v24082_v16 = vpop.f32.mrf.mxu0 }
 0x652   : > { %v14053_v11 = vshll.u32 %v31100_v58, 16  ;;  %v13968_v52 = vadd.f32 %v13704_v20, %v13555_v37  ;;  %v14051_v2 = vshrl.u32 %v31100_v58, 16  ;;  %v14010_v49 = vmax.f32 %v13992_v48, 0.0 }
 0x653   : > { %v24106_v4 = vpop.f32.mrf.mxu1  ;;  %v13660_v40 = vpop.f32.mrf.mxu0 }
 0x654   : > { %v14055_v38 = vrot.slane %v14053_v11, 1  ;;  %v13993_v15 = vadd.f32 %v31089_v7, %v13968_v52  ;;  %v13965_v27 = vadd.f32 %v13660_v40, %v13552_v18 }
 0x655   : > { %v13783_v50 = vpop.f32.mrf.mxu1  ;;  %v24097_v22 = vpop.f32.mrf.mxu0 }
 0x656   : > { %v14056_v3 = vor.u32 %v14055_v38, %v14051_v2  ;;  %v13971_v8 = vadd.f32 %v13783_v50, %v13558_v17  ;;  %v14011_v43 = vmax.f32 %v13993_v15, 0.0  ;;  %v13990_v34 = vadd.f32 %v31089_v7, %v13965_v27 }
 0x657   : > { %v24121_v19 = vpop.f32.mrf.mxu1  ;;  %v13663_v10 = vpop.f32.mrf.mxu0 }
 0x658   : > { %24164 = vmatmul.mubr.msk.bf16.vlgmr.msra.gmra.mxu0 %vm530_vm1, %v14056_v3  ;;  %v31117_v51 = vpack.c.bf16 %v14011_v43, %v14010_v49  ;;  %v13996_v25 = vadd.f32 %v31089_v7, %v13971_v8  ;;  %v13966_v31 = vadd.f32 %v13663_v10, %v13553_v57  ;;  %v14008_v62 = vmax.f32 %v13990_v34, 0.0 }
 0x659   : > { %24180 = vmatpush3.bf16.msra.mxu0 %v30956_v32  ;;  %v13786_v5 = vpop.f32.mrf.mxu1  ;;  %24187 = vmatprep.mubr.msk.bf16.mxu0 %vm25474_vm2, %v33365_v21  ;;  %v24098_v45 = vpop.f32.mrf.mxu0 }
 0x65a   : > { %v13972_v9 = vadd.f32 %v13786_v5, %v13559_v36  ;;  %24181 = vmatprep.subr.bf16.mxu0 %v33365_v21  ;;  %v13991_v55 = vadd.f32 %v31089_v7, %v13966_v31  ;;  %v14014_v35 = vmax.f32 %v13996_v25, 0.0  ;;  %v14177_v41 = vshll.u32 %v31117_v51, 16 }
 0x65b   : > { %v24122_v30 = vpop.f32.mrf.mxu1  ;;  %v13742_v23 = vpop.f32.mrf.mxu0  ;;  %v14175_v29 = vshrl.u32 %v31117_v51, 16 }
 0x65c   : > { %v13997_v56 = vadd.f32 %v31089_v7, %v13972_v9  ;;  %v14009_v53 = vmax.f32 %v13991_v55, 0.0  ;;  %v13969_v20 = vadd.f32 %v13742_v23, %v13556_v26  ;;  %v14179_v17 = vrot.slane %v14177_v41, 1 }
 0x65d   : > { %24182 = vmatpush3.bf16.msra.mxu0 %v30974_v1  ;;  %v13865_v33 = vpop.f32.mrf.mxu1  ;;  %v24113_v48 = vpop.f32.mrf.mxu0  ;;  %v13561_v9 = vadd.f32 %v31077_v28, %v31061_v39 }
 0x65e   : > { %v14015_v37 = vmax.f32 %v13997_v56, 0.0  ;;  %24183 = vmatprep.subr.bf16.mxu0 %v33365_v21  ;;  %v13975_v11 = vadd.f32 %v13865_v33, %v13562_v60  ;;  %v31134_v63 = vpack.c.bf16 %v14009_v53, %v14008_v62  ;;  %v13994_v2 = vadd.f32 %v31089_v7, %v13969_v20 }
 0x65f   : > { %v24137_v52 = vpop.f32.mrf.mxu1  ;;  %v13745_v16 = vpop.f32.mrf.mxu0  ;;  %v31154_v19 = vor.u32 %v14179_v17, %v14175_v29 }
 0x660   : > { %v31136_v44 = vpack.c.bf16 %v14015_v37, %v14014_v35  ;;  %v14127_v18 = vshll.u32 %v31134_v63, 16  ;;  %v14000_v38 = vadd.f32 %v31089_v7, %v13975_v11  ;;  %v13970_v15 = vadd.f32 %v13745_v16, %v13557_v13 }
 0x661   : > { %24184 = vmatpush3.bf16.msra.mxu0 %v30980_v59  ;;  %v13868_v4 = vpop.f32.mrf.mxu1  ;;  %v24114_v50 = vpop.f32.mrf.mxu0  ;;  %v14125_v46 = vshrl.u32 %v31134_v63, 16  ;;  %v14012_v36 = vmax.f32 %v13994_v2, 0.0 }
 0x662   : > { %24185 = vmatprep.subr.bf16.mxu0 %v33365_v21  ;;  %v13976_v40 = vadd.f32 %v13868_v4, %v13563_v14  ;;  %v14129_v47 = vrot.slane %v14127_v18, 1  ;;  %v13995_v3 = vadd.f32 %v31089_v7, %v13970_v15  ;;  %v14018_v34 = vmax.f32 %v14000_v38, 0.0 }
 0x663   : > { %v24138_v24 = vpop.f32.mrf.mxu1  ;;  %v13824_v8 = vpop.f32.mrf.mxu0  ;;  %v14277_v53 = vshll.u32 %v31136_v44, 16  ;;  %v14275_v38 = vshrl.u32 %v31136_v44, 16 }
 0x664   : > { %v14001_v27 = vadd.f32 %v31089_v7, %v13976_v40  ;;  %v13973_v43 = vadd.f32 %v13824_v8, %v31075_v54  ;;  %v31157_v57 = vor.u32 %v14129_v47, %v14125_v46  ;;  %v14013_v10 = vmax.f32 %v13995_v3, 0.0 }
 0x665   : > { %24186 = vmatpush3.bf16.msra.mxu0 %v30992_v61  ;;  %v13956_v49 = vpop.f32.mrf.mxu1  ;;  %v24129_v25 = vpop.f32.mrf.mxu0  ;;  %v14279_v4 = vrot.slane %v14277_v53, 1  ;;  %v31581_v53 = vld [vmem:[%s33025_s5 + $0x90] sm:$0xff]  }
 0x666   : > { %v13979_v22 = vadd.f32 %v13956_v49, %v31098_v0  ;;  %24203 = vmatprep.subr.bf16.mxu0 %v33365_v21  ;;  %v14019_v5 = vmax.f32 %v14001_v27, 0.0  ;;  %24176 = vmatmul.mubr.msk.bf16.vlgmr.msra.gmra.mxu1 %vm530_vm1, %v31157_v57  ;;  %v31166_v54 = vpack.c.bf16 %v14013_v10, %v14012_v36  ;;  %v13998_v30 = vadd.f32 %v31089_v7, %v13973_v43  ;;  %v31241_v27 = vld [vmem:[%s33025_s5 + $0x18] sm:$0xff]   ;;  %v31271_v49 = vld [vmem:[%s33025_s5 + $0x8] sm:$0xff]   ;;  %v31280_v43 = vld [vmem:[%s33025_s5] sm:$0xff]  }
 0x667   : > { %v24153_v31 = vpop.f32.mrf.mxu1  ;;  %24192 = vmatpush3.bf16.msra.mxu1 %v30956_v32  ;;  %v13827_v55 = vpop.f32.mrf.mxu0  ;;  %24199 = vmatprep.mubr.msk.bf16.mxu1 %vm25474_vm2, %v33365_v21  ;;  %v31206_v50 = vor.u32 %v14279_v4, %v14275_v38  ;;  %v31350_v36 = vld [vmem:[%s33025_s5 + $0x50] sm:$0xff]   ;;  %v31372_v10 = vld [vmem:[%s33025_s5 + $0x40] sm:$0xff]   ;;  %v31404_v25 = vrot.slane %v31117_v51, 1 }
 0x668   : > { %v14004_v45 = vadd.f32 %v31089_v7, %v13979_v22  ;;  %24188 = vmatmul.mubr.msk.bf16.vlgmr.msra.gmra.mxu0 %vm530_vm1, %v31154_v19  ;;  %v31168_v0 = vpack.c.bf16 %v14019_v5, %v14018_v34  ;;  %v13974_v28 = vadd.f32 %v13827_v55, %v13561_v9  ;;  %24193 = vmatprep.subr.bf16.mxu1 %v33365_v21  ;;  %v14016_v33 = vmax.f32 %v13998_v30, 0.0  ;;  %v31337_v22 = vld [vmem:[%s33025_s5 + $0x58] sm:$0xff]   ;;  %v31363_v34 = vld [vmem:[%s33025_s5 + $0x48] sm:$0xff]  }
 0x669   : > { %24204 = vmatpush3.bf16.msra.mxu0 %v30956_v32  ;;  %v13959_v39 = vpop.f32.mrf.mxu1  ;;  %v24130_v26 = vpop.f32.mrf.mxu0  ;;  %24211 = vmatprep.mubr.msk.bf16.mxu0 %vm25474_vm2, %v33365_v21  ;;  %v14227_v11 = vshll.u32 %v31166_v54, 16  ;;  %v14225_v2 = vshrl.u32 %v31166_v54, 16  ;;  %v14752_v5 = vrot.slane %v31100_v58, 1  ;;  %v31432_v31 = vrot.slane %v31166_v54, 1 }
 0x66a   : > { %v13980_v56 = vadd.f32 %v13959_v39, %v31106_v6  ;;  %24205 = vmatprep.subr.bf16.mxu0 %v33365_v21  ;;  %v13999_v62 = vadd.f32 %v31089_v7, %v13974_v28  ;;  %v14022_v35 = vmax.f32 %v14004_v45, 0.0  ;;  %v14377_v46 = vshll.u32 %v31168_v0, 16  ;;  %v31464_v45 = vld [vmem:[%s33025_s5 + $0x78] sm:$0xff]   ;;  %v31483_v39 = vld [vmem:[%s33025_s5 + $0x70] sm:$0xff]   ;;  %v31496_v28 = vld [vmem:[%s33025_s5 + $0x68] sm:$0xff]  }
 0x66b   : > { %v24154_v60 = vpop.f32.mrf.mxu1  ;;  %24194 = vmatpush3.bf16.msra.mxu1 %v30974_v1  ;;  %v13906_v6 = vpop.f32.mrf.mxu0  ;;  %v14375_v3 = vshrl.u32 %v31168_v0, 16  ;;  %v31435_v9 = vrot.slane %v31136_v44, 1  ;;  %v31470_v55 = vrot.slane %v31168_v0, 1 }
 0x66c   : > { %v14005_v23 = vadd.f32 %v31089_v7, %v13980_v56  ;;  %v14017_v37 = vmax.f32 %v13999_v62, 0.0  ;;  %v13977_v20 = vadd.f32 %v13906_v6, %v31079_v12  ;;  %24195 = vmatprep.subr.bf16.mxu1 %v33365_v21  ;;  %v14229_v12 = vrot.slane %v14227_v11, 1  ;;  %v31505_v56 = vld [vmem:[%s33025_s5 + $0x60] sm:$0xff]  }
 0x66d   : > { %24206 = vmatpush3.bf16.msra.mxu0 %v30974_v1  ;;  %v24145_v48 = vpop.f32.mrf.mxu0  ;;  %v14379_v29 = vrot.slane %v14377_v46, 1 }
 0x66e   : > { %v14023_v41 = vmax.f32 %v14005_v23, 0.0  ;;  %24207 = vmatprep.subr.bf16.mxu0 %v33365_v21  ;;  %v31189_v52 = vpack.c.bf16 %v14017_v37, %v14016_v33  ;;  %v14002_v14 = vadd.f32 %v31089_v7, %v13977_v20  ;;  %v31204_v40 = vor.u32 %v14229_v12, %v14225_v2  ;;  %v31564_v33 = vld [vmem:[%s33025_s5 + $0x98] sm:$0xff]   ;;  %v31594_v48 = vld [vmem:[%s33025_s5 + $0x88] sm:$0xff]   ;;  %v31603_v12 = vld [vmem:[%s33025_s5 + $0x80] sm:$0xff]  }
 0x66f   : > { %24196 = vmatpush3.bf16.msra.mxu1 %v30980_v59  ;;  %v13909_v16 = vpop.f32.mrf.mxu0  ;;  %v31245_v8 = vor.u32 %v14379_v29, %v14375_v3 }
 0x670   : > { %v31191_v13 = vpack.c.bf16 %v14023_v41, %v14022_v35  ;;  %24197 = vmatprep.subr.bf16.mxu1 %v33365_v21  ;;  %v13978_v18 = vadd.f32 %v13909_v16, %v31081_v42  ;;  %v14020_v42 = vmax.f32 %v14002_v14, 0.0  ;;  %v31467_v30 = vrot.slane %v31189_v52, 1 }
 0x671   : > { %24208 = vmatpush3.bf16.msra.mxu0 %v30980_v59  ;;  %v24146_v17 = vpop.f32.mrf.mxu0 }
 0x672   : > { %24209 = vmatprep.subr.bf16.mxu0 %v33365_v21  ;;  %v14003_v15 = vadd.f32 %v31089_v7, %v13978_v18 }
 0x673   : > { %24198 = vmatpush3.bf16.msra.mxu1 %v30992_v61 }
 0x674   : > { %24215 = vmatprep.subr.bf16.mxu1 %v33365_v21  ;;  %v14021_v24 = vmax.f32 %v14003_v15, 0.0 }
 0x675   : > { %24210 = vmatpush3.bf16.msra.mxu0 %v30992_v61 }
 0x676   : > { %24227 = vmatprep.subr.bf16.mxu0 %v33365_v21  ;;  %24200 = vmatmul.mubr.msk.bf16.vlgmr.msra.gmra.mxu1 %vm530_vm1, %v31204_v40  ;;  %v31214_v7 = vpack.c.bf16 %v14021_v24, %v14020_v42 }
 0x677   : > { %24216 = vmatpush3.bf16.msra.mxu1 %v30956_v32  ;;  %24223 = vmatprep.mubr.msk.bf16.mxu1 %vm25474_vm2, %v33365_v21 }
 0x678   : > { %24212 = vmatmul.mubr.msk.bf16.vlgmr.msra.gmra.mxu0 %vm530_vm1, %v31206_v50  ;;  %24217 = vmatprep.subr.bf16.mxu1 %v33365_v21 }
 0x679   : > { %24228 = vmatpush3.bf16.msra.mxu0 %v30956_v32  ;;  %24235 = vmatprep.mubr.msk.bf16.mxu0 %vm25474_vm2, %v33365_v21  ;;  %v14327_v32 = vshll.u32 %v31189_v52, 16 }
 0x67a   : > { %24229 = vmatprep.subr.bf16.mxu0 %v33365_v21 }
 0x67b   : > { %24218 = vmatpush3.bf16.msra.mxu1 %v30974_v1  ;;  %v14329_v47 = vrot.slane %v14327_v32, 1 }
 0x67c   : > { %24219 = vmatprep.subr.bf16.mxu1 %v33365_v21 }
 0x67d   : > { %24230 = vmatpush3.bf16.msra.mxu0 %v30974_v1  ;;  %v14325_v1 = vshrl.u32 %v31189_v52, 16 }
 0x67e   : > { %24231 = vmatprep.subr.bf16.mxu0 %v33365_v21 }
 0x67f   : > { %24220 = vmatpush3.bf16.msra.mxu1 %v30980_v59 }
 0x680   : > { %24221 = vmatprep.subr.bf16.mxu1 %v33365_v21 }
 0x681   : > { %24232 = vmatpush3.bf16.msra.mxu0 %v30980_v59  ;;  %v31243_v59 = vor.u32 %v14329_v47, %v14325_v1 }
 0x682   : > { %24233 = vmatprep.subr.bf16.mxu0 %v33365_v21 }
 0x683   : > { %24222 = vmatpush3.bf16.msra.mxu1 %v30992_v61 }
 0x684   : > { %24239 = vmatprep.subr.bf16.mxu1 %v33365_v21 }
 0x685   : > { %24234 = vmatpush3.bf16.msra.mxu0 %v30992_v61  ;;  %v31258_v61 = vld [vmem:[%s33025_s5 + $0x10] sm:$0xff]  }
 0x686   : > { %24251 = vmatprep.subr.bf16.mxu0 %v33365_v21  ;;  %24224 = vmatmul.mubr.msk.bf16.vlgmr.msra.gmra.mxu1 %vm530_vm1, %v31243_v59 }
 0x687   : > { %24240 = vmatpush3.bf16.msra.mxu1 %v31241_v27  ;;  %24247 = vmatprep.mubr.msk.bf16.mxu1 %vm25474_vm2, %v33365_v21 }
 0x688   : > { %24236 = vmatmul.mubr.msk.bf16.vlgmr.msra.gmra.mxu0 %vm530_vm1, %v31245_v8  ;;  %24241 = vmatprep.subr.bf16.mxu1 %v33365_v21 }
 0x689   : > { %24252 = vmatpush3.bf16.msra.mxu0 %v31241_v27  ;;  %24259 = vmatprep.mubr.msk.bf16.mxu0 %vm25474_vm2, %v33365_v21 }
 0x68a   : > { %24253 = vmatprep.subr.bf16.mxu0 %v33365_v21 }
 0x68b   : > { %24242 = vmatpush3.bf16.msra.mxu1 %v31258_v61 }
 0x68c   : > { %24243 = vmatprep.subr.bf16.mxu1 %v33365_v21 }
 0x68d   : > { %24254 = vmatpush3.bf16.msra.mxu0 %v31258_v61 }
 0x68e   : > { %24255 = vmatprep.subr.bf16.mxu0 %v33365_v21 }
 0x68f   : > { %24244 = vmatpush3.bf16.msra.mxu1 %v31271_v49 }
 0x690   : > { %24245 = vmatprep.subr.bf16.mxu1 %v33365_v21 }
 0x691   : > { %24256 = vmatpush3.bf16.msra.mxu0 %v31271_v49 }
 0x692   : > { %24257 = vmatprep.subr.bf16.mxu0 %v33365_v21 }
 0x693   : > { %24246 = vmatpush3.bf16.msra.mxu1 %v31280_v43 }
 0x694   : > { %24263 = vmatprep.subr.bf16.mxu1 %v33365_v21 }
 0x695   : > { %24258 = vmatpush3.bf16.msra.mxu0 %v31280_v43 }
 0x696   : > { %24275 = vmatprep.subr.bf16.mxu0 %v33365_v21  ;;  %24248 = vmatmul.mubr.msk.bf16.vlgmr.msra.gmra.mxu1 %vm530_vm1, %v31100_v58  ;;  %v14821_v58 = vrot.slane %v31134_v63, 1 }
 0x697   : > { %24264 = vmatpush3.bf16.msra.mxu1 %v31241_v27  ;;  %24271 = vmatprep.mubr.msk.bf16.mxu1 %vm25474_vm2, %v33365_v21 }
 0x698   : > { %24260 = vmatmul.mubr.msk.bf16.vlgmr.msra.gmra.mxu0 %vm530_vm1, %v31134_v63  ;;  %24265 = vmatprep.subr.bf16.mxu1 %v33365_v21 }
 0x699   : > { %24276 = vmatpush3.bf16.msra.mxu0 %v31241_v27  ;;  %24283 = vmatprep.mubr.msk.bf16.mxu0 %vm25474_vm2, %v33365_v21 }
 0x69a   : > { %24277 = vmatprep.subr.bf16.mxu0 %v33365_v21 }
 0x69b   : > { %24266 = vmatpush3.bf16.msra.mxu1 %v31258_v61 }
 0x69c   : > { %24267 = vmatprep.subr.bf16.mxu1 %v33365_v21 }
 0x69d   : > { %24278 = vmatpush3.bf16.msra.mxu0 %v31258_v61 }
 0x69e   : > { %24279 = vmatprep.subr.bf16.mxu0 %v33365_v21 }
 0x69f   : > { %24268 = vmatpush3.bf16.msra.mxu1 %v31271_v49 }
 0x6a0   : > { %24269 = vmatprep.subr.bf16.mxu1 %v33365_v21 }
 0x6a1   : > { %24280 = vmatpush3.bf16.msra.mxu0 %v31271_v49 }
 0x6a2   : > { %24281 = vmatprep.subr.bf16.mxu0 %v33365_v21 }
 0x6a3   : > { %24270 = vmatpush3.bf16.msra.mxu1 %v31280_v43 }
 0x6a4   : > { %24287 = vmatprep.subr.bf16.mxu1 %v33365_v21 }
 0x6a5   : > { %24282 = vmatpush3.bf16.msra.mxu0 %v31280_v43 }
 0x6a6   : > { %24299 = vmatprep.subr.bf16.mxu0 %v33365_v21  ;;  %24272 = vmatmul.mubr.msk.bf16.vlgmr.msra.gmra.mxu1 %vm530_vm1, %v31117_v51 }
 0x6a7   : > { %24288 = vmatpush3.bf16.msra.mxu1 %v31241_v27  ;;  %24295 = vmatprep.mubr.msk.bf16.mxu1 %vm25474_vm2, %v33365_v21 }
 0x6a8   : > { %24284 = vmatmul.mubr.msk.bf16.vlgmr.msra.gmra.mxu0 %vm530_vm1, %v31166_v54  ;;  %24289 = vmatprep.subr.bf16.mxu1 %v33365_v21 }
 0x6a9   : > { %24300 = vmatpush3.bf16.msra.mxu0 %v31241_v27  ;;  %24307 = vmatprep.mubr.msk.bf16.mxu0 %vm25474_vm2, %v33365_v21 }
 0x6aa   : > { %24301 = vmatprep.subr.bf16.mxu0 %v33365_v21 }
 0x6ab   : > { %24290 = vmatpush3.bf16.msra.mxu1 %v31258_v61 }
 0x6ac   : > { %24291 = vmatprep.subr.bf16.mxu1 %v33365_v21 }
 0x6ad   : > { %24302 = vmatpush3.bf16.msra.mxu0 %v31258_v61 }
 0x6ae   : > { %24303 = vmatprep.subr.bf16.mxu0 %v33365_v21 }
 0x6af   : > { %24292 = vmatpush3.bf16.msra.mxu1 %v31271_v49 }
 0x6b0   : > { %24293 = vmatprep.subr.bf16.mxu1 %v33365_v21 }
 0x6b1   : > { %24304 = vmatpush3.bf16.msra.mxu0 %v31271_v49 }
 0x6b2   : > { %24305 = vmatprep.subr.bf16.mxu0 %v33365_v21 }
 0x6b3   : > { %24294 = vmatpush3.bf16.msra.mxu1 %v31280_v43 }
 0x6b4   : > { %24311 = vmatprep.subr.bf16.mxu1 %v33365_v21 }
 0x6b5   : > { %24306 = vmatpush3.bf16.msra.mxu0 %v31280_v43 }
 0x6b6   : > { %24323 = vmatprep.subr.bf16.mxu0 %v33365_v21  ;;  %24296 = vmatmul.mubr.msk.bf16.vlgmr.msra.gmra.mxu1 %vm530_vm1, %v31136_v44 }
 0x6b7   : > { %24312 = vmatpush3.bf16.msra.mxu1 %v31241_v27  ;;  %24319 = vmatprep.mubr.msk.bf16.mxu1 %vm25474_vm2, %v33365_v21 }
 0x6b8   : > { %24308 = vmatmul.mubr.msk.bf16.vlgmr.msra.gmra.mxu0 %vm530_vm1, %v31189_v52  ;;  %24313 = vmatprep.subr.bf16.mxu1 %v33365_v21 }
 0x6b9   : > { %24324 = vmatpush3.bf16.msra.mxu0 %v31337_v22  ;;  %24331 = vmatprep.mubr.msk.bf16.mxu0 %vm25474_vm2, %v33365_v21 }
 0x6ba   : > { %24325 = vmatprep.subr.bf16.mxu0 %v33365_v21 }
 0x6bb   : > { %24314 = vmatpush3.bf16.msra.mxu1 %v31258_v61 }
 0x6bc   : > { %24315 = vmatprep.subr.bf16.mxu1 %v33365_v21 }
 0x6bd   : > { %24326 = vmatpush3.bf16.msra.mxu0 %v31350_v36 }
 0x6be   : > { %24327 = vmatprep.subr.bf16.mxu0 %v33365_v21 }
 0x6bf   : > { %24316 = vmatpush3.bf16.msra.mxu1 %v31271_v49 }
 0x6c0   : > { %24317 = vmatprep.subr.bf16.mxu1 %v33365_v21 }
 0x6c1   : > { %24328 = vmatpush3.bf16.msra.mxu0 %v31363_v34 }
 0x6c2   : > { %24329 = vmatprep.subr.bf16.mxu0 %v33365_v21 }
 0x6c3   : > { %24318 = vmatpush3.bf16.msra.mxu1 %v31280_v43 }
 0x6c4   : > { %24335 = vmatprep.subr.bf16.mxu1 %v33365_v21 }
 0x6c5   : > { %24330 = vmatpush3.bf16.msra.mxu0 %v31372_v10 }
 0x6c6   : > { %24347 = vmatprep.subr.bf16.mxu0 %v33365_v21  ;;  %24320 = vmatmul.mubr.msk.bf16.vlgmr.msra.gmra.mxu1 %vm530_vm1, %v31168_v0 }
 0x6c7   : > { %24336 = vmatpush3.bf16.msra.mxu1 %v31337_v22  ;;  %24343 = vmatprep.mubr.msk.bf16.mxu1 %vm25474_vm2, %v33365_v21 }
 0x6c8   : > { %24332 = vmatmul.mubr.msk.bf16.vlgmr.msra.gmra.mxu0 %vm530_vm1, %v14752_v5  ;;  %24337 = vmatprep.subr.bf16.mxu1 %v33365_v21 }
 0x6c9   : > { %24348 = vmatpush3.bf16.msra.mxu0 %v31337_v22  ;;  %24355 = vmatprep.mubr.msk.bf16.mxu0 %vm25474_vm2, %v33365_v21 }
 0x6ca   : > { %24349 = vmatprep.subr.bf16.mxu0 %v33365_v21 }
 0x6cb   : > { %24338 = vmatpush3.bf16.msra.mxu1 %v31350_v36 }
 0x6cc   : > { %24339 = vmatprep.subr.bf16.mxu1 %v33365_v21 }
 0x6cd   : > { %24350 = vmatpush3.bf16.msra.mxu0 %v31350_v36 }
 0x6ce   : > { %24351 = vmatprep.subr.bf16.mxu0 %v33365_v21 }
 0x6cf   : > { %24340 = vmatpush3.bf16.msra.mxu1 %v31363_v34 }
 0x6d0   : > { %24341 = vmatprep.subr.bf16.mxu1 %v33365_v21 }
 0x6d1   : > { %24352 = vmatpush3.bf16.msra.mxu0 %v31363_v34 }
 0x6d2   : > { %24353 = vmatprep.subr.bf16.mxu0 %v33365_v21 }
 0x6d3   : > { %24342 = vmatpush3.bf16.msra.mxu1 %v31372_v10 }
 0x6d4   : > { %24359 = vmatprep.subr.bf16.mxu1 %v33365_v21 }
 0x6d5   : > { %24354 = vmatpush3.bf16.msra.mxu0 %v31372_v10 }
 0x6d6   : > { %24371 = vmatprep.subr.bf16.mxu0 %v33365_v21  ;;  %24344 = vmatmul.mubr.msk.bf16.vlgmr.msra.gmra.mxu1 %vm530_vm1, %v14821_v58 }
 0x6d7   : > { %24360 = vmatpush3.bf16.msra.mxu1 %v31337_v22  ;;  %24367 = vmatprep.mubr.msk.bf16.mxu1 %vm25474_vm2, %v33365_v21 }
 0x6d8   : > { %24356 = vmatmul.mubr.msk.bf16.vlgmr.msra.gmra.mxu0 %vm530_vm1, %v31404_v25  ;;  %24361 = vmatprep.subr.bf16.mxu1 %v33365_v21 }
 0x6d9   : > { %24372 = vmatpush3.bf16.msra.mxu0 %v31337_v22  ;;  %24379 = vmatprep.mubr.msk.bf16.mxu0 %vm25474_vm2, %v33365_v21 }
 0x6da   : > { %24373 = vmatprep.subr.bf16.mxu0 %v33365_v21 }
 0x6db   : > { %24362 = vmatpush3.bf16.msra.mxu1 %v31350_v36 }
 0x6dc   : > { %24363 = vmatprep.subr.bf16.mxu1 %v33365_v21 }
 0x6dd   : > { %24374 = vmatpush3.bf16.msra.mxu0 %v31350_v36 }
 0x6de   : > { %24375 = vmatprep.subr.bf16.mxu0 %v33365_v21 }
 0x6df   : > { %24364 = vmatpush3.bf16.msra.mxu1 %v31363_v34 }
 0x6e0   : > { %24365 = vmatprep.subr.bf16.mxu1 %v33365_v21 }
 0x6e1   : > { %24376 = vmatpush3.bf16.msra.mxu0 %v31363_v34 }
 0x6e2   : > { %24377 = vmatprep.subr.bf16.mxu0 %v33365_v21 }
 0x6e3   : > { %24366 = vmatpush3.bf16.msra.mxu1 %v31372_v10 }
 0x6e4   : > { %24383 = vmatprep.subr.bf16.mxu1 %v33365_v21 }
 0x6e5   : > { %24378 = vmatpush3.bf16.msra.mxu0 %v31372_v10 }
 0x6e6   : > { %24395 = vmatprep.subr.bf16.mxu0 %v33365_v21  ;;  %24368 = vmatmul.mubr.msk.bf16.vlgmr.msra.gmra.mxu1 %vm530_vm1, %v31432_v31 }
 0x6e7   : > { %24384 = vmatpush3.bf16.msra.mxu1 %v31337_v22  ;;  %24391 = vmatprep.mubr.msk.bf16.mxu1 %vm25474_vm2, %v33365_v21 }
 0x6e8   : > { %24380 = vmatmul.mubr.msk.bf16.vlgmr.msra.gmra.mxu0 %vm530_vm1, %v31435_v9  ;;  %24385 = vmatprep.subr.bf16.mxu1 %v33365_v21 }
 0x6e9   : > { %24396 = vmatpush3.bf16.msra.mxu0 %v31337_v22  ;;  %24403 = vmatprep.mubr.msk.bf16.mxu0 %vm25474_vm2, %v33365_v21 }
 0x6ea   : > { %24397 = vmatprep.subr.bf16.mxu0 %v33365_v21 }
 0x6eb   : > { %24386 = vmatpush3.bf16.msra.mxu1 %v31350_v36 }
 0x6ec   : > { %24387 = vmatprep.subr.bf16.mxu1 %v33365_v21 }
 0x6ed   : > { %24398 = vmatpush3.bf16.msra.mxu0 %v31350_v36 }
 0x6ee   : > { %24399 = vmatprep.subr.bf16.mxu0 %v33365_v21 }
 0x6ef   : > { %24388 = vmatpush3.bf16.msra.mxu1 %v31363_v34 }
 0x6f0   : > { %24389 = vmatprep.subr.bf16.mxu1 %v33365_v21 }
 0x6f1   : > { %24400 = vmatpush3.bf16.msra.mxu0 %v31363_v34 }
 0x6f2   : > { %24401 = vmatprep.subr.bf16.mxu0 %v33365_v21 }
 0x6f3   : > { %24390 = vmatpush3.bf16.msra.mxu1 %v31372_v10 }
 0x6f4   : > { %24407 = vmatprep.subr.bf16.mxu1 %v33365_v21 }
 0x6f5   : > { %24402 = vmatpush3.bf16.msra.mxu0 %v31372_v10 }
 0x6f6   : > { %24419 = vmatprep.subr.bf16.mxu0 %v33365_v21  ;;  %24392 = vmatmul.mubr.msk.bf16.vlgmr.msra.gmra.mxu1 %vm530_vm1, %v31467_v30 }
 0x6f7   : > { %24408 = vmatpush3.bf16.msra.mxu1 %v31464_v45  ;;  %24415 = vmatprep.mubr.msk.bf16.mxu1 %vm25474_vm2, %v33365_v21 }
 0x6f8   : > { %24404 = vmatmul.mubr.msk.bf16.vlgmr.msra.gmra.mxu0 %vm530_vm1, %v31470_v55  ;;  %24409 = vmatprep.subr.bf16.mxu1 %v33365_v21 }
 0x6f9   : > { %24420 = vmatpush3.bf16.msra.mxu0 %v31464_v45  ;;  %24427 = vmatprep.mubr.msk.bf16.mxu0 %vm25474_vm2, %v33365_v21 }
 0x6fa   : > { %24421 = vmatprep.subr.bf16.mxu0 %v33365_v21 }
 0x6fb   : > { %24410 = vmatpush3.bf16.msra.mxu1 %v31483_v39 }
 0x6fc   : > { %24411 = vmatprep.subr.bf16.mxu1 %v33365_v21 }
 0x6fd   : > { %24422 = vmatpush3.bf16.msra.mxu0 %v31483_v39 }
 0x6fe   : > { %24423 = vmatprep.subr.bf16.mxu0 %v33365_v21 }
 0x6ff   : > { %24412 = vmatpush3.bf16.msra.mxu1 %v31496_v28 }
 0x700   : > { %24413 = vmatprep.subr.bf16.mxu1 %v33365_v21 }
 0x701   : > { %24424 = vmatpush3.bf16.msra.mxu0 %v31496_v28 }
 0x702   : > { %24425 = vmatprep.subr.bf16.mxu0 %v33365_v21 }
 0x703   : > { %24414 = vmatpush3.bf16.msra.mxu1 %v31505_v56 }
 0x704   : > { %24431 = vmatprep.subr.bf16.mxu1 %v33365_v21 }
 0x705   : > { %24426 = vmatpush3.bf16.msra.mxu0 %v31505_v56 }
 0x706   : > { %24443 = vmatprep.subr.bf16.mxu0 %v33365_v21  ;;  %24416 = vmatmul.mubr.msk.bf16.vlgmr.msra.gmra.mxu1 %vm530_vm1, %v31134_v63 }
 0x707   : > { %24432 = vmatpush3.bf16.msra.mxu1 %v31464_v45  ;;  %24439 = vmatprep.mubr.msk.bf16.mxu1 %vm25474_vm2, %v33365_v21 }
 0x708   : > { %24428 = vmatmul.mubr.msk.bf16.vlgmr.msra.gmra.mxu0 %vm530_vm1, %v31117_v51  ;;  %24433 = vmatprep.subr.bf16.mxu1 %v33365_v21 }
 0x709   : > { %24444 = vmatpush3.bf16.msra.mxu0 %v31464_v45  ;;  %24451 = vmatprep.mubr.msk.bf16.mxu0 %vm25474_vm2, %v33365_v21 }
 0x70a   : > { %24445 = vmatprep.subr.bf16.mxu0 %v33365_v21 }
 0x70b   : > { %24434 = vmatpush3.bf16.msra.mxu1 %v31483_v39 }
 0x70c   : > { %24435 = vmatprep.subr.bf16.mxu1 %v33365_v21 }
 0x70d   : > { %24446 = vmatpush3.bf16.msra.mxu0 %v31483_v39 }
 0x70e   : > { %24447 = vmatprep.subr.bf16.mxu0 %v33365_v21 }
 0x70f   : > { %24436 = vmatpush3.bf16.msra.mxu1 %v31496_v28 }
 0x710   : > { %24437 = vmatprep.subr.bf16.mxu1 %v33365_v21 }
 0x711   : > { %24448 = vmatpush3.bf16.msra.mxu0 %v31496_v28 }
 0x712   : > { %24449 = vmatprep.subr.bf16.mxu0 %v33365_v21 }
 0x713   : > { %24438 = vmatpush3.bf16.msra.mxu1 %v31505_v56 }
 0x714   : > { %24455 = vmatprep.subr.bf16.mxu1 %v33365_v21 }
 0x715   : > { %24450 = vmatpush3.bf16.msra.mxu0 %v31505_v56 }
 0x716   : > { %24467 = vmatprep.subr.bf16.mxu0 %v33365_v21  ;;  %24440 = vmatmul.mubr.msk.bf16.vlgmr.msra.gmra.mxu1 %vm530_vm1, %v31166_v54 }
 0x717   : > { %24456 = vmatpush3.bf16.msra.mxu1 %v31464_v45  ;;  %24463 = vmatprep.mubr.msk.bf16.mxu1 %vm25474_vm2, %v33365_v21 }
 0x718   : > { %24452 = vmatmul.mubr.msk.bf16.vlgmr.msra.gmra.mxu0 %vm530_vm1, %v31136_v44  ;;  %v31541_v26 = vpop.f32.mrf.mxu0  ;;  %24457 = vmatprep.subr.bf16.mxu1 %v33365_v21 }
 0x719   : > { %24468 = vmatpush3.bf16.msra.mxu0 %v31464_v45  ;;  %24475 = vmatprep.mubr.msk.bf16.mxu0 %vm25474_vm2, %v33365_v21 }
 0x71a   : > { %v24165_v60 = vpop.f32.mrf.mxu0  ;;  %24469 = vmatprep.subr.bf16.mxu0 %v33365_v21 }
 0x71b   : > { %24458 = vmatpush3.bf16.msra.mxu1 %v31483_v39  ;;  %v31700_v60 = vld [vmem:[%s33025_s5 + $0xb8] sm:$0xff]  }
 0x71c   : > { %v14121_v62 = vpop.f32.mrf.mxu0  ;;  %24459 = vmatprep.subr.bf16.mxu1 %v33365_v21 }
 0x71d   : > { %24470 = vmatpush3.bf16.msra.mxu0 %v31483_v39 }
 0x71e   : > { %v24166_v23 = vpop.f32.mrf.mxu0  ;;  %24471 = vmatprep.subr.bf16.mxu0 %v33365_v21 }
 0x71f   : > { %24460 = vmatpush3.bf16.msra.mxu1 %v31496_v28 }
 0x720   : > { %24461 = vmatprep.subr.bf16.mxu1 %v33365_v21 }
 0x721   : > { %24472 = vmatpush3.bf16.msra.mxu0 %v31496_v28 }
 0x722   : > { %24473 = vmatprep.subr.bf16.mxu0 %v33365_v21 }
 0x723   : > { %24462 = vmatpush3.bf16.msra.mxu1 %v31505_v56 }
 0x724   : > { %24479 = vmatprep.subr.bf16.mxu1 %v33365_v21 }
 0x725   : > { %24474 = vmatpush3.bf16.msra.mxu0 %v31505_v56 }
 0x726   : > { %24491 = vmatprep.subr.bf16.mxu0 %v33365_v21  ;;  %24464 = vmatmul.mubr.msk.bf16.vlgmr.msra.gmra.mxu1 %vm530_vm1, %v31189_v52  ;;  %v31574_v6 = vpop.f32.mrf.mxu1 }
 0x727   : > { %24480 = vmatpush3.bf16.msra.mxu1 %v31464_v45  ;;  %24487 = vmatprep.mubr.msk.bf16.mxu1 %vm25474_vm2, %v33365_v21  ;;  %v15695_v45 = vshll.u32 %v31214_v7, 16 }
 0x728   : > { %v31568_v35 = vpop.f32.mrf.mxu0  ;;  %24476 = vmatmul.mubr.msk.bf16.vlgmr.msra.gmra.mxu0 %vm530_vm1, %v31168_v0  ;;  %v24177_v41 = vpop.f32.mrf.mxu1  ;;  %24481 = vmatprep.subr.bf16.mxu1 %v33365_v21 }
 0x729   : > { %24492 = vmatpush3.bf16.msra.mxu0 %v31564_v33  ;;  %24499 = vmatprep.mubr.msk.bf16.mxu0 %vm25474_vm2, %v33365_v21 }
 0x72a   : > { %v24189_v37 = vpop.f32.mrf.mxu0  ;;  %24493 = vmatprep.subr.bf16.mxu0 %v33365_v21  ;;  %v14171_v11 = vpop.f32.mrf.mxu1 }
 0x72b   : > { %24482 = vmatpush3.bf16.msra.mxu1 %v31483_v39  ;;  %v31721_v37 = vld [vmem:[%s33025_s5 + $0xb0] sm:$0xff]  }
 0x72c   : > { %v14221_v20 = vpop.f32.mrf.mxu0  ;;  %v24178_v16 = vpop.f32.mrf.mxu1  ;;  %24483 = vmatprep.subr.bf16.mxu1 %v33365_v21 }
 0x72d   : > { %24494 = vmatpush3.bf16.msra.mxu0 %v31581_v53 }
 0x72e   : > { %v24190_v14 = vpop.f32.mrf.mxu0  ;;  %24495 = vmatprep.subr.bf16.mxu0 %v33365_v21 }
 0x72f   : > { %24484 = vmatpush3.bf16.msra.mxu1 %v31496_v28 }
 0x730   : > { %24485 = vmatprep.subr.bf16.mxu1 %v33365_v21 }
 0x731   : > { %24496 = vmatpush3.bf16.msra.mxu0 %v31594_v48 }
 0x732   : > { %24497 = vmatprep.subr.bf16.mxu0 %v33365_v21 }
 0x733   : > { %24486 = vmatpush3.bf16.msra.mxu1 %v31505_v56  ;;  %v15697_v56 = vrot.slane %v15695_v45, 1  ;;  %v31832_v45 = vld [vmem:[%s33025_s5 + $0xd0] sm:$0xff]  }
 0x734   : > { %24503 = vmatprep.subr.bf16.mxu1 %v33365_v21 }
 0x735   : > { %24498 = vmatpush3.bf16.msra.mxu0 %v31603_v12 }
 0x736   : > { %24515 = vmatprep.subr.bf16.mxu0 %v33365_v21  ;;  %v31611_v4 = vpop.f32.mrf.mxu1  ;;  %24488 = vmatmul.mubr.msk.bf16.vlgmr.msra.gmra.mxu1 %vm530_vm1, %v31214_v7 }
 0x737   : > { %24504 = vmatpush3.bf16.msra.mxu1 %v31564_v33  ;;  %24511 = vmatprep.mubr.msk.bf16.mxu1 %vm25474_vm2, %v33365_v21 }
 0x738   : > { %v31613_v18 = vpop.f32.mrf.mxu0  ;;  %24500 = vmatmul.mubr.msk.bf16.vlgmr.msra.gmra.mxu0 %vm530_vm1, %v31157_v57  ;;  %v24201_v17 = vpop.f32.mrf.mxu1  ;;  %24505 = vmatprep.subr.bf16.mxu1 %v33365_v21 }
 0x739   : > { %24516 = vmatpush3.bf16.msra.mxu0 %v31564_v33  ;;  %24523 = vmatprep.mubr.msk.bf16.mxu0 %vm25474_vm2, %v33365_v21 }
 0x73a   : > { %v24213_v2 = vpop.f32.mrf.mxu0  ;;  %24517 = vmatprep.subr.bf16.mxu0 %v33365_v21  ;;  %v14271_v38 = vpop.f32.mrf.mxu1 }
 0x73b   : > { %24506 = vmatpush3.bf16.msra.mxu1 %v31581_v53 }
 0x73c   : > { %v14321_v15 = vpop.f32.mrf.mxu0  ;;  %v24202_v57 = vpop.f32.mrf.mxu1  ;;  %24507 = vmatprep.subr.bf16.mxu1 %v33365_v21 }
 0x73d   : > { %24518 = vmatpush3.bf16.msra.mxu0 %v31581_v53 }
 0x73e   : > { %v24214_v42 = vpop.f32.mrf.mxu0  ;;  %24519 = vmatprep.subr.bf16.mxu0 %v33365_v21 }
 0x73f   : > { %24508 = vmatpush3.bf16.msra.mxu1 %v31594_v48 }
 0x740   : > { %24509 = vmatprep.subr.bf16.mxu1 %v33365_v21 }
 0x741   : > { %24520 = vmatpush3.bf16.msra.mxu0 %v31594_v48 }
 0x742   : > { %24521 = vmatprep.subr.bf16.mxu0 %v33365_v21 }
 0x743   : > { %24510 = vmatpush3.bf16.msra.mxu1 %v31603_v12 }
 0x744   : > { %24527 = vmatprep.subr.bf16.mxu1 %v33365_v21 }
 0x745   : > { %24522 = vmatpush3.bf16.msra.mxu0 %v31603_v12 }
 0x746   : > { %24539 = vmatprep.subr.bf16.mxu0 %v33365_v21  ;;  %v31639_v24 = vpop.f32.mrf.mxu1  ;;  %24512 = vmatmul.mubr.msk.bf16.vlgmr.msra.gmra.mxu1 %vm530_vm1, %v31154_v19 }
 0x747   : > { %24528 = vmatpush3.bf16.msra.mxu1 %v31564_v33  ;;  %24535 = vmatprep.mubr.msk.bf16.mxu1 %vm25474_vm2, %v33365_v21 }
 0x748   : > { %v31641_v32 = vpop.f32.mrf.mxu0  ;;  %24524 = vmatmul.mubr.msk.bf16.vlgmr.msra.gmra.mxu0 %vm530_vm1, %v31204_v40  ;;  %v24225_v46 = vpop.f32.mrf.mxu1  ;;  %24529 = vmatprep.subr.bf16.mxu1 %v33365_v21 }
 0x749   : > { %24540 = vmatpush3.bf16.msra.mxu0 %v31564_v33  ;;  %24547 = vmatprep.mubr.msk.bf16.mxu0 %vm25474_vm2, %v33365_v21 }
 0x74a   : > { %v24237_v47 = vpop.f32.mrf.mxu0  ;;  %24541 = vmatprep.subr.bf16.mxu0 %v33365_v21  ;;  %v14371_v29 = vpop.f32.mrf.mxu1 }
 0x74b   : > { %24530 = vmatpush3.bf16.msra.mxu1 %v31581_v53 }
 0x74c   : > { %v14421_v1 = vpop.f32.mrf.mxu0  ;;  %v24226_v3 = vpop.f32.mrf.mxu1  ;;  %24531 = vmatprep.subr.bf16.mxu1 %v33365_v21 }
 0x74d   : > { %24542 = vmatpush3.bf16.msra.mxu0 %v31581_v53 }
 0x74e   : > { %v24238_v27 = vpop.f32.mrf.mxu0  ;;  %24543 = vmatprep.subr.bf16.mxu0 %v33365_v21 }
 0x74f   : > { %24532 = vmatpush3.bf16.msra.mxu1 %v31594_v48 }
 0x750   : > { %24533 = vmatprep.subr.bf16.mxu1 %v33365_v21 }
 0x751   : > { %24544 = vmatpush3.bf16.msra.mxu0 %v31594_v48 }
 0x752   : > { %24545 = vmatprep.subr.bf16.mxu0 %v33365_v21 }
 0x753   : > { %24534 = vmatpush3.bf16.msra.mxu1 %v31603_v12 }
 0x754   : > { %24551 = vmatprep.subr.bf16.mxu1 %v33365_v21 }
 0x755   : > { %24546 = vmatpush3.bf16.msra.mxu0 %v31603_v12 }
 0x756   : > { %24563 = vmatprep.subr.bf16.mxu0 %v33365_v21  ;;  %v14484_v61 = vpop.f32.mrf.mxu1  ;;  %24536 = vmatmul.mubr.msk.bf16.vlgmr.msra.gmra.mxu1 %vm530_vm1, %v31206_v50 }
 0x757   : > { %v31672_v43 = vadd.f32 %v14484_v61, %v31541_v26  ;;  %24552 = vmatpush3.bf16.msra.mxu1 %v31564_v33  ;;  %24559 = vmatprep.mubr.msk.bf16.mxu1 %vm25474_vm2, %v33365_v21  ;;  %v15693_v26 = vshrl.u32 %v31214_v7, 16 }
 0x758   : > { %v14526_v49 = vpop.f32.mrf.mxu0  ;;  %24548 = vmatmul.mubr.msk.bf16.vlgmr.msra.gmra.mxu0 %vm530_vm1, %v31243_v59  ;;  %v24249_v36 = vpop.f32.mrf.mxu1  ;;  %24553 = vmatprep.subr.bf16.mxu1 %v33365_v21 }
 0x759   : > { %v31675_v22 = vadd.f32 %v14526_v49, %v31574_v6  ;;  %24564 = vmatpush3.bf16.msra.mxu0 %v31564_v33  ;;  %24571 = vmatprep.mubr.msk.bf16.mxu0 %vm25474_vm2, %v33365_v21  ;;  %v31702_v62 = vor.u32 %v15697_v56, %v15693_v26  ;;  %v31845_v26 = vld [vmem:[%s33025_s5 + $0xc8] sm:$0xff]  }
 0x75a   : > { %v24261_v34 = vpop.f32.mrf.mxu0  ;;  %24565 = vmatprep.subr.bf16.mxu0 %v33365_v21  ;;  %v14487_v10 = vpop.f32.mrf.mxu1 }
 0x75b   : > { %24554 = vmatpush3.bf16.msra.mxu1 %v31581_v53 }
 0x75c   : > { %v14529_v5 = vpop.f32.mrf.mxu0  ;;  %v24250_v39 = vpop.f32.mrf.mxu1  ;;  %24555 = vmatprep.subr.bf16.mxu1 %v33365_v21 }
 0x75d   : > { %24566 = vmatpush3.bf16.msra.mxu0 %v31581_v53 }
 0x75e   : > { %v24262_v28 = vpop.f32.mrf.mxu0  ;;  %24567 = vmatprep.subr.bf16.mxu0 %v33365_v21 }
 0x75f   : > { %24556 = vmatpush3.bf16.msra.mxu1 %v31594_v48 }
 0x760   : > { %24557 = vmatprep.subr.bf16.mxu1 %v33365_v21 }
 0x761   : > { %24568 = vmatpush3.bf16.msra.mxu0 %v31594_v48  ;;  %v31734_v48 = vld [vmem:[%s33025_s5 + $0xa8] sm:$0xff]  }
 0x762   : > { %24569 = vmatprep.subr.bf16.mxu0 %v33365_v21 }
 0x763   : > { %24558 = vmatpush3.bf16.msra.mxu1 %v31603_v12 }
 0x764   : > { %24575 = vmatprep.subr.bf16.mxu1 %v33365_v21 }
 0x765   : > { %24570 = vmatpush3.bf16.msra.mxu0 %v31603_v12  ;;  %v31743_v12 = vld [vmem:[%s33025_s5 + $0xa0] sm:$0xff]  }
 0x766   : > { %24587 = vmatprep.subr.bf16.mxu0 %v33365_v21  ;;  %v14568_v23 = vpop.f32.mrf.mxu1  ;;  %24560 = vmatmul.mubr.msk.bf16.vlgmr.msra.gmra.mxu1 %vm530_vm1, %v31245_v8 }
 0x767   : > { %v31711_v6 = vadd.f32 %v14568_v23, %v31568_v35  ;;  %24576 = vmatpush3.bf16.msra.mxu1 %v31700_v60  ;;  %24583 = vmatprep.mubr.msk.bf16.mxu1 %vm25474_vm2, %v33365_v21 }
 0x768   : > { %v14610_v33 = vpop.f32.mrf.mxu0  ;;  %24572 = vmatmul.mubr.msk.bf16.vlgmr.msra.gmra.mxu0 %vm530_vm1, %v31702_v62  ;;  %v24273_v41 = vpop.f32.mrf.mxu1  ;;  %24577 = vmatprep.subr.bf16.mxu1 %v33365_v21 }
 0x769   : > { %v31714_v53 = vadd.f32 %v14610_v33, %v31611_v4  ;;  %24588 = vmatpush3.bf16.msra.mxu0 %v31700_v60  ;;  %24595 = vmatprep.mubr.msk.bf16.mxu0 %vm25474_vm2, %v33365_v21  ;;  %v31854_v33 = vld [vmem:[%s33025_s5 + $0xc0] sm:$0xff]  }
 0x76a   : > { %v24285_v20 = vpop.f32.mrf.mxu0  ;;  %24589 = vmatprep.subr.bf16.mxu0 %v33365_v21  ;;  %v14571_v35 = vpop.f32.mrf.mxu1 }
 0x76b   : > { %24578 = vmatpush3.bf16.msra.mxu1 %v31721_v37 }
 0x76c   : > { %v14613_v11 = vpop.f32.mrf.mxu0  ;;  %v24274_v14 = vpop.f32.mrf.mxu1  ;;  %24579 = vmatprep.subr.bf16.mxu1 %v33365_v21 }
 0x76d   : > { %24590 = vmatpush3.bf16.msra.mxu0 %v31721_v37 }
 0x76e   : > { %v24286_v16 = vpop.f32.mrf.mxu0  ;;  %24591 = vmatprep.subr.bf16.mxu0 %v33365_v21 }
 0x76f   : > { %24580 = vmatpush3.bf16.msra.mxu1 %v31734_v48 }
 0x770   : > { %24581 = vmatprep.subr.bf16.mxu1 %v33365_v21 }
 0x771   : > { %24592 = vmatpush3.bf16.msra.mxu0 %v31734_v48 }
 0x772   : > { %24593 = vmatprep.subr.bf16.mxu0 %v33365_v21 }
 0x773   : > { %24582 = vmatpush3.bf16.msra.mxu1 %v31743_v12 }
 0x774   : > { %24599 = vmatprep.subr.bf16.mxu1 %v33365_v21 }
 0x775   : > { %24594 = vmatpush3.bf16.msra.mxu0 %v31743_v12 }
 0x776   : > { %24611 = vmatprep.subr.bf16.mxu0 %v33365_v21  ;;  %v14652_v4 = vpop.f32.mrf.mxu1  ;;  %24584 = vmatmul.mubr.msk.bf16.vlgmr.msra.gmra.mxu1 %vm530_vm1, %v14821_v58 }
 0x777   : > { %v31757_v2 = vadd.f32 %v14652_v4, %v31613_v18  ;;  %24600 = vmatpush3.bf16.msra.mxu1 %v31700_v60  ;;  %24607 = vmatprep.mubr.msk.bf16.mxu1 %vm25474_vm2, %v33365_v21 }
 0x778   : > { %v14694_v17 = vpop.f32.mrf.mxu0  ;;  %24596 = vmatmul.mubr.msk.bf16.vlgmr.msra.gmra.mxu0 %vm530_vm1, %v31404_v25  ;;  %v24297_v15 = vpop.f32.mrf.mxu1  ;;  %24601 = vmatprep.subr.bf16.mxu1 %v33365_v21 }
 0x779   : > { %v31760_v38 = vadd.f32 %v14694_v17, %v31639_v24  ;;  %24612 = vmatpush3.bf16.msra.mxu0 %v31700_v60  ;;  %24619 = vmatprep.mubr.msk.bf16.mxu0 %vm25474_vm2, %v33365_v21 }
 0x77a   : > { %v24309_v57 = vpop.f32.mrf.mxu0  ;;  %24613 = vmatprep.subr.bf16.mxu0 %v33365_v21  ;;  %v14655_v63 = vpop.f32.mrf.mxu1 }
 0x77b   : > { %24602 = vmatpush3.bf16.msra.mxu1 %v31721_v37 }
 0x77c   : > { %v14697_v58 = vpop.f32.mrf.mxu0  ;;  %v24298_v18 = vpop.f32.mrf.mxu1  ;;  %24603 = vmatprep.subr.bf16.mxu1 %v33365_v21 }
 0x77d   : > { %24614 = vmatpush3.bf16.msra.mxu0 %v31721_v37 }
 0x77e   : > { %v24310_v42 = vpop.f32.mrf.mxu0  ;;  %24615 = vmatprep.subr.bf16.mxu0 %v33365_v21 }
 0x77f   : > { %24604 = vmatpush3.bf16.msra.mxu1 %v31734_v48 }
 0x780   : > { %24605 = vmatprep.subr.bf16.mxu1 %v33365_v21 }
 0x781   : > { %24616 = vmatpush3.bf16.msra.mxu0 %v31734_v48 }
 0x782   : > { %24617 = vmatprep.subr.bf16.mxu0 %v33365_v21 }
 0x783   : > { %24606 = vmatpush3.bf16.msra.mxu1 %v31743_v12 }
 0x784   : > { %24623 = vmatprep.subr.bf16.mxu1 %v33365_v21 }
 0x785   : > { %24618 = vmatpush3.bf16.msra.mxu0 %v31743_v12 }
 0x786   : > { %24635 = vmatprep.subr.bf16.mxu0 %v33365_v21  ;;  %v14736_v24 = vpop.f32.mrf.mxu1  ;;  %24608 = vmatmul.mubr.msk.bf16.vlgmr.msra.gmra.mxu1 %vm530_vm1, %v31432_v31 }
 0x787   : > { %v31787_v47 = vadd.f32 %v14736_v24, %v31641_v32  ;;  %24624 = vmatpush3.bf16.msra.mxu1 %v31700_v60  ;;  %24631 = vmatprep.mubr.msk.bf16.mxu1 %vm25474_vm2, %v33365_v21 }
 0x788   : > { %v14814_v46 = vpop.f32.mrf.mxu0  ;;  %24620 = vmatmul.mubr.msk.bf16.vlgmr.msra.gmra.mxu0 %vm530_vm1, %v31435_v9  ;;  %v24321_v1 = vpop.f32.mrf.mxu1  ;;  %24625 = vmatprep.subr.bf16.mxu1 %v33365_v21 }
 0x789   : > { %v31790_v29 = vadd.f32 %v14814_v46, %v31672_v43  ;;  %24636 = vmatpush3.bf16.msra.mxu0 %v31700_v60  ;;  %24643 = vmatprep.mubr.msk.bf16.mxu0 %vm25474_vm2, %v33365_v21  ;;  %v31813_v43 = vld [vmem:[%s33025_s5 + $0xd8] sm:$0xff]  }
 0x78a   : > { %v24333_v3 = vpop.f32.mrf.mxu0  ;;  %24637 = vmatprep.subr.bf16.mxu0 %v33365_v21  ;;  %v14739_v32 = vpop.f32.mrf.mxu1 }
 0x78b   : > { %24626 = vmatpush3.bf16.msra.mxu1 %v31721_v37  ;;  %v31955_v3 = vld [vmem:[%s33025_s5 + $0xf8] sm:$0xff]  }
 0x78c   : > { %v14817_v27 = vpop.f32.mrf.mxu0  ;;  %v24322_v61 = vpop.f32.mrf.mxu1  ;;  %24627 = vmatprep.subr.bf16.mxu1 %v33365_v21 }
 0x78d   : > { %24638 = vmatpush3.bf16.msra.mxu0 %v31721_v37 }
 0x78e   : > { %v24334_v49 = vpop.f32.mrf.mxu0  ;;  %24639 = vmatprep.subr.bf16.mxu0 %v33365_v21 }
 0x78f   : > { %24628 = vmatpush3.bf16.msra.mxu1 %v31734_v48 }
 0x790   : > { %24629 = vmatprep.subr.bf16.mxu1 %v33365_v21 }
 0x791   : > { %24640 = vmatpush3.bf16.msra.mxu0 %v31734_v48 }
 0x792   : > { %24641 = vmatprep.subr.bf16.mxu0 %v33365_v21 }
 0x793   : > { %24630 = vmatpush3.bf16.msra.mxu1 %v31743_v12 }
 0x794   : > { %24647 = vmatprep.subr.bf16.mxu1 %v33365_v21 }
 0x795   : > { %24642 = vmatpush3.bf16.msra.mxu0 %v31743_v12 }
 0x796   : > { %24659 = vmatprep.subr.bf16.mxu0 %v33365_v21  ;;  %v14859_v36 = vpop.f32.mrf.mxu1  ;;  %24632 = vmatmul.mubr.msk.bf16.vlgmr.msra.gmra.mxu1 %vm530_vm1, %v31467_v30 }
 0x797   : > { %v31822_v10 = vadd.f32 %v14859_v36, %v31675_v22  ;;  %24648 = vmatpush3.bf16.msra.mxu1 %v31700_v60  ;;  %24655 = vmatprep.mubr.msk.bf16.mxu1 %vm25474_vm2, %v33365_v21 }
 0x798   : > { %v14904_v34 = vpop.f32.mrf.mxu0  ;;  %24644 = vmatmul.mubr.msk.bf16.vlgmr.msra.gmra.mxu0 %vm530_vm1, %v31470_v55  ;;  %v24345_v39 = vpop.f32.mrf.mxu1  ;;  %24649 = vmatprep.subr.bf16.mxu1 %v33365_v21 }
 0x799   : > { %v31825_v5 = vadd.f32 %v14904_v34, %v31711_v6  ;;  %24660 = vmatpush3.bf16.msra.mxu0 %v31813_v43  ;;  %24667 = vmatprep.mubr.msk.bf16.mxu0 %vm25474_vm2, %v33365_v21  ;;  %v16023_v6 = vrot.slane %v31214_v7, 1 }
 0x79a   : > { %v24357_v28 = vpop.f32.mrf.mxu0  ;;  %24661 = vmatprep.subr.bf16.mxu0 %v33365_v21  ;;  %v14862_v22 = vpop.f32.mrf.mxu1 }
 0x79b   : > { %24650 = vmatpush3.bf16.msra.mxu1 %v31721_v37  ;;  %v31996_v22 = vld [vmem:[%s33025_s5 + $0xe0] sm:$0xff]  }
 0x79c   : > { %v14907_v56 = vpop.f32.mrf.mxu0  ;;  %v24346_v60 = vpop.f32.mrf.mxu1  ;;  %24651 = vmatprep.subr.bf16.mxu1 %v33365_v21 }
 0x79d   : > { %24662 = vmatpush3.bf16.msra.mxu0 %v31832_v45 }
 0x79e   : > { %v24358_v23 = vpop.f32.mrf.mxu0  ;;  %24663 = vmatprep.subr.bf16.mxu0 %v33365_v21 }
 0x79f   : > { %24652 = vmatpush3.bf16.msra.mxu1 %v31734_v48 }
 0x7a0   : > { %24653 = vmatprep.subr.bf16.mxu1 %v33365_v21 }
 0x7a1   : > { %24664 = vmatpush3.bf16.msra.mxu0 %v31845_v26 }
 0x7a2   : > { %24665 = vmatprep.subr.bf16.mxu0 %v33365_v21 }
 0x7a3   : > { %24654 = vmatpush3.bf16.msra.mxu1 %v31743_v12 }
 0x7a4   : > { %24671 = vmatprep.subr.bf16.mxu1 %v33365_v21 }
 0x7a5   : > { %24666 = vmatpush3.bf16.msra.mxu0 %v31854_v33 }
 0x7a6   : > { %24683 = vmatprep.subr.bf16.mxu0 %v33365_v21  ;;  %v14949_v37 = vpop.f32.mrf.mxu1  ;;  %24656 = vmatmul.mubr.msk.bf16.vlgmr.msra.gmra.mxu1 %vm530_vm1, %v16023_v6 }
 0x7a7   : > { %v31869_v20 = vadd.f32 %v14949_v37, %v31714_v53  ;;  %24672 = vmatpush3.bf16.msra.mxu1 %v31813_v43  ;;  %24679 = vmatprep.mubr.msk.bf16.mxu1 %vm25474_vm2, %v33365_v21 }
 0x7a8   : > { %v14994_v41 = vpop.f32.mrf.mxu0  ;;  %24668 = vmatmul.mubr.msk.bf16.vlgmr.msra.gmra.mxu0 %vm530_vm1, %v31117_v51  ;;  %v24369_v11 = vpop.f32.mrf.mxu1  ;;  %24673 = vmatprep.subr.bf16.mxu1 %v33365_v21 }
 0x7a9   : > { %v31872_v35 = vadd.f32 %v14994_v41, %v31757_v2  ;;  %24684 = vmatpush3.bf16.msra.mxu0 %v31813_v43  ;;  %24691 = vmatprep.mubr.msk.bf16.mxu0 %vm25474_vm2, %v33365_v21 }
 0x7aa   : > { %v24381_v48 = vpop.f32.mrf.mxu0  ;;  %24685 = vmatprep.subr.bf16.mxu0 %v33365_v21  ;;  %v14952_v51 = vpop.f32.mrf.mxu1 }
 0x7ab   : > { %24674 = vmatpush3.bf16.msra.mxu1 %v31832_v45 }
 0x7ac   : > { %v14997_v53 = vpop.f32.mrf.mxu0  ;;  %v24370_v14 = vpop.f32.mrf.mxu1  ;;  %24675 = vmatprep.subr.bf16.mxu1 %v33365_v21 }
 0x7ad   : > { %24686 = vmatpush3.bf16.msra.mxu0 %v31832_v45 }
 0x7ae   : > { %v24382_v16 = vpop.f32.mrf.mxu0  ;;  %24687 = vmatprep.subr.bf16.mxu0 %v33365_v21 }
 0x7af   : > { %24676 = vmatpush3.bf16.msra.mxu1 %v31845_v26 }
 0x7b0   : > { %24677 = vmatprep.subr.bf16.mxu1 %v33365_v21 }
 0x7b1   : > { %24688 = vmatpush3.bf16.msra.mxu0 %v31845_v26 }
 0x7b2   : > { %24689 = vmatprep.subr.bf16.mxu0 %v33365_v21 }
 0x7b3   : > { %24678 = vmatpush3.bf16.msra.mxu1 %v31854_v33 }
 0x7b4   : > { %24695 = vmatprep.subr.bf16.mxu1 %v33365_v21 }
 0x7b5   : > { %24690 = vmatpush3.bf16.msra.mxu0 %v31854_v33 }
 0x7b6   : > { %24707 = vmatprep.subr.bf16.mxu0 %v33365_v21  ;;  %v15039_v12 = vpop.f32.mrf.mxu1  ;;  %24680 = vmatmul.mubr.msk.bf16.vlgmr.msra.gmra.mxu1 %vm530_vm1, %v31166_v54 }
 0x7b7   : > { %v31899_v17 = vadd.f32 %v15039_v12, %v31760_v38  ;;  %24696 = vmatpush3.bf16.msra.mxu1 %v31813_v43  ;;  %24703 = vmatprep.mubr.msk.bf16.mxu1 %vm25474_vm2, %v33365_v21 }
 0x7b8   : > { %v15084_v4 = vpop.f32.mrf.mxu0  ;;  %24692 = vmatmul.mubr.msk.bf16.vlgmr.msra.gmra.mxu0 %vm530_vm1, %v31136_v44  ;;  %v24393_v15 = vpop.f32.mrf.mxu1  ;;  %24697 = vmatprep.subr.bf16.mxu1 %v33365_v21 }
 0x7b9   : > { %v31902_v2 = vadd.f32 %v15084_v4, %v31787_v47  ;;  %24708 = vmatpush3.bf16.msra.mxu0 %v31813_v43  ;;  %24715 = vmatprep.mubr.msk.bf16.mxu0 %vm25474_vm2, %v33365_v21  ;;  %v32065_v4 = vld [vmem:[%s33025_s5 + $0x118] sm:$0xff]  }
 0x7ba   : > { %v24405_v57 = vpop.f32.mrf.mxu0  ;;  %24709 = vmatprep.subr.bf16.mxu0 %v33365_v21  ;;  %v15042_v44 = vpop.f32.mrf.mxu1 }
 0x7bb   : > { %24698 = vmatpush3.bf16.msra.mxu1 %v31832_v45  ;;  %v32084_v44 = vld [vmem:[%s33025_s5 + $0x110] sm:$0xff]  }
 0x7bc   : > { %v15087_v54 = vpop.f32.mrf.mxu0  ;;  %v24394_v38 = vpop.f32.mrf.mxu1  ;;  %24699 = vmatprep.subr.bf16.mxu1 %v33365_v21 }
 0x7bd   : > { %24710 = vmatpush3.bf16.msra.mxu0 %v31832_v45 }
 0x7be   : > { %v24406_v63 = vpop.f32.mrf.mxu0  ;;  %24711 = vmatprep.subr.bf16.mxu0 %v33365_v21 }
 0x7bf   : > { %24700 = vmatpush3.bf16.msra.mxu1 %v31845_v26  ;;  %v32097_v63 = vld [vmem:[%s33025_s5 + $0x108] sm:$0xff]  }
 0x7c0   : > { %24701 = vmatprep.subr.bf16.mxu1 %v33365_v21 }
 0x7c1   : > { %24712 = vmatpush3.bf16.msra.mxu0 %v31845_v26 }
 0x7c2   : > { %24713 = vmatprep.subr.bf16.mxu0 %v33365_v21 }
 0x7c3   : > { %24702 = vmatpush3.bf16.msra.mxu1 %v31854_v33 }
 0x7c4   : > { %24719 = vmatprep.subr.bf16.mxu1 %v33365_v21 }
 0x7c5   : > { %24714 = vmatpush3.bf16.msra.mxu0 %v31854_v33 }
 0x7c6   : > { %24731 = vmatprep.subr.bf16.mxu0 %v33365_v21  ;;  %v15164_v58 = vpop.f32.mrf.mxu1  ;;  %24704 = vmatmul.mubr.msk.bf16.vlgmr.msra.gmra.mxu1 %vm530_vm1, %v31189_v52 }
 0x7c7   : > { %v31929_v42 = vadd.f32 %v15164_v58, %v31790_v29  ;;  %24720 = vmatpush3.bf16.msra.mxu1 %v31813_v43  ;;  %24727 = vmatprep.mubr.msk.bf16.mxu1 %vm25474_vm2, %v33365_v21  ;;  %v16672_v58 = vshll.u32 %v31191_v13, 16 }
 0x7c8   : > { %v15204_v18 = vpop.f32.mrf.mxu0  ;;  %24716 = vmatmul.mubr.msk.bf16.vlgmr.msra.gmra.mxu0 %vm530_vm1, %v31168_v0  ;;  %v24417_v46 = vpop.f32.mrf.mxu1  ;;  %24721 = vmatprep.subr.bf16.mxu1 %v33365_v21 }
 0x7c9   : > { %v31932_v24 = vadd.f32 %v15204_v18, %v31822_v10  ;;  %24732 = vmatpush3.bf16.msra.mxu0 %v31813_v43  ;;  %24739 = vmatprep.mubr.msk.bf16.mxu0 %vm25474_vm2, %v33365_v21  ;;  %v31974_v43 = vld [vmem:[%s33025_s5 + $0xf0] sm:$0xff]   ;;  %v16674_v46 = vrot.slane %v16672_v58, 1 }
 0x7ca   : > { %v24429_v47 = vpop.f32.mrf.mxu0  ;;  %24733 = vmatprep.subr.bf16.mxu0 %v33365_v21  ;;  %v15167_v0 = vpop.f32.mrf.mxu1 }
 0x7cb   : > { %24722 = vmatpush3.bf16.msra.mxu1 %v31832_v45  ;;  %v16670_v47 = vshrl.u32 %v31191_v13, 16 }
 0x7cc   : > { %v15207_v52 = vpop.f32.mrf.mxu0  ;;  %v24418_v29 = vpop.f32.mrf.mxu1  ;;  %24723 = vmatprep.subr.bf16.mxu1 %v33365_v21 }
 0x7cd   : > { %24734 = vmatpush3.bf16.msra.mxu0 %v31832_v45  ;;  %v31987_v45 = vld [vmem:[%s33025_s5 + $0xe8] sm:$0xff]   ;;  %v16675_v0 = vor.u32 %v16674_v46, %v16670_v47 }
 0x7ce   : > { %v24430_v1 = vpop.f32.mrf.mxu0  ;;  %24735 = vmatprep.subr.bf16.mxu0 %v33365_v21 }
 0x7cf   : > { %24724 = vmatpush3.bf16.msra.mxu1 %v31845_v26 }
 0x7d0   : > { %24725 = vmatprep.subr.bf16.mxu1 %v33365_v21 }
 0x7d1   : > { %24736 = vmatpush3.bf16.msra.mxu0 %v31845_v26 }
 0x7d2   : > { %24737 = vmatprep.subr.bf16.mxu0 %v33365_v21 }
 0x7d3   : > { %24726 = vmatpush3.bf16.msra.mxu1 %v31854_v33 }
 0x7d4   : > { %24743 = vmatprep.subr.bf16.mxu1 %v33365_v21 }
 0x7d5   : > { %24738 = vmatpush3.bf16.msra.mxu0 %v31854_v33 }
 0x7d6   : > { %24755 = vmatprep.subr.bf16.mxu0 %v33365_v21  ;;  %v15244_v32 = vpop.f32.mrf.mxu1  ;;  %24728 = vmatmul.mubr.msk.bf16.vlgmr.msra.gmra.mxu1 %vm530_vm1, %v31214_v7 }
 0x7d7   : > { %v31964_v61 = vadd.f32 %v15244_v32, %v31825_v5  ;;  %24744 = vmatpush3.bf16.msra.mxu1 %v31955_v3  ;;  %24751 = vmatprep.mubr.msk.bf16.mxu1 %vm25474_vm2, %v33365_v21 }
 0x7d8   : > { %v15284_v27 = vpop.f32.mrf.mxu0  ;;  %24740 = vmatmul.mubr.msk.bf16.vlgmr.msra.gmra.mxu0 %vm530_vm1, %v31191_v13  ;;  %v24441_v36 = vpop.f32.mrf.mxu1  ;;  %24745 = vmatprep.subr.bf16.mxu1 %v33365_v21 }
 0x7d9   : > { %v31967_v49 = vadd.f32 %v15284_v27, %v31869_v20  ;;  %24756 = vmatpush3.bf16.msra.mxu0 %v31955_v3  ;;  %24763 = vmatprep.mubr.msk.bf16.mxu0 %vm25474_vm2, %v33365_v21 }
 0x7da   : > { %v24453_v34 = vpop.f32.mrf.mxu0  ;;  %24757 = vmatprep.subr.bf16.mxu0 %v33365_v21  ;;  %v15247_v10 = vpop.f32.mrf.mxu1 }
 0x7db   : > { %24746 = vmatpush3.bf16.msra.mxu1 %v31974_v43 }
 0x7dc   : > { %v15287_v5 = vpop.f32.mrf.mxu0  ;;  %v24442_v39 = vpop.f32.mrf.mxu1  ;;  %24747 = vmatprep.subr.bf16.mxu1 %v33365_v21 }
 0x7dd   : > { %24758 = vmatpush3.bf16.msra.mxu0 %v31974_v43 }
 0x7de   : > { %v24454_v28 = vpop.f32.mrf.mxu0  ;;  %24759 = vmatprep.subr.bf16.mxu0 %v33365_v21 }
 0x7df   : > { %24748 = vmatpush3.bf16.msra.mxu1 %v31987_v45 }
 0x7e0   : > { %24749 = vmatprep.subr.bf16.mxu1 %v33365_v21 }
 0x7e1   : > { %24760 = vmatpush3.bf16.msra.mxu0 %v31987_v45 }
 0x7e2   : > { %24761 = vmatprep.subr.bf16.mxu0 %v33365_v21 }
 0x7e3   : > { %24750 = vmatpush3.bf16.msra.mxu1 %v31996_v22 }
 0x7e4   : > { %24767 = vmatprep.subr.bf16.mxu1 %v33365_v21 }
 0x7e5   : > { %24762 = vmatpush3.bf16.msra.mxu0 %v31996_v22 }
 0x7e6   : > { %24779 = vmatprep.subr.bf16.mxu0 %v33365_v21  ;;  %v15324_v56 = vpop.f32.mrf.mxu1  ;;  %24752 = vmatmul.mubr.msk.bf16.vlgmr.msra.gmra.mxu1 %vm530_vm1, %v31154_v19 }
 0x7e7   : > { %v32009_v60 = vadd.f32 %v15324_v56, %v31872_v35  ;;  %24768 = vmatpush3.bf16.msra.mxu1 %v31955_v3  ;;  %24775 = vmatprep.mubr.msk.bf16.mxu1 %vm25474_vm2, %v33365_v21 }
 0x7e8   : > { %v15364_v26 = vpop.f32.mrf.mxu0  ;;  %24764 = vmatmul.mubr.msk.bf16.vlgmr.msra.gmra.mxu0 %vm530_vm1, %v31204_v40  ;;  %v24465_v33 = vpop.f32.mrf.mxu1  ;;  %24769 = vmatprep.subr.bf16.mxu1 %v33365_v21 }
 0x7e9   : > { %v32012_v23 = vadd.f32 %v15364_v26, %v31899_v17  ;;  %24780 = vmatpush3.bf16.msra.mxu0 %v31955_v3  ;;  %24787 = vmatprep.mubr.msk.bf16.mxu0 %vm25474_vm2, %v33365_v21 }
 0x7ea   : > { %v24477_v37 = vpop.f32.mrf.mxu0  ;;  %24781 = vmatprep.subr.bf16.mxu0 %v33365_v21  ;;  %v15327_v19 = vpop.f32.mrf.mxu1 }
 0x7eb   : > { %24770 = vmatpush3.bf16.msra.mxu1 %v31974_v43 }
 0x7ec   : > { %v15367_v40 = vpop.f32.mrf.mxu0  ;;  %v24466_v41 = vpop.f32.mrf.mxu1  ;;  %24771 = vmatprep.subr.bf16.mxu1 %v33365_v21 }
 0x7ed   : > { %24782 = vmatpush3.bf16.msra.mxu0 %v31974_v43  ;;  %v17000_v41 = vrot.slane %v31191_v13, 1 }
 0x7ee   : > { %v24478_v20 = vpop.f32.mrf.mxu0  ;;  %24783 = vmatprep.subr.bf16.mxu0 %v33365_v21 }
 0x7ef   : > { %24772 = vmatpush3.bf16.msra.mxu1 %v31987_v45 }
 0x7f0   : > { %24773 = vmatprep.subr.bf16.mxu1 %v33365_v21 }
 0x7f1   : > { %24784 = vmatpush3.bf16.msra.mxu0 %v31987_v45 }
 0x7f2   : > { %24785 = vmatprep.subr.bf16.mxu0 %v33365_v21 }
 0x7f3   : > { %24774 = vmatpush3.bf16.msra.mxu1 %v31996_v22 }
 0x7f4   : > { %24791 = vmatprep.subr.bf16.mxu1 %v33365_v21 }
 0x7f5   : > { %24786 = vmatpush3.bf16.msra.mxu0 %v31996_v22 }
 0x7f6   : > { %24803 = vmatprep.subr.bf16.mxu0 %v33365_v21  ;;  %v15407_v35 = vpop.f32.mrf.mxu1  ;;  %24776 = vmatmul.mubr.msk.bf16.vlgmr.msra.gmra.mxu1 %vm530_vm1, %v31206_v50 }
 0x7f7   : > { %v32039_v48 = vadd.f32 %v15407_v35, %v31902_v2  ;;  %24792 = vmatpush3.bf16.msra.mxu1 %v31955_v3  ;;  %24799 = vmatprep.mubr.msk.bf16.mxu1 %vm25474_vm2, %v33365_v21 }
 0x7f8   : > { %v15487_v11 = vpop.f32.mrf.mxu0  ;;  %24788 = vmatmul.mubr.msk.bf16.vlgmr.msra.gmra.mxu0 %vm530_vm1, %v31243_v59  ;;  %v24489_v53 = vpop.f32.mrf.mxu1  ;;  %24793 = vmatprep.subr.bf16.mxu1 %v33365_v21 }
 0x7f9   : > { %v32042_v51 = vadd.f32 %v15487_v11, %v31929_v42  ;;  %24804 = vmatpush3.bf16.msra.mxu0 %v31955_v3  ;;  %24811 = vmatprep.mubr.msk.bf16.mxu0 %vm25474_vm2, %v33365_v21 }
 0x7fa   : > { %v24501_v14 = vpop.f32.mrf.mxu0  ;;  %24805 = vmatprep.subr.bf16.mxu0 %v33365_v21  ;;  %v15410_v50 = vpop.f32.mrf.mxu1 }
 0x7fb   : > { %24794 = vmatpush3.bf16.msra.mxu1 %v31974_v43 }
 0x7fc   : > { %v15490_v59 = vpop.f32.mrf.mxu0  ;;  %v24490_v16 = vpop.f32.mrf.mxu1  ;;  %24795 = vmatprep.subr.bf16.mxu1 %v33365_v21 }
 0x7fd   : > { %24806 = vmatpush3.bf16.msra.mxu0 %v31974_v43 }
 0x7fe   : > { %v24502_v12 = vpop.f32.mrf.mxu0  ;;  %24807 = vmatprep.subr.bf16.mxu0 %v33365_v21 }
 0x7ff   : > { %24796 = vmatpush3.bf16.msra.mxu1 %v31987_v45 }
 0x800   : > { %24797 = vmatprep.subr.bf16.mxu1 %v33365_v21 }
 0x801   : > { %24808 = vmatpush3.bf16.msra.mxu0 %v31987_v45 }
 0x802   : > { %24809 = vmatprep.subr.bf16.mxu0 %v33365_v21 }
 0x803   : > { %24798 = vmatpush3.bf16.msra.mxu1 %v31996_v22 }
 0x804   : > { %24815 = vmatprep.subr.bf16.mxu1 %v33365_v21 }
 0x805   : > { %24810 = vmatpush3.bf16.msra.mxu0 %v31996_v22 }
 0x806   : > { %24827 = vmatprep.subr.bf16.mxu0 %v33365_v21  ;;  %v15527_v17 = vpop.f32.mrf.mxu1  ;;  %24800 = vmatmul.mubr.msk.bf16.vlgmr.msra.gmra.mxu1 %vm530_vm1, %v31245_v8 }
 0x807   : > { %v32074_v15 = vadd.f32 %v15527_v17, %v31932_v24  ;;  %24816 = vmatpush3.bf16.msra.mxu1 %v31955_v3  ;;  %24823 = vmatprep.mubr.msk.bf16.mxu1 %vm25474_vm2, %v33365_v21  ;;  %v32107_v24 = vld [vmem:[%s33025_s5 + $0x100] sm:$0xff]  }
 0x808   : > { %v15567_v2 = vpop.f32.mrf.mxu0  ;;  %24812 = vmatmul.mubr.msk.bf16.vlgmr.msra.gmra.mxu0 %vm530_vm1, %v31702_v62  ;;  %v24513_v54 = vpop.f32.mrf.mxu1  ;;  %24817 = vmatprep.subr.bf16.mxu1 %v33365_v21 }
 0x809   : > { %v32077_v57 = vadd.f32 %v15567_v2, %v31964_v61  ;;  %24828 = vmatpush3.bf16.msra.mxu0 %v32065_v4  ;;  %24835 = vmatprep.mubr.msk.bf16.mxu0 %vm25474_vm2, %v33365_v21 }
 0x80a   : > { %v24525_v8 = vpop.f32.mrf.mxu0  ;;  %24829 = vmatprep.subr.bf16.mxu0 %v33365_v21  ;;  %v15530_v62 = vpop.f32.mrf.mxu1 }
 0x80b   : > { %24818 = vmatpush3.bf16.msra.mxu1 %v31974_v43 }
 0x80c   : > { %v15570_v38 = vpop.f32.mrf.mxu0  ;;  %v24514_v18 = vpop.f32.mrf.mxu1  ;;  %24819 = vmatprep.subr.bf16.mxu1 %v33365_v21 }
 0x80d   : > { %24830 = vmatpush3.bf16.msra.mxu0 %v32084_v44 }
 0x80e   : > { %v24526_v42 = vpop.f32.mrf.mxu0  ;;  %24831 = vmatprep.subr.bf16.mxu0 %v33365_v21 }
 0x80f   : > { %24820 = vmatpush3.bf16.msra.mxu1 %v31987_v45 }
 0x810   : > { %24821 = vmatprep.subr.bf16.mxu1 %v33365_v21 }
 0x811   : > { %24832 = vmatpush3.bf16.msra.mxu0 %v32097_v63 }
 0x812   : > { %24833 = vmatprep.subr.bf16.mxu0 %v33365_v21 }
 0x813   : > { %24822 = vmatpush3.bf16.msra.mxu1 %v31996_v22 }
 0x814   : > { %24839 = vmatprep.subr.bf16.mxu1 %v33365_v21 }
 0x815   : > { %24834 = vmatpush3.bf16.msra.mxu0 %v32107_v24 }
 0x816   : > { %24851 = vmatprep.subr.bf16.mxu0 %v33365_v21  ;;  %v15607_v52 = vpop.f32.mrf.mxu1  ;;  %24824 = vmatmul.mubr.msk.bf16.vlgmr.msra.gmra.mxu1 %vm530_vm1, %v16675_v0 }
 0x817   : > { %v32120_v1 = vadd.f32 %v15607_v52, %v31967_v49  ;;  %24840 = vmatpush3.bf16.msra.mxu1 %v32065_v4  ;;  %24847 = vmatprep.mubr.msk.bf16.mxu1 %vm25474_vm2, %v33365_v21 }
 0x818   : > { %v15647_v29 = vpop.f32.mrf.mxu0  ;;  %24836 = vmatmul.mubr.msk.bf16.vlgmr.msra.gmra.mxu0 %vm530_vm1, %v31404_v25  ;;  %v24537_v32 = vpop.f32.mrf.mxu1  ;;  %24841 = vmatprep.subr.bf16.mxu1 %v33365_v21 }
 0x819   : > { %v32123_v3 = vadd.f32 %v15647_v29, %v32009_v60  ;;  %24852 = vmatpush3.bf16.msra.mxu0 %v32065_v4  ;;  %24859 = vmatprep.mubr.msk.bf16.mxu0 %vm25474_vm2, %v33365_v21 }
 0x81a   : > { %v24549_v27 = vpop.f32.mrf.mxu0  ;;  %24853 = vmatprep.subr.bf16.mxu0 %v33365_v21  ;;  %v15610_v25 = vpop.f32.mrf.mxu1 }
 0x81b   : > { %24842 = vmatpush3.bf16.msra.mxu1 %v32084_v44 }
 0x81c   : > { %v15650_v61 = vpop.f32.mrf.mxu0  ;;  %v24538_v49 = vpop.f32.mrf.mxu1  ;;  %24843 = vmatprep.subr.bf16.mxu1 %v33365_v21 }
 0x81d   : > { %24854 = vmatpush3.bf16.msra.mxu0 %v32084_v44 }
 0x81e   : > { %v24550_v43 = vpop.f32.mrf.mxu0  ;;  %24855 = vmatprep.subr.bf16.mxu0 %v33365_v21 }
 0x81f   : > { %24844 = vmatpush3.bf16.msra.mxu1 %v32097_v63 }
 0x820   : > { %24845 = vmatprep.subr.bf16.mxu1 %v33365_v21 }
 0x821   : > { %24856 = vmatpush3.bf16.msra.mxu0 %v32097_v63 }
 0x822   : > { %24857 = vmatprep.subr.bf16.mxu0 %v33365_v21 }
 0x823   : > { %24846 = vmatpush3.bf16.msra.mxu1 %v32107_v24 }
 0x824   : > { %24863 = vmatprep.subr.bf16.mxu1 %v33365_v21 }
 0x825   : > { %24858 = vmatpush3.bf16.msra.mxu0 %v32107_v24 }
 0x826   : > { %24875 = vmatprep.subr.bf16.mxu0 %v33365_v21  ;;  %v15687_v36 = vpop.f32.mrf.mxu1  ;;  %24848 = vmatmul.mubr.msk.bf16.vlgmr.msra.gmra.mxu1 %vm530_vm1, %v31432_v31 }
 0x827   : > { %v32150_v10 = vadd.f32 %v15687_v36, %v32012_v23  ;;  %24864 = vmatpush3.bf16.msra.mxu1 %v32065_v4  ;;  %24871 = vmatprep.mubr.msk.bf16.mxu1 %vm25474_vm2, %v33365_v21 }
 0x828   : > { %v15736_v34 = vpop.f32.mrf.mxu0  ;;  %24860 = vmatmul.mubr.msk.bf16.vlgmr.msra.gmra.mxu0 %vm530_vm1, %v31435_v9  ;;  %v24561_v45 = vpop.f32.mrf.mxu1  ;;  %24865 = vmatprep.subr.bf16.mxu1 %v33365_v21 }
 0x829   : > { %v32153_v5 = vadd.f32 %v15736_v34, %v32039_v48  ;;  %24876 = vmatpush3.bf16.msra.mxu0 %v32065_v4  ;;  %24883 = vmatprep.mubr.msk.bf16.mxu0 %vm25474_vm2, %v33365_v21 }
 0x82a   : > { %v24573_v39 = vpop.f32.mrf.mxu0  ;;  %24877 = vmatprep.subr.bf16.mxu0 %v33365_v21  ;;  %v15690_v31 = vpop.f32.mrf.mxu1 }
 0x82b   : > { %24866 = vmatpush3.bf16.msra.mxu1 %v32084_v44 }
 0x82c   : > { %v15739_v9 = vpop.f32.mrf.mxu0  ;;  %v24562_v28 = vpop.f32.mrf.mxu1  ;;  %24867 = vmatprep.subr.bf16.mxu1 %v33365_v21 }
 0x82d   : > { %24878 = vmatpush3.bf16.msra.mxu0 %v32084_v44 }
 0x82e   : > { %v24574_v22 = vpop.f32.mrf.mxu0  ;;  %24879 = vmatprep.subr.bf16.mxu0 %v33365_v21 }
 0x82f   : > { %24868 = vmatpush3.bf16.msra.mxu1 %v32097_v63 }
 0x830   : > { %24869 = vmatprep.subr.bf16.mxu1 %v33365_v21 }
 0x831   : > { %24880 = vmatpush3.bf16.msra.mxu0 %v32097_v63 }
 0x832   : > { %24881 = vmatprep.subr.bf16.mxu0 %v33365_v21 }
 0x833   : > { %24870 = vmatpush3.bf16.msra.mxu1 %v32107_v24 }
 0x834   : > { %24887 = vmatprep.subr.bf16.mxu1 %v33365_v21 }
 0x835   : > { %24882 = vmatpush3.bf16.msra.mxu0 %v32107_v24 }
 0x836   : > { %24899 = vmatprep.subr.bf16.mxu0 %v33365_v21  ;;  %v15816_v56 = vpop.f32.mrf.mxu1  ;;  %24872 = vmatmul.mubr.msk.bf16.vlgmr.msra.gmra.mxu1 %vm530_vm1, %v31467_v30 }
 0x837   : > { %v16067_v60 = vadd.f32 %v15816_v56, %v32042_v51  ;;  %24888 = vmatpush3.bf16.msra.mxu1 %v32065_v4  ;;  %24895 = vmatprep.mubr.msk.bf16.mxu1 %vm25474_vm2, %v33365_v21 }
 0x838   : > { %v15856_v26 = vpop.f32.mrf.mxu0  ;;  %24884 = vmatmul.mubr.msk.bf16.vlgmr.msra.gmra.mxu0 %vm530_vm1, %v31470_v55  ;;  %v24585_v33 = vpop.f32.mrf.mxu1  ;;  %24889 = vmatprep.subr.bf16.mxu1 %v33365_v21 }
 0x839   : > { %v16068_v23 = vadd.f32 %v15856_v26, %v32074_v15  ;;  %24900 = vmatpush3.bf16.msra.mxu0 %v32065_v4  ;;  %24907 = vmatprep.mubr.msk.bf16.mxu0 %vm25474_vm2, %v33365_v21 }
 0x83a   : > { %v24597_v37 = vpop.f32.mrf.mxu0  ;;  %24901 = vmatprep.subr.bf16.mxu0 %v33365_v21  ;;  %v15819_v30 = vpop.f32.mrf.mxu1 }
 0x83b   : > { %24890 = vmatpush3.bf16.msra.mxu1 %v32084_v44 }
 0x83c   : > { %v15859_v55 = vpop.f32.mrf.mxu0  ;;  %v24586_v19 = vpop.f32.mrf.mxu1  ;;  %24891 = vmatprep.subr.bf16.mxu1 %v33365_v21 }
 0x83d   : > { %24902 = vmatpush3.bf16.msra.mxu0 %v32084_v44  ;;  %v25178_v19 = vld [vmem:[%s33027_s7 + $0x78] sm:$0xff]  }
 0x83e   : > { %v24598_v40 = vpop.f32.mrf.mxu0  ;;  %24903 = vmatprep.subr.bf16.mxu0 %v33365_v21 }
 0x83f   : > { %24892 = vmatpush3.bf16.msra.mxu1 %v32097_v63  ;;  %v25179_v40 = vld [vmem:[%s33027_s7 + $0x38] sm:$0xff]  }
 0x840   : > { %24893 = vmatprep.subr.bf16.mxu1 %v33365_v21 }
 0x841   : > { %24904 = vmatpush3.bf16.msra.mxu0 %v32097_v63 }
 0x842   : > { %24905 = vmatprep.subr.bf16.mxu0 %v33365_v21 }
 0x843   : > { %24894 = vmatpush3.bf16.msra.mxu1 %v32107_v24 }
 0x844   : > { %21771 = vmatprep.subr.bf16.mxu1 %v25178_v19 }
 0x845   : > { %24906 = vmatpush3.bf16.msra.mxu0 %v32107_v24 }
 0x846   : > { %v15896_v20 = vpop.f32.mrf.mxu1  ;;  %24896 = vmatmul.mubr.msk.bf16.vlgmr.msra.gmra.mxu1 %vm530_vm1, %v16023_v6 }
 0x847   : > { %v16069_v11 = vadd.f32 %v15896_v20, %v32077_v57  ;;  %v25185_v20 = vld [vmem:[%s33027_s7 + $0xf8] sm:$0xff]   ;;  %21772 = vmatpush3.bf16.msra.mxu1 %v25179_v40 }
 0x848   : > { %v15936_v35 = vpop.f32.mrf.mxu0  ;;  %24908 = vmatmul.mubr.msk.bf16.vlgmr.msra.gmra.mxu0 %vm530_vm1, %v17000_v41  ;;  %v24609_v51 = vpop.f32.mrf.mxu1  ;;  %v25180_v41 = vld [vmem:[%s33027_s7 + $0x70] sm:$0xff]   ;;  %21793 = vmatprep.subr.bf16.mxu0 %v25185_v20 }
 0x849   : > { %v16070_v48 = vadd.f32 %v15936_v35, %v32120_v1  ;;  %v25181_v35 = vld [vmem:[%s33027_s7 + $0x30] sm:$0xff]   ;;  %21773 = vmatprep.subr.bf16.mxu1 %v25180_v41  ;;  %v25182_v51 = vld [vmem:[%s33027_s7 + $0x68] sm:$0xff]  }
 0x84a   : > { %v24621_v53 = vpop.f32.mrf.mxu0  ;;  %v15899_v14 = vpop.f32.mrf.mxu1  ;;  %v25204_v20 = vld [vmem:[%s33027_s7 + $0xd0] sm:$0xff]  }
 0x84b   : > { %v25191_v53 = vld [vmem:[%s33027_s7 + $0xb0] sm:$0xff]   ;;  %v25193_v14 = vld [vmem:[%s33027_s7 + $0xe8] sm:$0xff]   ;;  %21774 = vmatpush3.bf16.msra.mxu1 %v25181_v35  ;;  %v25205_v35 = vld [vmem:[%s33027_s7 + $0x178] sm:$0xff]  }
 0x84c   : > { %v15939_v50 = vpop.f32.mrf.mxu0  ;;  %v24610_v59 = vpop.f32.mrf.mxu1  ;;  %21775 = vmatprep.subr.bf16.mxu1 %v25182_v51 }
 0x84d   : > { %v25183_v50 = vld [vmem:[%s33027_s7 + $0x28] sm:$0xff]   ;;  %v25184_v59 = vld [vmem:[%s33027_s7 + $0x60] sm:$0xff]  }
 0x84e   : > { %v24622_v16 = vpop.f32.mrf.mxu0 }
 0x84f   : > { %21776 = vmatpush3.bf16.msra.mxu1 %v25183_v50 }
 0x850   : > { %21777 = vmatprep.subr.bf16.mxu1 %v25184_v59  ;;  %v25210_v59 = vld [vmem:[%s33027_s7 + $0x88] sm:$0xff]  }
 0x856   : > { %v15976_v12 = vpop.f32.mrf.mxu1 }
 0x857   : > { %v16071_v4 = vadd.f32 %v15976_v12, %v32123_v3 }
 0x858   : > { %v16016_v13 = vpop.f32.mrf.mxu0  ;;  %v24633_v17 = vpop.f32.mrf.mxu1 }
 0x859   : > { %v16072_v7 = vadd.f32 %v16016_v13, %v32150_v10  ;;  %v25195_v13 = vld [vmem:[%s33027_s7 + $0xa8] sm:$0xff]  }
 0x85a   : > { %v24645_v6 = vpop.f32.mrf.mxu0  ;;  %v15979_v2 = vpop.f32.mrf.mxu1 }
 0x85b   : > { %v25186_v6 = vld [vmem:[%s33027_s7 + $0x20] sm:$0xff]   ;;  %v25188_v2 = vld [vmem:[%s33027_s7 + $0x58] sm:$0xff]  }
 0x85c   : > { %v16019_v15 = vpop.f32.mrf.mxu0  ;;  %v24634_v44 = vpop.f32.mrf.mxu1  ;;  %21778 = vmatpush3.bf16.msra.mxu1 %v25186_v6 }
 0x85d   : > { %21779 = vmatprep.subr.bf16.mxu1 %v25188_v2 }
 0x85e   : > { %v24646_v57 = vpop.f32.mrf.mxu0 }
 0x85f   : > { %v25199_v57 = vld [vmem:[%s33027_s7 + $0xa0] sm:$0xff]  }
 0x866   : > { %v16061_v54 = vpop.f32.mrf.mxu1 }
 0x867   : > { %v16073_v62 = vadd.f32 %v16061_v54, %v32153_v5 }
 0x868   : > { %v16141_v8 = vpop.f32.mrf.mxu0  ;;  %v24657_v63 = vpop.f32.mrf.mxu1 }
 0x869   : > { %v32209_v38 = vadd.f32 %v16141_v8, %v16067_v60  ;;  %v25192_v63 = vld [vmem:[%s33027_s7 + $0x50] sm:$0xff]  }
 0x86a   : > { %v24669_v58 = vpop.f32.mrf.mxu0  ;;  %v16064_v18 = vpop.f32.mrf.mxu1 }
 0x86b   : > { %v25194_v58 = vld [vmem:[%s33027_s7 + $0x10] sm:$0xff]   ;;  %v25196_v18 = vld [vmem:[%s33027_s7 + $0x48] sm:$0xff]  }
 0x86c   : > { %v16144_v42 = vpop.f32.mrf.mxu0  ;;  %v24658_v24 = vpop.f32.mrf.mxu1 }
 0x86d   : > { %v25198_v42 = vld [vmem:[%s33027_s7 + $0x8] sm:$0xff]  }
 0x86e   : > { %v24670_v46 = vpop.f32.mrf.mxu0 }
 0x876   : > { %v16181_v47 = vpop.f32.mrf.mxu1 }
 0x877   : > { %v32211_v52 = vadd.f32 %v16181_v47, %v16068_v23 }
 0x878   : > { %v16221_v0 = vpop.f32.mrf.mxu0  ;;  %v24681_v1 = vpop.f32.mrf.mxu1 }
 0x879   : > { %v32213_v29 = vadd.f32 %v16221_v0, %v16069_v11  ;;  %v25187_v11 = vld [vmem:[%s33027_s7 + $0xb8] sm:$0xff]  }
 0x87a   : > { %v24693_v3 = vpop.f32.mrf.mxu0  ;;  %v16184_v32 = vpop.f32.mrf.mxu1  ;;  %21794 = vmatpush3.bf16.msra.mxu0 %v25187_v11 }
 0x87c   : > { %v16224_v27 = vpop.f32.mrf.mxu0  ;;  %v24682_v25 = vpop.f32.mrf.mxu1 }
 0x87e   : > { %v24694_v61 = vpop.f32.mrf.mxu0 }
 0x886   : > { %v16261_v49 = vpop.f32.mrf.mxu1 }
 0x887   : > { %v32215_v36 = vadd.f32 %v16261_v49, %v16070_v48  ;;  %v25189_v48 = vld [vmem:[%s33027_s7 + $0xf0] sm:$0xff]  }
 0x888   : > { %v16301_v43 = vpop.f32.mrf.mxu0  ;;  %v24705_v10 = vpop.f32.mrf.mxu1  ;;  %21795 = vmatprep.subr.bf16.mxu0 %v25189_v48  ;;  %v25206_v48 = vld [vmem:[%s33027_s7 + $0x90] sm:$0xff]  }
 0x889   : > { %v32217_v34 = vadd.f32 %v16301_v43, %v16071_v4  ;;  %21796 = vmatpush3.bf16.msra.mxu0 %v25191_v53  ;;  %v25197_v4 = vld [vmem:[%s33027_s7 + $0xe0] sm:$0xff]  }
 0x88a   : > { %v24717_v5 = vpop.f32.mrf.mxu0  ;;  %v16264_v45 = vpop.f32.mrf.mxu1  ;;  %21797 = vmatprep.subr.bf16.mxu0 %v25193_v14  ;;  %v25208_v14 = vld [vmem:[%s33027_s7 + $0xc8] sm:$0xff]  }
 0x88c   : > { %v16304_v39 = vpop.f32.mrf.mxu0  ;;  %v24706_v31 = vpop.f32.mrf.mxu1 }
 0x88d   : > { %21798 = vmatpush3.bf16.msra.mxu0 %v25195_v13 }
 0x88e   : > { %v24718_v9 = vpop.f32.mrf.mxu0  ;;  %21799 = vmatprep.subr.bf16.mxu0 %v25197_v4  ;;  %v25212_v4 = vld [vmem:[%s33027_s7 + $0xc0] sm:$0xff]  }
 0x88f   : > { %v25200_v9 = vld [vmem:[%s33027_s7 + $0x40] sm:$0xff]  }
 0x891   : > { %21800 = vmatpush3.bf16.msra.mxu0 %v25199_v57 }
 0x896   : > { %v16341_v28 = vpop.f32.mrf.mxu1 }
 0x897   : > { %v32219_v56 = vadd.f32 %v16341_v28, %v16072_v7  ;;  %v25201_v28 = vld [vmem:[%s33027_s7 + $0xd8] sm:$0xff]  }
 0x898   : > { %v16384_v22 = vpop.f32.mrf.mxu0  ;;  %v24729_v60 = vpop.f32.mrf.mxu1  ;;  %21801 = vmatprep.subr.bf16.mxu0 %v25201_v28 }
 0x899   : > { %v32221_v26 = vadd.f32 %v16384_v22, %v16073_v62  ;;  %v25190_v62 = vld [vmem:[%s33027_s7 + $0x18] sm:$0xff]   ;;  %v25202_v22 = vld [vmem:[%s33027_s7] sm:$0xff]  }
 0x89a   : > { %v24741_v23 = vpop.f32.mrf.mxu0  ;;  %v16344_v33 = vpop.f32.mrf.mxu1  ;;  %21780 = vmatpush3.bf16.msra.mxu1 %v25190_v62 }
 0x89b   : > { %21781 = vmatprep.subr.bf16.mxu1 %v25192_v63  ;;  %v32312_v33 = vld [vmem:[%s33026_s6] ss:$0 sm:$0xff] }
 0x89c   : > { %v16387_v37 = vpop.f32.mrf.mxu0  ;;  %v24730_v30 = vpop.f32.mrf.mxu1 }
 0x89d   : > { %v25203_v37 = vld [vmem:[%s33027_s7 + $0x98] sm:$0xff]  }
 0x89e   : > { %v24742_v55 = vpop.f32.mrf.mxu0  ;;  %21782 = vmatpush3.bf16.msra.mxu1 %v25194_v58  ;;  %21802 = vmatpush3.bf16.msra.mxu0 %v25203_v37 }
 0x89f   : > { %21783 = vmatprep.subr.bf16.mxu1 %v25196_v18  ;;  %21803 = vmatprep.subr.bf16.mxu0 %v25204_v20 }
 0x8a2   : > { %21784 = vmatpush3.bf16.msra.mxu1 %v25198_v42  ;;  %21804 = vmatpush3.bf16.msra.mxu0 %v25206_v48 }
 0x8a3   : > { %21785 = vmatprep.subr.bf16.mxu1 %v25200_v9  ;;  %21805 = vmatprep.subr.bf16.mxu0 %v25208_v14 }
 0x8a6   : > { %v16464_v16 = vpop.f32.mrf.mxu1  ;;  %21786 = vmatpush3.bf16.msra.mxu1 %v25202_v22  ;;  %21806 = vmatpush3.bf16.msra.mxu0 %v25210_v59 }
 0x8a7   : > { %v16719_v31 = vadd.f32 %v16464_v16, %v32209_v38  ;;  %21815 = vmatprep.subr.bf16.mxu1 %v25205_v35  ;;  %21807 = vmatprep.subr.bf16.mxu0 %v25212_v4 }
 0x8a8   : > { %v32259_v12 = vpop.f32.mrf.mxu0  ;;  %v24753_v7 = vpop.f32.mrf.mxu1 }
 0x8a9   : > { %v25214_v7 = vld [vmem:[%s33027_s7 + $0x80] sm:$0xff]  }
 0x8aa   : > { %v24765_v17 = vpop.f32.mrf.mxu0  ;;  %v16467_v15 = vpop.f32.mrf.mxu1  ;;  %21808 = vmatpush3.bf16.msra.mxu0 %v25214_v7 }
 0x8ab   : > { %v16720_v17 = vadd.f32 %v32259_v12, %v32211_v52 }
 0x8ac   : > { %v16507_v44 = vpop.f32.mrf.mxu0  ;;  %v24754_v54 = vpop.f32.mrf.mxu1 }
 0x8ad   : > { %v25217_v44 = vld [vmem:[%s33027_s7 + $0x1f8] sm:$0xff]  }
 0x8ae   : > { %v24766_v8 = vpop.f32.mrf.mxu0  ;;  %21837 = vmatprep.subr.bf16.mxu0 %v25217_v44 }
 0x8b6   : > { %v16544_v24 = vpop.f32.mrf.mxu1 }
 0x8b7   : > { %v16721_v6 = vadd.f32 %v16544_v24, %v32213_v29 }
 0x8b8   : > { %v32291_v46 = vpop.f32.mrf.mxu0  ;;  %v24777_v47 = vpop.f32.mrf.mxu1 }
 0x8ba   : > { %v24789_v0 = vpop.f32.mrf.mxu0  ;;  %v16547_v1 = vpop.f32.mrf.mxu1 }
 0x8bc   : > { %v16587_v3 = vpop.f32.mrf.mxu0  ;;  %v24778_v32 = vpop.f32.mrf.mxu1 }
 0x8be   : > { %v24790_v27 = vpop.f32.mrf.mxu0 }
 0x8bf   : > { %v16722_v27 = vadd.f32 %v32291_v46, %v32215_v36 }
 0x8c6   : > { %v32293_v25 = vpop.f32.mrf.mxu1 }
 0x8c8   : > { %v32295_v61 = vpop.f32.mrf.mxu0  ;;  %v24801_v49 = vpop.f32.mrf.mxu1 }
 0x8c9   : > { %v16723_v49 = vadd.f32 %v32293_v25, %v32217_v34 }
 0x8ca   : > { %v24813_v43 = vpop.f32.mrf.mxu0  ;;  %v16627_v10 = vpop.f32.mrf.mxu1 }
 0x8cc   : > { %v16667_v5 = vpop.f32.mrf.mxu0  ;;  %v24802_v45 = vpop.f32.mrf.mxu1 }
 0x8ce   : > { %v24814_v39 = vpop.f32.mrf.mxu0 }
 0x8d6   : > { %v32307_v60 = vpop.f32.mrf.mxu1 }
 0x8d7   : > { %v16725_v48 = vadd.f32 %v32307_v60, %v32221_v26 }
 0x8d8   : > { %v16793_v23 = vpop.f32.mrf.mxu0  ;;  %v24825_v30 = vpop.f32.mrf.mxu1 }
 0x8d9   : > { %v17044_v38 = vadd.f32 %v16793_v23, %v16719_v31 }
 0x8da   : > { %v24837_v55 = vpop.f32.mrf.mxu0  ;;  %v16716_v40 = vpop.f32.mrf.mxu1 }
 0x8db   : > { %v17058_v19 = vadd.f32 %v32312_v33, %v17044_v38 }
 0x8dc   : > { %v16796_v41 = vpop.f32.mrf.mxu0  ;;  %v24826_v51 = vpop.f32.mrf.mxu1 }
 0x8dd   : > { %v17065_v11 = vmax.f32 %v17058_v19, 0.0 }
 0x8de   : > { %v24838_v53 = vpop.f32.mrf.mxu0 }
 0x8df   : > { %v32330_v50 = vpack.c.bf16 %v17065_v11, %v17065_v11  ;;  %v16724_v11 = vadd.f32 %v32295_v61, %v32219_v56 }
 0x8e1   : > { %v17080_v16 = vshrl.u32 %v32330_v50, 16 }
 0x8e3   : > { %v17086_v13 = vrot.slane %v17080_v16, 1  ;;  %v17090_v3 = vrot.slane %v17080_v16, 2 }
 0x8e5   : > { %17087 = vrot.lane.b32.xlu0 %v17086_v13, %s25475_s29 }
 0x8e6   : > { %v16833_v2 = vpop.f32.mrf.mxu1 }
 0x8e7   : > { %v17045_v57 = vadd.f32 %v16833_v2, %v16720_v17 }
 0x8e8   : > { %v16873_v15 = vpop.f32.mrf.mxu0  ;;  %v24849_v8 = vpop.f32.mrf.mxu1 }
 0x8e9   : > { %v17046_v54 = vadd.f32 %v16873_v15, %v16721_v6  ;;  %17082 = vrot.lane.b32.xlu0 %v17080_v16, %s25475_s29  ;;  %v17059_v63 = vadd.f32 %v32312_v33, %v17045_v57 }
 0x8ea   : > { %v24861_v62 = vpop.f32.mrf.mxu0  ;;  %v16836_v12 = vpop.f32.mrf.mxu1 }
 0x8eb   : > { %v17060_v52 = vadd.f32 %v32312_v33, %v17046_v54  ;;  %v17066_v58 = vmax.f32 %v17059_v63, 0.0 }
 0x8ec   : > { %v16876_v29 = vpop.f32.mrf.mxu0  ;;  %v24850_v42 = vpop.f32.mrf.mxu1 }
 0x8ed   : > { %v17067_v18 = vmax.f32 %v17060_v52, 0.0  ;;  %v32352_v47 = vpack.c.bf16 %v17066_v58, %v17066_v58  ;;  %v17085_v52 = vrot.slane %v32330_v50, 1  ;;  %v25207_v58 = vld [vmem:[%s33027_s7 + $0x138] sm:$0xff]   ;;  %v25209_v42 = vld [vmem:[%s33027_s7 + $0x170] sm:$0xff]  }
 0x8ee   : > { %v24862_v24 = vpop.f32.mrf.mxu0 }
 0x8ef   : > { %v32354_v0 = vpack.c.bf16 %v17067_v18, %v17067_v18  ;;  %17095 = vrot.lane.b32.xlu1 %v32352_v47, %s25475_s29  ;;  %v17104_v1 = vrot.slane %v32352_v47, 2  ;;  %v17100_v43 = vrot.slane %v32352_v47, 1  ;;  %v17108_v34 = vrot.slane %v32352_v47, 3 }
 0x8f1   : > { %17105 = vrot.lane.b32.xlu0 %v17104_v1, %s25475_s29  ;;  %v17112_v32 = vshrl.u32 %v32354_v0, 16  ;;  %v25211_v1 = vld [vmem:[%s33027_s7 + $0x130] sm:$0xff]  }
 0x8f3   : > { %17091 = vrot.lane.b32.xlu1 %v17090_v3, %s25475_s29  ;;  %v17148_v31 = vrot.slane %v17112_v32, 1  ;;  %v25213_v3 = vld [vmem:[%s33027_s7 + $0x168] sm:$0xff]  }
 0x8f5   : > { %17114 = vrot.lane.b32.xlu0 %v17112_v32, %s25475_s29  ;;  %v32428_v32 = vshrl.u32 %v32352_v47, 16 }
 0x8f6   : > { %v16913_v10 = vpop.f32.mrf.mxu1 }
 0x8f7   : > { %v17047_v45 = vadd.f32 %v16913_v10, %v16722_v27  ;;  %17101 = vrot.lane.b32.xlu1 %v17100_v43, %s25475_s29  ;;  %v17093_v27 = vrot.slane %v32330_v50, 3  ;;  %v25216_v10 = vld [vmem:[%s33027_s7 + $0x160] sm:$0xff]  }
 0x8f8   : > { %v16953_v5 = vpop.f32.mrf.mxu0  ;;  %v24873_v9 = vpop.f32.mrf.mxu1 }
 0x8f9   : > { %v17048_v39 = vadd.f32 %v16953_v5, %v16723_v49  ;;  %v17061_v22 = vadd.f32 %v32312_v33, %v17047_v45  ;;  %17149 = vrot.lane.b32.xlu0 %v17148_v31, %s25475_s29  ;;  %v25215_v49 = vld [vmem:[%s33027_s7 + $0x128] sm:$0xff]   ;;  %v17103_v45 = vrot.slane %v32428_v32, 1  ;;  %v25218_v9 = vld [vmem:[%s33027_s7 + $0x120] sm:$0xff]  }
 0x8fa   : > { %v24885_v28 = vpop.f32.mrf.mxu0  ;;  %v16916_v46 = vpop.f32.mrf.mxu1 }
 0x8fb   : > { %v17062_v36 = vadd.f32 %v32312_v33, %v17048_v39  ;;  %v17068_v23 = vmax.f32 %v17061_v22, 0.0  ;;  %17109 = vrot.lane.b32.xlu1 %v17108_v34, %s25475_s29  ;;  %v17089_v39 = vrot.slane %v32330_v50, 2  ;;  %v25219_v28 = vld [vmem:[%s33027_s7 + $0x1b8] sm:$0xff]  }
 0x8fc   : > { %v16956_v25 = vpop.f32.mrf.mxu0  ;;  %v24874_v37 = vpop.f32.mrf.mxu1 }
 0x8fd   : > { %v17069_v38 = vmax.f32 %v17062_v36, 0.0  ;;  %v32374_v55 = vpack.c.bf16 %v17068_v23, %v17068_v23  ;;  %v25220_v36 = vld [vmem:[%s33027_s7 + $0x158] sm:$0xff]   ;;  %v25224_v37 = vld [vmem:[%s33027_s7 + $0x150] sm:$0xff]  }
 0x8fe   : > { %v24886_v30 = vpop.f32.mrf.mxu0  ;;  %v25222_v23 = vld [vmem:[%s33027_s7 + $0x118] sm:$0xff]  }
 0x8ff   : > { %v32376_v19 = vpack.c.bf16 %v17069_v38, %v17069_v38  ;;  %17160 = vrot.lane.b32.xlu1 %v32374_v55, %s25475_s29  ;;  %v17153_v40 = vrot.slane %v32374_v55, 7  ;;  %v17166_v41 = vrot.slane %v32374_v55, 2  ;;  %v17162_v20 = vrot.slane %v32374_v55, 1  ;;  %v25223_v38 = vld [vmem:[%s33027_s7 + $0x1b0] sm:$0xff]   ;;  %v25225_v30 = vld [vmem:[%s33027_s7 + $0x1e8] sm:$0xff]  }
 0x901   : > { %17154 = vrot.lane.b32.xlu0 %v17153_v40, %s25475_s29  ;;  %v17172_v35 = vshrl.u32 %v32376_v19, 16  ;;  %v25226_v40 = vld [vmem:[%s33027_s7 + $0x110] sm:$0xff]  }
 0x903   : > { %17167 = vrot.lane.b32.xlu1 %v17166_v41, %s25475_s29  ;;  %v17174_v16 = vrot.slane %v17172_v35, 7  ;;  %v25227_v41 = vld [vmem:[%s33027_s7 + $0x1a8] sm:$0xff]  }
 0x905   : > { %17163 = vrot.lane.b32.xlu0 %v17162_v20, %s25475_s29  ;;  %v25228_v20 = vld [vmem:[%s33027_s7 + $0x148] sm:$0xff]  }
 0x906   : > { %v16993_v51 = vpop.f32.mrf.mxu1 }
 0x907   : > { %v17049_v14 = vadd.f32 %v16993_v51, %v16724_v11  ;;  %17177 = vrot.lane.b32.xlu1 %v17172_v35, %s25475_s29  ;;  %v25229_v35 = vld [vmem:[%s33027_s7 + $0x1e0] sm:$0xff]   ;;  %v25230_v11 = vld [vmem:[%s33027_s7 + $0x108] sm:$0xff]  }
 0x908   : > { %v17038_v53 = vpop.f32.mrf.mxu0  ;;  %v24897_v13 = vpop.f32.mrf.mxu1  ;;  %v25232_v51 = vld [vmem:[%s33027_s7 + $0x140] sm:$0xff]  }
 0x909   : > { %v17050_v59 = vadd.f32 %v17038_v53, %v16725_v48  ;;  %v17063_v7 = vadd.f32 %v32312_v33, %v17049_v14  ;;  %17175 = vrot.lane.b32.xlu0 %v17174_v16, %s25475_s29  ;;  %v25231_v48 = vld [vmem:[%s33027_s7 + $0x1a0] sm:$0xff]   ;;  %v25233_v53 = vld [vmem:[%s33027_s7 + $0x1d8] sm:$0xff]  }
 0x90a   : > { %v24909_v4 = vpop.f32.mrf.mxu0  ;;  %v16996_v56 = vpop.f32.mrf.mxu1  ;;  %v25234_v14 = vld [vmem:[%s33027_s7 + $0x100] sm:$0xff]  }
 0x90b   : > { %v17064_v17 = vadd.f32 %v32312_v33, %v17050_v59  ;;  %v17070_v26 = vmax.f32 %v17063_v7, 0.0  ;;  %v25235_v59 = vld [vmem:[%s33027_s7 + $0x198] sm:$0xff]   ;;  %v25236_v4 = vld [vmem:[%s33027_s7 + $0x1d0] sm:$0xff]  }
 0x90c   : > { %v17041_v61 = vpop.f32.mrf.mxu0  ;;  %v24898_v6 = vpop.f32.mrf.mxu1  ;;  %v25237_v7 = vld [vmem:[%s33027_s7 + $0x278] sm:$0xff]  }
 0x90d   : > { %v17071_v60 = vmax.f32 %v17064_v17, 0.0  ;;  %v32395_v15 = vpack.c.bf16 %v17070_v26, %v17070_v26  ;;  %v17147_v17 = vrot.slane %v32354_v0, 1  ;;  %v25238_v61 = vld [vmem:[%s33027_s7 + $0x190] sm:$0xff]   ;;  %v25239_v26 = vld [vmem:[%s33027_s7 + $0x238] sm:$0xff]  }
 0x90e   : > { %v24910_v2 = vpop.f32.mrf.mxu0 }
 0x90f   : > { %v32397_v44 = vpack.c.bf16 %v17071_v60, %v17071_v60  ;;  %17212 = vrot.lane.b32.xlu0 %v32395_v15, %s25475_s29  ;;  %v17201_v57 = vrot.slane %v32395_v15, 6  ;;  %v17208_v8 = vrot.slane %v32395_v15, 7  ;;  %v17214_v62 = vrot.slane %v32395_v15, 1  ;;  %v25240_v60 = vld [vmem:[%s33027_s7 + $0x1c8] sm:$0xff]   ;;  %v25241_v2 = vld [vmem:[%s33027_s7 + $0x270] sm:$0xff]  }
 0x911   : > { %v17220_v54 = vshrl.u32 %v32397_v44, 16  ;;  %17202 = vrot.lane.b32.xlu1 %v17201_v57, %s25475_s29 }
 0x913   : > { %v17222_v33 = vrot.slane %v17220_v54, 6  ;;  %v17226_v63 = vrot.slane %v17220_v54, 7 }
 0x915   : > { %17223 = vrot.lane.b32.xlu0 %v17222_v33, %s25475_s29  ;;  %17209 = vrot.lane.b32.xlu1 %v17208_v8, %s25475_s29  ;;  %v25242_v33 = vld [vmem:[%s33027_s7 + $0x188] sm:$0xff]   ;;  %v25243_v8 = vld [vmem:[%s33027_s7 + $0x230] sm:$0xff]  }
 0x919   : > { %17229 = vrot.lane.b32.xlu0 %v17220_v54, %s25475_s29  ;;  %17215 = vrot.lane.b32.xlu1 %v17214_v62, %s25475_s29  ;;  %v25244_v62 = vld [vmem:[%s33027_s7 + $0x1c0] sm:$0xff]  }
 0x91d   : > { %17227 = vrot.lane.b32.xlu1 %v17226_v63, %s25475_s29  ;;  %v25245_v63 = vld [vmem:[%s33027_s7 + $0x268] sm:$0xff]  }
 0x957   : > { %v17088_v12 = vpop.permute.xlu0 %17087 }
 0x958   : > { %v17121_v29 = vsel %vm530_vm1, %v17085_v52, %v17088_v12  ;;  %v32536_v52 = vshrl.u32 %v32374_v55, 16  ;;  %v25246_v12 = vld [vmem:[%s33027_s7 + $0x180] sm:$0xff]   ;;  %v25249_v55 = vld [vmem:[%s33027_s7 + $0x2f8] sm:$0xff]  }
 0x959   : > { %18903 = vmatprep.mubr.bf16.mxu1 %v17121_v29  ;;  %v25247_v29 = vld [vmem:[%s33027_s7 + $0x228] sm:$0xff]  }
 0x95b   : > { %v17083_v18 = vpop.permute.xlu0 %17082 }
 0x95c   : > { %v17117_v24 = vsel %vm530_vm1, %v32330_v50, %v17083_v18  ;;  %v25221_v50 = vld [vmem:[%s33027_s7 + $0x1f0] sm:$0xff]   ;;  %v25248_v18 = vld [vmem:[%s33027_s7 + $0x260] sm:$0xff]  }
 0x95d   : > { %18904 = vmatmul.mubr.bf16.vlgmr.msra.gmra.mxu1 %v17117_v24  ;;  %v17107_v24 = vrot.slane %v32428_v32, 2 }
 0x95e   : > { %21816 = vmatpush3.bf16.msra.mxu1 %v25207_v58 }
 0x95f   : > { %21817 = vmatprep.subr.bf16.mxu1 %v25209_v42  ;;  %v17159_v42 = vrot.slane %v32536_v52, 7 }
 0x961   : > { %v17096_v43 = vpop.permute.xlu1 %17095 }
 0x962   : > { %21818 = vmatpush3.bf16.msra.mxu1 %v25211_v1  ;;  %v17129_v5 = vsel %vm530_vm1, %v17093_v27, %v17096_v43  ;;  %v25251_v27 = vld [vmem:[%s33027_s7 + $0x2b8] sm:$0xff]   ;;  %v25253_v43 = vld [vmem:[%s33027_s7 + $0x2f0] sm:$0xff]  }
 0x963   : > { %21819 = vmatprep.subr.bf16.mxu1 %v25213_v3  ;;  %18943 = vmatprep.mubr.bf16.mxu0 %v17129_v5  ;;  %v17106_v47 = vpop.permute.xlu0 %17105  ;;  %v25250_v3 = vld [vmem:[%s33027_s7 + $0x220] sm:$0xff]   ;;  %v25254_v5 = vld [vmem:[%s33027_s7 + $0x218] sm:$0xff]  }
 0x964   : > { %v17137_v31 = vsel %vm530_vm1, %v17103_v45, %v17106_v47  ;;  %v25255_v45 = vld [vmem:[%s33027_s7 + $0x2b0] sm:$0xff]  }
 0x965   : > { %v17092_v22 = vpop.permute.xlu1 %17091  ;;  %18983 = vmatprep.mubr.bf16.mxu1 %v17137_v31  ;;  %v25256_v47 = vld [vmem:[%s33027_s7 + $0x250] sm:$0xff]  }
 0x966   : > { %21820 = vmatpush3.bf16.msra.mxu1 %v25215_v49  ;;  %v17125_v34 = vsel %vm530_vm1, %v17089_v39, %v17092_v22  ;;  %v25252_v49 = vld [vmem:[%s33027_s7 + $0x258] sm:$0xff]   ;;  %v25257_v39 = vld [vmem:[%s33027_s7 + $0x2e8] sm:$0xff]   ;;  %v25258_v31 = vld [vmem:[%s33027_s7 + $0x210] sm:$0xff]  }
 0x967   : > { %21821 = vmatprep.subr.bf16.mxu1 %v25216_v10  ;;  %18944 = vmatmul.mubr.bf16.vlgmr.msra.gmra.mxu0 %v17125_v34  ;;  %v17115_v46 = vpop.permute.xlu0 %17114  ;;  %v25261_v22 = vld [vmem:[%s33027_s7 + $0x2e0] sm:$0xff]  }
 0x968   : > { %21838 = vmatpush3.bf16.msra.mxu0 %v25219_v28  ;;  %v32456_v25 = vsel %vm530_vm1, %v32354_v0, %v17115_v46  ;;  %v25260_v28 = vld [vmem:[%s33027_s7 + $0x248] sm:$0xff]   ;;  %v25263_v34 = vld [vmem:[%s33027_s7 + $0x2a0] sm:$0xff]   ;;  %v25265_v46 = vld [vmem:[%s33027_s7 + $0x2d8] sm:$0xff]  }
 0x969   : > { %19023 = vmatprep.mubr.bf16.mxu0 %v32456_v25  ;;  %21839 = vmatprep.subr.bf16.mxu0 %v25221_v50  ;;  %v17102_v16 = vpop.permute.xlu1 %17101  ;;  %v25264_v50 = vld [vmem:[%s33027_s7 + $0x240] sm:$0xff]  }
 0x96a   : > { %21822 = vmatpush3.bf16.msra.mxu1 %v25218_v9  ;;  %v17133_v6 = vsel %vm530_vm1, %v32428_v32, %v17102_v16  ;;  %v25259_v9 = vld [vmem:[%s33027_s7 + $0x2a8] sm:$0xff]   ;;  %v25276_v16 = vld [vmem:[%s33027_s7 + $0x2c0] sm:$0xff]  }
 0x96b   : > { %21823 = vmatprep.subr.bf16.mxu1 %v25220_v36  ;;  %v17150_v13 = vpop.permute.xlu0 %17149  ;;  %v25262_v36 = vld [vmem:[%s33027_s7 + $0x208] sm:$0xff]  }
 0x96c   : > { %21840 = vmatpush3.bf16.msra.mxu0 %v25223_v38  ;;  %v17181_v56 = vsel %vm530_vm1, %v17147_v17, %v17150_v13  ;;  %v25267_v38 = vld [vmem:[%s33027_s7 + $0x298] sm:$0xff]   ;;  %v25277_v13 = vld [vmem:[%s33027_s7 + $0x368] sm:$0xff]   ;;  %v25278_v17 = vld [vmem:[%s33027_s7 + $0x280] sm:$0xff]  }
 0x96d   : > { %21841 = vmatprep.subr.bf16.mxu0 %v25225_v30  ;;  %v17260_v57 = vrot.slane %v17181_v56, 1  ;;  %v17110_v54 = vpop.permute.xlu1 %17109  ;;  %v25268_v30 = vld [vmem:[%s33027_s7 + $0x2d0] sm:$0xff]   ;;  %v25279_v56 = vld [vmem:[%s33027_s7 + $0x328] sm:$0xff]  }
 0x96e   : > { %21824 = vmatpush3.bf16.msra.mxu1 %v25222_v23  ;;  %v17141_v32 = vsel %vm530_vm1, %v17107_v24, %v17110_v54  ;;  %v25266_v23 = vld [vmem:[%s33027_s7 + $0x200] sm:$0xff]  }
 0x96f   : > { %21825 = vmatprep.subr.bf16.mxu1 %v25224_v37  ;;  %v25293_v24 = vld [vmem:[%s33027_s7 + $0x3e0] sm:$0xff]  }
 0x970   : > { %21842 = vmatpush3.bf16.msra.mxu0 %v25227_v41  ;;  %v17165_v41 = vrot.slane %v32536_v52, 1 }
 0x971   : > { %21843 = vmatprep.subr.bf16.mxu0 %v25229_v35  ;;  %v17161_v58 = vpop.permute.xlu1 %17160  ;;  %v25270_v35 = vld [vmem:[%s33027_s7 + $0x290] sm:$0xff]  }
 0x972   : > { %21826 = vmatpush3.bf16.msra.mxu1 %v25226_v40  ;;  %v17187_v1 = vsel %vm530_vm1, %v17159_v42, %v17161_v58  ;;  %v25269_v40 = vld [vmem:[%s33027_s7 + $0x378] sm:$0xff]   ;;  %v25289_v58 = vld [vmem:[%s33027_s7 + $0x3e8] sm:$0xff]  }
 0x973   : > { %21827 = vmatprep.subr.bf16.mxu1 %v25228_v20  ;;  %v17262_v10 = vrot.slane %v17187_v1, 1  ;;  %v25292_v42 = vld [vmem:[%s33027_s7 + $0x348] sm:$0xff]  }
 0x974   : > { %21844 = vmatpush3.bf16.msra.mxu0 %v25231_v48  ;;  %v17259_v48 = vrot.slane %v32456_v25, 1  ;;  %v25275_v25 = vld [vmem:[%s33027_s7 + $0x330] sm:$0xff]   ;;  %v25294_v1 = vld [vmem:[%s33027_s7 + $0x308] sm:$0xff]  }
 0x975   : > { %21845 = vmatprep.subr.bf16.mxu0 %v25233_v53  ;;  %v17168_v37 = vpop.permute.xlu1 %17167  ;;  %v25273_v53 = vld [vmem:[%s33027_s7 + $0x370] sm:$0xff]  }
 0x976   : > { %21828 = vmatpush3.bf16.msra.mxu1 %v25230_v11  ;;  %v17193_v20 = vsel %vm530_vm1, %v17165_v41, %v17168_v37  ;;  %v25271_v11 = vld [vmem:[%s33027_s7 + $0x338] sm:$0xff]   ;;  %v25308_v37 = vld [vmem:[%s33027_s7 + $0x3c0] sm:$0xff]   ;;  %v17170_v41 = vrot.slane %v32376_v19, 7 }
 0x977   : > { %21829 = vmatprep.subr.bf16.mxu1 %v25232_v51  ;;  %v25272_v51 = vld [vmem:[%s33027_s7 + $0x2c8] sm:$0xff]  }
 0x978   : > { %21846 = vmatpush3.bf16.msra.mxu0 %v25235_v59  ;;  %v25274_v59 = vld [vmem:[%s33027_s7 + $0x288] sm:$0xff]  }
 0x979   : > { %21847 = vmatprep.subr.bf16.mxu0 %v25236_v4  ;;  %v17155_v4 = vpop.permute.xlu0 %17154 }
 0x97a   : > { %21830 = vmatpush3.bf16.msra.mxu1 %v25234_v14  ;;  %v17264_v14 = vrot.slane %v17193_v20, 1  ;;  %v25310_v20 = vld [vmem:[%s33027_s7 + $0x380] sm:$0xff]  }
 0x97b   : > { %21859 = vmatprep.subr.bf16.mxu1 %v25237_v7  ;;  %v17151_v7 = vrot.slane %v32354_v0, 2  ;;  %v25281_v0 = vld [vmem:[%s33027_s7 + $0x3f8] sm:$0xff]  }
 0x97c   : > { %21848 = vmatpush3.bf16.msra.mxu0 %v25238_v61  ;;  %v17178_v61 = vpop.permute.xlu1 %17177 }
 0x97d   : > { %18984 = vmatmul.mubr.bf16.vlgmr.msra.gmra.mxu1 %v17133_v6  ;;  %21849 = vmatprep.subr.bf16.mxu0 %v25240_v60  ;;  %v17184_v60 = vsel %vm530_vm1, %v17151_v7, %v17155_v4  ;;  %v32657_v6 = vsel %vm530_vm1, %v32376_v19, %v17178_v61  ;;  %v25318_v7 = vld [vmem:[%s33027_s7 + $0x418] sm:$0xff]   ;;  %v25321_v61 = vld [vmem:[%s33027_s7 + $0x4e8] sm:$0xff]  }
 0x97e   : > { %21860 = vmatpush3.bf16.msra.mxu1 %v25239_v26  ;;  %19063 = vmatprep.mubr.bf16.mxu1 %v17260_v57  ;;  %v25280_v26 = vld [vmem:[%s33027_s7 + $0x360] sm:$0xff]   ;;  %v25283_v57 = vld [vmem:[%s33027_s7 + $0x3b8] sm:$0xff]   ;;  %v17261_v54 = vrot.slane %v17184_v60, 1  ;;  %v25324_v60 = vld [vmem:[%s33027_s7 + $0x448] sm:$0xff]  }
 0x97f   : > { %21861 = vmatprep.subr.bf16.mxu1 %v25241_v2  ;;  %v25282_v2 = vld [vmem:[%s33027_s7 + $0x320] sm:$0xff]  }
 0x980   : > { %21850 = vmatpush3.bf16.msra.mxu0 %v25242_v33  ;;  %v25284_v33 = vld [vmem:[%s33027_s7 + $0x358] sm:$0xff]  }
 0x981   : > { %21851 = vmatprep.subr.bf16.mxu0 %v25244_v62  ;;  %v17266_v62 = vrot.slane %v32657_v6, 1 }
 0x982   : > { %21862 = vmatpush3.bf16.msra.mxu1 %v25243_v8  ;;  %v25285_v8 = vld [vmem:[%s33027_s7 + $0x3f0] sm:$0xff]  }
 0x983   : > { %21863 = vmatprep.subr.bf16.mxu1 %v25245_v63  ;;  %v25286_v63 = vld [vmem:[%s33027_s7 + $0x318] sm:$0xff]  }
 0x984   : > { %21852 = vmatpush3.bf16.msra.mxu0 %v25246_v12  ;;  %v25287_v12 = vld [vmem:[%s33027_s7 + $0x3b0] sm:$0xff]  }
 0x985   : > { %21881 = vmatprep.subr.bf16.mxu0 %v25249_v55  ;;  %v25291_v55 = vld [vmem:[%s33027_s7 + $0x3a8] sm:$0xff]  }
 0x986   : > { %21864 = vmatpush3.bf16.msra.mxu1 %v25247_v29  ;;  %v25288_v29 = vld [vmem:[%s33027_s7 + $0x350] sm:$0xff]  }
 0x987   : > { %21865 = vmatprep.subr.bf16.mxu1 %v25248_v18  ;;  %19024 = vmatmul.mubr.bf16.vlgmr.msra.gmra.mxu0 %v17141_v32  ;;  %v25290_v18 = vld [vmem:[%s33027_s7 + $0x310] sm:$0xff]   ;;  %v17164_v32 = vpop.permute.xlu0 %17163 }
 0x988   : > { %21882 = vmatpush3.bf16.msra.mxu0 %v25251_v27  ;;  %19103 = vmatprep.mubr.bf16.mxu0 %v17262_v10  ;;  %v25296_v27 = vld [vmem:[%s33027_s7 + $0x340] sm:$0xff]   ;;  %v25299_v10 = vld [vmem:[%s33027_s7 + $0x398] sm:$0xff]  }
 0x989   : > { %21883 = vmatprep.subr.bf16.mxu0 %v25253_v43  ;;  %v25298_v43 = vld [vmem:[%s33027_s7 + $0x300] sm:$0xff]  }
 0x98a   : > { %21866 = vmatpush3.bf16.msra.mxu1 %v25250_v3  ;;  %v25295_v3 = vld [vmem:[%s33027_s7 + $0x3a0] sm:$0xff]  }
 0x98b   : > { %21867 = vmatprep.subr.bf16.mxu1 %v25252_v49  ;;  %v25297_v49 = vld [vmem:[%s33027_s7 + $0x3d8] sm:$0xff]  }
 0x98c   : > { %21884 = vmatpush3.bf16.msra.mxu0 %v25255_v45  ;;  %v25300_v45 = vld [vmem:[%s33027_s7 + $0x3d0] sm:$0xff]  }
 0x98d   : > { %21885 = vmatprep.subr.bf16.mxu0 %v25257_v39  ;;  %v17190_v39 = vsel %vm530_vm1, %v32536_v52, %v17164_v32  ;;  %v25304_v52 = vld [vmem:[%s33027_s7 + $0x3c8] sm:$0xff]  }
 0x98e   : > { %21868 = vmatpush3.bf16.msra.mxu1 %v25254_v5  ;;  %v17203_v5 = vpop.permute.xlu1 %17202  ;;  %v25338_v32 = vld [vmem:[%s33027_s7 + $0x488] sm:$0xff]  }
 0x98f   : > { %21869 = vmatprep.subr.bf16.mxu1 %v25256_v47  ;;  %v25301_v47 = vld [vmem:[%s33027_s7 + $0x478] sm:$0xff]  }
 0x990   : > { %21886 = vmatpush3.bf16.msra.mxu0 %v25259_v9 }
 0x991   : > { %21887 = vmatprep.subr.bf16.mxu0 %v25261_v22  ;;  %v25303_v22 = vld [vmem:[%s33027_s7 + $0x438] sm:$0xff]  }
 0x992   : > { %21870 = vmatpush3.bf16.msra.mxu1 %v25258_v31  ;;  %v17199_v31 = vrot.slane %v32376_v19, 1  ;;  %v25313_v19 = vld [vmem:[%s33027_s7 + $0x4f8] sm:$0xff]  }
 0x993   : > { %21871 = vmatprep.subr.bf16.mxu1 %v25260_v28  ;;  %v25302_v28 = vld [vmem:[%s33027_s7 + $0x390] sm:$0xff]  }
 0x994   : > { %21888 = vmatpush3.bf16.msra.mxu0 %v25263_v34  ;;  %v17233_v9 = vsel %vm530_vm1, %v17199_v31, %v17203_v5  ;;  %v25305_v34 = vld [vmem:[%s33027_s7 + $0x470] sm:$0xff]   ;;  %v17210_v5 = vpop.permute.xlu1 %17209 }
 0x995   : > { %21889 = vmatprep.subr.bf16.mxu0 %v25265_v46  ;;  %v25306_v46 = vld [vmem:[%s33027_s7 + $0x388] sm:$0xff]  }
 0x996   : > { %21872 = vmatpush3.bf16.msra.mxu1 %v25262_v36  ;;  %v17263_v36 = vrot.slane %v17190_v39, 1  ;;  %v25343_v39 = vld [vmem:[%s33027_s7 + $0x528] sm:$0xff]  }
 0x997   : > { %21873 = vmatprep.subr.bf16.mxu1 %v25264_v50  ;;  %v17283_v50 = vrot.slane %v17233_v9, 2  ;;  %v25344_v9 = vld [vmem:[%s33027_s7 + $0x560] sm:$0xff]  }
 0x998   : > { %21890 = vmatpush3.bf16.msra.mxu0 %v25267_v38  ;;  %v17176_v38 = vpop.permute.xlu0 %17175 }
 0x999   : > { %21891 = vmatprep.subr.bf16.mxu0 %v25268_v30  ;;  %v25309_v30 = vld [vmem:[%s33027_s7 + $0x468] sm:$0xff]  }
 0x99a   : > { %21874 = vmatpush3.bf16.msra.mxu1 %v25266_v23  ;;  %v25307_v23 = vld [vmem:[%s33027_s7 + $0x430] sm:$0xff]  }
 0x99b   : > { %21903 = vmatprep.subr.bf16.mxu1 %v25269_v40  ;;  %v32749_v40 = vshrl.u32 %v32395_v15, 16  ;;  %v25312_v15 = vld [vmem:[%s33027_s7 + $0x460] sm:$0xff]  }
 0x99c   : > { %21892 = vmatpush3.bf16.msra.mxu0 %v25270_v35  ;;  %v25311_v35 = vld [vmem:[%s33027_s7 + $0x428] sm:$0xff]  }
 0x99d   : > { %19064 = vmatmul.mubr.bf16.vlgmr.msra.gmra.mxu1 %v17259_v48  ;;  %21893 = vmatprep.subr.bf16.mxu0 %v25272_v51  ;;  %v17196_v48 = vsel %vm530_vm1, %v17170_v41, %v17176_v38  ;;  %v17211_v51 = vrot.slane %v32749_v40, 7  ;;  %v25352_v41 = vld [vmem:[%s33027_s7 + $0x550] sm:$0xff]  }
 0x99e   : > { %21904 = vmatpush3.bf16.msra.mxu1 %v25271_v11  ;;  %19143 = vmatprep.mubr.bf16.mxu1 %v17264_v14  ;;  %v17213_v11 = vpop.permute.xlu0 %17212  ;;  %v25314_v14 = vld [vmem:[%s33027_s7 + $0x420] sm:$0xff]  }
 0x99f   : > { %21905 = vmatprep.subr.bf16.mxu1 %v25273_v53  ;;  %v17239_v53 = vsel %vm530_vm1, %v17211_v51, %v17213_v11  ;;  %v25355_v11 = vld [vmem:[%s33027_s7 + $0x5a8] sm:$0xff]   ;;  %v25359_v51 = vld [vmem:[%s33027_s7 + $0x5a0] sm:$0xff]  }
 0x9a0   : > { %21894 = vmatpush3.bf16.msra.mxu0 %v25274_v59  ;;  %v25315_v59 = vld [vmem:[%s33027_s7 + $0x4b8] sm:$0xff]   ;;  %v17285_v4 = vrot.slane %v17239_v53, 2  ;;  %v25360_v53 = vld [vmem:[%s33027_s7 + $0x540] sm:$0xff]  }
 0x9a1   : > { %21895 = vmatprep.subr.bf16.mxu0 %v25276_v16  ;;  %v25316_v16 = vld [vmem:[%s33027_s7 + $0x458] sm:$0xff]  }
 0x9a2   : > { %21906 = vmatpush3.bf16.msra.mxu1 %v25275_v25  ;;  %v17265_v25 = vrot.slane %v17196_v48, 1  ;;  %v25358_v48 = vld [vmem:[%s33027_s7 + $0x508] sm:$0xff]  }
 0x9a3   : > { %21907 = vmatprep.subr.bf16.mxu1 %v25277_v13  ;;  %v25317_v13 = vld [vmem:[%s33027_s7 + $0x4f0] sm:$0xff]  }
 0x9a4   : > { %21896 = vmatpush3.bf16.msra.mxu0 %v25278_v17  ;;  %v25319_v17 = vld [vmem:[%s33027_s7 + $0x4b0] sm:$0xff]  }
 0x9a5   : > { %21925 = vmatprep.subr.bf16.mxu0 %v25281_v0  ;;  %v25323_v0 = vld [vmem:[%s33027_s7 + $0x4a8] sm:$0xff]  }
 0x9a6   : > { %21908 = vmatpush3.bf16.msra.mxu1 %v25279_v56  ;;  %v25320_v56 = vld [vmem:[%s33027_s7 + $0x450] sm:$0xff]  }
 0x9a7   : > { %21909 = vmatprep.subr.bf16.mxu1 %v25280_v26  ;;  %19104 = vmatmul.mubr.bf16.vlgmr.msra.gmra.mxu0 %v17261_v54  ;;  %v25322_v26 = vld [vmem:[%s33027_s7 + $0x410] sm:$0xff]   ;;  %v25327_v54 = vld [vmem:[%s33027_s7 + $0x4a0] sm:$0xff]  }
 0x9a8   : > { %21926 = vmatpush3.bf16.msra.mxu0 %v25283_v57  ;;  %19183 = vmatprep.mubr.bf16.mxu0 %v17266_v62  ;;  %v25326_v57 = vld [vmem:[%s33027_s7 + $0x408] sm:$0xff]   ;;  %v25330_v62 = vld [vmem:[%s33027_s7 + $0x400] sm:$0xff]  }
 0x9a9   : > { %21927 = vmatprep.subr.bf16.mxu0 %v25285_v8  ;;  %v25329_v8 = vld [vmem:[%s33027_s7 + $0x4d8] sm:$0xff]  }
 0x9aa   : > { %21910 = vmatpush3.bf16.msra.mxu1 %v25282_v2  ;;  %v25325_v2 = vld [vmem:[%s33027_s7 + $0x4e0] sm:$0xff]  }
 0x9ab   : > { %21911 = vmatprep.subr.bf16.mxu1 %v25284_v33  ;;  %v25328_v33 = vld [vmem:[%s33027_s7 + $0x440] sm:$0xff]  }
 0x9ac   : > { %21928 = vmatpush3.bf16.msra.mxu0 %v25287_v12  ;;  %v17224_v12 = vpop.permute.xlu0 %17223 }
 0x9ad   : > { %21929 = vmatprep.subr.bf16.mxu0 %v25289_v58  ;;  %v25333_v58 = vld [vmem:[%s33027_s7 + $0x578] sm:$0xff]  }
 0x9ae   : > { %21912 = vmatpush3.bf16.msra.mxu1 %v25286_v63  ;;  %v25331_v63 = vld [vmem:[%s33027_s7 + $0x498] sm:$0xff]  }
 0x9af   : > { %21913 = vmatprep.subr.bf16.mxu1 %v25288_v29  ;;  %v25332_v29 = vld [vmem:[%s33027_s7 + $0x4d0] sm:$0xff]  }
 0x9b0   : > { %21930 = vmatpush3.bf16.msra.mxu0 %v25291_v55  ;;  %v17230_v31 = vpop.permute.xlu0 %17229 }
 0x9b1   : > { %21931 = vmatprep.subr.bf16.mxu0 %v25293_v24  ;;  %v25335_v24 = vld [vmem:[%s33027_s7 + $0x538] sm:$0xff]  }
 0x9b2   : > { %21914 = vmatpush3.bf16.msra.mxu1 %v25290_v18  ;;  %v17218_v18 = vrot.slane %v32397_v44, 6 }
 0x9b3   : > { %21915 = vmatprep.subr.bf16.mxu1 %v25292_v42  ;;  %v25334_v42 = vld [vmem:[%s33027_s7 + $0x490] sm:$0xff]  }
 0x9b4   : > { %21932 = vmatpush3.bf16.msra.mxu0 %v25295_v3  ;;  %v17245_v55 = vsel %vm530_vm1, %v17218_v18, %v17224_v12  ;;  %v25336_v3 = vld [vmem:[%s33027_s7 + $0x4c8] sm:$0xff]  }
 0x9b5   : > { %21933 = vmatprep.subr.bf16.mxu0 %v25297_v49  ;;  %v17287_v49 = vrot.slane %v17245_v55, 2 }
 0x9b6   : > { %21916 = vmatpush3.bf16.msra.mxu1 %v25294_v1  ;;  %v17282_v1 = vrot.slane %v32657_v6, 2  ;;  %v25339_v6 = vld [vmem:[%s33027_s7 + $0x530] sm:$0xff]  }
 0x9b7   : > { %21917 = vmatprep.subr.bf16.mxu1 %v25296_v27  ;;  %v25337_v27 = vld [vmem:[%s33027_s7 + $0x570] sm:$0xff]  }
 0x9b8   : > { %21934 = vmatpush3.bf16.msra.mxu0 %v25299_v10  ;;  %v25341_v10 = vld [vmem:[%s33027_s7 + $0x568] sm:$0xff]  }
 0x9b9   : > { %21935 = vmatprep.subr.bf16.mxu0 %v25300_v45  ;;  %v17207_v45 = vrot.slane %v32749_v40, 6 }
 0x9ba   : > { %21918 = vmatpush3.bf16.msra.mxu1 %v25298_v43  ;;  %v25340_v43 = vld [vmem:[%s33027_s7 + $0x4c0] sm:$0xff]  }
 0x9bb   : > { %21947 = vmatprep.subr.bf16.mxu1 %v25301_v47  ;;  %v25342_v47 = vld [vmem:[%s33027_s7 + $0x480] sm:$0xff]  }
 0x9bc   : > { %21936 = vmatpush3.bf16.msra.mxu0 %v25302_v28  ;;  %v25345_v28 = vld [vmem:[%s33027_s7 + $0x5f8] sm:$0xff]  }
 0x9bd   : > { %19144 = vmatmul.mubr.bf16.vlgmr.msra.gmra.mxu1 %v17263_v36  ;;  %21937 = vmatprep.subr.bf16.mxu0 %v25304_v52  ;;  %v17250_v36 = vsel %vm530_vm1, %v32397_v44, %v17230_v31  ;;  %v25346_v52 = vld [vmem:[%s33027_s7 + $0x520] sm:$0xff]  }
 0x9be   : > { %21948 = vmatpush3.bf16.msra.mxu1 %v25303_v22  ;;  %19223 = vmatprep.mubr.bf16.mxu1 %v17283_v50  ;;  %v17236_v22 = vsel %vm530_vm1, %v17207_v45, %v17210_v5  ;;  %v17289_v38 = vrot.slane %v17250_v36, 2 }
 0x9bf   : > { %21949 = vmatprep.subr.bf16.mxu1 %v25305_v34  ;;  %v25347_v34 = vld [vmem:[%s33027_s7 + $0x5b8] sm:$0xff]   ;;  %v17284_v50 = vrot.slane %v17236_v22, 2 }
 0x9c0   : > { %21938 = vmatpush3.bf16.msra.mxu0 %v25306_v46  ;;  %v25348_v46 = vld [vmem:[%s33027_s7 + $0x558] sm:$0xff]  }
 0x9c1   : > { %21939 = vmatprep.subr.bf16.mxu0 %v25308_v37  ;;  %v25350_v37 = vld [vmem:[%s33027_s7 + $0x518] sm:$0xff]  }
 0x9c2   : > { %21950 = vmatpush3.bf16.msra.mxu1 %v25307_v23  ;;  %v25349_v23 = vld [vmem:[%s33027_s7 + $0x5f0] sm:$0xff]  }
 0x9c3   : > { %21951 = vmatprep.subr.bf16.mxu1 %v25309_v30  ;;  %v25351_v30 = vld [vmem:[%s33027_s7 + $0x5b0] sm:$0xff]  }
 0x9c4   : > { %21940 = vmatpush3.bf16.msra.mxu0 %v25310_v20  ;;  %v25353_v20 = vld [vmem:[%s33027_s7 + $0x5e8] sm:$0xff]  }
 0x9c5   : > { %21969 = vmatprep.subr.bf16.mxu0 %v25313_v19  ;;  %v25357_v19 = vld [vmem:[%s33027_s7 + $0x5e0] sm:$0xff]  }
 0x9c6   : > { %21952 = vmatpush3.bf16.msra.mxu1 %v25311_v35  ;;  %v25354_v35 = vld [vmem:[%s33027_s7 + $0x510] sm:$0xff]  }
 0x9c7   : > { %21953 = vmatprep.subr.bf16.mxu1 %v25312_v15  ;;  %19184 = vmatmul.mubr.bf16.vlgmr.msra.gmra.mxu0 %v17265_v25  ;;  %v25356_v15 = vld [vmem:[%s33027_s7 + $0x548] sm:$0xff]   ;;  %v25362_v25 = vld [vmem:[%s33027_s7 + $0x500] sm:$0xff]  }
 0x9c8   : > { %21970 = vmatpush3.bf16.msra.mxu0 %v25315_v59  ;;  %19263 = vmatprep.mubr.bf16.mxu0 %v17285_v4  ;;  %v17216_v59 = vpop.permute.xlu1 %17215 }
 0x9c9   : > { %21971 = vmatprep.subr.bf16.mxu0 %v25317_v13  ;;  %v25364_v13 = vld [vmem:[%s33027_s7 + $0x5d0] sm:$0xff]   ;;  %v17242_v4 = vsel %vm530_vm1, %v32749_v40, %v17216_v59  ;;  %v25368_v40 = vld [vmem:[%s33027_s7 + $0x588] sm:$0xff]  }
 0x9ca   : > { %21954 = vmatpush3.bf16.msra.mxu1 %v25314_v14  ;;  %v25361_v14 = vld [vmem:[%s33027_s7 + $0x5d8] sm:$0xff]  }
 0x9cb   : > { %21955 = vmatprep.subr.bf16.mxu1 %v25316_v16  ;;  %v25363_v16 = vld [vmem:[%s33027_s7 + $0x598] sm:$0xff]  }
 0x9cc   : > { %21972 = vmatpush3.bf16.msra.mxu0 %v25319_v17  ;;  %v25366_v17 = vld [vmem:[%s33027_s7 + $0x618] sm:$0xff]  }
 0x9cd   : > { %21973 = vmatprep.subr.bf16.mxu0 %v25321_v61  ;;  %v25367_v61 = vld [vmem:[%s33027_s7 + $0x5c8] sm:$0xff]  }
 0x9ce   : > { %21956 = vmatpush3.bf16.msra.mxu1 %v25318_v7  ;;  %v25365_v7 = vld [vmem:[%s33027_s7 + $0x590] sm:$0xff]  }
 0x9cf   : > { %21957 = vmatprep.subr.bf16.mxu1 %v25320_v56  ;;  %v17286_v56 = vrot.slane %v17242_v4, 2 }
 0x9d0   : > { %21974 = vmatpush3.bf16.msra.mxu0 %v25323_v0  ;;  %v25370_v0 = vld [vmem:[%s33027_s7 + $0x5c0] sm:$0xff]  }
 0x9d1   : > { %21975 = vmatprep.subr.bf16.mxu0 %v25325_v2  ;;  %v17225_v2 = vrot.slane %v32397_v44, 7 }
 0x9d2   : > { %21958 = vmatpush3.bf16.msra.mxu1 %v25322_v26  ;;  %v25369_v26 = vld [vmem:[%s33027_s7 + $0x610] sm:$0xff]  }
 0x9d3   : > { %21959 = vmatprep.subr.bf16.mxu1 %v25324_v60  ;;  %v17228_v60 = vpop.permute.xlu1 %17227 }
 0x9d4   : > { %21976 = vmatpush3.bf16.msra.mxu0 %v25327_v54  ;;  %v25372_v54 = vld [vmem:[%s33027_s7 + $0x608] sm:$0xff]  }
 0x9d5   : > { %21977 = vmatprep.subr.bf16.mxu0 %v25329_v8  ;;  %v25373_v8 = vld [vmem:[%s33027_s7 + $0x600] sm:$0xff]  }
 0x9d6   : > { %21960 = vmatpush3.bf16.msra.mxu1 %v25326_v57  ;;  %v25371_v57 = vld [vmem:[%s33027_s7 + $0x580] sm:$0xff]  }
 0x9d7   : > { %21961 = vmatprep.subr.bf16.mxu1 %v25328_v33  ;;  %v17248_v33 = vsel %vm530_vm1, %v17225_v2, %v17228_v60 }
 0x9d8   : > { %21978 = vmatpush3.bf16.msra.mxu0 %v25331_v63  ;;  %v17298_v63 = vrot.slane %v32397_v44, 3 }
 0x9d9   : > { %21979 = vmatprep.subr.bf16.mxu0 %v25332_v29 }
 0x9da   : > { %21962 = vmatpush3.bf16.msra.mxu1 %v25330_v62  ;;  %v17288_v62 = vrot.slane %v17248_v33, 2 }
 0x9db   : > { %21991 = vmatprep.subr.bf16.mxu1 %v25333_v58 }
 0x9dc   : > { %21980 = vmatpush3.bf16.msra.mxu0 %v25334_v42  ;;  %v17691_v42 = vld [vmem:[%s33028_s8] sm:$0x1] }
 0x9dd   : > { %19224 = vmatmul.mubr.bf16.vlgmr.msra.gmra.mxu1 %v17282_v1  ;;  %21981 = vmatprep.subr.bf16.mxu0 %v25336_v3 }
 0x9de   : > { %21992 = vmatpush3.bf16.msra.mxu1 %v25335_v24  ;;  %19303 = vmatprep.mubr.bf16.mxu1 %v17287_v49 }
 0x9df   : > { %21993 = vmatprep.subr.bf16.mxu1 %v25337_v27 }
 0x9e0   : > { %21982 = vmatpush3.bf16.msra.mxu0 %v25338_v32 }
 0x9e1   : > { %21983 = vmatprep.subr.bf16.mxu0 %v25340_v43 }
 0x9e2   : > { %21994 = vmatpush3.bf16.msra.mxu1 %v25339_v6 }
 0x9e3   : > { %21995 = vmatprep.subr.bf16.mxu1 %v25341_v10 }
 0x9e4   : > { %21984 = vmatpush3.bf16.msra.mxu0 %v25342_v47 }
 0x9e5   : > { %22013 = vmatprep.subr.bf16.mxu0 %v25345_v28 }
 0x9e6   : > { %21996 = vmatpush3.bf16.msra.mxu1 %v25343_v39 }
 0x9e7   : > { %21997 = vmatprep.subr.bf16.mxu1 %v25344_v9  ;;  %19264 = vmatmul.mubr.bf16.vlgmr.msra.gmra.mxu0 %v17284_v50 }
 0x9e8   : > { %22014 = vmatpush3.bf16.msra.mxu0 %v25347_v34  ;;  %19343 = vmatprep.mubr.bf16.mxu0 %v17289_v38  ;;  %v25375_v34 = vld [vmem:[%s33029_s9] sm:$0xff]  }
 0x9e9   : > { %22015 = vmatprep.subr.bf16.mxu0 %v25349_v23 }
 0x9ea   : > { %21998 = vmatpush3.bf16.msra.mxu1 %v25346_v52  ;;  %v25374_v52 = vld [vmem:[%s33029_s9 + $0x8] sm:$0xff]  }
 0x9eb   : > { %21999 = vmatprep.subr.bf16.mxu1 %v25348_v46 }
 0x9ec   : > { %22016 = vmatpush3.bf16.msra.mxu0 %v25351_v30 }
 0x9ed   : > { %22017 = vmatprep.subr.bf16.mxu0 %v25353_v20 }
 0x9ee   : > { %22000 = vmatpush3.bf16.msra.mxu1 %v25350_v37 }
 0x9ef   : > { %22001 = vmatprep.subr.bf16.mxu1 %v25352_v41 }
 0x9f0   : > { %22018 = vmatpush3.bf16.msra.mxu0 %v25355_v11 }
 0x9f1   : > { %22019 = vmatprep.subr.bf16.mxu0 %v25357_v19 }
 0x9f2   : > { %22002 = vmatpush3.bf16.msra.mxu1 %v25354_v35 }
 0x9f3   : > { %22003 = vmatprep.subr.bf16.mxu1 %v25356_v15 }
 0x9f4   : > { %22020 = vmatpush3.bf16.msra.mxu0 %v25359_v51 }
 0x9f5   : > { %22021 = vmatprep.subr.bf16.mxu0 %v25361_v14 }
 0x9f6   : > { %22004 = vmatpush3.bf16.msra.mxu1 %v25358_v48 }
 0x9f7   : > { %22005 = vmatprep.subr.bf16.mxu1 %v25360_v53 }
 0x9f8   : > { %22022 = vmatpush3.bf16.msra.mxu0 %v25363_v16 }
 0x9f9   : > { %22023 = vmatprep.subr.bf16.mxu0 %v25364_v13 }
 0x9fa   : > { %22006 = vmatpush3.bf16.msra.mxu1 %v25362_v25 }
 0x9fb   : > { %24911 = vmatprep.subr.bf16.mxu1 %v33365_v21 }
 0x9fc   : > { %22024 = vmatpush3.bf16.msra.mxu0 %v25365_v7 }
 0x9fd   : > { %19304 = vmatmul.mubr.bf16.vlgmr.msra.gmra.mxu1 %v17286_v56  ;;  %22025 = vmatprep.subr.bf16.mxu0 %v25367_v61 }
 0x9fe   : > { %24912 = vmatpush3.bf16.msra.mxu1 %v25366_v17  ;;  %24919 = vmatprep.mubr.msk.bf16.mxu1 %vm25474_vm2, %v33365_v21 }
 0x9ff   : > { %24913 = vmatprep.subr.bf16.mxu1 %v33365_v21 }
 0xa00   : > { %22026 = vmatpush3.bf16.msra.mxu0 %v25368_v40 }
 0xa01   : > { %22027 = vmatprep.subr.bf16.mxu0 %v25370_v0 }
 0xa02   : > { %24914 = vmatpush3.bf16.msra.mxu1 %v25369_v26 }
 0xa03   : > { %24915 = vmatprep.subr.bf16.mxu1 %v33365_v21 }
 0xa04   : > { %22028 = vmatpush3.bf16.msra.mxu0 %v25371_v57 }
 0xa05   : > { %24923 = vmatprep.subr.bf16.mxu0 %v33365_v21 }
 0xa06   : > { %24916 = vmatpush3.bf16.msra.mxu1 %v25372_v54 }
 0xa07   : > { %24917 = vmatprep.subr.bf16.mxu1 %v33365_v21  ;;  %19344 = vmatmul.mubr.bf16.vlgmr.msra.gmra.mxu0 %v17288_v62 }
 0xa08   : > { %24927 = vmatprep.mubr.msk.bf16.mxu0 %vm25474_vm2, %v33365_v21  ;;  %24924 = vmatpush3.bf16.msra.mxu0 %v25374_v52 }
 0xa09   : > { %24925 = vmatprep.subr.bf16.mxu0 %v33365_v21 }
 0xa0a   : > { %24918 = vmatpush3.bf16.msra.mxu1 %v25373_v8 }
 0xa0c   : > { %24926 = vmatpush3.bf16.msra.mxu0 %v25375_v34 }
 0xa0d   : > { %24920 = vmatmul.mubr.msk.bf16.vlgmr.msra.gmra.mxu1 %vm530_vm1, %v17298_v63 }
 0xa1d   : > { %v21787_v12 = vpop.f32.mrf.mxu1 }
 0xa1f   : > { %v21788_v29 = vpop.f32.mrf.mxu1 }
 0xa20   : > { %v21789_v58 = vadd.f32 %v21788_v29, %v21787_v12 }
 0xa21   : > { %v21790_v18 = vpop.f32.mrf.mxu1 }
 0xa22   : > { %v18906_v3 = vadd.f32 %v21789_v58, %v17691_v42 }
 0xa23   : > { %v21791_v55 = vpop.f32.mrf.mxu1 }
 0xa27   : > { %v21809_v24 = vpop.f32.mrf.mxu0 }
 0xa29   : > { %v21810_v1 = vpop.f32.mrf.mxu0 }
 0xa2a   : > { %v21811_v27 = vadd.f32 %v21810_v1, %v21809_v24 }
 0xa2b   : > { %v21812_v49 = vpop.f32.mrf.mxu0 }
 0xa2c   : > { %v18946_v32 = vadd.f32 %v21811_v27, %v18906_v3 }
 0xa2d   : > { %v21813_v6 = vpop.f32.mrf.mxu0 }
 0xa3d   : > { %v21831_v43 = vpop.f32.mrf.mxu1 }
 0xa3f   : > { %v21832_v44 = vpop.f32.mrf.mxu1 }
 0xa40   : > { %v21833_v10 = vadd.f32 %v21832_v44, %v21831_v43 }
 0xa41   : > { %v21834_v5 = vpop.f32.mrf.mxu1 }
 0xa42   : > { %v18986_v45 = vadd.f32 %v21833_v10, %v18946_v32 }
 0xa43   : > { %v21835_v47 = vpop.f32.mrf.mxu1 }
 0xa44   : > { %v19397_v47 = vld [vmem:[%s33030_s10] sm:$0x1] }
 0xa47   : > { %v21853_v39 = vpop.f32.mrf.mxu0 }
 0xa49   : > { %v21854_v31 = vpop.f32.mrf.mxu0 }
 0xa4a   : > { %v21855_v9 = vadd.f32 %v21854_v31, %v21853_v39 }
 0xa4b   : > { %v21856_v28 = vpop.f32.mrf.mxu0 }
 0xa4c   : > { %v19026_v22 = vadd.f32 %v21855_v9, %v18986_v45 }
 0xa4d   : > { %v21857_v36 = vpop.f32.mrf.mxu0 }
 0xa5d   : > { %v21875_v50 = vpop.f32.mrf.mxu1 }
 0xa5f   : > { %v21876_v46 = vpop.f32.mrf.mxu1 }
 0xa60   : > { %v21877_v23 = vadd.f32 %v21876_v46, %v21875_v50 }
 0xa61   : > { %v21878_v38 = vpop.f32.mrf.mxu1 }
 0xa62   : > { %v19066_v37 = vadd.f32 %v21877_v23, %v19026_v22 }
 0xa63   : > { %v21879_v30 = vpop.f32.mrf.mxu1 }
 0xa67   : > { %v21897_v41 = vpop.f32.mrf.mxu0 }
 0xa69   : > { %v21898_v20 = vpop.f32.mrf.mxu0 }
 0xa6a   : > { %v21899_v35 = vadd.f32 %v21898_v20, %v21897_v41 }
 0xa6b   : > { %v21900_v11 = vpop.f32.mrf.mxu0 }
 0xa6c   : > { %v19106_v15 = vadd.f32 %v21899_v35, %v19066_v37 }
 0xa6d   : > { %v21901_v19 = vpop.f32.mrf.mxu0 }
 0xa7d   : > { %v21919_v48 = vpop.f32.mrf.mxu1 }
 0xa7f   : > { %v21920_v51 = vpop.f32.mrf.mxu1 }
 0xa80   : > { %v21921_v53 = vadd.f32 %v21920_v51, %v21919_v48 }
 0xa81   : > { %v21922_v14 = vpop.f32.mrf.mxu1 }
 0xa82   : > { %v19146_v59 = vadd.f32 %v21921_v53, %v19106_v15 }
 0xa83   : > { %v21923_v25 = vpop.f32.mrf.mxu1 }
 0xa87   : > { %v21941_v21 = vpop.f32.mrf.mxu0 }
 0xa89   : > { %v21942_v16 = vpop.f32.mrf.mxu0 }
 0xa8a   : > { %v21943_v33 = vadd.f32 %v21942_v16, %v21941_v21 }
 0xa8b   : > { %v21944_v13 = vpop.f32.mrf.mxu0 }
 0xa8c   : > { %v19186_v63 = vadd.f32 %v21943_v33, %v19146_v59 }
 0xa8d   : > { %v21945_v4 = vpop.f32.mrf.mxu0 }
 0xa9d   : > { %v21963_v7 = vpop.f32.mrf.mxu1 }
 0xa9f   : > { %v21964_v17 = vpop.f32.mrf.mxu1 }
 0xaa0   : > { %v21965_v62 = vadd.f32 %v21964_v17, %v21963_v7 }
 0xaa1   : > { %v21966_v56 = vpop.f32.mrf.mxu1 }
 0xaa2   : > { %v19226_v29 = vadd.f32 %v21965_v62, %v19186_v63 }
 0xaa3   : > { %v21967_v61 = vpop.f32.mrf.mxu1 }
 0xaa7   : > { %v21985_v40 = vpop.f32.mrf.mxu0 }
 0xaa9   : > { %v21986_v26 = vpop.f32.mrf.mxu0 }
 0xaaa   : > { %v21987_v12 = vadd.f32 %v21986_v26, %v21985_v40 }
 0xaab   : > { %v21988_v0 = vpop.f32.mrf.mxu0 }
 0xaac   : > { %v19266_v55 = vadd.f32 %v21987_v12, %v19226_v29 }
 0xaad   : > { %v21989_v60 = vpop.f32.mrf.mxu0 }
 0xabd   : > { %v22007_v2 = vpop.f32.mrf.mxu1 }
 0xabf   : > { %v22008_v57 = vpop.f32.mrf.mxu1 }
 0xac0   : > { %v22009_v58 = vadd.f32 %v22008_v57, %v22007_v2 }
 0xac1   : > { %v22010_v54 = vpop.f32.mrf.mxu1 }
 0xac2   : > { %v19306_v24 = vadd.f32 %v22009_v58, %v19266_v55 }
 0xac3   : > { %v22011_v8 = vpop.f32.mrf.mxu1 }
 0xac7   : > { %v22029_v18 = vpop.f32.mrf.mxu0 }
 0xac9   : > { %v22030_v42 = vpop.f32.mrf.mxu0 }
 0xaca   : > { %v22031_v1 = vadd.f32 %v22030_v42, %v22029_v18 }
 0xacb   : > { %v22032_v3 = vpop.f32.mrf.mxu0 }
 0xacc   : > { %v19346_v49 = vadd.f32 %v22031_v1, %v19306_v24 }
 0xacd   : > { %v19385_v27 = vpop.f32.mrf.mxu1  ;;  %v22033_v32 = vpop.f32.mrf.mxu0 }
 0xace   : > { %v19386_v43 = vadd.f32 %v19385_v27, %v19346_v49 }
 0xacf   : > { %v24921_v6 = vpop.f32.mrf.mxu1 }
 0xad0   : > { %v19391_v10 = vmax.f32 %v19386_v43, 0.0 }
 0xad1   : > { %v19388_v44 = vpop.f32.mrf.mxu1 }
 0xad2   : > { %v19392_v45 = vpack.c.bf16 %v19391_v10, %v19391_v10 }
 0xad3   : > { %v24922_v5 = vpop.f32.mrf.mxu1 }
 0xad4   : > { %24928 = vmatmul.mubr.msk.bf16.vlgmr.msra.gmra.mxu0 %vm7101_vm10, %v19392_v45 }
 0xb94   : > { %v19447_v39 = vpop.f32.mrf.mxu0 }
 0xb95   : > { %v19448_v31 = vadd.f32 %v19447_v39, %v19397_v47 }
 0xb96   : > { %v24929_v9 = vpop.f32.mrf.mxu0 }
 0xb97   : > { %v19454_v28 = vsel %vm19453_vm11, %v19448_v31, -inf }
 0xb98   : > { %19455 = vmax.xlane.f32.xlu0 %v19454_v28  ;;  %v19450_v22 = vpop.f32.mrf.mxu0 }
 0xb9a   : > { %v24930_v36 = vpop.f32.mrf.mxu0 }
 0xc21   : > { %v19456_v52 = vpop.xlane.xlu0 %19455 }
 0xc22   : > { %v19457_v34 = vsub.f32 %v19448_v31, %v19456_v52 }
 0xc24   : > { %v19458_v50 = vmul.f32 1.442695, %v19457_v34 }
 0xc26   : > { %25376 = vpow2.f32 %v19458_v50 }
 0xc33   : > { %v25377_v46 = vpop.eup %25376 }
 0xc34   : > { %v19460_v23 = vsel %vm19453_vm11, %v25377_v46, 0.0 }
 0xc35   : > { %19461 = vadd.xlane.f32.xlu1 %v19460_v23 }
 0xcbe   : > { %v19462_v38 = vpop.xlane.xlu1 %19461 }
 0xcbf   : > { %25378 = vrcp.f32 %v19462_v38 }
 0xccc   : > { %v25379_v37 = vpop.eup %25378 }
 0xccd   : > { %v19464_v30 = vmul.f32 %v25379_v37, %v25377_v46 }
 0xccf   : > { %19465 = vst.msk [vmem:[%s378_s22] sm:$0x1] %vm19453_vm11, %v19464_v30 }
 0xcd0   : > { %25424 = shalt.err (!%p25421_p3)
}
 0xcd1   : > { %s25425_s25 = scalar_lea.hbm %s19477_s30, 16  ;;  %s25429_s22 = scalar_lea.hbm %s33031_s11, 32 }
 0xcd2   : > { %p25426_p4 = scmp.ne.s32.totalorder %s19477_s30, %s25425_s25  ;;  %p25430_p9 = scmp.lt.s32.totalorder %s19477_s30, %s33031_s11 }
 0xcd3   : > { %p25431_p10 = scmp.lt.s32.totalorder %s25429_s22, %s25425_s25 }
 0xcd4   : > { %p25427_p7 = pnand %p25426_p4, %p25575_p5 }
 0xcd5   : > { %p25432_p11 = por %p25431_p10, %p25430_p9 }
 0xcd6   : > { %p25428_p8 = pneg %p25427_p7 }
 0xcd8   : > { %p25433_p12 = pnand %p25432_p11, %p25428_p8 }
 0xcda   : > { %25436 = shalt.err (!%p25433_p12)
}
 0xcdb   : > { %24932 = dma.vmem_to_hbm [thread:$0]  (%p25575_p5), %s19480_s24, 16, %s19477_s30, %s19467_s13  }
 0xcdc PF: > { %p24938_p13 = scmp.ge.s32.totalorder %s25471_s20, 2  ;;  %s19491_s0 = sand.u32 1, %s25459_s17  }
 0xcdd   : > { %s19492_s14 = scalar_lea.sflag [#allocation3], %s19491_s0 }
 0xcde   : > { %p24935_p0 = pnand %p24938_p13, %p25579_p6 }
 0xce0   : > { %p24936_p1 = pneg %p24935_p0 }
 0xce2   : > { %25454 = dma.done.wait (%p24936_p1), %s19492_s14, 16  }
 0xce3   : > { %25456 = vsyncadd (%p24936_p1), %s19492_s14, 4294967280  ;;  %p21_p2 = scmp.ge.s32.totalorder %s25562_s23, 4   ;;  %s33580_s17 = smov %s25463_s18 }
 0xce4   : > { %s33581_s18 = smov %s25467_s19  ;;  %s33582_s19 = smov %s25573_s26 }
 0xce5   : > { %s33583_s20 = smov %s25562_s23  ;;  %23 = sbr.rel (!%p21_p2) target bundleno = 6 (0x6), region = 126 }
 0xcea   :  { %19496 = vsyncpa [#allocation3], 1 }
 0xceb   :  { %19498 = vsyncpa [#allocation3 + $0x1], 1 }

</bundles_post_ra>
